<compile_context>
chip_gen: v5e
topology: v5e:2x2
jax: 0.10.0
libtpu: 0.0.40
codegen_flags: <defaults>
</compile_context>

<pallas_src>
import jax
import jax.numpy as jnp
from jax.experimental import pallas as pl
from jax.experimental.pallas import tpu as pltpu

EPS = 1e-5                     # PyTorch LayerNorm default
MXU_DTYPE = jnp.bfloat16       # matmul operand dtype; accumulation is f32


# ---------------------------------------------------------------------------
# Kernel
# ---------------------------------------------------------------------------
def _make_kernel(*, num_heads, num_layers, seq, d_model, mxu_dtype):
    have_trm = num_layers > 1

    def kernel(*refs):
        it = iter(refs)
        text_ref = next(it)
        vis_ref = next(it)
        hyp_ref = next(it)
        # AHL weights (stacked over L); LN affines already folded into W/b,
        # query scale folded into Wq/bq, per-head slabs pre-sliced host-side.
        a_gb = next(it)                      # (L, 2, D)  gamma3 / beta3
        a_wq = next(it); a_bq = next(it)     # (L, H, D, hd) / (L, H, 1, hd)
        a_wk = next(it); a_bk = next(it)
        a_wv = next(it); a_bv = next(it)
        a_wo = next(it); a_bo = next(it)     # (L, H, hd, D) / (L, 1, D)
        if have_trm:
            t_wq = next(it); t_bq = next(it)
            t_wk = next(it); t_bk = next(it)
            t_wv = next(it); t_bv = next(it)
            t_wo = next(it); t_bo = next(it)
            t_w1 = next(it); t_b1 = next(it)  # (Lt, D, FF) / (Lt, 1, FF)
            t_w2 = next(it); t_b2 = next(it)  # (Lt, FF, D) / (Lt, 1, D)
        hyper_out_ref = next(it)
        text_out_ref = next(it)

        def ln_hat(x):
            # Unscaled LayerNorm (affine folded into the following projection).
            mu = jnp.mean(x, axis=-1, keepdims=True)
            var = jnp.mean((x - mu) ** 2, axis=-1, keepdims=True)
            return (x - mu) * jax.lax.rsqrt(var + EPS)

        def mha(xq_m, xkv_m, wq, bq, wk, bk, wv, bv, wo, bo, l):
            """Multi-head attention; heads are accumulated into an f32
            register value -> no VMEM scratch, no masked partial stores."""
            out = jnp.zeros((seq, d_model), jnp.float32)
            for h in range(num_heads):       # static unroll (H small)
                q = jnp.dot(xq_m, wq[l, h],
                            preferred_element_type=jnp.float32) + bq[l, h]
                k = jnp.dot(xkv_m, wk[l, h],
                            preferred_element_type=jnp.float32) + bk[l, h]
                v = jnp.dot(xkv_m, wv[l, h],
                            preferred_element_type=jnp.float32) + bv[l, h]
                # scores (S, S); query scale already folded into wq/bq.
                s = jnp.einsum('qd,kd->qk', q.astype(mxu_dtype),
                               k.astype(mxu_dtype),
                               preferred_element_type=jnp.float32)
                s = s - jnp.max(s, axis=-1, keepdims=True)
                p = jnp.exp(s)
                p = p / jnp.sum(p, axis=-1, keepdims=True)   # exact softmax
                o = jnp.dot(p.astype(mxu_dtype), v.astype(mxu_dtype),
                            preferred_element_type=jnp.float32)
                out = out + jnp.dot(o.astype(mxu_dtype), wo[l, h],
                                    preferred_element_type=jnp.float32)
            return out + bo[l]

        text = text_ref[0]      # (S, D) f32
        vis = vis_ref[0]
        hyper = hyp_ref[0]

        # Visual never changes across layers and its per-layer LN affine is
        # folded into wk/wv, so its x_hat is computed (and cast) exactly once.
        v_hat_m = ln_hat(vis).astype(mxu_dtype)

        for l in range(num_layers):          # static unroll; weights read per-layer
            # ---- AHL layer l: hyper = MHA(LN1(text), LN2(vis), LN2(vis)) + LN3(hyper)
            t_hat = ln_hat(text)
            t_hat_m = t_hat.astype(mxu_dtype)
            gb = a_gb[l]                     # (2, D): gamma3 / beta3 (applied here)
            h_n = ln_hat(hyper) * gb[0:1] + gb[1:2]
            hyper = h_n + mha(t_hat_m, v_hat_m,
                              a_wq, a_bq, a_wk, a_bk, a_wv, a_bv, a_wo, a_bo, l)

            # ---- TRM layer l (only between AHL layers)
            # TODO(synk): the TransformerEncoder class is not in the source
            # listing; implemented as the ALMT-style pre-norm encoder block
            # (self-MHA + GELU FFN), mirrored exactly by the reference below.
            if l < num_layers - 1:
                # LN1(text) affine folded into t_wq/t_wk/t_wv -> reuse t_hat_m.
                text = text + mha(t_hat_m, t_hat_m,
                                  t_wq, t_bq, t_wk, t_bk, t_wv, t_bv,
                                  t_wo, t_bo, l)
                y_hat_m = ln_hat(text).astype(mxu_dtype)     # LN2 affine folded into w1/b1
                h1 = jnp.dot(y_hat_m, t_w1[l],
                             preferred_element_type=jnp.float32) + t_b1[l]
                h1 = jax.nn.gelu(h1, approximate=True)
                text = text + jnp.dot(h1.astype(mxu_dtype), t_w2[l],
                                      preferred_element_type=jnp.float32) + t_b2[l]

        hyper_out_ref[0] = hyper
        text_out_ref[0] = text

    return kernel


# ---------------------------------------------------------------------------
# Host-side weight preprocessing: fold LN affines + query scale, split heads
# ---------------------------------------------------------------------------
def _fold_params(p, *, num_heads, mxu_dtype):
    L, D, _ = p["ahl_wq"].shape
    H = num_heads
    hd = D // H
    scale = 1.0 / float(hd) ** 0.5

    def fold(g, b, w, bias):
        # (x_hat*g + b) @ W + bias == x_hat @ (g[:,None]*W) + (b@W + bias)
        wf = g[:, :, None] * w
        bf = jnp.einsum('nd,ndk->nk', b, w) + bias
        return wf, bf

    def split_heads_in(w, b):            # (N,D,D),(N,D) -> (N,H,D,hd),(N,H,1,hd)
        n = w.shape[0]
        wh = w.reshape(n, D, H, hd).transpose(0, 2, 1, 3)
        bh = b.reshape(n, H, 1, hd)
        return wh, bh

    ln = p["ahl_ln"]                     # (L, 6, D): g1,b1,g2,b2,g3,b3
    wq, bq = fold(ln[:, 0], ln[:, 1], p["ahl_wq"], p["ahl_bq"])
    wq, bq = wq * scale, bq * scale      # fold 1/sqrt(hd) into the query path
    wk, bk = fold(ln[:, 2], ln[:, 3], p["ahl_wk"], p["ahl_bk"])
    wv, bv = fold(ln[:, 2], ln[:, 3], p["ahl_wv"], p["ahl_bv"])
    wq, bq = split_heads_in(wq, bq)
    wk, bk = split_heads_in(wk, bk)
    wv, bv = split_heads_in(wv, bv)
    wo = p["ahl_wo"].reshape(L, H, hd, D)
    bo = p["ahl_bo"].reshape(L, 1, D)
    gb3 = ln[:, 4:6]                     # hyper LN affine, applied in-kernel

    out = [gb3.astype(jnp.float32),
           wq.astype(mxu_dtype), bq.astype(jnp.float32),
           wk.astype(mxu_dtype), bk.astype(jnp.float32),
           wv.astype(mxu_dtype), bv.astype(jnp.float32),
           wo.astype(mxu_dtype), bo.astype(jnp.float32)]

    if "trm_wq" in p:
        tln = p["trm_ln"]                # (Lt, 4, D): g1,b1,g2,b2
        Lt = tln.shape[0]
        twq, tbq = fold(tln[:, 0], tln[:, 1], p["trm_wq"], p["trm_bq"])
        twq, tbq = twq * scale, tbq * scale
        twk, tbk = fold(tln[:, 0], tln[:, 1], p["trm_wk"], p["trm_bk"])
        twv, tbv = fold(tln[:, 0], tln[:, 1], p["trm_wv"], p["trm_bv"])
        twq, tbq = split_heads_in(twq, tbq)
        twk, tbk = split_heads_in(twk, tbk)
        twv, tbv = split_heads_in(twv, tbv)
        two = p["trm_wo"].reshape(Lt, H, hd, D)
        tbo = p["trm_bo"].reshape(Lt, 1, D)
        tw1, tb1 = fold(tln[:, 2], tln[:, 3], p["trm_w1"], p["trm_b1"])
        FF = tw1.shape[-1]
        out += [twq.astype(mxu_dtype), tbq.astype(jnp.float32),
                twk.astype(mxu_dtype), tbk.astype(jnp.float32),
                twv.astype(mxu_dtype), tbv.astype(jnp.float32),
                two.astype(mxu_dtype), tbo.astype(jnp.float32),
                tw1.astype(mxu_dtype), tb1.reshape(Lt, 1, FF).astype(jnp.float32),
                p["trm_w2"].astype(mxu_dtype),
                p["trm_b2"].reshape(Lt, 1, D).astype(jnp.float32)]
    return out


# ---------------------------------------------------------------------------
# Wrapper
# ---------------------------------------------------------------------------
def hyper_modality_learning(text, visual, hyper0, raw_params, *, num_heads,
                            num_layers, mxu_dtype=MXU_DTYPE):
    B, S, D = text.shape
    assert D % num_heads == 0

    acts = [text.astype(jnp.float32), visual.astype(jnp.float32),
            hyper0.astype(jnp.float32)]
    weights = _fold_params(raw_params, num_heads=num_heads, mxu_dtype=mxu_dtype)
    inputs = acts + weights

    def act_spec():
        return pl.BlockSpec((1, S, D), lambda b: (b, 0, 0))

    def const_spec(arr):
        return pl.BlockSpec(arr.shape, lambda b, _n=arr.ndim: (0,) * _n)

    in_specs = [act_spec(), act_spec(), act_spec()] + [const_spec(w) for w in weights]
    out_specs = [act_spec(), act_spec()]
    out_shape = [jax.ShapeDtypeStruct((B, S, D), jnp.float32),
                 jax.ShapeDtypeStruct((B, S, D), jnp.float32)]

    # Explicit VMEM budget: ~2x resident bytes (double buffering) + headroom,
    # capped at v7x's 64 MiB physical VMEM.
    input_bytes = sum(int(x.size) * x.dtype.itemsize for x in inputs)
    out_bytes = 2 * S * D * 4
    vmem_limit = int(min(64 * 2 ** 20,
                         max(8 * 2 ** 20, 2 * (input_bytes + out_bytes) + (1 << 20))))

    # Advisory cost estimate for XLA's scheduler.
    L = num_layers
    FF = raw_params["trm_w1"].shape[-1] if num_layers > 1 else 0
    attn_flops = 8 * S * D * D + 4 * S * S * D
    flops = B * (L * attn_flops + max(L - 1, 0) * (attn_flops + 4 * S * D * FF))
    transcendentals = B * ((2 * L - 1) * num_heads * S * S + max(L - 1, 0) * S * FF)
    cost = pl.CostEstimate(flops=int(flops),
                           transcendentals=int(transcendentals),
                           bytes_accessed=int(input_bytes + 2 * B * S * D * 4))

    kernel = _make_kernel(num_heads=num_heads, num_layers=num_layers,
                          seq=S, d_model=D, mxu_dtype=mxu_dtype)

    hyper_f, text_f = pl.pallas_call(
        kernel,
        out_shape=out_shape,
        grid=(B,),
        in_specs=in_specs,
        out_specs=out_specs,
        compiler_params=pltpu.CompilerParams(
            dimension_semantics=("parallel",),      # v7x megacore over batch
            vmem_limit_bytes=vmem_limit),
        cost_estimate=cost,
    )(*inputs)

    return hyper_f, text_f


# ---------------------------------------------------------------------------
# Synthetic raw parameters (module-like: separate LN affines, unfused weights)
# ---------------------------------------------------------------------------
def init_params(key, D, FF, L):
    Lt = L - 1
    ks = iter(jax.random.split(key, 32))

    def w(shape, s=0.05):
        return s * jax.random.normal(next(ks), shape, jnp.float32)

    def gamma(shape):
        return 1.0 + 0.1 * jax.random.normal(next(ks), shape, jnp.float32)

    def beta(shape):
        return 0.1 * jax.random.normal(next(ks), shape, jnp.float32)

    ahl_ln = jnp.stack([gamma((L, D)), beta((L, D)), gamma((L, D)), beta((L, D)),
                        gamma((L, D)), beta((L, D))], axis=1)            # (L,6,D)
    p = dict(
        ahl_ln=ahl_ln,
        ahl_wq=w((L, D, D)), ahl_bq=beta((L, D)),
        ahl_wk=w((L, D, D)), ahl_bk=beta((L, D)),
        ahl_wv=w((L, D, D)), ahl_bv=beta((L, D)),
        ahl_wo=w((L, D, D)), ahl_bo=beta((L, D)),
    )
    if Lt > 0:
        trm_ln = jnp.stack([gamma((Lt, D)), beta((Lt, D)),
                            gamma((Lt, D)), beta((Lt, D))], axis=1)      # (Lt,4,D)
        p.update(
            trm_ln=trm_ln,
            trm_wq=w((Lt, D, D)), trm_bq=beta((Lt, D)),
            trm_wk=w((Lt, D, D)), trm_bk=beta((Lt, D)),
            trm_wv=w((Lt, D, D)), trm_bv=beta((Lt, D)),
            trm_wo=w((Lt, D, D)), trm_bo=beta((Lt, D)),
            trm_w1=w((Lt, D, FF)), trm_b1=beta((Lt, FF)),
            trm_w2=w((Lt, FF, D)), trm_b2=beta((Lt, D)),
        )
    return p


# ---------------------------------------------------------------------------
# Pure-JAX f32 reference (uses the RAW, unfolded parameters)
# ---------------------------------------------------------------------------
def _reference_forward(text, visual, hyper, p, num_heads, num_layers):
    B, S, D = text.shape
    H = num_heads
    hd = D // H
    scale = 1.0 / float(hd) ** 0.5
    hi = jax.lax.Precision.HIGHEST

    def ln(x, g, b):
        mu = jnp.mean(x, -1, keepdims=True)
        var = jnp.mean((x - mu) ** 2, -1, keepdims=True)
        return (x - mu) * jax.lax.rsqrt(var + EPS) * g + b

    def mha(xq, xkv, wq, bq, wk, bk, wv, bv, wo, bo):
        q = jnp.einsum('bsd,de->bse', xq, wq, precision=hi) + bq
        k = jnp.einsum('bsd,de->bse', xkv, wk, precision=hi) + bk
        v = jnp.einsum('bsd,de->bse', xkv, wv, precision=hi) + bv
        q = q.reshape(B, S, H, hd)
        k = k.reshape(B, S, H, hd)
        v = v.reshape(B, S, H, hd)
        s = jnp.einsum('bqhd,bkhd->bhqk', q, k, precision=hi) * scale
        a = jax.nn.softmax(s, axis=-1)
        o = jnp.einsum('bhqk,bkhd->bqhd', a, v, precision=hi).reshape(B, S, D)
        return jnp.einsum('bsd,de->bse', o, wo, precision=hi) + bo

    for l in range(num_layers):
        a = p["ahl_ln"][l]
        t_n = ln(text, a[0], a[1])
        v_n = ln(visual, a[2], a[3])
        h_n = ln(hyper, a[4], a[5])
        hyper = mha(t_n, v_n,
                    p["ahl_wq"][l], p["ahl_bq"][l], p["ahl_wk"][l], p["ahl_bk"][l],
                    p["ahl_wv"][l], p["ahl_bv"][l], p["ahl_wo"][l], p["ahl_bo"][l]) + h_n
        if l < num_layers - 1:
            t = p["trm_ln"][l]
            x_n = ln(text, t[0], t[1])
            text = text + mha(x_n, x_n,
                              p["trm_wq"][l], p["trm_bq"][l], p["trm_wk"][l], p["trm_bk"][l],
                              p["trm_wv"][l], p["trm_bv"][l], p["trm_wo"][l], p["trm_bo"][l])
            y_n = ln(text, t[2], t[3])
            h1 = jax.nn.gelu(jnp.einsum('bsd,df->bsf', y_n, p["trm_w1"][l], precision=hi)
                             + p["trm_b1"][l], approximate=True)
            text = text + jnp.einsum('bsf,fd->bsd', h1, p["trm_w2"][l],
                                     precision=hi) + p["trm_b2"][l]
    return hyper, text


if __name__ == "__main__":
    B, S, D, H, L = 2, 8, 32, 4, 3
    FF = 4 * D

    root = jax.random.PRNGKey(0)
    k_text, k_vis, k_hyp, k_par = jax.random.split(root, 4)

    text_embed = jax.random.normal(k_text, (B, S, D), dtype=jnp.float32)
    visual_embed = jax.random.normal(k_vis, (B, S, D), dtype=jnp.float32)
    # torch.randn(text_embed.shape) in the original forward -> deterministic
    # explicit input here.
    hyper0 = jax.random.normal(k_hyp, (B, S, D), dtype=jnp.float32)

    params = init_params(k_par, D, FF, L)

    hyper_out, text_out = hyper_modality_learning(
        text_embed, visual_embed, hyper0, params, num_heads=H, num_layers=L)
    jax.block_until_ready(hyper_out)
    jax.block_until_ready(text_out)

    assert hyper_out.shape == (B, S, D) and text_out.shape == (B, S, D)
    assert bool(jnp.all(jnp.isfinite(hyper_out))) and bool(jnp.all(jnp.isfinite(text_out)))

    # Correctness vs f32 reference (tolerance covers bf16 MXU operands).
    ref_h, ref_t = _reference_forward(text_embed, visual_embed, hyper0, params, H, L)
    err_h = float(jnp.max(jnp.abs(hyper_out - ref_h)))
    err_t = float(jnp.max(jnp.abs(text_out - ref_t)))
    assert err_h < 2e-2 and err_t < 2e-2, (err_h, err_t)

    print("KERNEL_OK")
</pallas_src>

<mosaic_0001>
module attributes {stable_mosaic.version = 11 : i64} {
  func.func @kernel(%arg0: i32, %arg1: memref<1x8x32xf32, #tpu.memory_space<vmem>>, %arg2: memref<1x8x32xf32, #tpu.memory_space<vmem>>, %arg3: memref<1x8x32xf32, #tpu.memory_space<vmem>>, %arg4: memref<3x2x32xf32, #tpu.memory_space<vmem>>, %arg5: memref<3x4x32x8xbf16, #tpu.memory_space<vmem>>, %arg6: memref<3x4x1x8xf32, #tpu.memory_space<vmem>>, %arg7: memref<3x4x32x8xbf16, #tpu.memory_space<vmem>>, %arg8: memref<3x4x1x8xf32, #tpu.memory_space<vmem>>, %arg9: memref<3x4x32x8xbf16, #tpu.memory_space<vmem>>, %arg10: memref<3x4x1x8xf32, #tpu.memory_space<vmem>>, %arg11: memref<3x4x8x32xbf16, #tpu.memory_space<vmem>>, %arg12: memref<3x1x32xf32, #tpu.memory_space<vmem>>, %arg13: memref<2x4x32x8xbf16, #tpu.memory_space<vmem>>, %arg14: memref<2x4x1x8xf32, #tpu.memory_space<vmem>>, %arg15: memref<2x4x32x8xbf16, #tpu.memory_space<vmem>>, %arg16: memref<2x4x1x8xf32, #tpu.memory_space<vmem>>, %arg17: memref<2x4x32x8xbf16, #tpu.memory_space<vmem>>, %arg18: memref<2x4x1x8xf32, #tpu.memory_space<vmem>>, %arg19: memref<2x4x8x32xbf16, #tpu.memory_space<vmem>>, %arg20: memref<2x1x32xf32, #tpu.memory_space<vmem>>, %arg21: memref<2x32x128xbf16, #tpu.memory_space<vmem>>, %arg22: memref<2x1x128xf32, #tpu.memory_space<vmem>>, %arg23: memref<2x128x32xbf16, #tpu.memory_space<vmem>>, %arg24: memref<2x1x32xf32, #tpu.memory_space<vmem>>, %arg25: memref<1x8x32xf32, #tpu.memory_space<vmem>>, %arg26: memref<1x8x32xf32, #tpu.memory_space<vmem>>) attributes {dimension_semantics = [#tpu.dimension_semantics<parallel>], iteration_bounds = array<i64: 2>, scalar_prefetch = 0 : i64, scratch_operands = 0 : i64, tpu.core_type = #tpu.core_type<tc>, window_params = [{transform_indices = @transform_0, window_bounds = array<i64: 1, 8, 32>}, {transform_indices = @transform_1, window_bounds = array<i64: 1, 8, 32>}, {transform_indices = @transform_2, window_bounds = array<i64: 1, 8, 32>}, {pipeline_mode = #tpu.pipeline_mode<synchronous>, transform_indices = @transform_3, window_bounds = array<i64: 3, 2, 32>}, {pipeline_mode = #tpu.pipeline_mode<synchronous>, transform_indices = @transform_4, window_bounds = array<i64: 3, 4, 32, 8>}, {pipeline_mode = #tpu.pipeline_mode<synchronous>, transform_indices = @transform_5, window_bounds = array<i64: 3, 4, 1, 8>}, {pipeline_mode = #tpu.pipeline_mode<synchronous>, transform_indices = @transform_6, window_bounds = array<i64: 3, 4, 32, 8>}, {pipeline_mode = #tpu.pipeline_mode<synchronous>, transform_indices = @transform_7, window_bounds = array<i64: 3, 4, 1, 8>}, {pipeline_mode = #tpu.pipeline_mode<synchronous>, transform_indices = @transform_8, window_bounds = array<i64: 3, 4, 32, 8>}, {pipeline_mode = #tpu.pipeline_mode<synchronous>, transform_indices = @transform_9, window_bounds = array<i64: 3, 4, 1, 8>}, {pipeline_mode = #tpu.pipeline_mode<synchronous>, transform_indices = @transform_10, window_bounds = array<i64: 3, 4, 8, 32>}, {pipeline_mode = #tpu.pipeline_mode<synchronous>, transform_indices = @transform_11, window_bounds = array<i64: 3, 1, 32>}, {pipeline_mode = #tpu.pipeline_mode<synchronous>, transform_indices = @transform_12, window_bounds = array<i64: 2, 4, 32, 8>}, {pipeline_mode = #tpu.pipeline_mode<synchronous>, transform_indices = @transform_13, window_bounds = array<i64: 2, 4, 1, 8>}, {pipeline_mode = #tpu.pipeline_mode<synchronous>, transform_indices = @transform_14, window_bounds = array<i64: 2, 4, 32, 8>}, {pipeline_mode = #tpu.pipeline_mode<synchronous>, transform_indices = @transform_15, window_bounds = array<i64: 2, 4, 1, 8>}, {pipeline_mode = #tpu.pipeline_mode<synchronous>, transform_indices = @transform_16, window_bounds = array<i64: 2, 4, 32, 8>}, {pipeline_mode = #tpu.pipeline_mode<synchronous>, transform_indices = @transform_17, window_bounds = array<i64: 2, 4, 1, 8>}, {pipeline_mode = #tpu.pipeline_mode<synchronous>, transform_indices = @transform_18, window_bounds = array<i64: 2, 4, 8, 32>}, {pipeline_mode = #tpu.pipeline_mode<synchronous>, transform_indices = @transform_19, window_bounds = array<i64: 2, 1, 32>}, {pipeline_mode = #tpu.pipeline_mode<synchronous>, transform_indices = @transform_20, window_bounds = array<i64: 2, 32, 128>}, {pipeline_mode = #tpu.pipeline_mode<synchronous>, transform_indices = @transform_21, window_bounds = array<i64: 2, 1, 128>}, {pipeline_mode = #tpu.pipeline_mode<synchronous>, transform_indices = @transform_22, window_bounds = array<i64: 2, 128, 32>}, {pipeline_mode = #tpu.pipeline_mode<synchronous>, transform_indices = @transform_23, window_bounds = array<i64: 2, 1, 32>}, {transform_indices = @transform_24, window_bounds = array<i64: 1, 8, 32>}, {transform_indices = @transform_25, window_bounds = array<i64: 1, 8, 32>}]} {
    %c0 = arith.constant 0 : index
    %c0_0 = arith.constant 0 : index
    %c0_1 = arith.constant 0 : index
    %0 = vector.load %arg1[%c0, %c0_0, %c0_1] : memref<1x8x32xf32, #tpu.memory_space<vmem>>, vector<1x8x32xf32>
    %1 = vector.shape_cast %0 : vector<1x8x32xf32> to vector<8x32xf32>
    %c0_2 = arith.constant 0 : index
    %c0_3 = arith.constant 0 : index
    %c0_4 = arith.constant 0 : index
    %2 = vector.load %arg2[%c0_2, %c0_3, %c0_4] : memref<1x8x32xf32, #tpu.memory_space<vmem>>, vector<1x8x32xf32>
    %3 = vector.shape_cast %2 : vector<1x8x32xf32> to vector<8x32xf32>
    %c0_5 = arith.constant 0 : index
    %c0_6 = arith.constant 0 : index
    %c0_7 = arith.constant 0 : index
    %4 = vector.load %arg3[%c0_5, %c0_6, %c0_7] : memref<1x8x32xf32, #tpu.memory_space<vmem>>, vector<1x8x32xf32>
    %5 = vector.shape_cast %4 : vector<1x8x32xf32> to vector<8x32xf32>
    %cst = arith.constant dense<0.000000e+00> : vector<8xf32>
    %6 = vector.multi_reduction <add>, %3, %cst [1] : vector<8x32xf32> to vector<8xf32>
    %7 = vector.shape_cast %6 : vector<8xf32> to vector<8x1xf32>
    %cst_8 = arith.constant 3.200000e+01 : f32
    %8 = vector.broadcast %cst_8 : f32 to vector<8x1xf32>
    %9 = arith.divf %7, %8 : vector<8x1xf32>
    %10 = vector.broadcast %9 : vector<8x1xf32> to vector<8x32xf32>
    %11 = arith.subf %3, %10 : vector<8x32xf32>
    %12 = arith.mulf %11, %11 : vector<8x32xf32>
    %cst_9 = arith.constant dense<0.000000e+00> : vector<8xf32>
    %13 = vector.multi_reduction <add>, %12, %cst_9 [1] : vector<8x32xf32> to vector<8xf32>
    %14 = vector.shape_cast %13 : vector<8xf32> to vector<8x1xf32>
    %cst_10 = arith.constant 3.200000e+01 : f32
    %15 = vector.broadcast %cst_10 : f32 to vector<8x1xf32>
    %16 = arith.divf %14, %15 : vector<8x1xf32>
    %17 = vector.broadcast %9 : vector<8x1xf32> to vector<8x32xf32>
    %18 = arith.subf %3, %17 : vector<8x32xf32>
    %cst_11 = arith.constant 9.99999974E-6 : f32
    %19 = vector.broadcast %cst_11 : f32 to vector<8x1xf32>
    %20 = arith.addf %16, %19 : vector<8x1xf32>
    %21 = math.rsqrt %20 : vector<8x1xf32>
    %22 = vector.broadcast %21 : vector<8x1xf32> to vector<8x32xf32>
    %23 = arith.mulf %18, %22 : vector<8x32xf32>
    %24 = arith.truncf %23 : vector<8x32xf32> to vector<8x32xbf16>
    %cst_12 = arith.constant dense<0.000000e+00> : vector<8xf32>
    %25 = vector.multi_reduction <add>, %1, %cst_12 [1] : vector<8x32xf32> to vector<8xf32>
    %26 = vector.shape_cast %25 : vector<8xf32> to vector<8x1xf32>
    %cst_13 = arith.constant 3.200000e+01 : f32
    %27 = vector.broadcast %cst_13 : f32 to vector<8x1xf32>
    %28 = arith.divf %26, %27 : vector<8x1xf32>
    %29 = vector.broadcast %28 : vector<8x1xf32> to vector<8x32xf32>
    %30 = arith.subf %1, %29 : vector<8x32xf32>
    %31 = arith.mulf %30, %30 : vector<8x32xf32>
    %cst_14 = arith.constant dense<0.000000e+00> : vector<8xf32>
    %32 = vector.multi_reduction <add>, %31, %cst_14 [1] : vector<8x32xf32> to vector<8xf32>
    %33 = vector.shape_cast %32 : vector<8xf32> to vector<8x1xf32>
    %cst_15 = arith.constant 3.200000e+01 : f32
    %34 = vector.broadcast %cst_15 : f32 to vector<8x1xf32>
    %35 = arith.divf %33, %34 : vector<8x1xf32>
    %36 = vector.broadcast %28 : vector<8x1xf32> to vector<8x32xf32>
    %37 = arith.subf %1, %36 : vector<8x32xf32>
    %cst_16 = arith.constant 9.99999974E-6 : f32
    %38 = vector.broadcast %cst_16 : f32 to vector<8x1xf32>
    %39 = arith.addf %35, %38 : vector<8x1xf32>
    %40 = math.rsqrt %39 : vector<8x1xf32>
    %41 = vector.broadcast %40 : vector<8x1xf32> to vector<8x32xf32>
    %42 = arith.mulf %37, %41 : vector<8x32xf32>
    %43 = arith.truncf %42 : vector<8x32xf32> to vector<8x32xbf16>
    %c0_17 = arith.constant 0 : index
    %c0_18 = arith.constant 0 : index
    %c0_19 = arith.constant 0 : index
    %44 = vector.load %arg4[%c0_17, %c0_18, %c0_19] : memref<3x2x32xf32, #tpu.memory_space<vmem>>, vector<1x2x32xf32>
    %45 = vector.shape_cast %44 : vector<1x2x32xf32> to vector<2x32xf32>
    %cst_20 = arith.constant dense<0.000000e+00> : vector<8xf32>
    %46 = vector.multi_reduction <add>, %5, %cst_20 [1] : vector<8x32xf32> to vector<8xf32>
    %47 = vector.shape_cast %46 : vector<8xf32> to vector<8x1xf32>
    %cst_21 = arith.constant 3.200000e+01 : f32
    %48 = vector.broadcast %cst_21 : f32 to vector<8x1xf32>
    %49 = arith.divf %47, %48 : vector<8x1xf32>
    %50 = vector.broadcast %49 : vector<8x1xf32> to vector<8x32xf32>
    %51 = arith.subf %5, %50 : vector<8x32xf32>
    %52 = arith.mulf %51, %51 : vector<8x32xf32>
    %cst_22 = arith.constant dense<0.000000e+00> : vector<8xf32>
    %53 = vector.multi_reduction <add>, %52, %cst_22 [1] : vector<8x32xf32> to vector<8xf32>
    %54 = vector.shape_cast %53 : vector<8xf32> to vector<8x1xf32>
    %cst_23 = arith.constant 3.200000e+01 : f32
    %55 = vector.broadcast %cst_23 : f32 to vector<8x1xf32>
    %56 = arith.divf %54, %55 : vector<8x1xf32>
    %57 = vector.broadcast %49 : vector<8x1xf32> to vector<8x32xf32>
    %58 = arith.subf %5, %57 : vector<8x32xf32>
    %cst_24 = arith.constant 9.99999974E-6 : f32
    %59 = vector.broadcast %cst_24 : f32 to vector<8x1xf32>
    %60 = arith.addf %56, %59 : vector<8x1xf32>
    %61 = math.rsqrt %60 : vector<8x1xf32>
    %62 = vector.broadcast %61 : vector<8x1xf32> to vector<8x32xf32>
    %63 = arith.mulf %58, %62 : vector<8x32xf32>
    %64 = vector.extract_strided_slice %45 {offsets = [0, 0], sizes = [1, 32], strides = [1, 1]} : vector<2x32xf32> to vector<1x32xf32>
    %65 = vector.broadcast %64 : vector<1x32xf32> to vector<8x32xf32>
    %66 = arith.mulf %63, %65 : vector<8x32xf32>
    %67 = vector.extract_strided_slice %45 {offsets = [1, 0], sizes = [1, 32], strides = [1, 1]} : vector<2x32xf32> to vector<1x32xf32>
    %68 = vector.broadcast %67 : vector<1x32xf32> to vector<8x32xf32>
    %69 = arith.addf %66, %68 : vector<8x32xf32>
    %cst_25 = arith.constant 0.000000e+00 : f32
    %70 = vector.broadcast %cst_25 : f32 to vector<8x32xf32>
    %c0_26 = arith.constant 0 : index
    %c0_27 = arith.constant 0 : index
    %c0_28 = arith.constant 0 : index
    %c0_29 = arith.constant 0 : index
    %71 = vector.load %arg5[%c0_26, %c0_27, %c0_28, %c0_29] : memref<3x4x32x8xbf16, #tpu.memory_space<vmem>>, vector<1x1x32x8xbf16>
    %72 = vector.shape_cast %71 : vector<1x1x32x8xbf16> to vector<32x8xbf16>
    %cst_30 = arith.constant dense<0.000000e+00> : vector<8x8xf32>
    %73 = tpu.matmul %43, %72, %cst_30 {dimension_numbers = #tpu.dot_dimension_numbers<[1], [0], [0], [1], [0, 0, 1, 1], [], []>} : vector<8x32xbf16>, vector<32x8xbf16>, vector<8x8xf32> -> vector<8x8xf32>
    %c0_31 = arith.constant 0 : index
    %c0_32 = arith.constant 0 : index
    %c0_33 = arith.constant 0 : index
    %c0_34 = arith.constant 0 : index
    %74 = vector.load %arg6[%c0_31, %c0_32, %c0_33, %c0_34] : memref<3x4x1x8xf32, #tpu.memory_space<vmem>>, vector<1x1x1x8xf32>
    %75 = vector.shape_cast %74 : vector<1x1x1x8xf32> to vector<1x8xf32>
    %76 = vector.broadcast %75 : vector<1x8xf32> to vector<8x8xf32>
    %77 = arith.addf %73, %76 : vector<8x8xf32>
    %c0_35 = arith.constant 0 : index
    %c0_36 = arith.constant 0 : index
    %c0_37 = arith.constant 0 : index
    %c0_38 = arith.constant 0 : index
    %78 = vector.load %arg7[%c0_35, %c0_36, %c0_37, %c0_38] : memref<3x4x32x8xbf16, #tpu.memory_space<vmem>>, vector<1x1x32x8xbf16>
    %79 = vector.shape_cast %78 : vector<1x1x32x8xbf16> to vector<32x8xbf16>
    %cst_39 = arith.constant dense<0.000000e+00> : vector<8x8xf32>
    %80 = tpu.matmul %24, %79, %cst_39 {dimension_numbers = #tpu.dot_dimension_numbers<[1], [0], [0], [1], [0, 0, 1, 1], [], []>} : vector<8x32xbf16>, vector<32x8xbf16>, vector<8x8xf32> -> vector<8x8xf32>
    %c0_40 = arith.constant 0 : index
    %c0_41 = arith.constant 0 : index
    %c0_42 = arith.constant 0 : index
    %c0_43 = arith.constant 0 : index
    %81 = vector.load %arg8[%c0_40, %c0_41, %c0_42, %c0_43] : memref<3x4x1x8xf32, #tpu.memory_space<vmem>>, vector<1x1x1x8xf32>
    %82 = vector.shape_cast %81 : vector<1x1x1x8xf32> to vector<1x8xf32>
    %83 = vector.broadcast %82 : vector<1x8xf32> to vector<8x8xf32>
    %84 = arith.addf %80, %83 : vector<8x8xf32>
    %c0_44 = arith.constant 0 : index
    %c0_45 = arith.constant 0 : index
    %c0_46 = arith.constant 0 : index
    %c0_47 = arith.constant 0 : index
    %85 = vector.load %arg9[%c0_44, %c0_45, %c0_46, %c0_47] : memref<3x4x32x8xbf16, #tpu.memory_space<vmem>>, vector<1x1x32x8xbf16>
    %86 = vector.shape_cast %85 : vector<1x1x32x8xbf16> to vector<32x8xbf16>
    %cst_48 = arith.constant dense<0.000000e+00> : vector<8x8xf32>
    %87 = tpu.matmul %24, %86, %cst_48 {dimension_numbers = #tpu.dot_dimension_numbers<[1], [0], [0], [1], [0, 0, 1, 1], [], []>} : vector<8x32xbf16>, vector<32x8xbf16>, vector<8x8xf32> -> vector<8x8xf32>
    %c0_49 = arith.constant 0 : index
    %c0_50 = arith.constant 0 : index
    %c0_51 = arith.constant 0 : index
    %c0_52 = arith.constant 0 : index
    %88 = vector.load %arg10[%c0_49, %c0_50, %c0_51, %c0_52] : memref<3x4x1x8xf32, #tpu.memory_space<vmem>>, vector<1x1x1x8xf32>
    %89 = vector.shape_cast %88 : vector<1x1x1x8xf32> to vector<1x8xf32>
    %90 = vector.broadcast %89 : vector<1x8xf32> to vector<8x8xf32>
    %91 = arith.addf %87, %90 : vector<8x8xf32>
    %92 = arith.truncf %77 : vector<8x8xf32> to vector<8x8xbf16>
    %93 = arith.truncf %84 : vector<8x8xf32> to vector<8x8xbf16>
    "tpu.trace_start"() <{level = 10 : i32, message = "qd,kd->qk"}> : () -> ()
    %cst_53 = arith.constant dense<0.000000e+00> : vector<8x8xf32>
    %94 = tpu.matmul %92, %93, %cst_53 {dimension_numbers = #tpu.dot_dimension_numbers<[1], [1], [0], [0], [0, 0, 1, 0], [], []>} : vector<8x8xbf16>, vector<8x8xbf16>, vector<8x8xf32> -> vector<8x8xf32>
    "tpu.trace_stop"() : () -> ()
    %cst_54 = arith.constant dense<0xFF800000> : vector<8xf32>
    %95 = vector.multi_reduction <maximumf>, %94, %cst_54 [1] : vector<8x8xf32> to vector<8xf32>
    %96 = vector.shape_cast %95 : vector<8xf32> to vector<8x1xf32>
    %97 = vector.broadcast %96 : vector<8x1xf32> to vector<8x8xf32>
    %98 = arith.subf %94, %97 : vector<8x8xf32>
    %99 = math.exp %98 : vector<8x8xf32>
    %cst_55 = arith.constant dense<0.000000e+00> : vector<8xf32>
    %100 = vector.multi_reduction <add>, %99, %cst_55 [1] : vector<8x8xf32> to vector<8xf32>
    %101 = vector.shape_cast %100 : vector<8xf32> to vector<8x1xf32>
    %102 = vector.broadcast %101 : vector<8x1xf32> to vector<8x8xf32>
    %103 = arith.divf %99, %102 : vector<8x8xf32>
    %104 = arith.truncf %103 : vector<8x8xf32> to vector<8x8xbf16>
    %105 = arith.truncf %91 : vector<8x8xf32> to vector<8x8xbf16>
    %cst_56 = arith.constant dense<0.000000e+00> : vector<8x8xf32>
    %106 = tpu.matmul %104, %105, %cst_56 {dimension_numbers = #tpu.dot_dimension_numbers<[1], [0], [0], [1], [0, 0, 1, 1], [], []>} : vector<8x8xbf16>, vector<8x8xbf16>, vector<8x8xf32> -> vector<8x8xf32>
    %107 = arith.truncf %106 : vector<8x8xf32> to vector<8x8xbf16>
    %c0_57 = arith.constant 0 : index
    %c0_58 = arith.constant 0 : index
    %c0_59 = arith.constant 0 : index
    %c0_60 = arith.constant 0 : index
    %108 = vector.load %arg11[%c0_57, %c0_58, %c0_59, %c0_60] : memref<3x4x8x32xbf16, #tpu.memory_space<vmem>>, vector<1x1x8x32xbf16>
    %109 = vector.shape_cast %108 : vector<1x1x8x32xbf16> to vector<8x32xbf16>
    %cst_61 = arith.constant dense<0.000000e+00> : vector<8x32xf32>
    %110 = tpu.matmul %107, %109, %cst_61 {dimension_numbers = #tpu.dot_dimension_numbers<[1], [0], [0], [1], [0, 0, 1, 1], [], []>} : vector<8x8xbf16>, vector<8x32xbf16>, vector<8x32xf32> -> vector<8x32xf32>
    %111 = arith.addf %70, %110 : vector<8x32xf32>
    %c0_62 = arith.constant 0 : index
    %c1 = arith.constant 1 : index
    %c0_63 = arith.constant 0 : index
    %c0_64 = arith.constant 0 : index
    %112 = vector.load %arg5[%c0_62, %c1, %c0_63, %c0_64] : memref<3x4x32x8xbf16, #tpu.memory_space<vmem>>, vector<1x1x32x8xbf16>
    %113 = vector.shape_cast %112 : vector<1x1x32x8xbf16> to vector<32x8xbf16>
    %cst_65 = arith.constant dense<0.000000e+00> : vector<8x8xf32>
    %114 = tpu.matmul %43, %113, %cst_65 {dimension_numbers = #tpu.dot_dimension_numbers<[1], [0], [0], [1], [0, 0, 1, 1], [], []>} : vector<8x32xbf16>, vector<32x8xbf16>, vector<8x8xf32> -> vector<8x8xf32>
    %c0_66 = arith.constant 0 : index
    %c1_67 = arith.constant 1 : index
    %c0_68 = arith.constant 0 : index
    %c0_69 = arith.constant 0 : index
    %115 = vector.load %arg6[%c0_66, %c1_67, %c0_68, %c0_69] : memref<3x4x1x8xf32, #tpu.memory_space<vmem>>, vector<1x1x1x8xf32>
    %116 = vector.shape_cast %115 : vector<1x1x1x8xf32> to vector<1x8xf32>
    %117 = vector.broadcast %116 : vector<1x8xf32> to vector<8x8xf32>
    %118 = arith.addf %114, %117 : vector<8x8xf32>
    %c0_70 = arith.constant 0 : index
    %c1_71 = arith.constant 1 : index
    %c0_72 = arith.constant 0 : index
    %c0_73 = arith.constant 0 : index
    %119 = vector.load %arg7[%c0_70, %c1_71, %c0_72, %c0_73] : memref<3x4x32x8xbf16, #tpu.memory_space<vmem>>, vector<1x1x32x8xbf16>
    %120 = vector.shape_cast %119 : vector<1x1x32x8xbf16> to vector<32x8xbf16>
    %cst_74 = arith.constant dense<0.000000e+00> : vector<8x8xf32>
    %121 = tpu.matmul %24, %120, %cst_74 {dimension_numbers = #tpu.dot_dimension_numbers<[1], [0], [0], [1], [0, 0, 1, 1], [], []>} : vector<8x32xbf16>, vector<32x8xbf16>, vector<8x8xf32> -> vector<8x8xf32>
    %c0_75 = arith.constant 0 : index
    %c1_76 = arith.constant 1 : index
    %c0_77 = arith.constant 0 : index
    %c0_78 = arith.constant 0 : index
    %122 = vector.load %arg8[%c0_75, %c1_76, %c0_77, %c0_78] : memref<3x4x1x8xf32, #tpu.memory_space<vmem>>, vector<1x1x1x8xf32>
    %123 = vector.shape_cast %122 : vector<1x1x1x8xf32> to vector<1x8xf32>
    %124 = vector.broadcast %123 : vector<1x8xf32> to vector<8x8xf32>
    %125 = arith.addf %121, %124 : vector<8x8xf32>
    %c0_79 = arith.constant 0 : index
    %c1_80 = arith.constant 1 : index
    %c0_81 = arith.constant 0 : index
    %c0_82 = arith.constant 0 : index
    %126 = vector.load %arg9[%c0_79, %c1_80, %c0_81, %c0_82] : memref<3x4x32x8xbf16, #tpu.memory_space<vmem>>, vector<1x1x32x8xbf16>
    %127 = vector.shape_cast %126 : vector<1x1x32x8xbf16> to vector<32x8xbf16>
    %cst_83 = arith.constant dense<0.000000e+00> : vector<8x8xf32>
    %128 = tpu.matmul %24, %127, %cst_83 {dimension_numbers = #tpu.dot_dimension_numbers<[1], [0], [0], [1], [0, 0, 1, 1], [], []>} : vector<8x32xbf16>, vector<32x8xbf16>, vector<8x8xf32> -> vector<8x8xf32>
    %c0_84 = arith.constant 0 : index
    %c1_85 = arith.constant 1 : index
    %c0_86 = arith.constant 0 : index
    %c0_87 = arith.constant 0 : index
    %129 = vector.load %arg10[%c0_84, %c1_85, %c0_86, %c0_87] : memref<3x4x1x8xf32, #tpu.memory_space<vmem>>, vector<1x1x1x8xf32>
    %130 = vector.shape_cast %129 : vector<1x1x1x8xf32> to vector<1x8xf32>
    %131 = vector.broadcast %130 : vector<1x8xf32> to vector<8x8xf32>
    %132 = arith.addf %128, %131 : vector<8x8xf32>
    %133 = arith.truncf %118 : vector<8x8xf32> to vector<8x8xbf16>
    %134 = arith.truncf %125 : vector<8x8xf32> to vector<8x8xbf16>
    "tpu.trace_start"() <{level = 10 : i32, message = "qd,kd->qk"}> : () -> ()
    %cst_88 = arith.constant dense<0.000000e+00> : vector<8x8xf32>
    %135 = tpu.matmul %133, %134, %cst_88 {dimension_numbers = #tpu.dot_dimension_numbers<[1], [1], [0], [0], [0, 0, 1, 0], [], []>} : vector<8x8xbf16>, vector<8x8xbf16>, vector<8x8xf32> -> vector<8x8xf32>
    "tpu.trace_stop"() : () -> ()
    %cst_89 = arith.constant dense<0xFF800000> : vector<8xf32>
    %136 = vector.multi_reduction <maximumf>, %135, %cst_89 [1] : vector<8x8xf32> to vector<8xf32>
    %137 = vector.shape_cast %136 : vector<8xf32> to vector<8x1xf32>
    %138 = vector.broadcast %137 : vector<8x1xf32> to vector<8x8xf32>
    %139 = arith.subf %135, %138 : vector<8x8xf32>
    %140 = math.exp %139 : vector<8x8xf32>
    %cst_90 = arith.constant dense<0.000000e+00> : vector<8xf32>
    %141 = vector.multi_reduction <add>, %140, %cst_90 [1] : vector<8x8xf32> to vector<8xf32>
    %142 = vector.shape_cast %141 : vector<8xf32> to vector<8x1xf32>
    %143 = vector.broadcast %142 : vector<8x1xf32> to vector<8x8xf32>
    %144 = arith.divf %140, %143 : vector<8x8xf32>
    %145 = arith.truncf %144 : vector<8x8xf32> to vector<8x8xbf16>
    %146 = arith.truncf %132 : vector<8x8xf32> to vector<8x8xbf16>
    %cst_91 = arith.constant dense<0.000000e+00> : vector<8x8xf32>
    %147 = tpu.matmul %145, %146, %cst_91 {dimension_numbers = #tpu.dot_dimension_numbers<[1], [0], [0], [1], [0, 0, 1, 1], [], []>} : vector<8x8xbf16>, vector<8x8xbf16>, vector<8x8xf32> -> vector<8x8xf32>
    %148 = arith.truncf %147 : vector<8x8xf32> to vector<8x8xbf16>
    %c0_92 = arith.constant 0 : index
    %c1_93 = arith.constant 1 : index
    %c0_94 = arith.constant 0 : index
    %c0_95 = arith.constant 0 : index
    %149 = vector.load %arg11[%c0_92, %c1_93, %c0_94, %c0_95] : memref<3x4x8x32xbf16, #tpu.memory_space<vmem>>, vector<1x1x8x32xbf16>
    %150 = vector.shape_cast %149 : vector<1x1x8x32xbf16> to vector<8x32xbf16>
    %cst_96 = arith.constant dense<0.000000e+00> : vector<8x32xf32>
    %151 = tpu.matmul %148, %150, %cst_96 {dimension_numbers = #tpu.dot_dimension_numbers<[1], [0], [0], [1], [0, 0, 1, 1], [], []>} : vector<8x8xbf16>, vector<8x32xbf16>, vector<8x32xf32> -> vector<8x32xf32>
    %152 = arith.addf %111, %151 : vector<8x32xf32>
    %c0_97 = arith.constant 0 : index
    %c2 = arith.constant 2 : index
    %c0_98 = arith.constant 0 : index
    %c0_99 = arith.constant 0 : index
    %153 = vector.load %arg5[%c0_97, %c2, %c0_98, %c0_99] : memref<3x4x32x8xbf16, #tpu.memory_space<vmem>>, vector<1x1x32x8xbf16>
    %154 = vector.shape_cast %153 : vector<1x1x32x8xbf16> to vector<32x8xbf16>
    %cst_100 = arith.constant dense<0.000000e+00> : vector<8x8xf32>
    %155 = tpu.matmul %43, %154, %cst_100 {dimension_numbers = #tpu.dot_dimension_numbers<[1], [0], [0], [1], [0, 0, 1, 1], [], []>} : vector<8x32xbf16>, vector<32x8xbf16>, vector<8x8xf32> -> vector<8x8xf32>
    %c0_101 = arith.constant 0 : index
    %c2_102 = arith.constant 2 : index
    %c0_103 = arith.constant 0 : index
    %c0_104 = arith.constant 0 : index
    %156 = vector.load %arg6[%c0_101, %c2_102, %c0_103, %c0_104] : memref<3x4x1x8xf32, #tpu.memory_space<vmem>>, vector<1x1x1x8xf32>
    %157 = vector.shape_cast %156 : vector<1x1x1x8xf32> to vector<1x8xf32>
    %158 = vector.broadcast %157 : vector<1x8xf32> to vector<8x8xf32>
    %159 = arith.addf %155, %158 : vector<8x8xf32>
    %c0_105 = arith.constant 0 : index
    %c2_106 = arith.constant 2 : index
    %c0_107 = arith.constant 0 : index
    %c0_108 = arith.constant 0 : index
    %160 = vector.load %arg7[%c0_105, %c2_106, %c0_107, %c0_108] : memref<3x4x32x8xbf16, #tpu.memory_space<vmem>>, vector<1x1x32x8xbf16>
    %161 = vector.shape_cast %160 : vector<1x1x32x8xbf16> to vector<32x8xbf16>
    %cst_109 = arith.constant dense<0.000000e+00> : vector<8x8xf32>
    %162 = tpu.matmul %24, %161, %cst_109 {dimension_numbers = #tpu.dot_dimension_numbers<[1], [0], [0], [1], [0, 0, 1, 1], [], []>} : vector<8x32xbf16>, vector<32x8xbf16>, vector<8x8xf32> -> vector<8x8xf32>
    %c0_110 = arith.constant 0 : index
    %c2_111 = arith.constant 2 : index
    %c0_112 = arith.constant 0 : index
    %c0_113 = arith.constant 0 : index
    %163 = vector.load %arg8[%c0_110, %c2_111, %c0_112, %c0_113] : memref<3x4x1x8xf32, #tpu.memory_space<vmem>>, vector<1x1x1x8xf32>
    %164 = vector.shape_cast %163 : vector<1x1x1x8xf32> to vector<1x8xf32>
    %165 = vector.broadcast %164 : vector<1x8xf32> to vector<8x8xf32>
    %166 = arith.addf %162, %165 : vector<8x8xf32>
    %c0_114 = arith.constant 0 : index
    %c2_115 = arith.constant 2 : index
    %c0_116 = arith.constant 0 : index
    %c0_117 = arith.constant 0 : index
    %167 = vector.load %arg9[%c0_114, %c2_115, %c0_116, %c0_117] : memref<3x4x32x8xbf16, #tpu.memory_space<vmem>>, vector<1x1x32x8xbf16>
    %168 = vector.shape_cast %167 : vector<1x1x32x8xbf16> to vector<32x8xbf16>
    %cst_118 = arith.constant dense<0.000000e+00> : vector<8x8xf32>
    %169 = tpu.matmul %24, %168, %cst_118 {dimension_numbers = #tpu.dot_dimension_numbers<[1], [0], [0], [1], [0, 0, 1, 1], [], []>} : vector<8x32xbf16>, vector<32x8xbf16>, vector<8x8xf32> -> vector<8x8xf32>
    %c0_119 = arith.constant 0 : index
    %c2_120 = arith.constant 2 : index
    %c0_121 = arith.constant 0 : index
    %c0_122 = arith.constant 0 : index
    %170 = vector.load %arg10[%c0_119, %c2_120, %c0_121, %c0_122] : memref<3x4x1x8xf32, #tpu.memory_space<vmem>>, vector<1x1x1x8xf32>
    %171 = vector.shape_cast %170 : vector<1x1x1x8xf32> to vector<1x8xf32>
    %172 = vector.broadcast %171 : vector<1x8xf32> to vector<8x8xf32>
    %173 = arith.addf %169, %172 : vector<8x8xf32>
    %174 = arith.truncf %159 : vector<8x8xf32> to vector<8x8xbf16>
    %175 = arith.truncf %166 : vector<8x8xf32> to vector<8x8xbf16>
    "tpu.trace_start"() <{level = 10 : i32, message = "qd,kd->qk"}> : () -> ()
    %cst_123 = arith.constant dense<0.000000e+00> : vector<8x8xf32>
    %176 = tpu.matmul %174, %175, %cst_123 {dimension_numbers = #tpu.dot_dimension_numbers<[1], [1], [0], [0], [0, 0, 1, 0], [], []>} : vector<8x8xbf16>, vector<8x8xbf16>, vector<8x8xf32> -> vector<8x8xf32>
    "tpu.trace_stop"() : () -> ()
    %cst_124 = arith.constant dense<0xFF800000> : vector<8xf32>
    %177 = vector.multi_reduction <maximumf>, %176, %cst_124 [1] : vector<8x8xf32> to vector<8xf32>
    %178 = vector.shape_cast %177 : vector<8xf32> to vector<8x1xf32>
    %179 = vector.broadcast %178 : vector<8x1xf32> to vector<8x8xf32>
    %180 = arith.subf %176, %179 : vector<8x8xf32>
    %181 = math.exp %180 : vector<8x8xf32>
    %cst_125 = arith.constant dense<0.000000e+00> : vector<8xf32>
    %182 = vector.multi_reduction <add>, %181, %cst_125 [1] : vector<8x8xf32> to vector<8xf32>
    %183 = vector.shape_cast %182 : vector<8xf32> to vector<8x1xf32>
    %184 = vector.broadcast %183 : vector<8x1xf32> to vector<8x8xf32>
    %185 = arith.divf %181, %184 : vector<8x8xf32>
    %186 = arith.truncf %185 : vector<8x8xf32> to vector<8x8xbf16>
    %187 = arith.truncf %173 : vector<8x8xf32> to vector<8x8xbf16>
    %cst_126 = arith.constant dense<0.000000e+00> : vector<8x8xf32>
    %188 = tpu.matmul %186, %187, %cst_126 {dimension_numbers = #tpu.dot_dimension_numbers<[1], [0], [0], [1], [0, 0, 1, 1], [], []>} : vector<8x8xbf16>, vector<8x8xbf16>, vector<8x8xf32> -> vector<8x8xf32>
    %189 = arith.truncf %188 : vector<8x8xf32> to vector<8x8xbf16>
    %c0_127 = arith.constant 0 : index
    %c2_128 = arith.constant 2 : index
    %c0_129 = arith.constant 0 : index
    %c0_130 = arith.constant 0 : index
    %190 = vector.load %arg11[%c0_127, %c2_128, %c0_129, %c0_130] : memref<3x4x8x32xbf16, #tpu.memory_space<vmem>>, vector<1x1x8x32xbf16>
    %191 = vector.shape_cast %190 : vector<1x1x8x32xbf16> to vector<8x32xbf16>
    %cst_131 = arith.constant dense<0.000000e+00> : vector<8x32xf32>
    %192 = tpu.matmul %189, %191, %cst_131 {dimension_numbers = #tpu.dot_dimension_numbers<[1], [0], [0], [1], [0, 0, 1, 1], [], []>} : vector<8x8xbf16>, vector<8x32xbf16>, vector<8x32xf32> -> vector<8x32xf32>
    %193 = arith.addf %152, %192 : vector<8x32xf32>
    %c0_132 = arith.constant 0 : index
    %c3 = arith.constant 3 : index
    %c0_133 = arith.constant 0 : index
    %c0_134 = arith.constant 0 : index
    %194 = vector.load %arg5[%c0_132, %c3, %c0_133, %c0_134] : memref<3x4x32x8xbf16, #tpu.memory_space<vmem>>, vector<1x1x32x8xbf16>
    %195 = vector.shape_cast %194 : vector<1x1x32x8xbf16> to vector<32x8xbf16>
    %cst_135 = arith.constant dense<0.000000e+00> : vector<8x8xf32>
    %196 = tpu.matmul %43, %195, %cst_135 {dimension_numbers = #tpu.dot_dimension_numbers<[1], [0], [0], [1], [0, 0, 1, 1], [], []>} : vector<8x32xbf16>, vector<32x8xbf16>, vector<8x8xf32> -> vector<8x8xf32>
    %c0_136 = arith.constant 0 : index
    %c3_137 = arith.constant 3 : index
    %c0_138 = arith.constant 0 : index
    %c0_139 = arith.constant 0 : index
    %197 = vector.load %arg6[%c0_136, %c3_137, %c0_138, %c0_139] : memref<3x4x1x8xf32, #tpu.memory_space<vmem>>, vector<1x1x1x8xf32>
    %198 = vector.shape_cast %197 : vector<1x1x1x8xf32> to vector<1x8xf32>
    %199 = vector.broadcast %198 : vector<1x8xf32> to vector<8x8xf32>
    %200 = arith.addf %196, %199 : vector<8x8xf32>
    %c0_140 = arith.constant 0 : index
    %c3_141 = arith.constant 3 : index
    %c0_142 = arith.constant 0 : index
    %c0_143 = arith.constant 0 : index
    %201 = vector.load %arg7[%c0_140, %c3_141, %c0_142, %c0_143] : memref<3x4x32x8xbf16, #tpu.memory_space<vmem>>, vector<1x1x32x8xbf16>
    %202 = vector.shape_cast %201 : vector<1x1x32x8xbf16> to vector<32x8xbf16>
    %cst_144 = arith.constant dense<0.000000e+00> : vector<8x8xf32>
    %203 = tpu.matmul %24, %202, %cst_144 {dimension_numbers = #tpu.dot_dimension_numbers<[1], [0], [0], [1], [0, 0, 1, 1], [], []>} : vector<8x32xbf16>, vector<32x8xbf16>, vector<8x8xf32> -> vector<8x8xf32>
    %c0_145 = arith.constant 0 : index
    %c3_146 = arith.constant 3 : index
    %c0_147 = arith.constant 0 : index
    %c0_148 = arith.constant 0 : index
    %204 = vector.load %arg8[%c0_145, %c3_146, %c0_147, %c0_148] : memref<3x4x1x8xf32, #tpu.memory_space<vmem>>, vector<1x1x1x8xf32>
    %205 = vector.shape_cast %204 : vector<1x1x1x8xf32> to vector<1x8xf32>
    %206 = vector.broadcast %205 : vector<1x8xf32> to vector<8x8xf32>
    %207 = arith.addf %203, %206 : vector<8x8xf32>
    %c0_149 = arith.constant 0 : index
    %c3_150 = arith.constant 3 : index
    %c0_151 = arith.constant 0 : index
    %c0_152 = arith.constant 0 : index
    %208 = vector.load %arg9[%c0_149, %c3_150, %c0_151, %c0_152] : memref<3x4x32x8xbf16, #tpu.memory_space<vmem>>, vector<1x1x32x8xbf16>
    %209 = vector.shape_cast %208 : vector<1x1x32x8xbf16> to vector<32x8xbf16>
    %cst_153 = arith.constant dense<0.000000e+00> : vector<8x8xf32>
    %210 = tpu.matmul %24, %209, %cst_153 {dimension_numbers = #tpu.dot_dimension_numbers<[1], [0], [0], [1], [0, 0, 1, 1], [], []>} : vector<8x32xbf16>, vector<32x8xbf16>, vector<8x8xf32> -> vector<8x8xf32>
    %c0_154 = arith.constant 0 : index
    %c3_155 = arith.constant 3 : index
    %c0_156 = arith.constant 0 : index
    %c0_157 = arith.constant 0 : index
    %211 = vector.load %arg10[%c0_154, %c3_155, %c0_156, %c0_157] : memref<3x4x1x8xf32, #tpu.memory_space<vmem>>, vector<1x1x1x8xf32>
    %212 = vector.shape_cast %211 : vector<1x1x1x8xf32> to vector<1x8xf32>
    %213 = vector.broadcast %212 : vector<1x8xf32> to vector<8x8xf32>
    %214 = arith.addf %210, %213 : vector<8x8xf32>
    %215 = arith.truncf %200 : vector<8x8xf32> to vector<8x8xbf16>
    %216 = arith.truncf %207 : vector<8x8xf32> to vector<8x8xbf16>
    "tpu.trace_start"() <{level = 10 : i32, message = "qd,kd->qk"}> : () -> ()
    %cst_158 = arith.constant dense<0.000000e+00> : vector<8x8xf32>
    %217 = tpu.matmul %215, %216, %cst_158 {dimension_numbers = #tpu.dot_dimension_numbers<[1], [1], [0], [0], [0, 0, 1, 0], [], []>} : vector<8x8xbf16>, vector<8x8xbf16>, vector<8x8xf32> -> vector<8x8xf32>
    "tpu.trace_stop"() : () -> ()
    %cst_159 = arith.constant dense<0xFF800000> : vector<8xf32>
    %218 = vector.multi_reduction <maximumf>, %217, %cst_159 [1] : vector<8x8xf32> to vector<8xf32>
    %219 = vector.shape_cast %218 : vector<8xf32> to vector<8x1xf32>
    %220 = vector.broadcast %219 : vector<8x1xf32> to vector<8x8xf32>
    %221 = arith.subf %217, %220 : vector<8x8xf32>
    %222 = math.exp %221 : vector<8x8xf32>
    %cst_160 = arith.constant dense<0.000000e+00> : vector<8xf32>
    %223 = vector.multi_reduction <add>, %222, %cst_160 [1] : vector<8x8xf32> to vector<8xf32>
    %224 = vector.shape_cast %223 : vector<8xf32> to vector<8x1xf32>
    %225 = vector.broadcast %224 : vector<8x1xf32> to vector<8x8xf32>
    %226 = arith.divf %222, %225 : vector<8x8xf32>
    %227 = arith.truncf %226 : vector<8x8xf32> to vector<8x8xbf16>
    %228 = arith.truncf %214 : vector<8x8xf32> to vector<8x8xbf16>
    %cst_161 = arith.constant dense<0.000000e+00> : vector<8x8xf32>
    %229 = tpu.matmul %227, %228, %cst_161 {dimension_numbers = #tpu.dot_dimension_numbers<[1], [0], [0], [1], [0, 0, 1, 1], [], []>} : vector<8x8xbf16>, vector<8x8xbf16>, vector<8x8xf32> -> vector<8x8xf32>
    %230 = arith.truncf %229 : vector<8x8xf32> to vector<8x8xbf16>
    %c0_162 = arith.constant 0 : index
    %c3_163 = arith.constant 3 : index
    %c0_164 = arith.constant 0 : index
    %c0_165 = arith.constant 0 : index
    %231 = vector.load %arg11[%c0_162, %c3_163, %c0_164, %c0_165] : memref<3x4x8x32xbf16, #tpu.memory_space<vmem>>, vector<1x1x8x32xbf16>
    %232 = vector.shape_cast %231 : vector<1x1x8x32xbf16> to vector<8x32xbf16>
    %cst_166 = arith.constant dense<0.000000e+00> : vector<8x32xf32>
    %233 = tpu.matmul %230, %232, %cst_166 {dimension_numbers = #tpu.dot_dimension_numbers<[1], [0], [0], [1], [0, 0, 1, 1], [], []>} : vector<8x8xbf16>, vector<8x32xbf16>, vector<8x32xf32> -> vector<8x32xf32>
    %234 = arith.addf %193, %233 : vector<8x32xf32>
    %c0_167 = arith.constant 0 : index
    %c0_168 = arith.constant 0 : index
    %c0_169 = arith.constant 0 : index
    %235 = vector.load %arg12[%c0_167, %c0_168, %c0_169] : memref<3x1x32xf32, #tpu.memory_space<vmem>>, vector<1x1x32xf32>
    %236 = vector.shape_cast %235 : vector<1x1x32xf32> to vector<1x32xf32>
    %237 = vector.broadcast %236 : vector<1x32xf32> to vector<8x32xf32>
    %238 = arith.addf %234, %237 : vector<8x32xf32>
    %239 = arith.addf %69, %238 : vector<8x32xf32>
    %cst_170 = arith.constant 0.000000e+00 : f32
    %240 = vector.broadcast %cst_170 : f32 to vector<8x32xf32>
    %c0_171 = arith.constant 0 : index
    %c0_172 = arith.constant 0 : index
    %c0_173 = arith.constant 0 : index
    %c0_174 = arith.constant 0 : index
    %241 = vector.load %arg13[%c0_171, %c0_172, %c0_173, %c0_174] : memref<2x4x32x8xbf16, #tpu.memory_space<vmem>>, vector<1x1x32x8xbf16>
    %242 = vector.shape_cast %241 : vector<1x1x32x8xbf16> to vector<32x8xbf16>
    %cst_175 = arith.constant dense<0.000000e+00> : vector<8x8xf32>
    %243 = tpu.matmul %43, %242, %cst_175 {dimension_numbers = #tpu.dot_dimension_numbers<[1], [0], [0], [1], [0, 0, 1, 1], [], []>} : vector<8x32xbf16>, vector<32x8xbf16>, vector<8x8xf32> -> vector<8x8xf32>
    %c0_176 = arith.constant 0 : index
    %c0_177 = arith.constant 0 : index
    %c0_178 = arith.constant 0 : index
    %c0_179 = arith.constant 0 : index
    %244 = vector.load %arg14[%c0_176, %c0_177, %c0_178, %c0_179] : memref<2x4x1x8xf32, #tpu.memory_space<vmem>>, vector<1x1x1x8xf32>
    %245 = vector.shape_cast %244 : vector<1x1x1x8xf32> to vector<1x8xf32>
    %246 = vector.broadcast %245 : vector<1x8xf32> to vector<8x8xf32>
    %247 = arith.addf %243, %246 : vector<8x8xf32>
    %c0_180 = arith.constant 0 : index
    %c0_181 = arith.constant 0 : index
    %c0_182 = arith.constant 0 : index
    %c0_183 = arith.constant 0 : index
    %248 = vector.load %arg15[%c0_180, %c0_181, %c0_182, %c0_183] : memref<2x4x32x8xbf16, #tpu.memory_space<vmem>>, vector<1x1x32x8xbf16>
    %249 = vector.shape_cast %248 : vector<1x1x32x8xbf16> to vector<32x8xbf16>
    %cst_184 = arith.constant dense<0.000000e+00> : vector<8x8xf32>
    %250 = tpu.matmul %43, %249, %cst_184 {dimension_numbers = #tpu.dot_dimension_numbers<[1], [0], [0], [1], [0, 0, 1, 1], [], []>} : vector<8x32xbf16>, vector<32x8xbf16>, vector<8x8xf32> -> vector<8x8xf32>
    %c0_185 = arith.constant 0 : index
    %c0_186 = arith.constant 0 : index
    %c0_187 = arith.constant 0 : index
    %c0_188 = arith.constant 0 : index
    %251 = vector.load %arg16[%c0_185, %c0_186, %c0_187, %c0_188] : memref<2x4x1x8xf32, #tpu.memory_space<vmem>>, vector<1x1x1x8xf32>
    %252 = vector.shape_cast %251 : vector<1x1x1x8xf32> to vector<1x8xf32>
    %253 = vector.broadcast %252 : vector<1x8xf32> to vector<8x8xf32>
    %254 = arith.addf %250, %253 : vector<8x8xf32>
    %c0_189 = arith.constant 0 : index
    %c0_190 = arith.constant 0 : index
    %c0_191 = arith.constant 0 : index
    %c0_192 = arith.constant 0 : index
    %255 = vector.load %arg17[%c0_189, %c0_190, %c0_191, %c0_192] : memref<2x4x32x8xbf16, #tpu.memory_space<vmem>>, vector<1x1x32x8xbf16>
    %256 = vector.shape_cast %255 : vector<1x1x32x8xbf16> to vector<32x8xbf16>
    %cst_193 = arith.constant dense<0.000000e+00> : vector<8x8xf32>
    %257 = tpu.matmul %43, %256, %cst_193 {dimension_numbers = #tpu.dot_dimension_numbers<[1], [0], [0], [1], [0, 0, 1, 1], [], []>} : vector<8x32xbf16>, vector<32x8xbf16>, vector<8x8xf32> -> vector<8x8xf32>
    %c0_194 = arith.constant 0 : index
    %c0_195 = arith.constant 0 : index
    %c0_196 = arith.constant 0 : index
    %c0_197 = arith.constant 0 : index
    %258 = vector.load %arg18[%c0_194, %c0_195, %c0_196, %c0_197] : memref<2x4x1x8xf32, #tpu.memory_space<vmem>>, vector<1x1x1x8xf32>
    %259 = vector.shape_cast %258 : vector<1x1x1x8xf32> to vector<1x8xf32>
    %260 = vector.broadcast %259 : vector<1x8xf32> to vector<8x8xf32>
    %261 = arith.addf %257, %260 : vector<8x8xf32>
    %262 = arith.truncf %247 : vector<8x8xf32> to vector<8x8xbf16>
    %263 = arith.truncf %254 : vector<8x8xf32> to vector<8x8xbf16>
    "tpu.trace_start"() <{level = 10 : i32, message = "qd,kd->qk"}> : () -> ()
    %cst_198 = arith.constant dense<0.000000e+00> : vector<8x8xf32>
    %264 = tpu.matmul %262, %263, %cst_198 {dimension_numbers = #tpu.dot_dimension_numbers<[1], [1], [0], [0], [0, 0, 1, 0], [], []>} : vector<8x8xbf16>, vector<8x8xbf16>, vector<8x8xf32> -> vector<8x8xf32>
    "tpu.trace_stop"() : () -> ()
    %cst_199 = arith.constant dense<0xFF800000> : vector<8xf32>
    %265 = vector.multi_reduction <maximumf>, %264, %cst_199 [1] : vector<8x8xf32> to vector<8xf32>
    %266 = vector.shape_cast %265 : vector<8xf32> to vector<8x1xf32>
    %267 = vector.broadcast %266 : vector<8x1xf32> to vector<8x8xf32>
    %268 = arith.subf %264, %267 : vector<8x8xf32>
    %269 = math.exp %268 : vector<8x8xf32>
    %cst_200 = arith.constant dense<0.000000e+00> : vector<8xf32>
    %270 = vector.multi_reduction <add>, %269, %cst_200 [1] : vector<8x8xf32> to vector<8xf32>
    %271 = vector.shape_cast %270 : vector<8xf32> to vector<8x1xf32>
    %272 = vector.broadcast %271 : vector<8x1xf32> to vector<8x8xf32>
    %273 = arith.divf %269, %272 : vector<8x8xf32>
    %274 = arith.truncf %273 : vector<8x8xf32> to vector<8x8xbf16>
    %275 = arith.truncf %261 : vector<8x8xf32> to vector<8x8xbf16>
    %cst_201 = arith.constant dense<0.000000e+00> : vector<8x8xf32>
    %276 = tpu.matmul %274, %275, %cst_201 {dimension_numbers = #tpu.dot_dimension_numbers<[1], [0], [0], [1], [0, 0, 1, 1], [], []>} : vector<8x8xbf16>, vector<8x8xbf16>, vector<8x8xf32> -> vector<8x8xf32>
    %277 = arith.truncf %276 : vector<8x8xf32> to vector<8x8xbf16>
    %c0_202 = arith.constant 0 : index
    %c0_203 = arith.constant 0 : index
    %c0_204 = arith.constant 0 : index
    %c0_205 = arith.constant 0 : index
    %278 = vector.load %arg19[%c0_202, %c0_203, %c0_204, %c0_205] : memref<2x4x8x32xbf16, #tpu.memory_space<vmem>>, vector<1x1x8x32xbf16>
    %279 = vector.shape_cast %278 : vector<1x1x8x32xbf16> to vector<8x32xbf16>
    %cst_206 = arith.constant dense<0.000000e+00> : vector<8x32xf32>
    %280 = tpu.matmul %277, %279, %cst_206 {dimension_numbers = #tpu.dot_dimension_numbers<[1], [0], [0], [1], [0, 0, 1, 1], [], []>} : vector<8x8xbf16>, vector<8x32xbf16>, vector<8x32xf32> -> vector<8x32xf32>
    %281 = arith.addf %240, %280 : vector<8x32xf32>
    %c0_207 = arith.constant 0 : index
    %c1_208 = arith.constant 1 : index
    %c0_209 = arith.constant 0 : index
    %c0_210 = arith.constant 0 : index
    %282 = vector.load %arg13[%c0_207, %c1_208, %c0_209, %c0_210] : memref<2x4x32x8xbf16, #tpu.memory_space<vmem>>, vector<1x1x32x8xbf16>
    %283 = vector.shape_cast %282 : vector<1x1x32x8xbf16> to vector<32x8xbf16>
    %cst_211 = arith.constant dense<0.000000e+00> : vector<8x8xf32>
    %284 = tpu.matmul %43, %283, %cst_211 {dimension_numbers = #tpu.dot_dimension_numbers<[1], [0], [0], [1], [0, 0, 1, 1], [], []>} : vector<8x32xbf16>, vector<32x8xbf16>, vector<8x8xf32> -> vector<8x8xf32>
    %c0_212 = arith.constant 0 : index
    %c1_213 = arith.constant 1 : index
    %c0_214 = arith.constant 0 : index
    %c0_215 = arith.constant 0 : index
    %285 = vector.load %arg14[%c0_212, %c1_213, %c0_214, %c0_215] : memref<2x4x1x8xf32, #tpu.memory_space<vmem>>, vector<1x1x1x8xf32>
    %286 = vector.shape_cast %285 : vector<1x1x1x8xf32> to vector<1x8xf32>
    %287 = vector.broadcast %286 : vector<1x8xf32> to vector<8x8xf32>
    %288 = arith.addf %284, %287 : vector<8x8xf32>
    %c0_216 = arith.constant 0 : index
    %c1_217 = arith.constant 1 : index
    %c0_218 = arith.constant 0 : index
    %c0_219 = arith.constant 0 : index
    %289 = vector.load %arg15[%c0_216, %c1_217, %c0_218, %c0_219] : memref<2x4x32x8xbf16, #tpu.memory_space<vmem>>, vector<1x1x32x8xbf16>
    %290 = vector.shape_cast %289 : vector<1x1x32x8xbf16> to vector<32x8xbf16>
    %cst_220 = arith.constant dense<0.000000e+00> : vector<8x8xf32>
    %291 = tpu.matmul %43, %290, %cst_220 {dimension_numbers = #tpu.dot_dimension_numbers<[1], [0], [0], [1], [0, 0, 1, 1], [], []>} : vector<8x32xbf16>, vector<32x8xbf16>, vector<8x8xf32> -> vector<8x8xf32>
    %c0_221 = arith.constant 0 : index
    %c1_222 = arith.constant 1 : index
    %c0_223 = arith.constant 0 : index
    %c0_224 = arith.constant 0 : index
    %292 = vector.load %arg16[%c0_221, %c1_222, %c0_223, %c0_224] : memref<2x4x1x8xf32, #tpu.memory_space<vmem>>, vector<1x1x1x8xf32>
    %293 = vector.shape_cast %292 : vector<1x1x1x8xf32> to vector<1x8xf32>
    %294 = vector.broadcast %293 : vector<1x8xf32> to vector<8x8xf32>
    %295 = arith.addf %291, %294 : vector<8x8xf32>
    %c0_225 = arith.constant 0 : index
    %c1_226 = arith.constant 1 : index
    %c0_227 = arith.constant 0 : index
    %c0_228 = arith.constant 0 : index
    %296 = vector.load %arg17[%c0_225, %c1_226, %c0_227, %c0_228] : memref<2x4x32x8xbf16, #tpu.memory_space<vmem>>, vector<1x1x32x8xbf16>
    %297 = vector.shape_cast %296 : vector<1x1x32x8xbf16> to vector<32x8xbf16>
    %cst_229 = arith.constant dense<0.000000e+00> : vector<8x8xf32>
    %298 = tpu.matmul %43, %297, %cst_229 {dimension_numbers = #tpu.dot_dimension_numbers<[1], [0], [0], [1], [0, 0, 1, 1], [], []>} : vector<8x32xbf16>, vector<32x8xbf16>, vector<8x8xf32> -> vector<8x8xf32>
    %c0_230 = arith.constant 0 : index
    %c1_231 = arith.constant 1 : index
    %c0_232 = arith.constant 0 : index
    %c0_233 = arith.constant 0 : index
    %299 = vector.load %arg18[%c0_230, %c1_231, %c0_232, %c0_233] : memref<2x4x1x8xf32, #tpu.memory_space<vmem>>, vector<1x1x1x8xf32>
    %300 = vector.shape_cast %299 : vector<1x1x1x8xf32> to vector<1x8xf32>
    %301 = vector.broadcast %300 : vector<1x8xf32> to vector<8x8xf32>
    %302 = arith.addf %298, %301 : vector<8x8xf32>
    %303 = arith.truncf %288 : vector<8x8xf32> to vector<8x8xbf16>
    %304 = arith.truncf %295 : vector<8x8xf32> to vector<8x8xbf16>
    "tpu.trace_start"() <{level = 10 : i32, message = "qd,kd->qk"}> : () -> ()
    %cst_234 = arith.constant dense<0.000000e+00> : vector<8x8xf32>
    %305 = tpu.matmul %303, %304, %cst_234 {dimension_numbers = #tpu.dot_dimension_numbers<[1], [1], [0], [0], [0, 0, 1, 0], [], []>} : vector<8x8xbf16>, vector<8x8xbf16>, vector<8x8xf32> -> vector<8x8xf32>
    "tpu.trace_stop"() : () -> ()
    %cst_235 = arith.constant dense<0xFF800000> : vector<8xf32>
    %306 = vector.multi_reduction <maximumf>, %305, %cst_235 [1] : vector<8x8xf32> to vector<8xf32>
    %307 = vector.shape_cast %306 : vector<8xf32> to vector<8x1xf32>
    %308 = vector.broadcast %307 : vector<8x1xf32> to vector<8x8xf32>
    %309 = arith.subf %305, %308 : vector<8x8xf32>
    %310 = math.exp %309 : vector<8x8xf32>
    %cst_236 = arith.constant dense<0.000000e+00> : vector<8xf32>
    %311 = vector.multi_reduction <add>, %310, %cst_236 [1] : vector<8x8xf32> to vector<8xf32>
    %312 = vector.shape_cast %311 : vector<8xf32> to vector<8x1xf32>
    %313 = vector.broadcast %312 : vector<8x1xf32> to vector<8x8xf32>
    %314 = arith.divf %310, %313 : vector<8x8xf32>
    %315 = arith.truncf %314 : vector<8x8xf32> to vector<8x8xbf16>
    %316 = arith.truncf %302 : vector<8x8xf32> to vector<8x8xbf16>
    %cst_237 = arith.constant dense<0.000000e+00> : vector<8x8xf32>
    %317 = tpu.matmul %315, %316, %cst_237 {dimension_numbers = #tpu.dot_dimension_numbers<[1], [0], [0], [1], [0, 0, 1, 1], [], []>} : vector<8x8xbf16>, vector<8x8xbf16>, vector<8x8xf32> -> vector<8x8xf32>
    %318 = arith.truncf %317 : vector<8x8xf32> to vector<8x8xbf16>
    %c0_238 = arith.constant 0 : index
    %c1_239 = arith.constant 1 : index
    %c0_240 = arith.constant 0 : index
    %c0_241 = arith.constant 0 : index
    %319 = vector.load %arg19[%c0_238, %c1_239, %c0_240, %c0_241] : memref<2x4x8x32xbf16, #tpu.memory_space<vmem>>, vector<1x1x8x32xbf16>
    %320 = vector.shape_cast %319 : vector<1x1x8x32xbf16> to vector<8x32xbf16>
    %cst_242 = arith.constant dense<0.000000e+00> : vector<8x32xf32>
    %321 = tpu.matmul %318, %320, %cst_242 {dimension_numbers = #tpu.dot_dimension_numbers<[1], [0], [0], [1], [0, 0, 1, 1], [], []>} : vector<8x8xbf16>, vector<8x32xbf16>, vector<8x32xf32> -> vector<8x32xf32>
    %322 = arith.addf %281, %321 : vector<8x32xf32>
    %c0_243 = arith.constant 0 : index
    %c2_244 = arith.constant 2 : index
    %c0_245 = arith.constant 0 : index
    %c0_246 = arith.constant 0 : index
    %323 = vector.load %arg13[%c0_243, %c2_244, %c0_245, %c0_246] : memref<2x4x32x8xbf16, #tpu.memory_space<vmem>>, vector<1x1x32x8xbf16>
    %324 = vector.shape_cast %323 : vector<1x1x32x8xbf16> to vector<32x8xbf16>
    %cst_247 = arith.constant dense<0.000000e+00> : vector<8x8xf32>
    %325 = tpu.matmul %43, %324, %cst_247 {dimension_numbers = #tpu.dot_dimension_numbers<[1], [0], [0], [1], [0, 0, 1, 1], [], []>} : vector<8x32xbf16>, vector<32x8xbf16>, vector<8x8xf32> -> vector<8x8xf32>
    %c0_248 = arith.constant 0 : index
    %c2_249 = arith.constant 2 : index
    %c0_250 = arith.constant 0 : index
    %c0_251 = arith.constant 0 : index
    %326 = vector.load %arg14[%c0_248, %c2_249, %c0_250, %c0_251] : memref<2x4x1x8xf32, #tpu.memory_space<vmem>>, vector<1x1x1x8xf32>
    %327 = vector.shape_cast %326 : vector<1x1x1x8xf32> to vector<1x8xf32>
    %328 = vector.broadcast %327 : vector<1x8xf32> to vector<8x8xf32>
    %329 = arith.addf %325, %328 : vector<8x8xf32>
    %c0_252 = arith.constant 0 : index
    %c2_253 = arith.constant 2 : index
    %c0_254 = arith.constant 0 : index
    %c0_255 = arith.constant 0 : index
    %330 = vector.load %arg15[%c0_252, %c2_253, %c0_254, %c0_255] : memref<2x4x32x8xbf16, #tpu.memory_space<vmem>>, vector<1x1x32x8xbf16>
    %331 = vector.shape_cast %330 : vector<1x1x32x8xbf16> to vector<32x8xbf16>
    %cst_256 = arith.constant dense<0.000000e+00> : vector<8x8xf32>
    %332 = tpu.matmul %43, %331, %cst_256 {dimension_numbers = #tpu.dot_dimension_numbers<[1], [0], [0], [1], [0, 0, 1, 1], [], []>} : vector<8x32xbf16>, vector<32x8xbf16>, vector<8x8xf32> -> vector<8x8xf32>
    %c0_257 = arith.constant 0 : index
    %c2_258 = arith.constant 2 : index
    %c0_259 = arith.constant 0 : index
    %c0_260 = arith.constant 0 : index
    %333 = vector.load %arg16[%c0_257, %c2_258, %c0_259, %c0_260] : memref<2x4x1x8xf32, #tpu.memory_space<vmem>>, vector<1x1x1x8xf32>
    %334 = vector.shape_cast %333 : vector<1x1x1x8xf32> to vector<1x8xf32>
    %335 = vector.broadcast %334 : vector<1x8xf32> to vector<8x8xf32>
    %336 = arith.addf %332, %335 : vector<8x8xf32>
    %c0_261 = arith.constant 0 : index
    %c2_262 = arith.constant 2 : index
    %c0_263 = arith.constant 0 : index
    %c0_264 = arith.constant 0 : index
    %337 = vector.load %arg17[%c0_261, %c2_262, %c0_263, %c0_264] : memref<2x4x32x8xbf16, #tpu.memory_space<vmem>>, vector<1x1x32x8xbf16>
    %338 = vector.shape_cast %337 : vector<1x1x32x8xbf16> to vector<32x8xbf16>
    %cst_265 = arith.constant dense<0.000000e+00> : vector<8x8xf32>
    %339 = tpu.matmul %43, %338, %cst_265 {dimension_numbers = #tpu.dot_dimension_numbers<[1], [0], [0], [1], [0, 0, 1, 1], [], []>} : vector<8x32xbf16>, vector<32x8xbf16>, vector<8x8xf32> -> vector<8x8xf32>
    %c0_266 = arith.constant 0 : index
    %c2_267 = arith.constant 2 : index
    %c0_268 = arith.constant 0 : index
    %c0_269 = arith.constant 0 : index
    %340 = vector.load %arg18[%c0_266, %c2_267, %c0_268, %c0_269] : memref<2x4x1x8xf32, #tpu.memory_space<vmem>>, vector<1x1x1x8xf32>
    %341 = vector.shape_cast %340 : vector<1x1x1x8xf32> to vector<1x8xf32>
    %342 = vector.broadcast %341 : vector<1x8xf32> to vector<8x8xf32>
    %343 = arith.addf %339, %342 : vector<8x8xf32>
    %344 = arith.truncf %329 : vector<8x8xf32> to vector<8x8xbf16>
    %345 = arith.truncf %336 : vector<8x8xf32> to vector<8x8xbf16>
    "tpu.trace_start"() <{level = 10 : i32, message = "qd,kd->qk"}> : () -> ()
    %cst_270 = arith.constant dense<0.000000e+00> : vector<8x8xf32>
    %346 = tpu.matmul %344, %345, %cst_270 {dimension_numbers = #tpu.dot_dimension_numbers<[1], [1], [0], [0], [0, 0, 1, 0], [], []>} : vector<8x8xbf16>, vector<8x8xbf16>, vector<8x8xf32> -> vector<8x8xf32>
    "tpu.trace_stop"() : () -> ()
    %cst_271 = arith.constant dense<0xFF800000> : vector<8xf32>
    %347 = vector.multi_reduction <maximumf>, %346, %cst_271 [1] : vector<8x8xf32> to vector<8xf32>
    %348 = vector.shape_cast %347 : vector<8xf32> to vector<8x1xf32>
    %349 = vector.broadcast %348 : vector<8x1xf32> to vector<8x8xf32>
    %350 = arith.subf %346, %349 : vector<8x8xf32>
    %351 = math.exp %350 : vector<8x8xf32>
    %cst_272 = arith.constant dense<0.000000e+00> : vector<8xf32>
    %352 = vector.multi_reduction <add>, %351, %cst_272 [1] : vector<8x8xf32> to vector<8xf32>
    %353 = vector.shape_cast %352 : vector<8xf32> to vector<8x1xf32>
    %354 = vector.broadcast %353 : vector<8x1xf32> to vector<8x8xf32>
    %355 = arith.divf %351, %354 : vector<8x8xf32>
    %356 = arith.truncf %355 : vector<8x8xf32> to vector<8x8xbf16>
    %357 = arith.truncf %343 : vector<8x8xf32> to vector<8x8xbf16>
    %cst_273 = arith.constant dense<0.000000e+00> : vector<8x8xf32>
    %358 = tpu.matmul %356, %357, %cst_273 {dimension_numbers = #tpu.dot_dimension_numbers<[1], [0], [0], [1], [0, 0, 1, 1], [], []>} : vector<8x8xbf16>, vector<8x8xbf16>, vector<8x8xf32> -> vector<8x8xf32>
    %359 = arith.truncf %358 : vector<8x8xf32> to vector<8x8xbf16>
    %c0_274 = arith.constant 0 : index
    %c2_275 = arith.constant 2 : index
    %c0_276 = arith.constant 0 : index
    %c0_277 = arith.constant 0 : index
    %360 = vector.load %arg19[%c0_274, %c2_275, %c0_276, %c0_277] : memref<2x4x8x32xbf16, #tpu.memory_space<vmem>>, vector<1x1x8x32xbf16>
    %361 = vector.shape_cast %360 : vector<1x1x8x32xbf16> to vector<8x32xbf16>
    %cst_278 = arith.constant dense<0.000000e+00> : vector<8x32xf32>
    %362 = tpu.matmul %359, %361, %cst_278 {dimension_numbers = #tpu.dot_dimension_numbers<[1], [0], [0], [1], [0, 0, 1, 1], [], []>} : vector<8x8xbf16>, vector<8x32xbf16>, vector<8x32xf32> -> vector<8x32xf32>
    %363 = arith.addf %322, %362 : vector<8x32xf32>
    %c0_279 = arith.constant 0 : index
    %c3_280 = arith.constant 3 : index
    %c0_281 = arith.constant 0 : index
    %c0_282 = arith.constant 0 : index
    %364 = vector.load %arg13[%c0_279, %c3_280, %c0_281, %c0_282] : memref<2x4x32x8xbf16, #tpu.memory_space<vmem>>, vector<1x1x32x8xbf16>
    %365 = vector.shape_cast %364 : vector<1x1x32x8xbf16> to vector<32x8xbf16>
    %cst_283 = arith.constant dense<0.000000e+00> : vector<8x8xf32>
    %366 = tpu.matmul %43, %365, %cst_283 {dimension_numbers = #tpu.dot_dimension_numbers<[1], [0], [0], [1], [0, 0, 1, 1], [], []>} : vector<8x32xbf16>, vector<32x8xbf16>, vector<8x8xf32> -> vector<8x8xf32>
    %c0_284 = arith.constant 0 : index
    %c3_285 = arith.constant 3 : index
    %c0_286 = arith.constant 0 : index
    %c0_287 = arith.constant 0 : index
    %367 = vector.load %arg14[%c0_284, %c3_285, %c0_286, %c0_287] : memref<2x4x1x8xf32, #tpu.memory_space<vmem>>, vector<1x1x1x8xf32>
    %368 = vector.shape_cast %367 : vector<1x1x1x8xf32> to vector<1x8xf32>
    %369 = vector.broadcast %368 : vector<1x8xf32> to vector<8x8xf32>
    %370 = arith.addf %366, %369 : vector<8x8xf32>
    %c0_288 = arith.constant 0 : index
    %c3_289 = arith.constant 3 : index
    %c0_290 = arith.constant 0 : index
    %c0_291 = arith.constant 0 : index
    %371 = vector.load %arg15[%c0_288, %c3_289, %c0_290, %c0_291] : memref<2x4x32x8xbf16, #tpu.memory_space<vmem>>, vector<1x1x32x8xbf16>
    %372 = vector.shape_cast %371 : vector<1x1x32x8xbf16> to vector<32x8xbf16>
    %cst_292 = arith.constant dense<0.000000e+00> : vector<8x8xf32>
    %373 = tpu.matmul %43, %372, %cst_292 {dimension_numbers = #tpu.dot_dimension_numbers<[1], [0], [0], [1], [0, 0, 1, 1], [], []>} : vector<8x32xbf16>, vector<32x8xbf16>, vector<8x8xf32> -> vector<8x8xf32>
    %c0_293 = arith.constant 0 : index
    %c3_294 = arith.constant 3 : index
    %c0_295 = arith.constant 0 : index
    %c0_296 = arith.constant 0 : index
    %374 = vector.load %arg16[%c0_293, %c3_294, %c0_295, %c0_296] : memref<2x4x1x8xf32, #tpu.memory_space<vmem>>, vector<1x1x1x8xf32>
    %375 = vector.shape_cast %374 : vector<1x1x1x8xf32> to vector<1x8xf32>
    %376 = vector.broadcast %375 : vector<1x8xf32> to vector<8x8xf32>
    %377 = arith.addf %373, %376 : vector<8x8xf32>
    %c0_297 = arith.constant 0 : index
    %c3_298 = arith.constant 3 : index
    %c0_299 = arith.constant 0 : index
    %c0_300 = arith.constant 0 : index
    %378 = vector.load %arg17[%c0_297, %c3_298, %c0_299, %c0_300] : memref<2x4x32x8xbf16, #tpu.memory_space<vmem>>, vector<1x1x32x8xbf16>
    %379 = vector.shape_cast %378 : vector<1x1x32x8xbf16> to vector<32x8xbf16>
    %cst_301 = arith.constant dense<0.000000e+00> : vector<8x8xf32>
    %380 = tpu.matmul %43, %379, %cst_301 {dimension_numbers = #tpu.dot_dimension_numbers<[1], [0], [0], [1], [0, 0, 1, 1], [], []>} : vector<8x32xbf16>, vector<32x8xbf16>, vector<8x8xf32> -> vector<8x8xf32>
    %c0_302 = arith.constant 0 : index
    %c3_303 = arith.constant 3 : index
    %c0_304 = arith.constant 0 : index
    %c0_305 = arith.constant 0 : index
    %381 = vector.load %arg18[%c0_302, %c3_303, %c0_304, %c0_305] : memref<2x4x1x8xf32, #tpu.memory_space<vmem>>, vector<1x1x1x8xf32>
    %382 = vector.shape_cast %381 : vector<1x1x1x8xf32> to vector<1x8xf32>
    %383 = vector.broadcast %382 : vector<1x8xf32> to vector<8x8xf32>
    %384 = arith.addf %380, %383 : vector<8x8xf32>
    %385 = arith.truncf %370 : vector<8x8xf32> to vector<8x8xbf16>
    %386 = arith.truncf %377 : vector<8x8xf32> to vector<8x8xbf16>
    "tpu.trace_start"() <{level = 10 : i32, message = "qd,kd->qk"}> : () -> ()
    %cst_306 = arith.constant dense<0.000000e+00> : vector<8x8xf32>
    %387 = tpu.matmul %385, %386, %cst_306 {dimension_numbers = #tpu.dot_dimension_numbers<[1], [1], [0], [0], [0, 0, 1, 0], [], []>} : vector<8x8xbf16>, vector<8x8xbf16>, vector<8x8xf32> -> vector<8x8xf32>
    "tpu.trace_stop"() : () -> ()
    %cst_307 = arith.constant dense<0xFF800000> : vector<8xf32>
    %388 = vector.multi_reduction <maximumf>, %387, %cst_307 [1] : vector<8x8xf32> to vector<8xf32>
    %389 = vector.shape_cast %388 : vector<8xf32> to vector<8x1xf32>
    %390 = vector.broadcast %389 : vector<8x1xf32> to vector<8x8xf32>
    %391 = arith.subf %387, %390 : vector<8x8xf32>
    %392 = math.exp %391 : vector<8x8xf32>
    %cst_308 = arith.constant dense<0.000000e+00> : vector<8xf32>
    %393 = vector.multi_reduction <add>, %392, %cst_308 [1] : vector<8x8xf32> to vector<8xf32>
    %394 = vector.shape_cast %393 : vector<8xf32> to vector<8x1xf32>
    %395 = vector.broadcast %394 : vector<8x1xf32> to vector<8x8xf32>
    %396 = arith.divf %392, %395 : vector<8x8xf32>
    %397 = arith.truncf %396 : vector<8x8xf32> to vector<8x8xbf16>
    %398 = arith.truncf %384 : vector<8x8xf32> to vector<8x8xbf16>
    %cst_309 = arith.constant dense<0.000000e+00> : vector<8x8xf32>
    %399 = tpu.matmul %397, %398, %cst_309 {dimension_numbers = #tpu.dot_dimension_numbers<[1], [0], [0], [1], [0, 0, 1, 1], [], []>} : vector<8x8xbf16>, vector<8x8xbf16>, vector<8x8xf32> -> vector<8x8xf32>
    %400 = arith.truncf %399 : vector<8x8xf32> to vector<8x8xbf16>
    %c0_310 = arith.constant 0 : index
    %c3_311 = arith.constant 3 : index
    %c0_312 = arith.constant 0 : index
    %c0_313 = arith.constant 0 : index
    %401 = vector.load %arg19[%c0_310, %c3_311, %c0_312, %c0_313] : memref<2x4x8x32xbf16, #tpu.memory_space<vmem>>, vector<1x1x8x32xbf16>
    %402 = vector.shape_cast %401 : vector<1x1x8x32xbf16> to vector<8x32xbf16>
    %cst_314 = arith.constant dense<0.000000e+00> : vector<8x32xf32>
    %403 = tpu.matmul %400, %402, %cst_314 {dimension_numbers = #tpu.dot_dimension_numbers<[1], [0], [0], [1], [0, 0, 1, 1], [], []>} : vector<8x8xbf16>, vector<8x32xbf16>, vector<8x32xf32> -> vector<8x32xf32>
    %404 = arith.addf %363, %403 : vector<8x32xf32>
    %c0_315 = arith.constant 0 : index
    %c0_316 = arith.constant 0 : index
    %c0_317 = arith.constant 0 : index
    %405 = vector.load %arg20[%c0_315, %c0_316, %c0_317] : memref<2x1x32xf32, #tpu.memory_space<vmem>>, vector<1x1x32xf32>
    %406 = vector.shape_cast %405 : vector<1x1x32xf32> to vector<1x32xf32>
    %407 = vector.broadcast %406 : vector<1x32xf32> to vector<8x32xf32>
    %408 = arith.addf %404, %407 : vector<8x32xf32>
    %409 = arith.addf %1, %408 : vector<8x32xf32>
    %cst_318 = arith.constant dense<0.000000e+00> : vector<8xf32>
    %410 = vector.multi_reduction <add>, %409, %cst_318 [1] : vector<8x32xf32> to vector<8xf32>
    %411 = vector.shape_cast %410 : vector<8xf32> to vector<8x1xf32>
    %cst_319 = arith.constant 3.200000e+01 : f32
    %412 = vector.broadcast %cst_319 : f32 to vector<8x1xf32>
    %413 = arith.divf %411, %412 : vector<8x1xf32>
    %414 = vector.broadcast %413 : vector<8x1xf32> to vector<8x32xf32>
    %415 = arith.subf %409, %414 : vector<8x32xf32>
    %416 = arith.mulf %415, %415 : vector<8x32xf32>
    %cst_320 = arith.constant dense<0.000000e+00> : vector<8xf32>
    %417 = vector.multi_reduction <add>, %416, %cst_320 [1] : vector<8x32xf32> to vector<8xf32>
    %418 = vector.shape_cast %417 : vector<8xf32> to vector<8x1xf32>
    %cst_321 = arith.constant 3.200000e+01 : f32
    %419 = vector.broadcast %cst_321 : f32 to vector<8x1xf32>
    %420 = arith.divf %418, %419 : vector<8x1xf32>
    %421 = vector.broadcast %413 : vector<8x1xf32> to vector<8x32xf32>
    %422 = arith.subf %409, %421 : vector<8x32xf32>
    %cst_322 = arith.constant 9.99999974E-6 : f32
    %423 = vector.broadcast %cst_322 : f32 to vector<8x1xf32>
    %424 = arith.addf %420, %423 : vector<8x1xf32>
    %425 = math.rsqrt %424 : vector<8x1xf32>
    %426 = vector.broadcast %425 : vector<8x1xf32> to vector<8x32xf32>
    %427 = arith.mulf %422, %426 : vector<8x32xf32>
    %428 = arith.truncf %427 : vector<8x32xf32> to vector<8x32xbf16>
    %c0_323 = arith.constant 0 : index
    %c0_324 = arith.constant 0 : index
    %c0_325 = arith.constant 0 : index
    %429 = vector.load %arg21[%c0_323, %c0_324, %c0_325] : memref<2x32x128xbf16, #tpu.memory_space<vmem>>, vector<1x32x128xbf16>
    %430 = vector.shape_cast %429 : vector<1x32x128xbf16> to vector<32x128xbf16>
    %cst_326 = arith.constant dense<0.000000e+00> : vector<8x128xf32>
    %431 = tpu.matmul %428, %430, %cst_326 {dimension_numbers = #tpu.dot_dimension_numbers<[1], [0], [0], [1], [0, 0, 1, 1], [], []>} : vector<8x32xbf16>, vector<32x128xbf16>, vector<8x128xf32> -> vector<8x128xf32>
    %c0_327 = arith.constant 0 : index
    %c0_328 = arith.constant 0 : index
    %c0_329 = arith.constant 0 : index
    %432 = vector.load %arg22[%c0_327, %c0_328, %c0_329] : memref<2x1x128xf32, #tpu.memory_space<vmem>>, vector<1x1x128xf32>
    %433 = vector.shape_cast %432 : vector<1x1x128xf32> to vector<1x128xf32>
    %434 = vector.broadcast %433 : vector<1x128xf32> to vector<8x128xf32>
    %435 = arith.addf %431, %434 : vector<8x128xf32>
    %436 = arith.mulf %435, %435 : vector<8x128xf32>
    %437 = arith.mulf %435, %436 : vector<8x128xf32>
    %cst_330 = arith.constant 4.471500e-02 : f32
    %438 = vector.broadcast %cst_330 : f32 to vector<8x128xf32>
    %439 = arith.mulf %438, %437 : vector<8x128xf32>
    %440 = arith.addf %435, %439 : vector<8x128xf32>
    %cst_331 = arith.constant 0.797884583 : f32
    %441 = vector.broadcast %cst_331 : f32 to vector<8x128xf32>
    %442 = arith.mulf %441, %440 : vector<8x128xf32>
    %443 = math.tanh %442 : vector<8x128xf32>
    %cst_332 = arith.constant 1.000000e+00 : f32
    %444 = vector.broadcast %cst_332 : f32 to vector<8x128xf32>
    %445 = arith.addf %444, %443 : vector<8x128xf32>
    %cst_333 = arith.constant 5.000000e-01 : f32
    %446 = vector.broadcast %cst_333 : f32 to vector<8x128xf32>
    %447 = arith.mulf %446, %445 : vector<8x128xf32>
    %448 = arith.mulf %435, %447 : vector<8x128xf32>
    %449 = arith.truncf %448 : vector<8x128xf32> to vector<8x128xbf16>
    %c0_334 = arith.constant 0 : index
    %c0_335 = arith.constant 0 : index
    %c0_336 = arith.constant 0 : index
    %450 = vector.load %arg23[%c0_334, %c0_335, %c0_336] : memref<2x128x32xbf16, #tpu.memory_space<vmem>>, vector<1x128x32xbf16>
    %451 = vector.shape_cast %450 : vector<1x128x32xbf16> to vector<128x32xbf16>
    %cst_337 = arith.constant dense<0.000000e+00> : vector<8x32xf32>
    %452 = tpu.matmul %449, %451, %cst_337 {dimension_numbers = #tpu.dot_dimension_numbers<[1], [0], [0], [1], [0, 0, 1, 1], [], []>} : vector<8x128xbf16>, vector<128x32xbf16>, vector<8x32xf32> -> vector<8x32xf32>
    %453 = arith.addf %409, %452 : vector<8x32xf32>
    %c0_338 = arith.constant 0 : index
    %c0_339 = arith.constant 0 : index
    %c0_340 = arith.constant 0 : index
    %454 = vector.load %arg24[%c0_338, %c0_339, %c0_340] : memref<2x1x32xf32, #tpu.memory_space<vmem>>, vector<1x1x32xf32>
    %455 = vector.shape_cast %454 : vector<1x1x32xf32> to vector<1x32xf32>
    %456 = vector.broadcast %455 : vector<1x32xf32> to vector<8x32xf32>
    %457 = arith.addf %453, %456 : vector<8x32xf32>
    %cst_341 = arith.constant dense<0.000000e+00> : vector<8xf32>
    %458 = vector.multi_reduction <add>, %457, %cst_341 [1] : vector<8x32xf32> to vector<8xf32>
    %459 = vector.shape_cast %458 : vector<8xf32> to vector<8x1xf32>
    %cst_342 = arith.constant 3.200000e+01 : f32
    %460 = vector.broadcast %cst_342 : f32 to vector<8x1xf32>
    %461 = arith.divf %459, %460 : vector<8x1xf32>
    %462 = vector.broadcast %461 : vector<8x1xf32> to vector<8x32xf32>
    %463 = arith.subf %457, %462 : vector<8x32xf32>
    %464 = arith.mulf %463, %463 : vector<8x32xf32>
    %cst_343 = arith.constant dense<0.000000e+00> : vector<8xf32>
    %465 = vector.multi_reduction <add>, %464, %cst_343 [1] : vector<8x32xf32> to vector<8xf32>
    %466 = vector.shape_cast %465 : vector<8xf32> to vector<8x1xf32>
    %cst_344 = arith.constant 3.200000e+01 : f32
    %467 = vector.broadcast %cst_344 : f32 to vector<8x1xf32>
    %468 = arith.divf %466, %467 : vector<8x1xf32>
    %469 = vector.broadcast %461 : vector<8x1xf32> to vector<8x32xf32>
    %470 = arith.subf %457, %469 : vector<8x32xf32>
    %cst_345 = arith.constant 9.99999974E-6 : f32
    %471 = vector.broadcast %cst_345 : f32 to vector<8x1xf32>
    %472 = arith.addf %468, %471 : vector<8x1xf32>
    %473 = math.rsqrt %472 : vector<8x1xf32>
    %474 = vector.broadcast %473 : vector<8x1xf32> to vector<8x32xf32>
    %475 = arith.mulf %470, %474 : vector<8x32xf32>
    %476 = arith.truncf %475 : vector<8x32xf32> to vector<8x32xbf16>
    %c1_346 = arith.constant 1 : index
    %c0_347 = arith.constant 0 : index
    %c0_348 = arith.constant 0 : index
    %477 = vector.load %arg4[%c1_346, %c0_347, %c0_348] : memref<3x2x32xf32, #tpu.memory_space<vmem>>, vector<1x2x32xf32>
    %478 = vector.shape_cast %477 : vector<1x2x32xf32> to vector<2x32xf32>
    %cst_349 = arith.constant dense<0.000000e+00> : vector<8xf32>
    %479 = vector.multi_reduction <add>, %239, %cst_349 [1] : vector<8x32xf32> to vector<8xf32>
    %480 = vector.shape_cast %479 : vector<8xf32> to vector<8x1xf32>
    %cst_350 = arith.constant 3.200000e+01 : f32
    %481 = vector.broadcast %cst_350 : f32 to vector<8x1xf32>
    %482 = arith.divf %480, %481 : vector<8x1xf32>
    %483 = vector.broadcast %482 : vector<8x1xf32> to vector<8x32xf32>
    %484 = arith.subf %239, %483 : vector<8x32xf32>
    %485 = arith.mulf %484, %484 : vector<8x32xf32>
    %cst_351 = arith.constant dense<0.000000e+00> : vector<8xf32>
    %486 = vector.multi_reduction <add>, %485, %cst_351 [1] : vector<8x32xf32> to vector<8xf32>
    %487 = vector.shape_cast %486 : vector<8xf32> to vector<8x1xf32>
    %cst_352 = arith.constant 3.200000e+01 : f32
    %488 = vector.broadcast %cst_352 : f32 to vector<8x1xf32>
    %489 = arith.divf %487, %488 : vector<8x1xf32>
    %490 = vector.broadcast %482 : vector<8x1xf32> to vector<8x32xf32>
    %491 = arith.subf %239, %490 : vector<8x32xf32>
    %cst_353 = arith.constant 9.99999974E-6 : f32
    %492 = vector.broadcast %cst_353 : f32 to vector<8x1xf32>
    %493 = arith.addf %489, %492 : vector<8x1xf32>
    %494 = math.rsqrt %493 : vector<8x1xf32>
    %495 = vector.broadcast %494 : vector<8x1xf32> to vector<8x32xf32>
    %496 = arith.mulf %491, %495 : vector<8x32xf32>
    %497 = vector.extract_strided_slice %478 {offsets = [0, 0], sizes = [1, 32], strides = [1, 1]} : vector<2x32xf32> to vector<1x32xf32>
    %498 = vector.broadcast %497 : vector<1x32xf32> to vector<8x32xf32>
    %499 = arith.mulf %496, %498 : vector<8x32xf32>
    %500 = vector.extract_strided_slice %478 {offsets = [1, 0], sizes = [1, 32], strides = [1, 1]} : vector<2x32xf32> to vector<1x32xf32>
    %501 = vector.broadcast %500 : vector<1x32xf32> to vector<8x32xf32>
    %502 = arith.addf %499, %501 : vector<8x32xf32>
    %cst_354 = arith.constant 0.000000e+00 : f32
    %503 = vector.broadcast %cst_354 : f32 to vector<8x32xf32>
    %c1_355 = arith.constant 1 : index
    %c0_356 = arith.constant 0 : index
    %c0_357 = arith.constant 0 : index
    %c0_358 = arith.constant 0 : index
    %504 = vector.load %arg5[%c1_355, %c0_356, %c0_357, %c0_358] : memref<3x4x32x8xbf16, #tpu.memory_space<vmem>>, vector<1x1x32x8xbf16>
    %505 = vector.shape_cast %504 : vector<1x1x32x8xbf16> to vector<32x8xbf16>
    %cst_359 = arith.constant dense<0.000000e+00> : vector<8x8xf32>
    %506 = tpu.matmul %476, %505, %cst_359 {dimension_numbers = #tpu.dot_dimension_numbers<[1], [0], [0], [1], [0, 0, 1, 1], [], []>} : vector<8x32xbf16>, vector<32x8xbf16>, vector<8x8xf32> -> vector<8x8xf32>
    %c1_360 = arith.constant 1 : index
    %c0_361 = arith.constant 0 : index
    %c0_362 = arith.constant 0 : index
    %c0_363 = arith.constant 0 : index
    %507 = vector.load %arg6[%c1_360, %c0_361, %c0_362, %c0_363] : memref<3x4x1x8xf32, #tpu.memory_space<vmem>>, vector<1x1x1x8xf32>
    %508 = vector.shape_cast %507 : vector<1x1x1x8xf32> to vector<1x8xf32>
    %509 = vector.broadcast %508 : vector<1x8xf32> to vector<8x8xf32>
    %510 = arith.addf %506, %509 : vector<8x8xf32>
    %c1_364 = arith.constant 1 : index
    %c0_365 = arith.constant 0 : index
    %c0_366 = arith.constant 0 : index
    %c0_367 = arith.constant 0 : index
    %511 = vector.load %arg7[%c1_364, %c0_365, %c0_366, %c0_367] : memref<3x4x32x8xbf16, #tpu.memory_space<vmem>>, vector<1x1x32x8xbf16>
    %512 = vector.shape_cast %511 : vector<1x1x32x8xbf16> to vector<32x8xbf16>
    %cst_368 = arith.constant dense<0.000000e+00> : vector<8x8xf32>
    %513 = tpu.matmul %24, %512, %cst_368 {dimension_numbers = #tpu.dot_dimension_numbers<[1], [0], [0], [1], [0, 0, 1, 1], [], []>} : vector<8x32xbf16>, vector<32x8xbf16>, vector<8x8xf32> -> vector<8x8xf32>
    %c1_369 = arith.constant 1 : index
    %c0_370 = arith.constant 0 : index
    %c0_371 = arith.constant 0 : index
    %c0_372 = arith.constant 0 : index
    %514 = vector.load %arg8[%c1_369, %c0_370, %c0_371, %c0_372] : memref<3x4x1x8xf32, #tpu.memory_space<vmem>>, vector<1x1x1x8xf32>
    %515 = vector.shape_cast %514 : vector<1x1x1x8xf32> to vector<1x8xf32>
    %516 = vector.broadcast %515 : vector<1x8xf32> to vector<8x8xf32>
    %517 = arith.addf %513, %516 : vector<8x8xf32>
    %c1_373 = arith.constant 1 : index
    %c0_374 = arith.constant 0 : index
    %c0_375 = arith.constant 0 : index
    %c0_376 = arith.constant 0 : index
    %518 = vector.load %arg9[%c1_373, %c0_374, %c0_375, %c0_376] : memref<3x4x32x8xbf16, #tpu.memory_space<vmem>>, vector<1x1x32x8xbf16>
    %519 = vector.shape_cast %518 : vector<1x1x32x8xbf16> to vector<32x8xbf16>
    %cst_377 = arith.constant dense<0.000000e+00> : vector<8x8xf32>
    %520 = tpu.matmul %24, %519, %cst_377 {dimension_numbers = #tpu.dot_dimension_numbers<[1], [0], [0], [1], [0, 0, 1, 1], [], []>} : vector<8x32xbf16>, vector<32x8xbf16>, vector<8x8xf32> -> vector<8x8xf32>
    %c1_378 = arith.constant 1 : index
    %c0_379 = arith.constant 0 : index
    %c0_380 = arith.constant 0 : index
    %c0_381 = arith.constant 0 : index
    %521 = vector.load %arg10[%c1_378, %c0_379, %c0_380, %c0_381] : memref<3x4x1x8xf32, #tpu.memory_space<vmem>>, vector<1x1x1x8xf32>
    %522 = vector.shape_cast %521 : vector<1x1x1x8xf32> to vector<1x8xf32>
    %523 = vector.broadcast %522 : vector<1x8xf32> to vector<8x8xf32>
    %524 = arith.addf %520, %523 : vector<8x8xf32>
    %525 = arith.truncf %510 : vector<8x8xf32> to vector<8x8xbf16>
    %526 = arith.truncf %517 : vector<8x8xf32> to vector<8x8xbf16>
    "tpu.trace_start"() <{level = 10 : i32, message = "qd,kd->qk"}> : () -> ()
    %cst_382 = arith.constant dense<0.000000e+00> : vector<8x8xf32>
    %527 = tpu.matmul %525, %526, %cst_382 {dimension_numbers = #tpu.dot_dimension_numbers<[1], [1], [0], [0], [0, 0, 1, 0], [], []>} : vector<8x8xbf16>, vector<8x8xbf16>, vector<8x8xf32> -> vector<8x8xf32>
    "tpu.trace_stop"() : () -> ()
    %cst_383 = arith.constant dense<0xFF800000> : vector<8xf32>
    %528 = vector.multi_reduction <maximumf>, %527, %cst_383 [1] : vector<8x8xf32> to vector<8xf32>
    %529 = vector.shape_cast %528 : vector<8xf32> to vector<8x1xf32>
    %530 = vector.broadcast %529 : vector<8x1xf32> to vector<8x8xf32>
    %531 = arith.subf %527, %530 : vector<8x8xf32>
    %532 = math.exp %531 : vector<8x8xf32>
    %cst_384 = arith.constant dense<0.000000e+00> : vector<8xf32>
    %533 = vector.multi_reduction <add>, %532, %cst_384 [1] : vector<8x8xf32> to vector<8xf32>
    %534 = vector.shape_cast %533 : vector<8xf32> to vector<8x1xf32>
    %535 = vector.broadcast %534 : vector<8x1xf32> to vector<8x8xf32>
    %536 = arith.divf %532, %535 : vector<8x8xf32>
    %537 = arith.truncf %536 : vector<8x8xf32> to vector<8x8xbf16>
    %538 = arith.truncf %524 : vector<8x8xf32> to vector<8x8xbf16>
    %cst_385 = arith.constant dense<0.000000e+00> : vector<8x8xf32>
    %539 = tpu.matmul %537, %538, %cst_385 {dimension_numbers = #tpu.dot_dimension_numbers<[1], [0], [0], [1], [0, 0, 1, 1], [], []>} : vector<8x8xbf16>, vector<8x8xbf16>, vector<8x8xf32> -> vector<8x8xf32>
    %540 = arith.truncf %539 : vector<8x8xf32> to vector<8x8xbf16>
    %c1_386 = arith.constant 1 : index
    %c0_387 = arith.constant 0 : index
    %c0_388 = arith.constant 0 : index
    %c0_389 = arith.constant 0 : index
    %541 = vector.load %arg11[%c1_386, %c0_387, %c0_388, %c0_389] : memref<3x4x8x32xbf16, #tpu.memory_space<vmem>>, vector<1x1x8x32xbf16>
    %542 = vector.shape_cast %541 : vector<1x1x8x32xbf16> to vector<8x32xbf16>
    %cst_390 = arith.constant dense<0.000000e+00> : vector<8x32xf32>
    %543 = tpu.matmul %540, %542, %cst_390 {dimension_numbers = #tpu.dot_dimension_numbers<[1], [0], [0], [1], [0, 0, 1, 1], [], []>} : vector<8x8xbf16>, vector<8x32xbf16>, vector<8x32xf32> -> vector<8x32xf32>
    %544 = arith.addf %503, %543 : vector<8x32xf32>
    %c1_391 = arith.constant 1 : index
    %c1_392 = arith.constant 1 : index
    %c0_393 = arith.constant 0 : index
    %c0_394 = arith.constant 0 : index
    %545 = vector.load %arg5[%c1_391, %c1_392, %c0_393, %c0_394] : memref<3x4x32x8xbf16, #tpu.memory_space<vmem>>, vector<1x1x32x8xbf16>
    %546 = vector.shape_cast %545 : vector<1x1x32x8xbf16> to vector<32x8xbf16>
    %cst_395 = arith.constant dense<0.000000e+00> : vector<8x8xf32>
    %547 = tpu.matmul %476, %546, %cst_395 {dimension_numbers = #tpu.dot_dimension_numbers<[1], [0], [0], [1], [0, 0, 1, 1], [], []>} : vector<8x32xbf16>, vector<32x8xbf16>, vector<8x8xf32> -> vector<8x8xf32>
    %c1_396 = arith.constant 1 : index
    %c1_397 = arith.constant 1 : index
    %c0_398 = arith.constant 0 : index
    %c0_399 = arith.constant 0 : index
    %548 = vector.load %arg6[%c1_396, %c1_397, %c0_398, %c0_399] : memref<3x4x1x8xf32, #tpu.memory_space<vmem>>, vector<1x1x1x8xf32>
    %549 = vector.shape_cast %548 : vector<1x1x1x8xf32> to vector<1x8xf32>
    %550 = vector.broadcast %549 : vector<1x8xf32> to vector<8x8xf32>
    %551 = arith.addf %547, %550 : vector<8x8xf32>
    %c1_400 = arith.constant 1 : index
    %c1_401 = arith.constant 1 : index
    %c0_402 = arith.constant 0 : index
    %c0_403 = arith.constant 0 : index
    %552 = vector.load %arg7[%c1_400, %c1_401, %c0_402, %c0_403] : memref<3x4x32x8xbf16, #tpu.memory_space<vmem>>, vector<1x1x32x8xbf16>
    %553 = vector.shape_cast %552 : vector<1x1x32x8xbf16> to vector<32x8xbf16>
    %cst_404 = arith.constant dense<0.000000e+00> : vector<8x8xf32>
    %554 = tpu.matmul %24, %553, %cst_404 {dimension_numbers = #tpu.dot_dimension_numbers<[1], [0], [0], [1], [0, 0, 1, 1], [], []>} : vector<8x32xbf16>, vector<32x8xbf16>, vector<8x8xf32> -> vector<8x8xf32>
    %c1_405 = arith.constant 1 : index
    %c1_406 = arith.constant 1 : index
    %c0_407 = arith.constant 0 : index
    %c0_408 = arith.constant 0 : index
    %555 = vector.load %arg8[%c1_405, %c1_406, %c0_407, %c0_408] : memref<3x4x1x8xf32, #tpu.memory_space<vmem>>, vector<1x1x1x8xf32>
    %556 = vector.shape_cast %555 : vector<1x1x1x8xf32> to vector<1x8xf32>
    %557 = vector.broadcast %556 : vector<1x8xf32> to vector<8x8xf32>
    %558 = arith.addf %554, %557 : vector<8x8xf32>
    %c1_409 = arith.constant 1 : index
    %c1_410 = arith.constant 1 : index
    %c0_411 = arith.constant 0 : index
    %c0_412 = arith.constant 0 : index
    %559 = vector.load %arg9[%c1_409, %c1_410, %c0_411, %c0_412] : memref<3x4x32x8xbf16, #tpu.memory_space<vmem>>, vector<1x1x32x8xbf16>
    %560 = vector.shape_cast %559 : vector<1x1x32x8xbf16> to vector<32x8xbf16>
    %cst_413 = arith.constant dense<0.000000e+00> : vector<8x8xf32>
    %561 = tpu.matmul %24, %560, %cst_413 {dimension_numbers = #tpu.dot_dimension_numbers<[1], [0], [0], [1], [0, 0, 1, 1], [], []>} : vector<8x32xbf16>, vector<32x8xbf16>, vector<8x8xf32> -> vector<8x8xf32>
    %c1_414 = arith.constant 1 : index
    %c1_415 = arith.constant 1 : index
    %c0_416 = arith.constant 0 : index
    %c0_417 = arith.constant 0 : index
    %562 = vector.load %arg10[%c1_414, %c1_415, %c0_416, %c0_417] : memref<3x4x1x8xf32, #tpu.memory_space<vmem>>, vector<1x1x1x8xf32>
    %563 = vector.shape_cast %562 : vector<1x1x1x8xf32> to vector<1x8xf32>
    %564 = vector.broadcast %563 : vector<1x8xf32> to vector<8x8xf32>
    %565 = arith.addf %561, %564 : vector<8x8xf32>
    %566 = arith.truncf %551 : vector<8x8xf32> to vector<8x8xbf16>
    %567 = arith.truncf %558 : vector<8x8xf32> to vector<8x8xbf16>
    "tpu.trace_start"() <{level = 10 : i32, message = "qd,kd->qk"}> : () -> ()
    %cst_418 = arith.constant dense<0.000000e+00> : vector<8x8xf32>
    %568 = tpu.matmul %566, %567, %cst_418 {dimension_numbers = #tpu.dot_dimension_numbers<[1], [1], [0], [0], [0, 0, 1, 0], [], []>} : vector<8x8xbf16>, vector<8x8xbf16>, vector<8x8xf32> -> vector<8x8xf32>
    "tpu.trace_stop"() : () -> ()
    %cst_419 = arith.constant dense<0xFF800000> : vector<8xf32>
    %569 = vector.multi_reduction <maximumf>, %568, %cst_419 [1] : vector<8x8xf32> to vector<8xf32>
    %570 = vector.shape_cast %569 : vector<8xf32> to vector<8x1xf32>
    %571 = vector.broadcast %570 : vector<8x1xf32> to vector<8x8xf32>
    %572 = arith.subf %568, %571 : vector<8x8xf32>
    %573 = math.exp %572 : vector<8x8xf32>
    %cst_420 = arith.constant dense<0.000000e+00> : vector<8xf32>
    %574 = vector.multi_reduction <add>, %573, %cst_420 [1] : vector<8x8xf32> to vector<8xf32>
    %575 = vector.shape_cast %574 : vector<8xf32> to vector<8x1xf32>
    %576 = vector.broadcast %575 : vector<8x1xf32> to vector<8x8xf32>
    %577 = arith.divf %573, %576 : vector<8x8xf32>
    %578 = arith.truncf %577 : vector<8x8xf32> to vector<8x8xbf16>
    %579 = arith.truncf %565 : vector<8x8xf32> to vector<8x8xbf16>
    %cst_421 = arith.constant dense<0.000000e+00> : vector<8x8xf32>
    %580 = tpu.matmul %578, %579, %cst_421 {dimension_numbers = #tpu.dot_dimension_numbers<[1], [0], [0], [1], [0, 0, 1, 1], [], []>} : vector<8x8xbf16>, vector<8x8xbf16>, vector<8x8xf32> -> vector<8x8xf32>
    %581 = arith.truncf %580 : vector<8x8xf32> to vector<8x8xbf16>
    %c1_422 = arith.constant 1 : index
    %c1_423 = arith.constant 1 : index
    %c0_424 = arith.constant 0 : index
    %c0_425 = arith.constant 0 : index
    %582 = vector.load %arg11[%c1_422, %c1_423, %c0_424, %c0_425] : memref<3x4x8x32xbf16, #tpu.memory_space<vmem>>, vector<1x1x8x32xbf16>
    %583 = vector.shape_cast %582 : vector<1x1x8x32xbf16> to vector<8x32xbf16>
    %cst_426 = arith.constant dense<0.000000e+00> : vector<8x32xf32>
    %584 = tpu.matmul %581, %583, %cst_426 {dimension_numbers = #tpu.dot_dimension_numbers<[1], [0], [0], [1], [0, 0, 1, 1], [], []>} : vector<8x8xbf16>, vector<8x32xbf16>, vector<8x32xf32> -> vector<8x32xf32>
    %585 = arith.addf %544, %584 : vector<8x32xf32>
    %c1_427 = arith.constant 1 : index
    %c2_428 = arith.constant 2 : index
    %c0_429 = arith.constant 0 : index
    %c0_430 = arith.constant 0 : index
    %586 = vector.load %arg5[%c1_427, %c2_428, %c0_429, %c0_430] : memref<3x4x32x8xbf16, #tpu.memory_space<vmem>>, vector<1x1x32x8xbf16>
    %587 = vector.shape_cast %586 : vector<1x1x32x8xbf16> to vector<32x8xbf16>
    %cst_431 = arith.constant dense<0.000000e+00> : vector<8x8xf32>
    %588 = tpu.matmul %476, %587, %cst_431 {dimension_numbers = #tpu.dot_dimension_numbers<[1], [0], [0], [1], [0, 0, 1, 1], [], []>} : vector<8x32xbf16>, vector<32x8xbf16>, vector<8x8xf32> -> vector<8x8xf32>
    %c1_432 = arith.constant 1 : index
    %c2_433 = arith.constant 2 : index
    %c0_434 = arith.constant 0 : index
    %c0_435 = arith.constant 0 : index
    %589 = vector.load %arg6[%c1_432, %c2_433, %c0_434, %c0_435] : memref<3x4x1x8xf32, #tpu.memory_space<vmem>>, vector<1x1x1x8xf32>
    %590 = vector.shape_cast %589 : vector<1x1x1x8xf32> to vector<1x8xf32>
    %591 = vector.broadcast %590 : vector<1x8xf32> to vector<8x8xf32>
    %592 = arith.addf %588, %591 : vector<8x8xf32>
    %c1_436 = arith.constant 1 : index
    %c2_437 = arith.constant 2 : index
    %c0_438 = arith.constant 0 : index
    %c0_439 = arith.constant 0 : index
    %593 = vector.load %arg7[%c1_436, %c2_437, %c0_438, %c0_439] : memref<3x4x32x8xbf16, #tpu.memory_space<vmem>>, vector<1x1x32x8xbf16>
    %594 = vector.shape_cast %593 : vector<1x1x32x8xbf16> to vector<32x8xbf16>
    %cst_440 = arith.constant dense<0.000000e+00> : vector<8x8xf32>
    %595 = tpu.matmul %24, %594, %cst_440 {dimension_numbers = #tpu.dot_dimension_numbers<[1], [0], [0], [1], [0, 0, 1, 1], [], []>} : vector<8x32xbf16>, vector<32x8xbf16>, vector<8x8xf32> -> vector<8x8xf32>
    %c1_441 = arith.constant 1 : index
    %c2_442 = arith.constant 2 : index
    %c0_443 = arith.constant 0 : index
    %c0_444 = arith.constant 0 : index
    %596 = vector.load %arg8[%c1_441, %c2_442, %c0_443, %c0_444] : memref<3x4x1x8xf32, #tpu.memory_space<vmem>>, vector<1x1x1x8xf32>
    %597 = vector.shape_cast %596 : vector<1x1x1x8xf32> to vector<1x8xf32>
    %598 = vector.broadcast %597 : vector<1x8xf32> to vector<8x8xf32>
    %599 = arith.addf %595, %598 : vector<8x8xf32>
    %c1_445 = arith.constant 1 : index
    %c2_446 = arith.constant 2 : index
    %c0_447 = arith.constant 0 : index
    %c0_448 = arith.constant 0 : index
    %600 = vector.load %arg9[%c1_445, %c2_446, %c0_447, %c0_448] : memref<3x4x32x8xbf16, #tpu.memory_space<vmem>>, vector<1x1x32x8xbf16>
    %601 = vector.shape_cast %600 : vector<1x1x32x8xbf16> to vector<32x8xbf16>
    %cst_449 = arith.constant dense<0.000000e+00> : vector<8x8xf32>
    %602 = tpu.matmul %24, %601, %cst_449 {dimension_numbers = #tpu.dot_dimension_numbers<[1], [0], [0], [1], [0, 0, 1, 1], [], []>} : vector<8x32xbf16>, vector<32x8xbf16>, vector<8x8xf32> -> vector<8x8xf32>
    %c1_450 = arith.constant 1 : index
    %c2_451 = arith.constant 2 : index
    %c0_452 = arith.constant 0 : index
    %c0_453 = arith.constant 0 : index
    %603 = vector.load %arg10[%c1_450, %c2_451, %c0_452, %c0_453] : memref<3x4x1x8xf32, #tpu.memory_space<vmem>>, vector<1x1x1x8xf32>
    %604 = vector.shape_cast %603 : vector<1x1x1x8xf32> to vector<1x8xf32>
    %605 = vector.broadcast %604 : vector<1x8xf32> to vector<8x8xf32>
    %606 = arith.addf %602, %605 : vector<8x8xf32>
    %607 = arith.truncf %592 : vector<8x8xf32> to vector<8x8xbf16>
    %608 = arith.truncf %599 : vector<8x8xf32> to vector<8x8xbf16>
    "tpu.trace_start"() <{level = 10 : i32, message = "qd,kd->qk"}> : () -> ()
    %cst_454 = arith.constant dense<0.000000e+00> : vector<8x8xf32>
    %609 = tpu.matmul %607, %608, %cst_454 {dimension_numbers = #tpu.dot_dimension_numbers<[1], [1], [0], [0], [0, 0, 1, 0], [], []>} : vector<8x8xbf16>, vector<8x8xbf16>, vector<8x8xf32> -> vector<8x8xf32>
    "tpu.trace_stop"() : () -> ()
    %cst_455 = arith.constant dense<0xFF800000> : vector<8xf32>
    %610 = vector.multi_reduction <maximumf>, %609, %cst_455 [1] : vector<8x8xf32> to vector<8xf32>
    %611 = vector.shape_cast %610 : vector<8xf32> to vector<8x1xf32>
    %612 = vector.broadcast %611 : vector<8x1xf32> to vector<8x8xf32>
    %613 = arith.subf %609, %612 : vector<8x8xf32>
    %614 = math.exp %613 : vector<8x8xf32>
    %cst_456 = arith.constant dense<0.000000e+00> : vector<8xf32>
    %615 = vector.multi_reduction <add>, %614, %cst_456 [1] : vector<8x8xf32> to vector<8xf32>
    %616 = vector.shape_cast %615 : vector<8xf32> to vector<8x1xf32>
    %617 = vector.broadcast %616 : vector<8x1xf32> to vector<8x8xf32>
    %618 = arith.divf %614, %617 : vector<8x8xf32>
    %619 = arith.truncf %618 : vector<8x8xf32> to vector<8x8xbf16>
    %620 = arith.truncf %606 : vector<8x8xf32> to vector<8x8xbf16>
    %cst_457 = arith.constant dense<0.000000e+00> : vector<8x8xf32>
    %621 = tpu.matmul %619, %620, %cst_457 {dimension_numbers = #tpu.dot_dimension_numbers<[1], [0], [0], [1], [0, 0, 1, 1], [], []>} : vector<8x8xbf16>, vector<8x8xbf16>, vector<8x8xf32> -> vector<8x8xf32>
    %622 = arith.truncf %621 : vector<8x8xf32> to vector<8x8xbf16>
    %c1_458 = arith.constant 1 : index
    %c2_459 = arith.constant 2 : index
    %c0_460 = arith.constant 0 : index
    %c0_461 = arith.constant 0 : index
    %623 = vector.load %arg11[%c1_458, %c2_459, %c0_460, %c0_461] : memref<3x4x8x32xbf16, #tpu.memory_space<vmem>>, vector<1x1x8x32xbf16>
    %624 = vector.shape_cast %623 : vector<1x1x8x32xbf16> to vector<8x32xbf16>
    %cst_462 = arith.constant dense<0.000000e+00> : vector<8x32xf32>
    %625 = tpu.matmul %622, %624, %cst_462 {dimension_numbers = #tpu.dot_dimension_numbers<[1], [0], [0], [1], [0, 0, 1, 1], [], []>} : vector<8x8xbf16>, vector<8x32xbf16>, vector<8x32xf32> -> vector<8x32xf32>
    %626 = arith.addf %585, %625 : vector<8x32xf32>
    %c1_463 = arith.constant 1 : index
    %c3_464 = arith.constant 3 : index
    %c0_465 = arith.constant 0 : index
    %c0_466 = arith.constant 0 : index
    %627 = vector.load %arg5[%c1_463, %c3_464, %c0_465, %c0_466] : memref<3x4x32x8xbf16, #tpu.memory_space<vmem>>, vector<1x1x32x8xbf16>
    %628 = vector.shape_cast %627 : vector<1x1x32x8xbf16> to vector<32x8xbf16>
    %cst_467 = arith.constant dense<0.000000e+00> : vector<8x8xf32>
    %629 = tpu.matmul %476, %628, %cst_467 {dimension_numbers = #tpu.dot_dimension_numbers<[1], [0], [0], [1], [0, 0, 1, 1], [], []>} : vector<8x32xbf16>, vector<32x8xbf16>, vector<8x8xf32> -> vector<8x8xf32>
    %c1_468 = arith.constant 1 : index
    %c3_469 = arith.constant 3 : index
    %c0_470 = arith.constant 0 : index
    %c0_471 = arith.constant 0 : index
    %630 = vector.load %arg6[%c1_468, %c3_469, %c0_470, %c0_471] : memref<3x4x1x8xf32, #tpu.memory_space<vmem>>, vector<1x1x1x8xf32>
    %631 = vector.shape_cast %630 : vector<1x1x1x8xf32> to vector<1x8xf32>
    %632 = vector.broadcast %631 : vector<1x8xf32> to vector<8x8xf32>
    %633 = arith.addf %629, %632 : vector<8x8xf32>
    %c1_472 = arith.constant 1 : index
    %c3_473 = arith.constant 3 : index
    %c0_474 = arith.constant 0 : index
    %c0_475 = arith.constant 0 : index
    %634 = vector.load %arg7[%c1_472, %c3_473, %c0_474, %c0_475] : memref<3x4x32x8xbf16, #tpu.memory_space<vmem>>, vector<1x1x32x8xbf16>
    %635 = vector.shape_cast %634 : vector<1x1x32x8xbf16> to vector<32x8xbf16>
    %cst_476 = arith.constant dense<0.000000e+00> : vector<8x8xf32>
    %636 = tpu.matmul %24, %635, %cst_476 {dimension_numbers = #tpu.dot_dimension_numbers<[1], [0], [0], [1], [0, 0, 1, 1], [], []>} : vector<8x32xbf16>, vector<32x8xbf16>, vector<8x8xf32> -> vector<8x8xf32>
    %c1_477 = arith.constant 1 : index
    %c3_478 = arith.constant 3 : index
    %c0_479 = arith.constant 0 : index
    %c0_480 = arith.constant 0 : index
    %637 = vector.load %arg8[%c1_477, %c3_478, %c0_479, %c0_480] : memref<3x4x1x8xf32, #tpu.memory_space<vmem>>, vector<1x1x1x8xf32>
    %638 = vector.shape_cast %637 : vector<1x1x1x8xf32> to vector<1x8xf32>
    %639 = vector.broadcast %638 : vector<1x8xf32> to vector<8x8xf32>
    %640 = arith.addf %636, %639 : vector<8x8xf32>
    %c1_481 = arith.constant 1 : index
    %c3_482 = arith.constant 3 : index
    %c0_483 = arith.constant 0 : index
    %c0_484 = arith.constant 0 : index
    %641 = vector.load %arg9[%c1_481, %c3_482, %c0_483, %c0_484] : memref<3x4x32x8xbf16, #tpu.memory_space<vmem>>, vector<1x1x32x8xbf16>
    %642 = vector.shape_cast %641 : vector<1x1x32x8xbf16> to vector<32x8xbf16>
    %cst_485 = arith.constant dense<0.000000e+00> : vector<8x8xf32>
    %643 = tpu.matmul %24, %642, %cst_485 {dimension_numbers = #tpu.dot_dimension_numbers<[1], [0], [0], [1], [0, 0, 1, 1], [], []>} : vector<8x32xbf16>, vector<32x8xbf16>, vector<8x8xf32> -> vector<8x8xf32>
    %c1_486 = arith.constant 1 : index
    %c3_487 = arith.constant 3 : index
    %c0_488 = arith.constant 0 : index
    %c0_489 = arith.constant 0 : index
    %644 = vector.load %arg10[%c1_486, %c3_487, %c0_488, %c0_489] : memref<3x4x1x8xf32, #tpu.memory_space<vmem>>, vector<1x1x1x8xf32>
    %645 = vector.shape_cast %644 : vector<1x1x1x8xf32> to vector<1x8xf32>
    %646 = vector.broadcast %645 : vector<1x8xf32> to vector<8x8xf32>
    %647 = arith.addf %643, %646 : vector<8x8xf32>
    %648 = arith.truncf %633 : vector<8x8xf32> to vector<8x8xbf16>
    %649 = arith.truncf %640 : vector<8x8xf32> to vector<8x8xbf16>
    "tpu.trace_start"() <{level = 10 : i32, message = "qd,kd->qk"}> : () -> ()
    %cst_490 = arith.constant dense<0.000000e+00> : vector<8x8xf32>
    %650 = tpu.matmul %648, %649, %cst_490 {dimension_numbers = #tpu.dot_dimension_numbers<[1], [1], [0], [0], [0, 0, 1, 0], [], []>} : vector<8x8xbf16>, vector<8x8xbf16>, vector<8x8xf32> -> vector<8x8xf32>
    "tpu.trace_stop"() : () -> ()
    %cst_491 = arith.constant dense<0xFF800000> : vector<8xf32>
    %651 = vector.multi_reduction <maximumf>, %650, %cst_491 [1] : vector<8x8xf32> to vector<8xf32>
    %652 = vector.shape_cast %651 : vector<8xf32> to vector<8x1xf32>
    %653 = vector.broadcast %652 : vector<8x1xf32> to vector<8x8xf32>
    %654 = arith.subf %650, %653 : vector<8x8xf32>
    %655 = math.exp %654 : vector<8x8xf32>
    %cst_492 = arith.constant dense<0.000000e+00> : vector<8xf32>
    %656 = vector.multi_reduction <add>, %655, %cst_492 [1] : vector<8x8xf32> to vector<8xf32>
    %657 = vector.shape_cast %656 : vector<8xf32> to vector<8x1xf32>
    %658 = vector.broadcast %657 : vector<8x1xf32> to vector<8x8xf32>
    %659 = arith.divf %655, %658 : vector<8x8xf32>
    %660 = arith.truncf %659 : vector<8x8xf32> to vector<8x8xbf16>
    %661 = arith.truncf %647 : vector<8x8xf32> to vector<8x8xbf16>
    %cst_493 = arith.constant dense<0.000000e+00> : vector<8x8xf32>
    %662 = tpu.matmul %660, %661, %cst_493 {dimension_numbers = #tpu.dot_dimension_numbers<[1], [0], [0], [1], [0, 0, 1, 1], [], []>} : vector<8x8xbf16>, vector<8x8xbf16>, vector<8x8xf32> -> vector<8x8xf32>
    %663 = arith.truncf %662 : vector<8x8xf32> to vector<8x8xbf16>
    %c1_494 = arith.constant 1 : index
    %c3_495 = arith.constant 3 : index
    %c0_496 = arith.constant 0 : index
    %c0_497 = arith.constant 0 : index
    %664 = vector.load %arg11[%c1_494, %c3_495, %c0_496, %c0_497] : memref<3x4x8x32xbf16, #tpu.memory_space<vmem>>, vector<1x1x8x32xbf16>
    %665 = vector.shape_cast %664 : vector<1x1x8x32xbf16> to vector<8x32xbf16>
    %cst_498 = arith.constant dense<0.000000e+00> : vector<8x32xf32>
    %666 = tpu.matmul %663, %665, %cst_498 {dimension_numbers = #tpu.dot_dimension_numbers<[1], [0], [0], [1], [0, 0, 1, 1], [], []>} : vector<8x8xbf16>, vector<8x32xbf16>, vector<8x32xf32> -> vector<8x32xf32>
    %667 = arith.addf %626, %666 : vector<8x32xf32>
    %c1_499 = arith.constant 1 : index
    %c0_500 = arith.constant 0 : index
    %c0_501 = arith.constant 0 : index
    %668 = vector.load %arg12[%c1_499, %c0_500, %c0_501] : memref<3x1x32xf32, #tpu.memory_space<vmem>>, vector<1x1x32xf32>
    %669 = vector.shape_cast %668 : vector<1x1x32xf32> to vector<1x32xf32>
    %670 = vector.broadcast %669 : vector<1x32xf32> to vector<8x32xf32>
    %671 = arith.addf %667, %670 : vector<8x32xf32>
    %672 = arith.addf %502, %671 : vector<8x32xf32>
    %cst_502 = arith.constant 0.000000e+00 : f32
    %673 = vector.broadcast %cst_502 : f32 to vector<8x32xf32>
    %c1_503 = arith.constant 1 : index
    %c0_504 = arith.constant 0 : index
    %c0_505 = arith.constant 0 : index
    %c0_506 = arith.constant 0 : index
    %674 = vector.load %arg13[%c1_503, %c0_504, %c0_505, %c0_506] : memref<2x4x32x8xbf16, #tpu.memory_space<vmem>>, vector<1x1x32x8xbf16>
    %675 = vector.shape_cast %674 : vector<1x1x32x8xbf16> to vector<32x8xbf16>
    %cst_507 = arith.constant dense<0.000000e+00> : vector<8x8xf32>
    %676 = tpu.matmul %476, %675, %cst_507 {dimension_numbers = #tpu.dot_dimension_numbers<[1], [0], [0], [1], [0, 0, 1, 1], [], []>} : vector<8x32xbf16>, vector<32x8xbf16>, vector<8x8xf32> -> vector<8x8xf32>
    %c1_508 = arith.constant 1 : index
    %c0_509 = arith.constant 0 : index
    %c0_510 = arith.constant 0 : index
    %c0_511 = arith.constant 0 : index
    %677 = vector.load %arg14[%c1_508, %c0_509, %c0_510, %c0_511] : memref<2x4x1x8xf32, #tpu.memory_space<vmem>>, vector<1x1x1x8xf32>
    %678 = vector.shape_cast %677 : vector<1x1x1x8xf32> to vector<1x8xf32>
    %679 = vector.broadcast %678 : vector<1x8xf32> to vector<8x8xf32>
    %680 = arith.addf %676, %679 : vector<8x8xf32>
    %c1_512 = arith.constant 1 : index
    %c0_513 = arith.constant 0 : index
    %c0_514 = arith.constant 0 : index
    %c0_515 = arith.constant 0 : index
    %681 = vector.load %arg15[%c1_512, %c0_513, %c0_514, %c0_515] : memref<2x4x32x8xbf16, #tpu.memory_space<vmem>>, vector<1x1x32x8xbf16>
    %682 = vector.shape_cast %681 : vector<1x1x32x8xbf16> to vector<32x8xbf16>
    %cst_516 = arith.constant dense<0.000000e+00> : vector<8x8xf32>
    %683 = tpu.matmul %476, %682, %cst_516 {dimension_numbers = #tpu.dot_dimension_numbers<[1], [0], [0], [1], [0, 0, 1, 1], [], []>} : vector<8x32xbf16>, vector<32x8xbf16>, vector<8x8xf32> -> vector<8x8xf32>
    %c1_517 = arith.constant 1 : index
    %c0_518 = arith.constant 0 : index
    %c0_519 = arith.constant 0 : index
    %c0_520 = arith.constant 0 : index
    %684 = vector.load %arg16[%c1_517, %c0_518, %c0_519, %c0_520] : memref<2x4x1x8xf32, #tpu.memory_space<vmem>>, vector<1x1x1x8xf32>
    %685 = vector.shape_cast %684 : vector<1x1x1x8xf32> to vector<1x8xf32>
    %686 = vector.broadcast %685 : vector<1x8xf32> to vector<8x8xf32>
    %687 = arith.addf %683, %686 : vector<8x8xf32>
    %c1_521 = arith.constant 1 : index
    %c0_522 = arith.constant 0 : index
    %c0_523 = arith.constant 0 : index
    %c0_524 = arith.constant 0 : index
    %688 = vector.load %arg17[%c1_521, %c0_522, %c0_523, %c0_524] : memref<2x4x32x8xbf16, #tpu.memory_space<vmem>>, vector<1x1x32x8xbf16>
    %689 = vector.shape_cast %688 : vector<1x1x32x8xbf16> to vector<32x8xbf16>
    %cst_525 = arith.constant dense<0.000000e+00> : vector<8x8xf32>
    %690 = tpu.matmul %476, %689, %cst_525 {dimension_numbers = #tpu.dot_dimension_numbers<[1], [0], [0], [1], [0, 0, 1, 1], [], []>} : vector<8x32xbf16>, vector<32x8xbf16>, vector<8x8xf32> -> vector<8x8xf32>
    %c1_526 = arith.constant 1 : index
    %c0_527 = arith.constant 0 : index
    %c0_528 = arith.constant 0 : index
    %c0_529 = arith.constant 0 : index
    %691 = vector.load %arg18[%c1_526, %c0_527, %c0_528, %c0_529] : memref<2x4x1x8xf32, #tpu.memory_space<vmem>>, vector<1x1x1x8xf32>
    %692 = vector.shape_cast %691 : vector<1x1x1x8xf32> to vector<1x8xf32>
    %693 = vector.broadcast %692 : vector<1x8xf32> to vector<8x8xf32>
    %694 = arith.addf %690, %693 : vector<8x8xf32>
    %695 = arith.truncf %680 : vector<8x8xf32> to vector<8x8xbf16>
    %696 = arith.truncf %687 : vector<8x8xf32> to vector<8x8xbf16>
    "tpu.trace_start"() <{level = 10 : i32, message = "qd,kd->qk"}> : () -> ()
    %cst_530 = arith.constant dense<0.000000e+00> : vector<8x8xf32>
    %697 = tpu.matmul %695, %696, %cst_530 {dimension_numbers = #tpu.dot_dimension_numbers<[1], [1], [0], [0], [0, 0, 1, 0], [], []>} : vector<8x8xbf16>, vector<8x8xbf16>, vector<8x8xf32> -> vector<8x8xf32>
    "tpu.trace_stop"() : () -> ()
    %cst_531 = arith.constant dense<0xFF800000> : vector<8xf32>
    %698 = vector.multi_reduction <maximumf>, %697, %cst_531 [1] : vector<8x8xf32> to vector<8xf32>
    %699 = vector.shape_cast %698 : vector<8xf32> to vector<8x1xf32>
    %700 = vector.broadcast %699 : vector<8x1xf32> to vector<8x8xf32>
    %701 = arith.subf %697, %700 : vector<8x8xf32>
    %702 = math.exp %701 : vector<8x8xf32>
    %cst_532 = arith.constant dense<0.000000e+00> : vector<8xf32>
    %703 = vector.multi_reduction <add>, %702, %cst_532 [1] : vector<8x8xf32> to vector<8xf32>
    %704 = vector.shape_cast %703 : vector<8xf32> to vector<8x1xf32>
    %705 = vector.broadcast %704 : vector<8x1xf32> to vector<8x8xf32>
    %706 = arith.divf %702, %705 : vector<8x8xf32>
    %707 = arith.truncf %706 : vector<8x8xf32> to vector<8x8xbf16>
    %708 = arith.truncf %694 : vector<8x8xf32> to vector<8x8xbf16>
    %cst_533 = arith.constant dense<0.000000e+00> : vector<8x8xf32>
    %709 = tpu.matmul %707, %708, %cst_533 {dimension_numbers = #tpu.dot_dimension_numbers<[1], [0], [0], [1], [0, 0, 1, 1], [], []>} : vector<8x8xbf16>, vector<8x8xbf16>, vector<8x8xf32> -> vector<8x8xf32>
    %710 = arith.truncf %709 : vector<8x8xf32> to vector<8x8xbf16>
    %c1_534 = arith.constant 1 : index
    %c0_535 = arith.constant 0 : index
    %c0_536 = arith.constant 0 : index
    %c0_537 = arith.constant 0 : index
    %711 = vector.load %arg19[%c1_534, %c0_535, %c0_536, %c0_537] : memref<2x4x8x32xbf16, #tpu.memory_space<vmem>>, vector<1x1x8x32xbf16>
    %712 = vector.shape_cast %711 : vector<1x1x8x32xbf16> to vector<8x32xbf16>
    %cst_538 = arith.constant dense<0.000000e+00> : vector<8x32xf32>
    %713 = tpu.matmul %710, %712, %cst_538 {dimension_numbers = #tpu.dot_dimension_numbers<[1], [0], [0], [1], [0, 0, 1, 1], [], []>} : vector<8x8xbf16>, vector<8x32xbf16>, vector<8x32xf32> -> vector<8x32xf32>
    %714 = arith.addf %673, %713 : vector<8x32xf32>
    %c1_539 = arith.constant 1 : index
    %c1_540 = arith.constant 1 : index
    %c0_541 = arith.constant 0 : index
    %c0_542 = arith.constant 0 : index
    %715 = vector.load %arg13[%c1_539, %c1_540, %c0_541, %c0_542] : memref<2x4x32x8xbf16, #tpu.memory_space<vmem>>, vector<1x1x32x8xbf16>
    %716 = vector.shape_cast %715 : vector<1x1x32x8xbf16> to vector<32x8xbf16>
    %cst_543 = arith.constant dense<0.000000e+00> : vector<8x8xf32>
    %717 = tpu.matmul %476, %716, %cst_543 {dimension_numbers = #tpu.dot_dimension_numbers<[1], [0], [0], [1], [0, 0, 1, 1], [], []>} : vector<8x32xbf16>, vector<32x8xbf16>, vector<8x8xf32> -> vector<8x8xf32>
    %c1_544 = arith.constant 1 : index
    %c1_545 = arith.constant 1 : index
    %c0_546 = arith.constant 0 : index
    %c0_547 = arith.constant 0 : index
    %718 = vector.load %arg14[%c1_544, %c1_545, %c0_546, %c0_547] : memref<2x4x1x8xf32, #tpu.memory_space<vmem>>, vector<1x1x1x8xf32>
    %719 = vector.shape_cast %718 : vector<1x1x1x8xf32> to vector<1x8xf32>
    %720 = vector.broadcast %719 : vector<1x8xf32> to vector<8x8xf32>
    %721 = arith.addf %717, %720 : vector<8x8xf32>
    %c1_548 = arith.constant 1 : index
    %c1_549 = arith.constant 1 : index
    %c0_550 = arith.constant 0 : index
    %c0_551 = arith.constant 0 : index
    %722 = vector.load %arg15[%c1_548, %c1_549, %c0_550, %c0_551] : memref<2x4x32x8xbf16, #tpu.memory_space<vmem>>, vector<1x1x32x8xbf16>
    %723 = vector.shape_cast %722 : vector<1x1x32x8xbf16> to vector<32x8xbf16>
    %cst_552 = arith.constant dense<0.000000e+00> : vector<8x8xf32>
    %724 = tpu.matmul %476, %723, %cst_552 {dimension_numbers = #tpu.dot_dimension_numbers<[1], [0], [0], [1], [0, 0, 1, 1], [], []>} : vector<8x32xbf16>, vector<32x8xbf16>, vector<8x8xf32> -> vector<8x8xf32>
    %c1_553 = arith.constant 1 : index
    %c1_554 = arith.constant 1 : index
    %c0_555 = arith.constant 0 : index
    %c0_556 = arith.constant 0 : index
    %725 = vector.load %arg16[%c1_553, %c1_554, %c0_555, %c0_556] : memref<2x4x1x8xf32, #tpu.memory_space<vmem>>, vector<1x1x1x8xf32>
    %726 = vector.shape_cast %725 : vector<1x1x1x8xf32> to vector<1x8xf32>
    %727 = vector.broadcast %726 : vector<1x8xf32> to vector<8x8xf32>
    %728 = arith.addf %724, %727 : vector<8x8xf32>
    %c1_557 = arith.constant 1 : index
    %c1_558 = arith.constant 1 : index
    %c0_559 = arith.constant 0 : index
    %c0_560 = arith.constant 0 : index
    %729 = vector.load %arg17[%c1_557, %c1_558, %c0_559, %c0_560] : memref<2x4x32x8xbf16, #tpu.memory_space<vmem>>, vector<1x1x32x8xbf16>
    %730 = vector.shape_cast %729 : vector<1x1x32x8xbf16> to vector<32x8xbf16>
    %cst_561 = arith.constant dense<0.000000e+00> : vector<8x8xf32>
    %731 = tpu.matmul %476, %730, %cst_561 {dimension_numbers = #tpu.dot_dimension_numbers<[1], [0], [0], [1], [0, 0, 1, 1], [], []>} : vector<8x32xbf16>, vector<32x8xbf16>, vector<8x8xf32> -> vector<8x8xf32>
    %c1_562 = arith.constant 1 : index
    %c1_563 = arith.constant 1 : index
    %c0_564 = arith.constant 0 : index
    %c0_565 = arith.constant 0 : index
    %732 = vector.load %arg18[%c1_562, %c1_563, %c0_564, %c0_565] : memref<2x4x1x8xf32, #tpu.memory_space<vmem>>, vector<1x1x1x8xf32>
    %733 = vector.shape_cast %732 : vector<1x1x1x8xf32> to vector<1x8xf32>
    %734 = vector.broadcast %733 : vector<1x8xf32> to vector<8x8xf32>
    %735 = arith.addf %731, %734 : vector<8x8xf32>
    %736 = arith.truncf %721 : vector<8x8xf32> to vector<8x8xbf16>
    %737 = arith.truncf %728 : vector<8x8xf32> to vector<8x8xbf16>
    "tpu.trace_start"() <{level = 10 : i32, message = "qd,kd->qk"}> : () -> ()
    %cst_566 = arith.constant dense<0.000000e+00> : vector<8x8xf32>
    %738 = tpu.matmul %736, %737, %cst_566 {dimension_numbers = #tpu.dot_dimension_numbers<[1], [1], [0], [0], [0, 0, 1, 0], [], []>} : vector<8x8xbf16>, vector<8x8xbf16>, vector<8x8xf32> -> vector<8x8xf32>
    "tpu.trace_stop"() : () -> ()
    %cst_567 = arith.constant dense<0xFF800000> : vector<8xf32>
    %739 = vector.multi_reduction <maximumf>, %738, %cst_567 [1] : vector<8x8xf32> to vector<8xf32>
    %740 = vector.shape_cast %739 : vector<8xf32> to vector<8x1xf32>
    %741 = vector.broadcast %740 : vector<8x1xf32> to vector<8x8xf32>
    %742 = arith.subf %738, %741 : vector<8x8xf32>
    %743 = math.exp %742 : vector<8x8xf32>
    %cst_568 = arith.constant dense<0.000000e+00> : vector<8xf32>
    %744 = vector.multi_reduction <add>, %743, %cst_568 [1] : vector<8x8xf32> to vector<8xf32>
    %745 = vector.shape_cast %744 : vector<8xf32> to vector<8x1xf32>
    %746 = vector.broadcast %745 : vector<8x1xf32> to vector<8x8xf32>
    %747 = arith.divf %743, %746 : vector<8x8xf32>
    %748 = arith.truncf %747 : vector<8x8xf32> to vector<8x8xbf16>
    %749 = arith.truncf %735 : vector<8x8xf32> to vector<8x8xbf16>
    %cst_569 = arith.constant dense<0.000000e+00> : vector<8x8xf32>
    %750 = tpu.matmul %748, %749, %cst_569 {dimension_numbers = #tpu.dot_dimension_numbers<[1], [0], [0], [1], [0, 0, 1, 1], [], []>} : vector<8x8xbf16>, vector<8x8xbf16>, vector<8x8xf32> -> vector<8x8xf32>
    %751 = arith.truncf %750 : vector<8x8xf32> to vector<8x8xbf16>
    %c1_570 = arith.constant 1 : index
    %c1_571 = arith.constant 1 : index
    %c0_572 = arith.constant 0 : index
    %c0_573 = arith.constant 0 : index
    %752 = vector.load %arg19[%c1_570, %c1_571, %c0_572, %c0_573] : memref<2x4x8x32xbf16, #tpu.memory_space<vmem>>, vector<1x1x8x32xbf16>
    %753 = vector.shape_cast %752 : vector<1x1x8x32xbf16> to vector<8x32xbf16>
    %cst_574 = arith.constant dense<0.000000e+00> : vector<8x32xf32>
    %754 = tpu.matmul %751, %753, %cst_574 {dimension_numbers = #tpu.dot_dimension_numbers<[1], [0], [0], [1], [0, 0, 1, 1], [], []>} : vector<8x8xbf16>, vector<8x32xbf16>, vector<8x32xf32> -> vector<8x32xf32>
    %755 = arith.addf %714, %754 : vector<8x32xf32>
    %c1_575 = arith.constant 1 : index
    %c2_576 = arith.constant 2 : index
    %c0_577 = arith.constant 0 : index
    %c0_578 = arith.constant 0 : index
    %756 = vector.load %arg13[%c1_575, %c2_576, %c0_577, %c0_578] : memref<2x4x32x8xbf16, #tpu.memory_space<vmem>>, vector<1x1x32x8xbf16>
    %757 = vector.shape_cast %756 : vector<1x1x32x8xbf16> to vector<32x8xbf16>
    %cst_579 = arith.constant dense<0.000000e+00> : vector<8x8xf32>
    %758 = tpu.matmul %476, %757, %cst_579 {dimension_numbers = #tpu.dot_dimension_numbers<[1], [0], [0], [1], [0, 0, 1, 1], [], []>} : vector<8x32xbf16>, vector<32x8xbf16>, vector<8x8xf32> -> vector<8x8xf32>
    %c1_580 = arith.constant 1 : index
    %c2_581 = arith.constant 2 : index
    %c0_582 = arith.constant 0 : index
    %c0_583 = arith.constant 0 : index
    %759 = vector.load %arg14[%c1_580, %c2_581, %c0_582, %c0_583] : memref<2x4x1x8xf32, #tpu.memory_space<vmem>>, vector<1x1x1x8xf32>
    %760 = vector.shape_cast %759 : vector<1x1x1x8xf32> to vector<1x8xf32>
    %761 = vector.broadcast %760 : vector<1x8xf32> to vector<8x8xf32>
    %762 = arith.addf %758, %761 : vector<8x8xf32>
    %c1_584 = arith.constant 1 : index
    %c2_585 = arith.constant 2 : index
    %c0_586 = arith.constant 0 : index
    %c0_587 = arith.constant 0 : index
    %763 = vector.load %arg15[%c1_584, %c2_585, %c0_586, %c0_587] : memref<2x4x32x8xbf16, #tpu.memory_space<vmem>>, vector<1x1x32x8xbf16>
    %764 = vector.shape_cast %763 : vector<1x1x32x8xbf16> to vector<32x8xbf16>
    %cst_588 = arith.constant dense<0.000000e+00> : vector<8x8xf32>
    %765 = tpu.matmul %476, %764, %cst_588 {dimension_numbers = #tpu.dot_dimension_numbers<[1], [0], [0], [1], [0, 0, 1, 1], [], []>} : vector<8x32xbf16>, vector<32x8xbf16>, vector<8x8xf32> -> vector<8x8xf32>
    %c1_589 = arith.constant 1 : index
    %c2_590 = arith.constant 2 : index
    %c0_591 = arith.constant 0 : index
    %c0_592 = arith.constant 0 : index
    %766 = vector.load %arg16[%c1_589, %c2_590, %c0_591, %c0_592] : memref<2x4x1x8xf32, #tpu.memory_space<vmem>>, vector<1x1x1x8xf32>
    %767 = vector.shape_cast %766 : vector<1x1x1x8xf32> to vector<1x8xf32>
    %768 = vector.broadcast %767 : vector<1x8xf32> to vector<8x8xf32>
    %769 = arith.addf %765, %768 : vector<8x8xf32>
    %c1_593 = arith.constant 1 : index
    %c2_594 = arith.constant 2 : index
    %c0_595 = arith.constant 0 : index
    %c0_596 = arith.constant 0 : index
    %770 = vector.load %arg17[%c1_593, %c2_594, %c0_595, %c0_596] : memref<2x4x32x8xbf16, #tpu.memory_space<vmem>>, vector<1x1x32x8xbf16>
    %771 = vector.shape_cast %770 : vector<1x1x32x8xbf16> to vector<32x8xbf16>
    %cst_597 = arith.constant dense<0.000000e+00> : vector<8x8xf32>
    %772 = tpu.matmul %476, %771, %cst_597 {dimension_numbers = #tpu.dot_dimension_numbers<[1], [0], [0], [1], [0, 0, 1, 1], [], []>} : vector<8x32xbf16>, vector<32x8xbf16>, vector<8x8xf32> -> vector<8x8xf32>
    %c1_598 = arith.constant 1 : index
    %c2_599 = arith.constant 2 : index
    %c0_600 = arith.constant 0 : index
    %c0_601 = arith.constant 0 : index
    %773 = vector.load %arg18[%c1_598, %c2_599, %c0_600, %c0_601] : memref<2x4x1x8xf32, #tpu.memory_space<vmem>>, vector<1x1x1x8xf32>
    %774 = vector.shape_cast %773 : vector<1x1x1x8xf32> to vector<1x8xf32>
    %775 = vector.broadcast %774 : vector<1x8xf32> to vector<8x8xf32>
    %776 = arith.addf %772, %775 : vector<8x8xf32>
    %777 = arith.truncf %762 : vector<8x8xf32> to vector<8x8xbf16>
    %778 = arith.truncf %769 : vector<8x8xf32> to vector<8x8xbf16>
    "tpu.trace_start"() <{level = 10 : i32, message = "qd,kd->qk"}> : () -> ()
    %cst_602 = arith.constant dense<0.000000e+00> : vector<8x8xf32>
    %779 = tpu.matmul %777, %778, %cst_602 {dimension_numbers = #tpu.dot_dimension_numbers<[1], [1], [0], [0], [0, 0, 1, 0], [], []>} : vector<8x8xbf16>, vector<8x8xbf16>, vector<8x8xf32> -> vector<8x8xf32>
    "tpu.trace_stop"() : () -> ()
    %cst_603 = arith.constant dense<0xFF800000> : vector<8xf32>
    %780 = vector.multi_reduction <maximumf>, %779, %cst_603 [1] : vector<8x8xf32> to vector<8xf32>
    %781 = vector.shape_cast %780 : vector<8xf32> to vector<8x1xf32>
    %782 = vector.broadcast %781 : vector<8x1xf32> to vector<8x8xf32>
    %783 = arith.subf %779, %782 : vector<8x8xf32>
    %784 = math.exp %783 : vector<8x8xf32>
    %cst_604 = arith.constant dense<0.000000e+00> : vector<8xf32>
    %785 = vector.multi_reduction <add>, %784, %cst_604 [1] : vector<8x8xf32> to vector<8xf32>
    %786 = vector.shape_cast %785 : vector<8xf32> to vector<8x1xf32>
    %787 = vector.broadcast %786 : vector<8x1xf32> to vector<8x8xf32>
    %788 = arith.divf %784, %787 : vector<8x8xf32>
    %789 = arith.truncf %788 : vector<8x8xf32> to vector<8x8xbf16>
    %790 = arith.truncf %776 : vector<8x8xf32> to vector<8x8xbf16>
    %cst_605 = arith.constant dense<0.000000e+00> : vector<8x8xf32>
    %791 = tpu.matmul %789, %790, %cst_605 {dimension_numbers = #tpu.dot_dimension_numbers<[1], [0], [0], [1], [0, 0, 1, 1], [], []>} : vector<8x8xbf16>, vector<8x8xbf16>, vector<8x8xf32> -> vector<8x8xf32>
    %792 = arith.truncf %791 : vector<8x8xf32> to vector<8x8xbf16>
    %c1_606 = arith.constant 1 : index
    %c2_607 = arith.constant 2 : index
    %c0_608 = arith.constant 0 : index
    %c0_609 = arith.constant 0 : index
    %793 = vector.load %arg19[%c1_606, %c2_607, %c0_608, %c0_609] : memref<2x4x8x32xbf16, #tpu.memory_space<vmem>>, vector<1x1x8x32xbf16>
    %794 = vector.shape_cast %793 : vector<1x1x8x32xbf16> to vector<8x32xbf16>
    %cst_610 = arith.constant dense<0.000000e+00> : vector<8x32xf32>
    %795 = tpu.matmul %792, %794, %cst_610 {dimension_numbers = #tpu.dot_dimension_numbers<[1], [0], [0], [1], [0, 0, 1, 1], [], []>} : vector<8x8xbf16>, vector<8x32xbf16>, vector<8x32xf32> -> vector<8x32xf32>
    %796 = arith.addf %755, %795 : vector<8x32xf32>
    %c1_611 = arith.constant 1 : index
    %c3_612 = arith.constant 3 : index
    %c0_613 = arith.constant 0 : index
    %c0_614 = arith.constant 0 : index
    %797 = vector.load %arg13[%c1_611, %c3_612, %c0_613, %c0_614] : memref<2x4x32x8xbf16, #tpu.memory_space<vmem>>, vector<1x1x32x8xbf16>
    %798 = vector.shape_cast %797 : vector<1x1x32x8xbf16> to vector<32x8xbf16>
    %cst_615 = arith.constant dense<0.000000e+00> : vector<8x8xf32>
    %799 = tpu.matmul %476, %798, %cst_615 {dimension_numbers = #tpu.dot_dimension_numbers<[1], [0], [0], [1], [0, 0, 1, 1], [], []>} : vector<8x32xbf16>, vector<32x8xbf16>, vector<8x8xf32> -> vector<8x8xf32>
    %c1_616 = arith.constant 1 : index
    %c3_617 = arith.constant 3 : index
    %c0_618 = arith.constant 0 : index
    %c0_619 = arith.constant 0 : index
    %800 = vector.load %arg14[%c1_616, %c3_617, %c0_618, %c0_619] : memref<2x4x1x8xf32, #tpu.memory_space<vmem>>, vector<1x1x1x8xf32>
    %801 = vector.shape_cast %800 : vector<1x1x1x8xf32> to vector<1x8xf32>
    %802 = vector.broadcast %801 : vector<1x8xf32> to vector<8x8xf32>
    %803 = arith.addf %799, %802 : vector<8x8xf32>
    %c1_620 = arith.constant 1 : index
    %c3_621 = arith.constant 3 : index
    %c0_622 = arith.constant 0 : index
    %c0_623 = arith.constant 0 : index
    %804 = vector.load %arg15[%c1_620, %c3_621, %c0_622, %c0_623] : memref<2x4x32x8xbf16, #tpu.memory_space<vmem>>, vector<1x1x32x8xbf16>
    %805 = vector.shape_cast %804 : vector<1x1x32x8xbf16> to vector<32x8xbf16>
    %cst_624 = arith.constant dense<0.000000e+00> : vector<8x8xf32>
    %806 = tpu.matmul %476, %805, %cst_624 {dimension_numbers = #tpu.dot_dimension_numbers<[1], [0], [0], [1], [0, 0, 1, 1], [], []>} : vector<8x32xbf16>, vector<32x8xbf16>, vector<8x8xf32> -> vector<8x8xf32>
    %c1_625 = arith.constant 1 : index
    %c3_626 = arith.constant 3 : index
    %c0_627 = arith.constant 0 : index
    %c0_628 = arith.constant 0 : index
    %807 = vector.load %arg16[%c1_625, %c3_626, %c0_627, %c0_628] : memref<2x4x1x8xf32, #tpu.memory_space<vmem>>, vector<1x1x1x8xf32>
    %808 = vector.shape_cast %807 : vector<1x1x1x8xf32> to vector<1x8xf32>
    %809 = vector.broadcast %808 : vector<1x8xf32> to vector<8x8xf32>
    %810 = arith.addf %806, %809 : vector<8x8xf32>
    %c1_629 = arith.constant 1 : index
    %c3_630 = arith.constant 3 : index
    %c0_631 = arith.constant 0 : index
    %c0_632 = arith.constant 0 : index
    %811 = vector.load %arg17[%c1_629, %c3_630, %c0_631, %c0_632] : memref<2x4x32x8xbf16, #tpu.memory_space<vmem>>, vector<1x1x32x8xbf16>
    %812 = vector.shape_cast %811 : vector<1x1x32x8xbf16> to vector<32x8xbf16>
    %cst_633 = arith.constant dense<0.000000e+00> : vector<8x8xf32>
    %813 = tpu.matmul %476, %812, %cst_633 {dimension_numbers = #tpu.dot_dimension_numbers<[1], [0], [0], [1], [0, 0, 1, 1], [], []>} : vector<8x32xbf16>, vector<32x8xbf16>, vector<8x8xf32> -> vector<8x8xf32>
    %c1_634 = arith.constant 1 : index
    %c3_635 = arith.constant 3 : index
    %c0_636 = arith.constant 0 : index
    %c0_637 = arith.constant 0 : index
    %814 = vector.load %arg18[%c1_634, %c3_635, %c0_636, %c0_637] : memref<2x4x1x8xf32, #tpu.memory_space<vmem>>, vector<1x1x1x8xf32>
    %815 = vector.shape_cast %814 : vector<1x1x1x8xf32> to vector<1x8xf32>
    %816 = vector.broadcast %815 : vector<1x8xf32> to vector<8x8xf32>
    %817 = arith.addf %813, %816 : vector<8x8xf32>
    %818 = arith.truncf %803 : vector<8x8xf32> to vector<8x8xbf16>
    %819 = arith.truncf %810 : vector<8x8xf32> to vector<8x8xbf16>
    "tpu.trace_start"() <{level = 10 : i32, message = "qd,kd->qk"}> : () -> ()
    %cst_638 = arith.constant dense<0.000000e+00> : vector<8x8xf32>
    %820 = tpu.matmul %818, %819, %cst_638 {dimension_numbers = #tpu.dot_dimension_numbers<[1], [1], [0], [0], [0, 0, 1, 0], [], []>} : vector<8x8xbf16>, vector<8x8xbf16>, vector<8x8xf32> -> vector<8x8xf32>
    "tpu.trace_stop"() : () -> ()
    %cst_639 = arith.constant dense<0xFF800000> : vector<8xf32>
    %821 = vector.multi_reduction <maximumf>, %820, %cst_639 [1] : vector<8x8xf32> to vector<8xf32>
    %822 = vector.shape_cast %821 : vector<8xf32> to vector<8x1xf32>
    %823 = vector.broadcast %822 : vector<8x1xf32> to vector<8x8xf32>
    %824 = arith.subf %820, %823 : vector<8x8xf32>
    %825 = math.exp %824 : vector<8x8xf32>
    %cst_640 = arith.constant dense<0.000000e+00> : vector<8xf32>
    %826 = vector.multi_reduction <add>, %825, %cst_640 [1] : vector<8x8xf32> to vector<8xf32>
    %827 = vector.shape_cast %826 : vector<8xf32> to vector<8x1xf32>
    %828 = vector.broadcast %827 : vector<8x1xf32> to vector<8x8xf32>
    %829 = arith.divf %825, %828 : vector<8x8xf32>
    %830 = arith.truncf %829 : vector<8x8xf32> to vector<8x8xbf16>
    %831 = arith.truncf %817 : vector<8x8xf32> to vector<8x8xbf16>
    %cst_641 = arith.constant dense<0.000000e+00> : vector<8x8xf32>
    %832 = tpu.matmul %830, %831, %cst_641 {dimension_numbers = #tpu.dot_dimension_numbers<[1], [0], [0], [1], [0, 0, 1, 1], [], []>} : vector<8x8xbf16>, vector<8x8xbf16>, vector<8x8xf32> -> vector<8x8xf32>
    %833 = arith.truncf %832 : vector<8x8xf32> to vector<8x8xbf16>
    %c1_642 = arith.constant 1 : index
    %c3_643 = arith.constant 3 : index
    %c0_644 = arith.constant 0 : index
    %c0_645 = arith.constant 0 : index
    %834 = vector.load %arg19[%c1_642, %c3_643, %c0_644, %c0_645] : memref<2x4x8x32xbf16, #tpu.memory_space<vmem>>, vector<1x1x8x32xbf16>
    %835 = vector.shape_cast %834 : vector<1x1x8x32xbf16> to vector<8x32xbf16>
    %cst_646 = arith.constant dense<0.000000e+00> : vector<8x32xf32>
    %836 = tpu.matmul %833, %835, %cst_646 {dimension_numbers = #tpu.dot_dimension_numbers<[1], [0], [0], [1], [0, 0, 1, 1], [], []>} : vector<8x8xbf16>, vector<8x32xbf16>, vector<8x32xf32> -> vector<8x32xf32>
    %837 = arith.addf %796, %836 : vector<8x32xf32>
    %c1_647 = arith.constant 1 : index
    %c0_648 = arith.constant 0 : index
    %c0_649 = arith.constant 0 : index
    %838 = vector.load %arg20[%c1_647, %c0_648, %c0_649] : memref<2x1x32xf32, #tpu.memory_space<vmem>>, vector<1x1x32xf32>
    %839 = vector.shape_cast %838 : vector<1x1x32xf32> to vector<1x32xf32>
    %840 = vector.broadcast %839 : vector<1x32xf32> to vector<8x32xf32>
    %841 = arith.addf %837, %840 : vector<8x32xf32>
    %842 = arith.addf %457, %841 : vector<8x32xf32>
    %cst_650 = arith.constant dense<0.000000e+00> : vector<8xf32>
    %843 = vector.multi_reduction <add>, %842, %cst_650 [1] : vector<8x32xf32> to vector<8xf32>
    %844 = vector.shape_cast %843 : vector<8xf32> to vector<8x1xf32>
    %cst_651 = arith.constant 3.200000e+01 : f32
    %845 = vector.broadcast %cst_651 : f32 to vector<8x1xf32>
    %846 = arith.divf %844, %845 : vector<8x1xf32>
    %847 = vector.broadcast %846 : vector<8x1xf32> to vector<8x32xf32>
    %848 = arith.subf %842, %847 : vector<8x32xf32>
    %849 = arith.mulf %848, %848 : vector<8x32xf32>
    %cst_652 = arith.constant dense<0.000000e+00> : vector<8xf32>
    %850 = vector.multi_reduction <add>, %849, %cst_652 [1] : vector<8x32xf32> to vector<8xf32>
    %851 = vector.shape_cast %850 : vector<8xf32> to vector<8x1xf32>
    %cst_653 = arith.constant 3.200000e+01 : f32
    %852 = vector.broadcast %cst_653 : f32 to vector<8x1xf32>
    %853 = arith.divf %851, %852 : vector<8x1xf32>
    %854 = vector.broadcast %846 : vector<8x1xf32> to vector<8x32xf32>
    %855 = arith.subf %842, %854 : vector<8x32xf32>
    %cst_654 = arith.constant 9.99999974E-6 : f32
    %856 = vector.broadcast %cst_654 : f32 to vector<8x1xf32>
    %857 = arith.addf %853, %856 : vector<8x1xf32>
    %858 = math.rsqrt %857 : vector<8x1xf32>
    %859 = vector.broadcast %858 : vector<8x1xf32> to vector<8x32xf32>
    %860 = arith.mulf %855, %859 : vector<8x32xf32>
    %861 = arith.truncf %860 : vector<8x32xf32> to vector<8x32xbf16>
    %c1_655 = arith.constant 1 : index
    %c0_656 = arith.constant 0 : index
    %c0_657 = arith.constant 0 : index
    %862 = vector.load %arg21[%c1_655, %c0_656, %c0_657] : memref<2x32x128xbf16, #tpu.memory_space<vmem>>, vector<1x32x128xbf16>
    %863 = vector.shape_cast %862 : vector<1x32x128xbf16> to vector<32x128xbf16>
    %cst_658 = arith.constant dense<0.000000e+00> : vector<8x128xf32>
    %864 = tpu.matmul %861, %863, %cst_658 {dimension_numbers = #tpu.dot_dimension_numbers<[1], [0], [0], [1], [0, 0, 1, 1], [], []>} : vector<8x32xbf16>, vector<32x128xbf16>, vector<8x128xf32> -> vector<8x128xf32>
    %c1_659 = arith.constant 1 : index
    %c0_660 = arith.constant 0 : index
    %c0_661 = arith.constant 0 : index
    %865 = vector.load %arg22[%c1_659, %c0_660, %c0_661] : memref<2x1x128xf32, #tpu.memory_space<vmem>>, vector<1x1x128xf32>
    %866 = vector.shape_cast %865 : vector<1x1x128xf32> to vector<1x128xf32>
    %867 = vector.broadcast %866 : vector<1x128xf32> to vector<8x128xf32>
    %868 = arith.addf %864, %867 : vector<8x128xf32>
    %869 = arith.mulf %868, %868 : vector<8x128xf32>
    %870 = arith.mulf %868, %869 : vector<8x128xf32>
    %cst_662 = arith.constant 4.471500e-02 : f32
    %871 = vector.broadcast %cst_662 : f32 to vector<8x128xf32>
    %872 = arith.mulf %871, %870 : vector<8x128xf32>
    %873 = arith.addf %868, %872 : vector<8x128xf32>
    %cst_663 = arith.constant 0.797884583 : f32
    %874 = vector.broadcast %cst_663 : f32 to vector<8x128xf32>
    %875 = arith.mulf %874, %873 : vector<8x128xf32>
    %876 = math.tanh %875 : vector<8x128xf32>
    %cst_664 = arith.constant 1.000000e+00 : f32
    %877 = vector.broadcast %cst_664 : f32 to vector<8x128xf32>
    %878 = arith.addf %877, %876 : vector<8x128xf32>
    %cst_665 = arith.constant 5.000000e-01 : f32
    %879 = vector.broadcast %cst_665 : f32 to vector<8x128xf32>
    %880 = arith.mulf %879, %878 : vector<8x128xf32>
    %881 = arith.mulf %868, %880 : vector<8x128xf32>
    %882 = arith.truncf %881 : vector<8x128xf32> to vector<8x128xbf16>
    %c1_666 = arith.constant 1 : index
    %c0_667 = arith.constant 0 : index
    %c0_668 = arith.constant 0 : index
    %883 = vector.load %arg23[%c1_666, %c0_667, %c0_668] : memref<2x128x32xbf16, #tpu.memory_space<vmem>>, vector<1x128x32xbf16>
    %884 = vector.shape_cast %883 : vector<1x128x32xbf16> to vector<128x32xbf16>
    %cst_669 = arith.constant dense<0.000000e+00> : vector<8x32xf32>
    %885 = tpu.matmul %882, %884, %cst_669 {dimension_numbers = #tpu.dot_dimension_numbers<[1], [0], [0], [1], [0, 0, 1, 1], [], []>} : vector<8x128xbf16>, vector<128x32xbf16>, vector<8x32xf32> -> vector<8x32xf32>
    %886 = arith.addf %842, %885 : vector<8x32xf32>
    %c1_670 = arith.constant 1 : index
    %c0_671 = arith.constant 0 : index
    %c0_672 = arith.constant 0 : index
    %887 = vector.load %arg24[%c1_670, %c0_671, %c0_672] : memref<2x1x32xf32, #tpu.memory_space<vmem>>, vector<1x1x32xf32>
    %888 = vector.shape_cast %887 : vector<1x1x32xf32> to vector<1x32xf32>
    %889 = vector.broadcast %888 : vector<1x32xf32> to vector<8x32xf32>
    %890 = arith.addf %886, %889 : vector<8x32xf32>
    %cst_673 = arith.constant dense<0.000000e+00> : vector<8xf32>
    %891 = vector.multi_reduction <add>, %890, %cst_673 [1] : vector<8x32xf32> to vector<8xf32>
    %892 = vector.shape_cast %891 : vector<8xf32> to vector<8x1xf32>
    %cst_674 = arith.constant 3.200000e+01 : f32
    %893 = vector.broadcast %cst_674 : f32 to vector<8x1xf32>
    %894 = arith.divf %892, %893 : vector<8x1xf32>
    %895 = vector.broadcast %894 : vector<8x1xf32> to vector<8x32xf32>
    %896 = arith.subf %890, %895 : vector<8x32xf32>
    %897 = arith.mulf %896, %896 : vector<8x32xf32>
    %cst_675 = arith.constant dense<0.000000e+00> : vector<8xf32>
    %898 = vector.multi_reduction <add>, %897, %cst_675 [1] : vector<8x32xf32> to vector<8xf32>
    %899 = vector.shape_cast %898 : vector<8xf32> to vector<8x1xf32>
    %cst_676 = arith.constant 3.200000e+01 : f32
    %900 = vector.broadcast %cst_676 : f32 to vector<8x1xf32>
    %901 = arith.divf %899, %900 : vector<8x1xf32>
    %902 = vector.broadcast %894 : vector<8x1xf32> to vector<8x32xf32>
    %903 = arith.subf %890, %902 : vector<8x32xf32>
    %cst_677 = arith.constant 9.99999974E-6 : f32
    %904 = vector.broadcast %cst_677 : f32 to vector<8x1xf32>
    %905 = arith.addf %901, %904 : vector<8x1xf32>
    %906 = math.rsqrt %905 : vector<8x1xf32>
    %907 = vector.broadcast %906 : vector<8x1xf32> to vector<8x32xf32>
    %908 = arith.mulf %903, %907 : vector<8x32xf32>
    %909 = arith.truncf %908 : vector<8x32xf32> to vector<8x32xbf16>
    %c2_678 = arith.constant 2 : index
    %c0_679 = arith.constant 0 : index
    %c0_680 = arith.constant 0 : index
    %910 = vector.load %arg4[%c2_678, %c0_679, %c0_680] : memref<3x2x32xf32, #tpu.memory_space<vmem>>, vector<1x2x32xf32>
    %911 = vector.shape_cast %910 : vector<1x2x32xf32> to vector<2x32xf32>
    %cst_681 = arith.constant dense<0.000000e+00> : vector<8xf32>
    %912 = vector.multi_reduction <add>, %672, %cst_681 [1] : vector<8x32xf32> to vector<8xf32>
    %913 = vector.shape_cast %912 : vector<8xf32> to vector<8x1xf32>
    %cst_682 = arith.constant 3.200000e+01 : f32
    %914 = vector.broadcast %cst_682 : f32 to vector<8x1xf32>
    %915 = arith.divf %913, %914 : vector<8x1xf32>
    %916 = vector.broadcast %915 : vector<8x1xf32> to vector<8x32xf32>
    %917 = arith.subf %672, %916 : vector<8x32xf32>
    %918 = arith.mulf %917, %917 : vector<8x32xf32>
    %cst_683 = arith.constant dense<0.000000e+00> : vector<8xf32>
    %919 = vector.multi_reduction <add>, %918, %cst_683 [1] : vector<8x32xf32> to vector<8xf32>
    %920 = vector.shape_cast %919 : vector<8xf32> to vector<8x1xf32>
    %cst_684 = arith.constant 3.200000e+01 : f32
    %921 = vector.broadcast %cst_684 : f32 to vector<8x1xf32>
    %922 = arith.divf %920, %921 : vector<8x1xf32>
    %923 = vector.broadcast %915 : vector<8x1xf32> to vector<8x32xf32>
    %924 = arith.subf %672, %923 : vector<8x32xf32>
    %cst_685 = arith.constant 9.99999974E-6 : f32
    %925 = vector.broadcast %cst_685 : f32 to vector<8x1xf32>
    %926 = arith.addf %922, %925 : vector<8x1xf32>
    %927 = math.rsqrt %926 : vector<8x1xf32>
    %928 = vector.broadcast %927 : vector<8x1xf32> to vector<8x32xf32>
    %929 = arith.mulf %924, %928 : vector<8x32xf32>
    %930 = vector.extract_strided_slice %911 {offsets = [0, 0], sizes = [1, 32], strides = [1, 1]} : vector<2x32xf32> to vector<1x32xf32>
    %931 = vector.broadcast %930 : vector<1x32xf32> to vector<8x32xf32>
    %932 = arith.mulf %929, %931 : vector<8x32xf32>
    %933 = vector.extract_strided_slice %911 {offsets = [1, 0], sizes = [1, 32], strides = [1, 1]} : vector<2x32xf32> to vector<1x32xf32>
    %934 = vector.broadcast %933 : vector<1x32xf32> to vector<8x32xf32>
    %935 = arith.addf %932, %934 : vector<8x32xf32>
    %cst_686 = arith.constant 0.000000e+00 : f32
    %936 = vector.broadcast %cst_686 : f32 to vector<8x32xf32>
    %c2_687 = arith.constant 2 : index
    %c0_688 = arith.constant 0 : index
    %c0_689 = arith.constant 0 : index
    %c0_690 = arith.constant 0 : index
    %937 = vector.load %arg5[%c2_687, %c0_688, %c0_689, %c0_690] : memref<3x4x32x8xbf16, #tpu.memory_space<vmem>>, vector<1x1x32x8xbf16>
    %938 = vector.shape_cast %937 : vector<1x1x32x8xbf16> to vector<32x8xbf16>
    %cst_691 = arith.constant dense<0.000000e+00> : vector<8x8xf32>
    %939 = tpu.matmul %909, %938, %cst_691 {dimension_numbers = #tpu.dot_dimension_numbers<[1], [0], [0], [1], [0, 0, 1, 1], [], []>} : vector<8x32xbf16>, vector<32x8xbf16>, vector<8x8xf32> -> vector<8x8xf32>
    %c2_692 = arith.constant 2 : index
    %c0_693 = arith.constant 0 : index
    %c0_694 = arith.constant 0 : index
    %c0_695 = arith.constant 0 : index
    %940 = vector.load %arg6[%c2_692, %c0_693, %c0_694, %c0_695] : memref<3x4x1x8xf32, #tpu.memory_space<vmem>>, vector<1x1x1x8xf32>
    %941 = vector.shape_cast %940 : vector<1x1x1x8xf32> to vector<1x8xf32>
    %942 = vector.broadcast %941 : vector<1x8xf32> to vector<8x8xf32>
    %943 = arith.addf %939, %942 : vector<8x8xf32>
    %c2_696 = arith.constant 2 : index
    %c0_697 = arith.constant 0 : index
    %c0_698 = arith.constant 0 : index
    %c0_699 = arith.constant 0 : index
    %944 = vector.load %arg7[%c2_696, %c0_697, %c0_698, %c0_699] : memref<3x4x32x8xbf16, #tpu.memory_space<vmem>>, vector<1x1x32x8xbf16>
    %945 = vector.shape_cast %944 : vector<1x1x32x8xbf16> to vector<32x8xbf16>
    %cst_700 = arith.constant dense<0.000000e+00> : vector<8x8xf32>
    %946 = tpu.matmul %24, %945, %cst_700 {dimension_numbers = #tpu.dot_dimension_numbers<[1], [0], [0], [1], [0, 0, 1, 1], [], []>} : vector<8x32xbf16>, vector<32x8xbf16>, vector<8x8xf32> -> vector<8x8xf32>
    %c2_701 = arith.constant 2 : index
    %c0_702 = arith.constant 0 : index
    %c0_703 = arith.constant 0 : index
    %c0_704 = arith.constant 0 : index
    %947 = vector.load %arg8[%c2_701, %c0_702, %c0_703, %c0_704] : memref<3x4x1x8xf32, #tpu.memory_space<vmem>>, vector<1x1x1x8xf32>
    %948 = vector.shape_cast %947 : vector<1x1x1x8xf32> to vector<1x8xf32>
    %949 = vector.broadcast %948 : vector<1x8xf32> to vector<8x8xf32>
    %950 = arith.addf %946, %949 : vector<8x8xf32>
    %c2_705 = arith.constant 2 : index
    %c0_706 = arith.constant 0 : index
    %c0_707 = arith.constant 0 : index
    %c0_708 = arith.constant 0 : index
    %951 = vector.load %arg9[%c2_705, %c0_706, %c0_707, %c0_708] : memref<3x4x32x8xbf16, #tpu.memory_space<vmem>>, vector<1x1x32x8xbf16>
    %952 = vector.shape_cast %951 : vector<1x1x32x8xbf16> to vector<32x8xbf16>
    %cst_709 = arith.constant dense<0.000000e+00> : vector<8x8xf32>
    %953 = tpu.matmul %24, %952, %cst_709 {dimension_numbers = #tpu.dot_dimension_numbers<[1], [0], [0], [1], [0, 0, 1, 1], [], []>} : vector<8x32xbf16>, vector<32x8xbf16>, vector<8x8xf32> -> vector<8x8xf32>
    %c2_710 = arith.constant 2 : index
    %c0_711 = arith.constant 0 : index
    %c0_712 = arith.constant 0 : index
    %c0_713 = arith.constant 0 : index
    %954 = vector.load %arg10[%c2_710, %c0_711, %c0_712, %c0_713] : memref<3x4x1x8xf32, #tpu.memory_space<vmem>>, vector<1x1x1x8xf32>
    %955 = vector.shape_cast %954 : vector<1x1x1x8xf32> to vector<1x8xf32>
    %956 = vector.broadcast %955 : vector<1x8xf32> to vector<8x8xf32>
    %957 = arith.addf %953, %956 : vector<8x8xf32>
    %958 = arith.truncf %943 : vector<8x8xf32> to vector<8x8xbf16>
    %959 = arith.truncf %950 : vector<8x8xf32> to vector<8x8xbf16>
    "tpu.trace_start"() <{level = 10 : i32, message = "qd,kd->qk"}> : () -> ()
    %cst_714 = arith.constant dense<0.000000e+00> : vector<8x8xf32>
    %960 = tpu.matmul %958, %959, %cst_714 {dimension_numbers = #tpu.dot_dimension_numbers<[1], [1], [0], [0], [0, 0, 1, 0], [], []>} : vector<8x8xbf16>, vector<8x8xbf16>, vector<8x8xf32> -> vector<8x8xf32>
    "tpu.trace_stop"() : () -> ()
    %cst_715 = arith.constant dense<0xFF800000> : vector<8xf32>
    %961 = vector.multi_reduction <maximumf>, %960, %cst_715 [1] : vector<8x8xf32> to vector<8xf32>
    %962 = vector.shape_cast %961 : vector<8xf32> to vector<8x1xf32>
    %963 = vector.broadcast %962 : vector<8x1xf32> to vector<8x8xf32>
    %964 = arith.subf %960, %963 : vector<8x8xf32>
    %965 = math.exp %964 : vector<8x8xf32>
    %cst_716 = arith.constant dense<0.000000e+00> : vector<8xf32>
    %966 = vector.multi_reduction <add>, %965, %cst_716 [1] : vector<8x8xf32> to vector<8xf32>
    %967 = vector.shape_cast %966 : vector<8xf32> to vector<8x1xf32>
    %968 = vector.broadcast %967 : vector<8x1xf32> to vector<8x8xf32>
    %969 = arith.divf %965, %968 : vector<8x8xf32>
    %970 = arith.truncf %969 : vector<8x8xf32> to vector<8x8xbf16>
    %971 = arith.truncf %957 : vector<8x8xf32> to vector<8x8xbf16>
    %cst_717 = arith.constant dense<0.000000e+00> : vector<8x8xf32>
    %972 = tpu.matmul %970, %971, %cst_717 {dimension_numbers = #tpu.dot_dimension_numbers<[1], [0], [0], [1], [0, 0, 1, 1], [], []>} : vector<8x8xbf16>, vector<8x8xbf16>, vector<8x8xf32> -> vector<8x8xf32>
    %973 = arith.truncf %972 : vector<8x8xf32> to vector<8x8xbf16>
    %c2_718 = arith.constant 2 : index
    %c0_719 = arith.constant 0 : index
    %c0_720 = arith.constant 0 : index
    %c0_721 = arith.constant 0 : index
    %974 = vector.load %arg11[%c2_718, %c0_719, %c0_720, %c0_721] : memref<3x4x8x32xbf16, #tpu.memory_space<vmem>>, vector<1x1x8x32xbf16>
    %975 = vector.shape_cast %974 : vector<1x1x8x32xbf16> to vector<8x32xbf16>
    %cst_722 = arith.constant dense<0.000000e+00> : vector<8x32xf32>
    %976 = tpu.matmul %973, %975, %cst_722 {dimension_numbers = #tpu.dot_dimension_numbers<[1], [0], [0], [1], [0, 0, 1, 1], [], []>} : vector<8x8xbf16>, vector<8x32xbf16>, vector<8x32xf32> -> vector<8x32xf32>
    %977 = arith.addf %936, %976 : vector<8x32xf32>
    %c2_723 = arith.constant 2 : index
    %c1_724 = arith.constant 1 : index
    %c0_725 = arith.constant 0 : index
    %c0_726 = arith.constant 0 : index
    %978 = vector.load %arg5[%c2_723, %c1_724, %c0_725, %c0_726] : memref<3x4x32x8xbf16, #tpu.memory_space<vmem>>, vector<1x1x32x8xbf16>
    %979 = vector.shape_cast %978 : vector<1x1x32x8xbf16> to vector<32x8xbf16>
    %cst_727 = arith.constant dense<0.000000e+00> : vector<8x8xf32>
    %980 = tpu.matmul %909, %979, %cst_727 {dimension_numbers = #tpu.dot_dimension_numbers<[1], [0], [0], [1], [0, 0, 1, 1], [], []>} : vector<8x32xbf16>, vector<32x8xbf16>, vector<8x8xf32> -> vector<8x8xf32>
    %c2_728 = arith.constant 2 : index
    %c1_729 = arith.constant 1 : index
    %c0_730 = arith.constant 0 : index
    %c0_731 = arith.constant 0 : index
    %981 = vector.load %arg6[%c2_728, %c1_729, %c0_730, %c0_731] : memref<3x4x1x8xf32, #tpu.memory_space<vmem>>, vector<1x1x1x8xf32>
    %982 = vector.shape_cast %981 : vector<1x1x1x8xf32> to vector<1x8xf32>
    %983 = vector.broadcast %982 : vector<1x8xf32> to vector<8x8xf32>
    %984 = arith.addf %980, %983 : vector<8x8xf32>
    %c2_732 = arith.constant 2 : index
    %c1_733 = arith.constant 1 : index
    %c0_734 = arith.constant 0 : index
    %c0_735 = arith.constant 0 : index
    %985 = vector.load %arg7[%c2_732, %c1_733, %c0_734, %c0_735] : memref<3x4x32x8xbf16, #tpu.memory_space<vmem>>, vector<1x1x32x8xbf16>
    %986 = vector.shape_cast %985 : vector<1x1x32x8xbf16> to vector<32x8xbf16>
    %cst_736 = arith.constant dense<0.000000e+00> : vector<8x8xf32>
    %987 = tpu.matmul %24, %986, %cst_736 {dimension_numbers = #tpu.dot_dimension_numbers<[1], [0], [0], [1], [0, 0, 1, 1], [], []>} : vector<8x32xbf16>, vector<32x8xbf16>, vector<8x8xf32> -> vector<8x8xf32>
    %c2_737 = arith.constant 2 : index
    %c1_738 = arith.constant 1 : index
    %c0_739 = arith.constant 0 : index
    %c0_740 = arith.constant 0 : index
    %988 = vector.load %arg8[%c2_737, %c1_738, %c0_739, %c0_740] : memref<3x4x1x8xf32, #tpu.memory_space<vmem>>, vector<1x1x1x8xf32>
    %989 = vector.shape_cast %988 : vector<1x1x1x8xf32> to vector<1x8xf32>
    %990 = vector.broadcast %989 : vector<1x8xf32> to vector<8x8xf32>
    %991 = arith.addf %987, %990 : vector<8x8xf32>
    %c2_741 = arith.constant 2 : index
    %c1_742 = arith.constant 1 : index
    %c0_743 = arith.constant 0 : index
    %c0_744 = arith.constant 0 : index
    %992 = vector.load %arg9[%c2_741, %c1_742, %c0_743, %c0_744] : memref<3x4x32x8xbf16, #tpu.memory_space<vmem>>, vector<1x1x32x8xbf16>
    %993 = vector.shape_cast %992 : vector<1x1x32x8xbf16> to vector<32x8xbf16>
    %cst_745 = arith.constant dense<0.000000e+00> : vector<8x8xf32>
    %994 = tpu.matmul %24, %993, %cst_745 {dimension_numbers = #tpu.dot_dimension_numbers<[1], [0], [0], [1], [0, 0, 1, 1], [], []>} : vector<8x32xbf16>, vector<32x8xbf16>, vector<8x8xf32> -> vector<8x8xf32>
    %c2_746 = arith.constant 2 : index
    %c1_747 = arith.constant 1 : index
    %c0_748 = arith.constant 0 : index
    %c0_749 = arith.constant 0 : index
    %995 = vector.load %arg10[%c2_746, %c1_747, %c0_748, %c0_749] : memref<3x4x1x8xf32, #tpu.memory_space<vmem>>, vector<1x1x1x8xf32>
    %996 = vector.shape_cast %995 : vector<1x1x1x8xf32> to vector<1x8xf32>
    %997 = vector.broadcast %996 : vector<1x8xf32> to vector<8x8xf32>
    %998 = arith.addf %994, %997 : vector<8x8xf32>
    %999 = arith.truncf %984 : vector<8x8xf32> to vector<8x8xbf16>
    %1000 = arith.truncf %991 : vector<8x8xf32> to vector<8x8xbf16>
    "tpu.trace_start"() <{level = 10 : i32, message = "qd,kd->qk"}> : () -> ()
    %cst_750 = arith.constant dense<0.000000e+00> : vector<8x8xf32>
    %1001 = tpu.matmul %999, %1000, %cst_750 {dimension_numbers = #tpu.dot_dimension_numbers<[1], [1], [0], [0], [0, 0, 1, 0], [], []>} : vector<8x8xbf16>, vector<8x8xbf16>, vector<8x8xf32> -> vector<8x8xf32>
    "tpu.trace_stop"() : () -> ()
    %cst_751 = arith.constant dense<0xFF800000> : vector<8xf32>
    %1002 = vector.multi_reduction <maximumf>, %1001, %cst_751 [1] : vector<8x8xf32> to vector<8xf32>
    %1003 = vector.shape_cast %1002 : vector<8xf32> to vector<8x1xf32>
    %1004 = vector.broadcast %1003 : vector<8x1xf32> to vector<8x8xf32>
    %1005 = arith.subf %1001, %1004 : vector<8x8xf32>
    %1006 = math.exp %1005 : vector<8x8xf32>
    %cst_752 = arith.constant dense<0.000000e+00> : vector<8xf32>
    %1007 = vector.multi_reduction <add>, %1006, %cst_752 [1] : vector<8x8xf32> to vector<8xf32>
    %1008 = vector.shape_cast %1007 : vector<8xf32> to vector<8x1xf32>
    %1009 = vector.broadcast %1008 : vector<8x1xf32> to vector<8x8xf32>
    %1010 = arith.divf %1006, %1009 : vector<8x8xf32>
    %1011 = arith.truncf %1010 : vector<8x8xf32> to vector<8x8xbf16>
    %1012 = arith.truncf %998 : vector<8x8xf32> to vector<8x8xbf16>
    %cst_753 = arith.constant dense<0.000000e+00> : vector<8x8xf32>
    %1013 = tpu.matmul %1011, %1012, %cst_753 {dimension_numbers = #tpu.dot_dimension_numbers<[1], [0], [0], [1], [0, 0, 1, 1], [], []>} : vector<8x8xbf16>, vector<8x8xbf16>, vector<8x8xf32> -> vector<8x8xf32>
    %1014 = arith.truncf %1013 : vector<8x8xf32> to vector<8x8xbf16>
    %c2_754 = arith.constant 2 : index
    %c1_755 = arith.constant 1 : index
    %c0_756 = arith.constant 0 : index
    %c0_757 = arith.constant 0 : index
    %1015 = vector.load %arg11[%c2_754, %c1_755, %c0_756, %c0_757] : memref<3x4x8x32xbf16, #tpu.memory_space<vmem>>, vector<1x1x8x32xbf16>
    %1016 = vector.shape_cast %1015 : vector<1x1x8x32xbf16> to vector<8x32xbf16>
    %cst_758 = arith.constant dense<0.000000e+00> : vector<8x32xf32>
    %1017 = tpu.matmul %1014, %1016, %cst_758 {dimension_numbers = #tpu.dot_dimension_numbers<[1], [0], [0], [1], [0, 0, 1, 1], [], []>} : vector<8x8xbf16>, vector<8x32xbf16>, vector<8x32xf32> -> vector<8x32xf32>
    %1018 = arith.addf %977, %1017 : vector<8x32xf32>
    %c2_759 = arith.constant 2 : index
    %c2_760 = arith.constant 2 : index
    %c0_761 = arith.constant 0 : index
    %c0_762 = arith.constant 0 : index
    %1019 = vector.load %arg5[%c2_759, %c2_760, %c0_761, %c0_762] : memref<3x4x32x8xbf16, #tpu.memory_space<vmem>>, vector<1x1x32x8xbf16>
    %1020 = vector.shape_cast %1019 : vector<1x1x32x8xbf16> to vector<32x8xbf16>
    %cst_763 = arith.constant dense<0.000000e+00> : vector<8x8xf32>
    %1021 = tpu.matmul %909, %1020, %cst_763 {dimension_numbers = #tpu.dot_dimension_numbers<[1], [0], [0], [1], [0, 0, 1, 1], [], []>} : vector<8x32xbf16>, vector<32x8xbf16>, vector<8x8xf32> -> vector<8x8xf32>
    %c2_764 = arith.constant 2 : index
    %c2_765 = arith.constant 2 : index
    %c0_766 = arith.constant 0 : index
    %c0_767 = arith.constant 0 : index
    %1022 = vector.load %arg6[%c2_764, %c2_765, %c0_766, %c0_767] : memref<3x4x1x8xf32, #tpu.memory_space<vmem>>, vector<1x1x1x8xf32>
    %1023 = vector.shape_cast %1022 : vector<1x1x1x8xf32> to vector<1x8xf32>
    %1024 = vector.broadcast %1023 : vector<1x8xf32> to vector<8x8xf32>
    %1025 = arith.addf %1021, %1024 : vector<8x8xf32>
    %c2_768 = arith.constant 2 : index
    %c2_769 = arith.constant 2 : index
    %c0_770 = arith.constant 0 : index
    %c0_771 = arith.constant 0 : index
    %1026 = vector.load %arg7[%c2_768, %c2_769, %c0_770, %c0_771] : memref<3x4x32x8xbf16, #tpu.memory_space<vmem>>, vector<1x1x32x8xbf16>
    %1027 = vector.shape_cast %1026 : vector<1x1x32x8xbf16> to vector<32x8xbf16>
    %cst_772 = arith.constant dense<0.000000e+00> : vector<8x8xf32>
    %1028 = tpu.matmul %24, %1027, %cst_772 {dimension_numbers = #tpu.dot_dimension_numbers<[1], [0], [0], [1], [0, 0, 1, 1], [], []>} : vector<8x32xbf16>, vector<32x8xbf16>, vector<8x8xf32> -> vector<8x8xf32>
    %c2_773 = arith.constant 2 : index
    %c2_774 = arith.constant 2 : index
    %c0_775 = arith.constant 0 : index
    %c0_776 = arith.constant 0 : index
    %1029 = vector.load %arg8[%c2_773, %c2_774, %c0_775, %c0_776] : memref<3x4x1x8xf32, #tpu.memory_space<vmem>>, vector<1x1x1x8xf32>
    %1030 = vector.shape_cast %1029 : vector<1x1x1x8xf32> to vector<1x8xf32>
    %1031 = vector.broadcast %1030 : vector<1x8xf32> to vector<8x8xf32>
    %1032 = arith.addf %1028, %1031 : vector<8x8xf32>
    %c2_777 = arith.constant 2 : index
    %c2_778 = arith.constant 2 : index
    %c0_779 = arith.constant 0 : index
    %c0_780 = arith.constant 0 : index
    %1033 = vector.load %arg9[%c2_777, %c2_778, %c0_779, %c0_780] : memref<3x4x32x8xbf16, #tpu.memory_space<vmem>>, vector<1x1x32x8xbf16>
    %1034 = vector.shape_cast %1033 : vector<1x1x32x8xbf16> to vector<32x8xbf16>
    %cst_781 = arith.constant dense<0.000000e+00> : vector<8x8xf32>
    %1035 = tpu.matmul %24, %1034, %cst_781 {dimension_numbers = #tpu.dot_dimension_numbers<[1], [0], [0], [1], [0, 0, 1, 1], [], []>} : vector<8x32xbf16>, vector<32x8xbf16>, vector<8x8xf32> -> vector<8x8xf32>
    %c2_782 = arith.constant 2 : index
    %c2_783 = arith.constant 2 : index
    %c0_784 = arith.constant 0 : index
    %c0_785 = arith.constant 0 : index
    %1036 = vector.load %arg10[%c2_782, %c2_783, %c0_784, %c0_785] : memref<3x4x1x8xf32, #tpu.memory_space<vmem>>, vector<1x1x1x8xf32>
    %1037 = vector.shape_cast %1036 : vector<1x1x1x8xf32> to vector<1x8xf32>
    %1038 = vector.broadcast %1037 : vector<1x8xf32> to vector<8x8xf32>
    %1039 = arith.addf %1035, %1038 : vector<8x8xf32>
    %1040 = arith.truncf %1025 : vector<8x8xf32> to vector<8x8xbf16>
    %1041 = arith.truncf %1032 : vector<8x8xf32> to vector<8x8xbf16>
    "tpu.trace_start"() <{level = 10 : i32, message = "qd,kd->qk"}> : () -> ()
    %cst_786 = arith.constant dense<0.000000e+00> : vector<8x8xf32>
    %1042 = tpu.matmul %1040, %1041, %cst_786 {dimension_numbers = #tpu.dot_dimension_numbers<[1], [1], [0], [0], [0, 0, 1, 0], [], []>} : vector<8x8xbf16>, vector<8x8xbf16>, vector<8x8xf32> -> vector<8x8xf32>
    "tpu.trace_stop"() : () -> ()
    %cst_787 = arith.constant dense<0xFF800000> : vector<8xf32>
    %1043 = vector.multi_reduction <maximumf>, %1042, %cst_787 [1] : vector<8x8xf32> to vector<8xf32>
    %1044 = vector.shape_cast %1043 : vector<8xf32> to vector<8x1xf32>
    %1045 = vector.broadcast %1044 : vector<8x1xf32> to vector<8x8xf32>
    %1046 = arith.subf %1042, %1045 : vector<8x8xf32>
    %1047 = math.exp %1046 : vector<8x8xf32>
    %cst_788 = arith.constant dense<0.000000e+00> : vector<8xf32>
    %1048 = vector.multi_reduction <add>, %1047, %cst_788 [1] : vector<8x8xf32> to vector<8xf32>
    %1049 = vector.shape_cast %1048 : vector<8xf32> to vector<8x1xf32>
    %1050 = vector.broadcast %1049 : vector<8x1xf32> to vector<8x8xf32>
    %1051 = arith.divf %1047, %1050 : vector<8x8xf32>
    %1052 = arith.truncf %1051 : vector<8x8xf32> to vector<8x8xbf16>
    %1053 = arith.truncf %1039 : vector<8x8xf32> to vector<8x8xbf16>
    %cst_789 = arith.constant dense<0.000000e+00> : vector<8x8xf32>
    %1054 = tpu.matmul %1052, %1053, %cst_789 {dimension_numbers = #tpu.dot_dimension_numbers<[1], [0], [0], [1], [0, 0, 1, 1], [], []>} : vector<8x8xbf16>, vector<8x8xbf16>, vector<8x8xf32> -> vector<8x8xf32>
    %1055 = arith.truncf %1054 : vector<8x8xf32> to vector<8x8xbf16>
    %c2_790 = arith.constant 2 : index
    %c2_791 = arith.constant 2 : index
    %c0_792 = arith.constant 0 : index
    %c0_793 = arith.constant 0 : index
    %1056 = vector.load %arg11[%c2_790, %c2_791, %c0_792, %c0_793] : memref<3x4x8x32xbf16, #tpu.memory_space<vmem>>, vector<1x1x8x32xbf16>
    %1057 = vector.shape_cast %1056 : vector<1x1x8x32xbf16> to vector<8x32xbf16>
    %cst_794 = arith.constant dense<0.000000e+00> : vector<8x32xf32>
    %1058 = tpu.matmul %1055, %1057, %cst_794 {dimension_numbers = #tpu.dot_dimension_numbers<[1], [0], [0], [1], [0, 0, 1, 1], [], []>} : vector<8x8xbf16>, vector<8x32xbf16>, vector<8x32xf32> -> vector<8x32xf32>
    %1059 = arith.addf %1018, %1058 : vector<8x32xf32>
    %c2_795 = arith.constant 2 : index
    %c3_796 = arith.constant 3 : index
    %c0_797 = arith.constant 0 : index
    %c0_798 = arith.constant 0 : index
    %1060 = vector.load %arg5[%c2_795, %c3_796, %c0_797, %c0_798] : memref<3x4x32x8xbf16, #tpu.memory_space<vmem>>, vector<1x1x32x8xbf16>
    %1061 = vector.shape_cast %1060 : vector<1x1x32x8xbf16> to vector<32x8xbf16>
    %cst_799 = arith.constant dense<0.000000e+00> : vector<8x8xf32>
    %1062 = tpu.matmul %909, %1061, %cst_799 {dimension_numbers = #tpu.dot_dimension_numbers<[1], [0], [0], [1], [0, 0, 1, 1], [], []>} : vector<8x32xbf16>, vector<32x8xbf16>, vector<8x8xf32> -> vector<8x8xf32>
    %c2_800 = arith.constant 2 : index
    %c3_801 = arith.constant 3 : index
    %c0_802 = arith.constant 0 : index
    %c0_803 = arith.constant 0 : index
    %1063 = vector.load %arg6[%c2_800, %c3_801, %c0_802, %c0_803] : memref<3x4x1x8xf32, #tpu.memory_space<vmem>>, vector<1x1x1x8xf32>
    %1064 = vector.shape_cast %1063 : vector<1x1x1x8xf32> to vector<1x8xf32>
    %1065 = vector.broadcast %1064 : vector<1x8xf32> to vector<8x8xf32>
    %1066 = arith.addf %1062, %1065 : vector<8x8xf32>
    %c2_804 = arith.constant 2 : index
    %c3_805 = arith.constant 3 : index
    %c0_806 = arith.constant 0 : index
    %c0_807 = arith.constant 0 : index
    %1067 = vector.load %arg7[%c2_804, %c3_805, %c0_806, %c0_807] : memref<3x4x32x8xbf16, #tpu.memory_space<vmem>>, vector<1x1x32x8xbf16>
    %1068 = vector.shape_cast %1067 : vector<1x1x32x8xbf16> to vector<32x8xbf16>
    %cst_808 = arith.constant dense<0.000000e+00> : vector<8x8xf32>
    %1069 = tpu.matmul %24, %1068, %cst_808 {dimension_numbers = #tpu.dot_dimension_numbers<[1], [0], [0], [1], [0, 0, 1, 1], [], []>} : vector<8x32xbf16>, vector<32x8xbf16>, vector<8x8xf32> -> vector<8x8xf32>
    %c2_809 = arith.constant 2 : index
    %c3_810 = arith.constant 3 : index
    %c0_811 = arith.constant 0 : index
    %c0_812 = arith.constant 0 : index
    %1070 = vector.load %arg8[%c2_809, %c3_810, %c0_811, %c0_812] : memref<3x4x1x8xf32, #tpu.memory_space<vmem>>, vector<1x1x1x8xf32>
    %1071 = vector.shape_cast %1070 : vector<1x1x1x8xf32> to vector<1x8xf32>
    %1072 = vector.broadcast %1071 : vector<1x8xf32> to vector<8x8xf32>
    %1073 = arith.addf %1069, %1072 : vector<8x8xf32>
    %c2_813 = arith.constant 2 : index
    %c3_814 = arith.constant 3 : index
    %c0_815 = arith.constant 0 : index
    %c0_816 = arith.constant 0 : index
    %1074 = vector.load %arg9[%c2_813, %c3_814, %c0_815, %c0_816] : memref<3x4x32x8xbf16, #tpu.memory_space<vmem>>, vector<1x1x32x8xbf16>
    %1075 = vector.shape_cast %1074 : vector<1x1x32x8xbf16> to vector<32x8xbf16>
    %cst_817 = arith.constant dense<0.000000e+00> : vector<8x8xf32>
    %1076 = tpu.matmul %24, %1075, %cst_817 {dimension_numbers = #tpu.dot_dimension_numbers<[1], [0], [0], [1], [0, 0, 1, 1], [], []>} : vector<8x32xbf16>, vector<32x8xbf16>, vector<8x8xf32> -> vector<8x8xf32>
    %c2_818 = arith.constant 2 : index
    %c3_819 = arith.constant 3 : index
    %c0_820 = arith.constant 0 : index
    %c0_821 = arith.constant 0 : index
    %1077 = vector.load %arg10[%c2_818, %c3_819, %c0_820, %c0_821] : memref<3x4x1x8xf32, #tpu.memory_space<vmem>>, vector<1x1x1x8xf32>
    %1078 = vector.shape_cast %1077 : vector<1x1x1x8xf32> to vector<1x8xf32>
    %1079 = vector.broadcast %1078 : vector<1x8xf32> to vector<8x8xf32>
    %1080 = arith.addf %1076, %1079 : vector<8x8xf32>
    %1081 = arith.truncf %1066 : vector<8x8xf32> to vector<8x8xbf16>
    %1082 = arith.truncf %1073 : vector<8x8xf32> to vector<8x8xbf16>
    "tpu.trace_start"() <{level = 10 : i32, message = "qd,kd->qk"}> : () -> ()
    %cst_822 = arith.constant dense<0.000000e+00> : vector<8x8xf32>
    %1083 = tpu.matmul %1081, %1082, %cst_822 {dimension_numbers = #tpu.dot_dimension_numbers<[1], [1], [0], [0], [0, 0, 1, 0], [], []>} : vector<8x8xbf16>, vector<8x8xbf16>, vector<8x8xf32> -> vector<8x8xf32>
    "tpu.trace_stop"() : () -> ()
    %cst_823 = arith.constant dense<0xFF800000> : vector<8xf32>
    %1084 = vector.multi_reduction <maximumf>, %1083, %cst_823 [1] : vector<8x8xf32> to vector<8xf32>
    %1085 = vector.shape_cast %1084 : vector<8xf32> to vector<8x1xf32>
    %1086 = vector.broadcast %1085 : vector<8x1xf32> to vector<8x8xf32>
    %1087 = arith.subf %1083, %1086 : vector<8x8xf32>
    %1088 = math.exp %1087 : vector<8x8xf32>
    %cst_824 = arith.constant dense<0.000000e+00> : vector<8xf32>
    %1089 = vector.multi_reduction <add>, %1088, %cst_824 [1] : vector<8x8xf32> to vector<8xf32>
    %1090 = vector.shape_cast %1089 : vector<8xf32> to vector<8x1xf32>
    %1091 = vector.broadcast %1090 : vector<8x1xf32> to vector<8x8xf32>
    %1092 = arith.divf %1088, %1091 : vector<8x8xf32>
    %1093 = arith.truncf %1092 : vector<8x8xf32> to vector<8x8xbf16>
    %1094 = arith.truncf %1080 : vector<8x8xf32> to vector<8x8xbf16>
    %cst_825 = arith.constant dense<0.000000e+00> : vector<8x8xf32>
    %1095 = tpu.matmul %1093, %1094, %cst_825 {dimension_numbers = #tpu.dot_dimension_numbers<[1], [0], [0], [1], [0, 0, 1, 1], [], []>} : vector<8x8xbf16>, vector<8x8xbf16>, vector<8x8xf32> -> vector<8x8xf32>
    %1096 = arith.truncf %1095 : vector<8x8xf32> to vector<8x8xbf16>
    %c2_826 = arith.constant 2 : index
    %c3_827 = arith.constant 3 : index
    %c0_828 = arith.constant 0 : index
    %c0_829 = arith.constant 0 : index
    %1097 = vector.load %arg11[%c2_826, %c3_827, %c0_828, %c0_829] : memref<3x4x8x32xbf16, #tpu.memory_space<vmem>>, vector<1x1x8x32xbf16>
    %1098 = vector.shape_cast %1097 : vector<1x1x8x32xbf16> to vector<8x32xbf16>
    %cst_830 = arith.constant dense<0.000000e+00> : vector<8x32xf32>
    %1099 = tpu.matmul %1096, %1098, %cst_830 {dimension_numbers = #tpu.dot_dimension_numbers<[1], [0], [0], [1], [0, 0, 1, 1], [], []>} : vector<8x8xbf16>, vector<8x32xbf16>, vector<8x32xf32> -> vector<8x32xf32>
    %1100 = arith.addf %1059, %1099 : vector<8x32xf32>
    %c2_831 = arith.constant 2 : index
    %c0_832 = arith.constant 0 : index
    %c0_833 = arith.constant 0 : index
    %1101 = vector.load %arg12[%c2_831, %c0_832, %c0_833] : memref<3x1x32xf32, #tpu.memory_space<vmem>>, vector<1x1x32xf32>
    %1102 = vector.shape_cast %1101 : vector<1x1x32xf32> to vector<1x32xf32>
    %1103 = vector.broadcast %1102 : vector<1x32xf32> to vector<8x32xf32>
    %1104 = arith.addf %1100, %1103 : vector<8x32xf32>
    %1105 = arith.addf %935, %1104 : vector<8x32xf32>
    %c0_834 = arith.constant 0 : index
    %c0_835 = arith.constant 0 : index
    %c0_836 = arith.constant 0 : index
    %1106 = vector.load %arg25[%c0_834, %c0_835, %c0_836] : memref<1x8x32xf32, #tpu.memory_space<vmem>>, vector<1x8x32xf32>
    %1107 = vector.shape_cast %1106 : vector<1x8x32xf32> to vector<8x32xf32>
    %1108 = vector.shape_cast %1105 : vector<8x32xf32> to vector<1x8x32xf32>
    tpu.vector_store %arg25[%c0_834, %c0_835, %c0_836], %1108 {strides = array<i32>} : memref<1x8x32xf32, #tpu.memory_space<vmem>>, vector<1x8x32xf32>,
    %c0_837 = arith.constant 0 : index
    %c0_838 = arith.constant 0 : index
    %c0_839 = arith.constant 0 : index
    %1109 = vector.load %arg26[%c0_837, %c0_838, %c0_839] : memref<1x8x32xf32, #tpu.memory_space<vmem>>, vector<1x8x32xf32>
    %1110 = vector.shape_cast %1109 : vector<1x8x32xf32> to vector<8x32xf32>
    %1111 = vector.shape_cast %890 : vector<8x32xf32> to vector<1x8x32xf32>
    tpu.vector_store %arg26[%c0_837, %c0_838, %c0_839], %1111 {strides = array<i32>} : memref<1x8x32xf32, #tpu.memory_space<vmem>>, vector<1x8x32xf32>,
    return
  }
  func.func @transform_0(%arg0: i32) -> (i32, i32, i32) {
    %c0_i32 = arith.constant 0 : i32
    %c0_i32_0 = arith.constant 0 : i32
    %c0_i32_1 = arith.constant 0 : i32
    return %arg0, %c0_i32, %c0_i32_0 : i32, i32, i32
  }
  func.func @transform_1(%arg0: i32) -> (i32, i32, i32) {
    %c0_i32 = arith.constant 0 : i32
    %c0_i32_0 = arith.constant 0 : i32
    %c0_i32_1 = arith.constant 0 : i32
    return %arg0, %c0_i32, %c0_i32_0 : i32, i32, i32
  }
  func.func @transform_2(%arg0: i32) -> (i32, i32, i32) {
    %c0_i32 = arith.constant 0 : i32
    %c0_i32_0 = arith.constant 0 : i32
    %c0_i32_1 = arith.constant 0 : i32
    return %arg0, %c0_i32, %c0_i32_0 : i32, i32, i32
  }
  func.func @transform_3(%arg0: i32) -> (i32, i32, i32) {
    %c0_i32 = arith.constant 0 : i32
    %c0_i32_0 = arith.constant 0 : i32
    %c0_i32_1 = arith.constant 0 : i32
    %c0_i32_2 = arith.constant 0 : i32
    return %c0_i32, %c0_i32_0, %c0_i32_1 : i32, i32, i32
  }
  func.func @transform_4(%arg0: i32) -> (i32, i32, i32, i32) {
    %c0_i32 = arith.constant 0 : i32
    %c0_i32_0 = arith.constant 0 : i32
    %c0_i32_1 = arith.constant 0 : i32
    %c0_i32_2 = arith.constant 0 : i32
    %c0_i32_3 = arith.constant 0 : i32
    return %c0_i32, %c0_i32_0, %c0_i32_1, %c0_i32_2 : i32, i32, i32, i32
  }
  func.func @transform_5(%arg0: i32) -> (i32, i32, i32, i32) {
    %c0_i32 = arith.constant 0 : i32
    %c0_i32_0 = arith.constant 0 : i32
    %c0_i32_1 = arith.constant 0 : i32
    %c0_i32_2 = arith.constant 0 : i32
    %c0_i32_3 = arith.constant 0 : i32
    return %c0_i32, %c0_i32_0, %c0_i32_1, %c0_i32_2 : i32, i32, i32, i32
  }
  func.func @transform_6(%arg0: i32) -> (i32, i32, i32, i32) {
    %c0_i32 = arith.constant 0 : i32
    %c0_i32_0 = arith.constant 0 : i32
    %c0_i32_1 = arith.constant 0 : i32
    %c0_i32_2 = arith.constant 0 : i32
    %c0_i32_3 = arith.constant 0 : i32
    return %c0_i32, %c0_i32_0, %c0_i32_1, %c0_i32_2 : i32, i32, i32, i32
  }
  func.func @transform_7(%arg0: i32) -> (i32, i32, i32, i32) {
    %c0_i32 = arith.constant 0 : i32
    %c0_i32_0 = arith.constant 0 : i32
    %c0_i32_1 = arith.constant 0 : i32
    %c0_i32_2 = arith.constant 0 : i32
    %c0_i32_3 = arith.constant 0 : i32
    return %c0_i32, %c0_i32_0, %c0_i32_1, %c0_i32_2 : i32, i32, i32, i32
  }
  func.func @transform_8(%arg0: i32) -> (i32, i32, i32, i32) {
    %c0_i32 = arith.constant 0 : i32
    %c0_i32_0 = arith.constant 0 : i32
    %c0_i32_1 = arith.constant 0 : i32
    %c0_i32_2 = arith.constant 0 : i32
    %c0_i32_3 = arith.constant 0 : i32
    return %c0_i32, %c0_i32_0, %c0_i32_1, %c0_i32_2 : i32, i32, i32, i32
  }
  func.func @transform_9(%arg0: i32) -> (i32, i32, i32, i32) {
    %c0_i32 = arith.constant 0 : i32
    %c0_i32_0 = arith.constant 0 : i32
    %c0_i32_1 = arith.constant 0 : i32
    %c0_i32_2 = arith.constant 0 : i32
    %c0_i32_3 = arith.constant 0 : i32
    return %c0_i32, %c0_i32_0, %c0_i32_1, %c0_i32_2 : i32, i32, i32, i32
  }
  func.func @transform_10(%arg0: i32) -> (i32, i32, i32, i32) {
    %c0_i32 = arith.constant 0 : i32
    %c0_i32_0 = arith.constant 0 : i32
    %c0_i32_1 = arith.constant 0 : i32
    %c0_i32_2 = arith.constant 0 : i32
    %c0_i32_3 = arith.constant 0 : i32
    return %c0_i32, %c0_i32_0, %c0_i32_1, %c0_i32_2 : i32, i32, i32, i32
  }
  func.func @transform_11(%arg0: i32) -> (i32, i32, i32) {
    %c0_i32 = arith.constant 0 : i32
    %c0_i32_0 = arith.constant 0 : i32
    %c0_i32_1 = arith.constant 0 : i32
    %c0_i32_2 = arith.constant 0 : i32
    return %c0_i32, %c0_i32_0, %c0_i32_1 : i32, i32, i32
  }
  func.func @transform_12(%arg0: i32) -> (i32, i32, i32, i32) {
    %c0_i32 = arith.constant 0 : i32
    %c0_i32_0 = arith.constant 0 : i32
    %c0_i32_1 = arith.constant 0 : i32
    %c0_i32_2 = arith.constant 0 : i32
    %c0_i32_3 = arith.constant 0 : i32
    return %c0_i32, %c0_i32_0, %c0_i32_1, %c0_i32_2 : i32, i32, i32, i32
  }
  func.func @transform_13(%arg0: i32) -> (i32, i32, i32, i32) {
    %c0_i32 = arith.constant 0 : i32
    %c0_i32_0 = arith.constant 0 : i32
    %c0_i32_1 = arith.constant 0 : i32
    %c0_i32_2 = arith.constant 0 : i32
    %c0_i32_3 = arith.constant 0 : i32
    return %c0_i32, %c0_i32_0, %c0_i32_1, %c0_i32_2 : i32, i32, i32, i32
  }
  func.func @transform_14(%arg0: i32) -> (i32, i32, i32, i32) {
    %c0_i32 = arith.constant 0 : i32
    %c0_i32_0 = arith.constant 0 : i32
    %c0_i32_1 = arith.constant 0 : i32
    %c0_i32_2 = arith.constant 0 : i32
    %c0_i32_3 = arith.constant 0 : i32
    return %c0_i32, %c0_i32_0, %c0_i32_1, %c0_i32_2 : i32, i32, i32, i32
  }
  func.func @transform_15(%arg0: i32) -> (i32, i32, i32, i32) {
    %c0_i32 = arith.constant 0 : i32
    %c0_i32_0 = arith.constant 0 : i32
    %c0_i32_1 = arith.constant 0 : i32
    %c0_i32_2 = arith.constant 0 : i32
    %c0_i32_3 = arith.constant 0 : i32
    return %c0_i32, %c0_i32_0, %c0_i32_1, %c0_i32_2 : i32, i32, i32, i32
  }
  func.func @transform_16(%arg0: i32) -> (i32, i32, i32, i32) {
    %c0_i32 = arith.constant 0 : i32
    %c0_i32_0 = arith.constant 0 : i32
    %c0_i32_1 = arith.constant 0 : i32
    %c0_i32_2 = arith.constant 0 : i32
    %c0_i32_3 = arith.constant 0 : i32
    return %c0_i32, %c0_i32_0, %c0_i32_1, %c0_i32_2 : i32, i32, i32, i32
  }
  func.func @transform_17(%arg0: i32) -> (i32, i32, i32, i32) {
    %c0_i32 = arith.constant 0 : i32
    %c0_i32_0 = arith.constant 0 : i32
    %c0_i32_1 = arith.constant 0 : i32
    %c0_i32_2 = arith.constant 0 : i32
    %c0_i32_3 = arith.constant 0 : i32
    return %c0_i32, %c0_i32_0, %c0_i32_1, %c0_i32_2 : i32, i32, i32, i32
  }
  func.func @transform_18(%arg0: i32) -> (i32, i32, i32, i32) {
    %c0_i32 = arith.constant 0 : i32
    %c0_i32_0 = arith.constant 0 : i32
    %c0_i32_1 = arith.constant 0 : i32
    %c0_i32_2 = arith.constant 0 : i32
    %c0_i32_3 = arith.constant 0 : i32
    return %c0_i32, %c0_i32_0, %c0_i32_1, %c0_i32_2 : i32, i32, i32, i32
  }
  func.func @transform_19(%arg0: i32) -> (i32, i32, i32) {
    %c0_i32 = arith.constant 0 : i32
    %c0_i32_0 = arith.constant 0 : i32
    %c0_i32_1 = arith.constant 0 : i32
    %c0_i32_2 = arith.constant 0 : i32
    return %c0_i32, %c0_i32_0, %c0_i32_1 : i32, i32, i32
  }
  func.func @transform_20(%arg0: i32) -> (i32, i32, i32) {
    %c0_i32 = arith.constant 0 : i32
    %c0_i32_0 = arith.constant 0 : i32
    %c0_i32_1 = arith.constant 0 : i32
    %c0_i32_2 = arith.constant 0 : i32
    return %c0_i32, %c0_i32_0, %c0_i32_1 : i32, i32, i32
  }
  func.func @transform_21(%arg0: i32) -> (i32, i32, i32) {
    %c0_i32 = arith.constant 0 : i32
    %c0_i32_0 = arith.constant 0 : i32
    %c0_i32_1 = arith.constant 0 : i32
    %c0_i32_2 = arith.constant 0 : i32
    return %c0_i32, %c0_i32_0, %c0_i32_1 : i32, i32, i32
  }
  func.func @transform_22(%arg0: i32) -> (i32, i32, i32) {
    %c0_i32 = arith.constant 0 : i32
    %c0_i32_0 = arith.constant 0 : i32
    %c0_i32_1 = arith.constant 0 : i32
    %c0_i32_2 = arith.constant 0 : i32
    return %c0_i32, %c0_i32_0, %c0_i32_1 : i32, i32, i32
  }
  func.func @transform_23(%arg0: i32) -> (i32, i32, i32) {
    %c0_i32 = arith.constant 0 : i32
    %c0_i32_0 = arith.constant 0 : i32
    %c0_i32_1 = arith.constant 0 : i32
    %c0_i32_2 = arith.constant 0 : i32
    return %c0_i32, %c0_i32_0, %c0_i32_1 : i32, i32, i32
  }
  func.func @transform_24(%arg0: i32) -> (i32, i32, i32) {
    %c0_i32 = arith.constant 0 : i32
    %c0_i32_0 = arith.constant 0 : i32
    %c0_i32_1 = arith.constant 0 : i32
    return %arg0, %c0_i32, %c0_i32_0 : i32, i32, i32
  }
  func.func @transform_25(%arg0: i32) -> (i32, i32, i32) {
    %c0_i32 = arith.constant 0 : i32
    %c0_i32_0 = arith.constant 0 : i32
    %c0_i32_1 = arith.constant 0 : i32
    return %arg0, %c0_i32, %c0_i32_0 : i32, i32, i32
  }
}

</mosaic_0001>

<bundles_post_ra>
// kernel: tpu_custom_call.1
= control target key start
LH: loop header
LB: loop body
LE: loop exit
PB: predicated region body
PF: predicated region fallthrough
CT: control target
= control target key end

     0   :  { %s8182_s0 = inlined_call_operand.vmem [shape: f32[2,8,32], index: 0, kind: input, shape index: {}]   ;;  %s8183_s1 = inlined_call_operand.vmem [shape: f32[2,8,32], index: 1, kind: input, shape index: {}]   ;;  %s8184_s2 = inlined_call_operand.vmem [shape: f32[2,8,32], index: 2, kind: input, shape index: {}]   ;;  %s8185_s3 = inlined_call_operand.vmem [shape: f32[3,2,32], index: 3, kind: input, shape index: {}]   ;;  %s8186_s4 = inlined_call_operand.vmem [shape: bf16[3,4,32,8], index: 4, kind: input, shape index: {}]   ;;  %s8187_s5 = inlined_call_operand.vmem [shape: f32[3,4,1,8], index: 5, kind: input, shape index: {}]   ;;  %s8188_s6 = inlined_call_operand.vmem [shape: bf16[3,4,32,8], index: 6, kind: input, shape index: {}]   ;;  %s8189_s7 = inlined_call_operand.vmem [shape: f32[3,4,1,8], index: 7, kind: input, shape index: {}]   ;;  %s8190_s8 = inlined_call_operand.vmem [shape: bf16[3,4,32,8], index: 8, kind: input, shape index: {}]   ;;  %s8191_s9 = inlined_call_operand.vmem [shape: f32[3,4,1,8], index: 9, kind: input, shape index: {}]   ;;  %s8192_s10 = inlined_call_operand.vmem [shape: bf16[3,4,8,32], index: 10, kind: input, shape index: {}]   ;;  %s8193_s11 = inlined_call_operand.vmem [shape: f32[3,1,32], index: 11, kind: input, shape index: {}]   ;;  %s8194_s12 = inlined_call_operand.vmem [shape: bf16[2,4,32,8], index: 12, kind: input, shape index: {}]   ;;  %s8195_s13 = inlined_call_operand.vmem [shape: f32[2,4,1,8], index: 13, kind: input, shape index: {}]   ;;  %s8196_s14 = inlined_call_operand.vmem [shape: bf16[2,4,32,8], index: 14, kind: input, shape index: {}]   ;;  %s8197_s15 = inlined_call_operand.vmem [shape: f32[2,4,1,8], index: 15, kind: input, shape index: {}]   ;;  %s8198_s16 = inlined_call_operand.vmem [shape: bf16[2,4,32,8], index: 16, kind: input, shape index: {}]   ;;  %s8199_s17 = inlined_call_operand.vmem [shape: f32[2,4,1,8], index: 17, kind: input, shape index: {}]   ;;  %s8200_s18 = inlined_call_operand.vmem [shape: bf16[2,4,8,32], index: 18, kind: input, shape index: {}]   ;;  %s8201_s19 = inlined_call_operand.vmem [shape: f32[2,1,32], index: 19, kind: input, shape index: {}]   ;;  %s8202_s20 = inlined_call_operand.vmem [shape: bf16[2,32,128], index: 20, kind: input, shape index: {}]   ;;  %s8203_s21 = inlined_call_operand.vmem [shape: f32[2,1,128], index: 21, kind: input, shape index: {}]   ;;  %s8204_s22 = inlined_call_operand.vmem [shape: bf16[2,128,32], index: 22, kind: input, shape index: {}]   ;;  %s8205_s23 = inlined_call_operand.vmem [shape: f32[2,1,32], index: 23, kind: input, shape index: {}]   ;;  %s8206_s24 = inlined_call_operand.hbm [shape: f32[2,8,32], index: 24, kind: output, shape index: {0}]   ;;  %s8207_s25 = inlined_call_operand.hbm [shape: f32[2,8,32], index: 25, kind: output, shape index: {1}]  }
   0x1   :  { %8232 = sst [smem:[#allocation16_spill]] %s8182_s0 }
   0x2   :  { %8233 = sst [smem:[#allocation17_spill]] %s8183_s1 }
   0x3   :  { %8234 = sst [smem:[#allocation18_spill]] %s8184_s2 }
   0x4   :  { %8235 = sst [smem:[#allocation19_spill]] %s8185_s3 }
   0x5   :  { %8236 = sst [smem:[#allocation20_spill]] %s8186_s4 }
   0x6   :  { %8237 = sst [smem:[#allocation21_spill]] %s8187_s5 }
   0x7   :  { %8238 = sst [smem:[#allocation22_spill]] %s8188_s6 }
   0x8   :  { %8239 = sst [smem:[#allocation23_spill]] %s8189_s7 }
   0x9   :  { %8240 = sst [smem:[#allocation24_spill]] %s8190_s8 }
   0xa   :  { %8241 = sst [smem:[#allocation25_spill]] %s8191_s9 }
   0xb   :  { %8242 = sst [smem:[#allocation26_spill]] %s8192_s10 }
   0xc   :  { %8243 = sst [smem:[#allocation27_spill]] %s8193_s11 }
   0xd   :  { %8244 = sst [smem:[#allocation28_spill]] %s8194_s12 }
   0xe   :  { %8245 = sst [smem:[#allocation29_spill]] %s8195_s13 }
   0xf   :  { %8246 = sst [smem:[#allocation30_spill]] %s8196_s14 }
  0x10   :  { %8247 = sst [smem:[#allocation31_spill]] %s8197_s15 }
  0x11   :  { %8248 = sst [smem:[#allocation32_spill]] %s8198_s16 }
  0x12   :  { %8249 = sst [smem:[#allocation33_spill]] %s8199_s17 }
  0x13   :  { %8250 = sst [smem:[#allocation34_spill]] %s8200_s18 }
  0x14   :  { %8251 = sst [smem:[#allocation35_spill]] %s8206_s24 }
  0x15   :  { %8252 = sst [smem:[#allocation36_spill]] %s8207_s25 }
  0x16   :  { %31 = vsyncpa [#allocation3], 0 }
  0x17   :  { %33 = vsyncpa [#allocation3 + $0x1], 0 }
  0x18   :  { %34 = vsyncpa [#allocation5], 0 }
  0x19   :  { %36 = vsyncpa [#allocation5 + $0x1], 0  ;;  %s6954_s29 = smov 0   ;;  %s6956_s2 = smov 0  }
  0x1a   :  { %s6958_s6 = smov 0   ;;  %s6960_s30 = smov 0  }
  0x1b LB: > { %8253 = sst [smem:[#allocation8_spill]] %s6809_s29  ;;  %s6975_s7 = sadd.s32 4294967295, %s6821_s30   ;;  %s6821_s30 = sphi %s6960_s30, %s8294_s30   ;;  %s6817_s6 = sphi %s6958_s6, %s8296_s6   ;;  %s6813_s2 = sphi %s6956_s2, %s8298_s2   ;;  %s6809_s29 = sphi %s6954_s29, %s8297_s29  }
  0x1c   : > { %8254 = sst [smem:[#allocation9_spill]] %s6817_s6  ;;  %s5356_s3 = sadd.s32 4294967294, %s6821_s30  }
  0x1d   : > { %8255 = sst [smem:[#allocation10_spill]] %s6821_s30  ;;  %s6979_s26 = sadd.s32 1, %s6821_s30  }
  0x1e   : > { %8256 = sst [smem:[#allocation11_spill]] %s6975_s7  ;;  %s568_s1 = sadd.s32 1, %s6817_s6 }
  0x1f   : > { %8257 = sst [smem:[#allocation12_spill]] %s6979_s26  ;;  %s565_s8 = ssub.s32 %s6821_s30, %s6979_s26 }
  0x20   : > { %p578_p0 = scmp.ne.s32.totalorder %s6817_s6, %s6813_s2  ;;  %p566_p1 = scmp.eq.s32.totalorder %s565_s8, 0 }
  0x21   : > { %p579_p2 = scmp.eq.s32.totalorder %s6975_s7, 1  ;;  %p584_p3 = scmp.ne.s32.totalorder %s6813_s2, %s6809_s29 }
  0x22   : > { %p585_p4 = scmp.eq.s32.totalorder %s5356_s3, 1  ;;  %p5359_p7 = scmp.ge.s32.totalorder %s6821_s30, 1 }
  0x23   : > { %s6990_s27 = scalar_select %p566_p1, %s6817_s6, %s568_s1  }
  0x24   : > { %p6992_p5 = por %p579_p2, %p578_p0  ;;  %p6996_p6 = por %p585_p4, %p584_p3 }
  0x25   : > { %8258 = sst [smem:[#allocation13_spill]] %s6990_s27  ;;  %p713_p8 = scmp.lt.s32.totalorder %s6821_s30, 3 }
  0x26   : > { %s8259_s4 = scalar_select %p6992_p5, 1, 0 }
  0x27   : > { %s8261_s28 = scalar_select %p6996_p6, 1, 0 }
  0x28   : > { %8260 = sst [smem:[#allocation14_spill]] %s8259_s4  ;;  %p714_p9 = pnand %p5359_p7, %p713_p8 }
  0x29   : > { %8262 = sst [smem:[#allocation15_spill]] %s8261_s28  ;;  %p793_p10 = scmp.lt.s32.totalorder (!%p714_p9), %s6975_s7, 1 }
  0x2a   : > { %717 = sbr.rel (%p714_p9) target bundleno = 13128 (0x3348), region = 116  ;;  %s8263_s1 = sld [smem:[#allocation17_spill]] (!%p714_p9) }
  0x2b   : > { %s8264_s26 = sld [smem:[#allocation16_spill]] (!%p714_p9)  ;;  %s7926_s4 = sand.u32 (!%p714_p9), 1, %s6813_s2  }
  0x2c   : > { %s8265_s27 = sld [smem:[#allocation22_spill]] (!%p714_p9) }
  0x2d   : > { %s8266_s3 = sld [smem:[#allocation24_spill]] (!%p714_p9) }
  0x2e   : > { %s8267_s6 = sld [smem:[#allocation20_spill]] (!%p714_p9) }
  0x2f   : > { %s794_s9 = scalar_select %p793_p10, %s6975_s7, 1  ;;  %vm809_vm0 = vcmask 261120   ;;  %v6823_v4 = vmov 32.0   ;;  %vm997_vm8 = vcmask 64512   ;;  %vm1046_vm9 = vcmask 1043456  }
  0x30   : > { %6622 = vrcp.f32 %v6823_v4  ;;  %s8269_s0 = sld [smem:[#allocation23_spill]] }
  0x31   : > { %s7004_s5 = sshll.u32 %s794_s9, 3  ;;  %s8270_s30 = sld [smem:[#allocation25_spill]] }
  0x32   : > { %s800_s8 = scalar_lea.vmem %s8263_s1, %s7004_s5  ;;  %s7014_s28 = scalar_lea.vmem %s8264_s26, %s7004_s5  ;;  %v6371_v21 = vld [vmem:[%s8265_s27 + $0x8] sm:$0xff]  ;;  %v6370_v23 = vld [vmem:[%s8265_s27] sm:$0xff]  ;;  %v6377_v30 = vld [vmem:[%s8265_s27 + $0x18] sm:$0xff] }
  0x33   : > { %v807_v0 = vld [vmem:[%s800_s8] sm:$0xff]  ;;  %v6373_v22 = vld [vmem:[%s8266_s3 + $0x8] sm:$0xff]  ;;  %955 = vmatpush.bf16.msra.mxu1 %v6371_v21  ;;  %v6376_v33 = vld [vmem:[%s8265_s27 + $0x10] sm:$0xff]  ;;  %s8272_s11 = sld [smem:[#allocation21_spill]] }
  0x34   : > { %v810_v1 = vsel %vm809_vm0, %v807_v0, 0.0  ;;  %v806_v2 = vld [vmem:[%s7014_s28] sm:$0xff]  ;;  %988 = vmatpush.bf16.msra.mxu2 %v6373_v22  ;;  %s8268_s26 = smov %s8267_s6  ;;  %v6369_v25 = vld [vmem:[%s8267_s6 + $0x8] sm:$0xff]  ;;  %v6379_v60 = vld [vmem:[%s8266_s3 + $0x18] sm:$0xff]  ;;  %s8273_s10 = sld [smem:[#allocation26_spill]] }
  0x35   : > { %811 = vadd.xlane.f32.xlu0 %v810_v1  ;;  %v840_v3 = vsel %vm809_vm0, %v806_v2, 0.0  ;;  %v6372_v24 = vld [vmem:[%s8266_s3] sm:$0xff]  ;;  %919 = vmatpush.bf16.msra.mxu0 %v6369_v25  ;;  %v6375_v29 = vld [vmem:[%s8268_s26 + $0x18] sm:$0xff]  ;;  %v6374_v32 = vld [vmem:[%s8268_s26 + $0x10] sm:$0xff]  ;;  %s8274_s12 = sld [smem:[#allocation28_spill]]  ;;  %s8228_s6 = sshll.u32 %s7926_s4, 3 }
  0x36   : > { %v6623_v5 = vpop.eup %6622  ;;  %v6368_v26 = vld [vmem:[%s8268_s26] sm:$0xff]  ;;  %v6378_v1 = vld [vmem:[%s8266_s3 + $0x10] sm:$0xff]  ;;  %s8275_s14 = sld [smem:[#allocation30_spill]]  ;;  %s7936_s9 = scalar_lea.vmem [#allocation4], %s8228_s6 }
  0x37   : > { %v814_v6 = vmul.f32 32.0, %v6623_v5  ;;  %vm818_vm1 = vweird.f32 %v6623_v5  ;;  %956 = vmatpush.bf16.msra.mxu1 %v6370_v23  ;;  %v6553_v55 = vld [vmem:[%s8269_s0] ss:$0 sm:$0xff]  ;;  %s8271_s24 = smov %s8270_s30  ;;  %s8276_s15 = sld [smem:[#allocation31_spill]] }
  0x38   : > { %989 = vmatpush.bf16.msra.mxu2 %v6372_v24  ;;  %v6554_v59 = vld [vmem:[%s8270_s30] ss:$0 sm:$0xff]  ;;  %v6558_v22 = vld [vmem:[%s8271_s24 + $0x1] ss:$0 sm:$0xff]  ;;  %s8277_s16 = sld [smem:[#allocation32_spill]] }
  0x39   : > { %v815_v7 = vsub.f32 1.0, %v814_v6  ;;  %920 = vmatpush.bf16.msra.mxu0 %v6368_v26  ;;  %v6555_v62 = vld [vmem:[%s8272_s11] ss:$0 sm:$0xff]  ;;  %s8278_s13 = sld [smem:[#allocation29_spill]] }
  0x3a   : > { %s8279_s17 = sld [smem:[#allocation33_spill]] }
  0x3b   : > { %v816_v8 = vmul.f32 %v6623_v5, %v815_v7  ;;  %1093 = vmatpush.bf16.msrb.mxu1 %v6375_v29  ;;  %s8280_s18 = sld [smem:[#allocation34_spill]] }
  0x3c   : > { %1128 = vmatpush.bf16.msrb.mxu2 %v6377_v30  ;;  %s8281_s6 = sld [smem:[#allocation18_spill]] }
  0x3d   : > { %841 = vadd.xlane.f32.xlu0 %v840_v3  ;;  %v817_v9 = vadd.f32 %v6623_v5, %v816_v8  ;;  %s8282_s30 = sld [smem:[#allocation19_spill]] }
  0x3e   : > { %s8285_s8 = sld [smem:[#allocation11_spill]] }
  0x3f   : > { %v7019_v10 = vsel %vm818_vm1, %v6623_v5, %v817_v9  ;;  %1094 = vmatpush.bf16.msrb.mxu1 %v6374_v32 }
  0x40   : > { %1129 = vmatpush.bf16.msrb.mxu2 %v6376_v33 }
  0x42   : > { %s804_s25 = scalar_lea.vmem %s8281_s6, %s7004_s5 }
  0x44   : > { %s6364_s1 = sshll.u32 %s8285_s8, 3 }
  0xa8   : > { %v812_v11 = vpop.xlane.xlu0 %811 }
  0xa9   : > { %v820_v12 = vmul.f32 %v7019_v10, %v812_v11 }
  0xab   : > { %v821_v13 = vsub.f32 %v807_v0, %v820_v12  ;;  %v6557_v12 = vld [vmem:[%s8269_s0 + $0x1] ss:$0 sm:$0xff] }
  0xad   : > { %v822_v14 = vmul.f32 %v821_v13, %v821_v13 }
  0xaf   : > { %v823_v15 = vsel %vm809_vm0, %v822_v14, 0.0 }
  0xb0   : > { %824 = vadd.xlane.f32.xlu1 %v823_v15  ;;  %v842_v16 = vpop.xlane.xlu0 %841 }
  0xb1   : > { %v843_v17 = vmul.f32 %v842_v16, %v7019_v10 }
  0xb3   : > { %v844_v18 = vsub.f32 %v806_v2, %v843_v17 }
  0xb5   : > { %v845_v19 = vmul.f32 %v844_v18, %v844_v18 }
  0xb7   : > { %v846_v20 = vsel %vm809_vm0, %v845_v19, 0.0 }
  0xb8   : > { %847 = vadd.xlane.f32.xlu1 %v846_v20 }
 0x123   : > { %v825_v27 = vpop.xlane.xlu1 %824 }
 0x124   : > { %v826_v28 = vmul.f32 %v825_v27, %v7019_v10 }
 0x126   : > { %v827_v31 = vadd.f32 1e-05, %v826_v28 }
 0x128   : > { %6624 = vrsqrt.f32 %v827_v31  ;;  %vm834_vm3 = vweird.f32 %v827_v31 }
 0x12b   : > { %v848_v34 = vpop.xlane.xlu1 %847 }
 0x12c   : > { %v849_v35 = vmul.f32 %v848_v34, %v7019_v10 }
 0x12e   : > { %v6625_v36 = vpop.eup %6624  ;;  %v850_v37 = vadd.f32 1e-05, %v849_v35 }
 0x12f   : > { %v829_v38 = vmul.f32 %v6625_v36, %v827_v31  ;;  %vm835_vm2 = vweird.f32 %v6625_v36 }
 0x130   : > { %6626 = vrsqrt.f32 %v850_v37  ;;  %vm836_vm4 = vmor %vm834_vm3, %vm835_vm2  ;;  %vm857_vm6 = vweird.f32 %v850_v37 }
 0x131   : > { %v830_v39 = vmul.f32 %v6625_v36, %v829_v38 }
 0x133   : > { %v831_v40 = vmul.f32 0.5, %v830_v39 }
 0x135   : > { %v832_v41 = vsub.f32 1.5, %v831_v40 }
 0x136   : > { %v6627_v42 = vpop.eup %6626 }
 0x137   : > { %v833_v43 = vmul.f32 %v6625_v36, %v832_v41  ;;  %v852_v44 = vmul.f32 %v6627_v42, %v850_v37  ;;  %vm858_vm5 = vweird.f32 %v6627_v42 }
 0x138   : > { %vm859_vm7 = vmor %vm857_vm6, %vm858_vm5 }
 0x139   : > { %v837_v45 = vsel %vm836_vm4, %v6625_v36, %v833_v43  ;;  %v853_v46 = vmul.f32 %v6627_v42, %v852_v44 }
 0x13a   : > { %v838_v47 = vmul.f32 %v837_v45, %v821_v13  ;;  %v6381_v45 = vld [vmem:[%s8268_s26 + $0x28] sm:$0xff] }
 0x13b   : > { %v854_v48 = vmul.f32 0.5, %v853_v46 }
 0x13c   : > { %v7057_v49 = vpack.c.bf16 %v838_v47, %v838_v47  ;;  %v6380_v47 = vld [vmem:[%s8268_s26 + $0x20] sm:$0xff] }
 0x13d   : > { %v855_v50 = vsub.f32 1.5, %v854_v48  ;;  %v6556_v48 = vld [vmem:[%s8272_s11 + $0x1] ss:$0 sm:$0xff] }
 0x13e   : > { %5382 = vmatmul.msk.bf16.vlgmr.msra.gmra.mxu1 %vm809_vm0, %v7057_v49  ;;  %5391 = vmatmul.msk.bf16.vlgmr.msra.gmra.mxu2 %vm809_vm0, %v7057_v49 }
 0x13f   : > { %v856_v51 = vmul.f32 %v6627_v42, %v855_v50 }
 0x141   : > { %v860_v52 = vsel %vm859_vm7, %v6627_v42, %v856_v51 }
 0x142   : > { %v861_v53 = vmul.f32 %v860_v52, %v844_v18  ;;  %v1064_v52 = vld [vmem:[%s8273_s10] sm:$0xf] }
 0x144   : > { %v7063_v54 = vpack.c.bf16 %v861_v53, %v861_v53  ;;  %v1262_v53 = vsel %vm1046_vm9, %v1064_v52, 0 }
 0x146   : > { %5373 = vmatmul.msk.bf16.vlgmr.msra.gmra.mxu0 %vm809_vm0, %v7063_v54 }
 0x14e   : > { %5407 = vmatmul.msk.bf16.vlgmr.msrb.gmra.mxu1 %vm809_vm0, %v7063_v54  ;;  %5421 = vmatmul.msk.bf16.vlgmr.msrb.gmra.mxu2 %vm809_vm0, %v7057_v49 }
 0x1bb   : > { %v958_v56 = vpop.f32.mrf.mxu1 }
 0x1bc   : > { %v959_v57 = vadd.f32 %v6553_v55, %v958_v56 }
 0x1be   : > { %v996_v58 = vpack.c.bf16 %v959_v57, %v959_v57 }
 0x1c0   : > { %v1002_v61 = vsel %vm997_vm8, %v996_v58, 0 }
 0x1c1   : > { %v991_v63 = vpop.f32.mrf.mxu2  ;;  %1011 = vmatpush.bf16.xpose.msra.mxu3 %v1002_v61 }
 0x1c2   : > { %v992_v0 = vadd.f32 %v6554_v59, %v991_v63 }
 0x1c3   : > { %v922_v2 = vpop.f32.mrf.mxu0  ;;  %v960_v3 = vpop.f32.mrf.mxu1 }
 0x1c4   : > { %v1042_v4 = vpack.c.bf16 %v992_v0, %v992_v0  ;;  %v923_v5 = vadd.f32 %v6555_v62, %v922_v2 }
 0x1c6   : > { %v995_v6 = vpack.c.bf16 %v923_v5, %v923_v5  ;;  %v1048_v7 = vsel %vm1046_vm9, %v1042_v4, 0 }
 0x1c7   : > { %1057 = vmatpush.bf16.msrb.mxu0 %v1048_v7  ;;  %v6382_v7 = vld [vmem:[%s8265_s27 + $0x20] sm:$0xff] }
 0x1c8   : > { %5392 = vmatmul.msk.bf16.vlgmr.msra.gmra.mxu3 %vm997_vm8, %v995_v6  ;;  %v6383_v6 = vld [vmem:[%s8265_s27 + $0x28] sm:$0xff] }
 0x1c9   : > { %1163 = vmatpush.bf16.msrb.mxu3 %v6379_v60  ;;  %v993_v8 = vpop.f32.mrf.mxu2 }
 0x1cb   : > { %v924_v9 = vpop.f32.mrf.mxu0  ;;  %v1096_v11 = vpop.f32.mrf.mxu1 }
 0x1cc   : > { %v1097_v50 = vadd.f32 %v6556_v48, %v1096_v11 }
 0x1cd   : > { %1164 = vmatpush.bf16.msrb.mxu3 %v6378_v1 }
 0x1ce   : > { %v1170_v51 = vpack.c.bf16 %v1097_v50, %v1097_v50 }
 0x1d1   : > { %v1131_v13 = vpop.f32.mrf.mxu2  ;;  %1271 = vmatpush.bf16.msra.mxu3 %v1262_v53 }
 0x1d2   : > { %v1132_v14 = vadd.f32 %v6557_v12, %v1131_v13 }
 0x1d3   : > { %v1098_v15 = vpop.f32.mrf.mxu1 }
 0x1d4   : > { %v1171_v16 = vpack.c.bf16 %v1132_v14, %v1132_v14 }
 0x1d6   : > { %v1176_v17 = vsel %vm997_vm8, %v1171_v16, 0 }
 0x1d7   : > { %1185 = vmatpush.bf16.xpose.msra.mxu0 %v1176_v17 }
 0x1d8   : > { %5435 = vmatmul.msk.bf16.vlgmr.msrb.gmra.mxu3 %vm809_vm0, %v7057_v49 }
 0x1d9   : > { %v1133_v18 = vpop.f32.mrf.mxu2 }
 0x24b   : > { %v1013_v19 = vpop.f32.mrf.mxu3 }
 0x24c   : > { %v1017_v20 = vsel %vm997_vm8, %v1013_v19, -inf }
 0x24d   : > { %1018 = vmax.xlane.f32.xlu2 %v1017_v20 }
 0x253   : > { %v1015_v21 = vpop.f32.mrf.mxu3 }
 0x25b   : > { %v1166_v23 = vpop.f32.mrf.mxu3 }
 0x25c   : > { %v1167_v24 = vadd.f32 %v6558_v22, %v1166_v23  ;;  %v5438_v22 = vld [vmem:[%s8273_s10 + $0x4] sm:$0xf] }
 0x25d   : > { %v1243_v23 = vsel %vm1046_vm9, %v5438_v22, 0  ;;  %v6393_v22 = vld [vmem:[%s8274_s12 + $0x8] sm:$0xff] }
 0x25e   : > { %v1216_v25 = vpack.c.bf16 %v1167_v24, %v1167_v24  ;;  %1252 = vmatpush.bf16.msra.mxu2 %v1243_v23  ;;  %v6385_v24 = vld [vmem:[%s8266_s3 + $0x28] sm:$0xff] }
 0x260   : > { %v1221_v26 = vsel %vm1046_vm9, %v1216_v25, 0  ;;  %v6384_v25 = vld [vmem:[%s8266_s3 + $0x20] sm:$0xff] }
 0x261   : > { %1230 = vmatpush.bf16.msra.mxu1 %v1221_v26 }
 0x262   : > { %1375 = vmatpush.bf16.msrb.mxu2 %v6385_v24  ;;  %v6392_v24 = vld [vmem:[%s8274_s12] sm:$0xff] }
 0x263   : > { %v1168_v27 = vpop.f32.mrf.mxu3 }
 0x264   : > { %v6387_v27 = vld [vmem:[%s8268_s26 + $0x38] sm:$0xff] }
 0x265   : > { %1340 = vmatpush.bf16.msrb.mxu1 %v6383_v6 }
 0x266   : > { %1376 = vmatpush.bf16.msrb.mxu2 %v6384_v25 }
 0x269   : > { %1341 = vmatpush.bf16.msrb.mxu1 %v6382_v7  ;;  %v6391_v7 = vld [vmem:[%s8266_s3 + $0x38] sm:$0xff] }
 0x2c0   : > { %v1019_v28 = vpop.xlane.xlu2 %1018 }
 0x2c1   : > { %v1020_v29 = vsub.f32 %v1013_v19, %v1019_v28 }
 0x2c3   : > { %v1021_v30 = vmul.f32 1.442695, %v1020_v29  ;;  %v6386_v29 = vld [vmem:[%s8268_s26 + $0x30] sm:$0xff] }
 0x2c5   : > { %6628 = vpow2.f32 %v1021_v30 }
 0x2cb   : > { %v6629_v31 = vpop.eup %6628 }
 0x2cc   : > { %v1023_v32 = vsel %vm997_vm8, %v6629_v31, 0.0 }
 0x2cd   : > { %1024 = vadd.xlane.f32.xlu2 %v1023_v32 }
 0x340   : > { %v1025_v33 = vpop.xlane.xlu2 %1024 }
 0x341   : > { %6630 = vrcp.f32 %v1025_v33  ;;  %v1037_v37 = vand.u32 2147483648, %v1025_v33  ;;  %v1035_v39 = vand.u32 2147483647, %v1025_v33  ;;  %vm1031_vm11 = vweird.f32 %v1025_v33 }
 0x343   : > { %v1038_v41 = vor.u32 1.1754944e-38, %v1037_v37  ;;  %vm1036_vm13 = vcmp.eq.f32.partialorder %v1035_v39, 8.507059e+37  ;;  %v6388_v39 = vld [vmem:[%s8265_s27 + $0x30] sm:$0xff] }
 0x347   : > { %v6631_v34 = vpop.eup %6630 }
 0x348   : > { %v1027_v35 = vmul.f32 %v6631_v34, %v1025_v33  ;;  %vm1032_vm10 = vweird.f32 %v6631_v34 }
 0x349   : > { %vm1033_vm12 = vmor %vm1031_vm11, %vm1032_vm10 }
 0x34a   : > { %v1028_v36 = vsub.f32 1.0, %v1027_v35 }
 0x34c   : > { %v1029_v38 = vmul.f32 %v6631_v34, %v1028_v36  ;;  %v6389_v36 = vld [vmem:[%s8265_s27 + $0x38] sm:$0xff] }
 0x34e   : > { %v1030_v40 = vadd.f32 %v6631_v34, %v1029_v38 }
 0x350   : > { %v1034_v42 = vsel %vm1033_vm12, %v6631_v34, %v1030_v40  ;;  %v6559_v34 = vld [vmem:[%s8272_s11 + $0x2] ss:$0 sm:$0xff] }
 0x351   : > { %v1039_v43 = vsel %vm1036_vm13, %v1038_v41, %v1034_v42 }
 0x352   : > { %v1040_v44 = vmul.f32 %v6629_v31, %v1039_v43  ;;  %v6560_v31 = vld [vmem:[%s8269_s0 + $0x2] ss:$0 sm:$0xff] }
 0x354   : > { %v1041_v46 = vpack.c.bf16 %v1040_v44, %v1040_v44  ;;  %v6561_v44 = vld [vmem:[%s8271_s24 + $0x2] ss:$0 sm:$0xff] }
 0x356   : > { %5393 = vmatmul.msk.bf16.vlgmr.msrb.gmra.mxu0 %vm997_vm8, %v1041_v46 }
 0x357   : > { %1305 = vmatpush.bf16.msrb.mxu0 %v6381_v45  ;;  %v5485_v45 = vld [vmem:[%s8273_s10 + $0x8] sm:$0xf] }
 0x358   : > { %v1455_v46 = vsel %vm1046_vm9, %v5485_v45, 0 }
 0x35b   : > { %1306 = vmatpush.bf16.msrb.mxu0 %v6380_v47 }
 0x366   : > { %5436 = vmatmul.msk.bf16.vlgmr.msra.gmra.mxu0 %vm997_vm8, %v1170_v51 }
 0x376   : > { %5454 = vmatmul.msk.bf16.vlgmr.msrb.gmra.mxu0 %vm809_vm0, %v7063_v54 }
 0x3d3   : > { %v1059_v55 = vpop.f32.mrf.mxu0 }
 0x3d4   : > { %v1063_v56 = vpack.c.bf16 %v1059_v55, %v1059_v55 }
 0x3d6   : > { %5440 = vmatmul.msk.bf16.vlgmr.msra.gmra.mxu3 %vm997_vm8, %v1063_v56 }
 0x3db   : > { %v1061_v57 = vpop.f32.mrf.mxu0 }
 0x3e3   : > { %v1187_v58 = vpop.f32.mrf.mxu0 }
 0x3e4   : > { %v1191_v59 = vsel %vm997_vm8, %v1187_v58, -inf }
 0x3e5   : > { %1192 = vmax.xlane.f32.xlu0 %v1191_v59 }
 0x3eb   : > { %v1189_v60 = vpop.f32.mrf.mxu0 }
 0x3f3   : > { %v1308_v61 = vpop.f32.mrf.mxu0 }
 0x3f4   : > { %v1309_v38 = vadd.f32 %v6559_v34, %v1308_v61  ;;  %v6399_v34 = vld [vmem:[%s8274_s12 + $0x18] sm:$0xff] }
 0x3f6   : > { %v1382_v41 = vpack.c.bf16 %v1309_v38, %v1309_v38  ;;  %v6398_v38 = vld [vmem:[%s8274_s12 + $0x10] sm:$0xff] }
 0x3fb   : > { %v1310_v62 = vpop.f32.mrf.mxu0 }
 0x458   : > { %v1193_v63 = vpop.xlane.xlu0 %1192 }
 0x459   : > { %v1194_v0 = vsub.f32 %v1187_v58, %v1193_v63  ;;  %v7120_v1 = vpop.f32.mrf.mxu3  ;;  %v6563_v58 = vld [vmem:[%s8269_s0 + $0x3] ss:$0 sm:$0xff] }
 0x45b   : > { %v1195_v2 = vmul.f32 1.442695, %v1194_v0 }
 0x45d   : > { %6632 = vpow2.f32 %v1195_v2 }
 0x461   : > { %v1275_v3 = vpop.f32.mrf.mxu3 }
 0x463   : > { %v6633_v4 = vpop.eup %6632 }
 0x464   : > { %v1197_v5 = vsel %vm997_vm8, %v6633_v4, 0.0 }
 0x465   : > { %1198 = vadd.xlane.f32.xlu1 %v1197_v5 }
 0x4d8   : > { %v1199_v8 = vpop.xlane.xlu1 %1198 }
 0x4d9   : > { %6634 = vrcp.f32 %v1199_v8  ;;  %v1211_v13 = vand.u32 2147483648, %v1199_v8  ;;  %v1209_v15 = vand.u32 2147483647, %v1199_v8  ;;  %vm1205_vm15 = vweird.f32 %v1199_v8 }
 0x4db   : > { %v1212_v17 = vor.u32 1.1754944e-38, %v1211_v13  ;;  %vm1210_vm2 = vcmp.eq.f32.partialorder %v1209_v15, 8.507059e+37 }
 0x4df   : > { %v6635_v9 = vpop.eup %6634 }
 0x4e0   : > { %v1201_v11 = vmul.f32 %v6635_v9, %v1199_v8  ;;  %vm1206_vm14 = vweird.f32 %v6635_v9  ;;  %v6390_v8 = vld [vmem:[%s8266_s3 + $0x30] sm:$0xff] }
 0x4e1   : > { %vm1207_vm1 = vmor %vm1205_vm15, %vm1206_vm14 }
 0x4e2   : > { %v1202_v12 = vsub.f32 1.0, %v1201_v11 }
 0x4e4   : > { %v1203_v14 = vmul.f32 %v6635_v9, %v1202_v12 }
 0x4e6   : > { %v1204_v16 = vadd.f32 %v6635_v9, %v1203_v14 }
 0x4e8   : > { %v1208_v18 = vsel %vm1207_vm1, %v6635_v9, %v1204_v16 }
 0x4e9   : > { %v1213_v19 = vsel %vm1210_vm2, %v1212_v17, %v1208_v18 }
 0x4ea   : > { %v1214_v20 = vmul.f32 %v6633_v4, %v1213_v19 }
 0x4ec   : > { %v1215_v21 = vpack.c.bf16 %v1214_v20, %v1214_v20 }
 0x4ee   : > { %5437 = vmatmul.msk.bf16.vlgmr.msra.gmra.mxu1 %vm997_vm8, %v1215_v21 }
 0x4ef   : > { %1464 = vmatpush.bf16.msra.mxu1 %v1455_v46 }
 0x4fe   : > { %5468 = vmatmul.msk.bf16.vlgmr.msrb.gmra.mxu1 %vm809_vm0, %v7057_v49 }
 0x56b   : > { %v1232_v26 = vpop.f32.mrf.mxu1 }
 0x56c   : > { %v1236_v28 = vpack.c.bf16 %v1232_v26, %v1232_v26  ;;  %v6395_v26 = vld [vmem:[%s8275_s14 + $0x8] sm:$0xff] }
 0x56e   : > { %5439 = vmatmul.msk.bf16.vlgmr.msra.gmra.mxu2 %vm997_vm8, %v1236_v28  ;;  %v6394_v28 = vld [vmem:[%s8275_s14] sm:$0xff] }
 0x56f   : > { %1499 = vmatpush.bf16.msra.mxu2 %v6387_v27 }
 0x573   : > { %v1234_v30 = vpop.f32.mrf.mxu1  ;;  %1500 = vmatpush.bf16.msra.mxu2 %v6386_v29 }
 0x574   : > { %v6562_v30 = vld [vmem:[%s8272_s11 + $0x3] ss:$0 sm:$0xff] }
 0x57b   : > { %v1343_v32 = vpop.f32.mrf.mxu1 }
 0x57c   : > { %v1344_v33 = vadd.f32 %v6560_v31, %v1343_v32  ;;  %v6564_v32 = vld [vmem:[%s8271_s24 + $0x3] ss:$0 sm:$0xff] }
 0x57e   : > { %v1383_v35 = vpack.c.bf16 %v1344_v33, %v1344_v33  ;;  %5482 = vmatmul.msk.bf16.vlgmr.msrb.gmra.mxu2 %vm809_vm0, %v7057_v49 }
 0x580   : > { %v1388_v37 = vsel %vm997_vm8, %v1383_v35, 0 }
 0x581   : > { %1397 = vmatpush.bf16.xpose.msrb.mxu3 %v1388_v37 }
 0x583   : > { %v1345_v40 = vpop.f32.mrf.mxu1 }
 0x588   : > { %5483 = vmatmul.msk.bf16.vlgmr.msrb.gmra.mxu3 %vm997_vm8, %v1382_v41 }
 0x589   : > { %1534 = vmatpush.bf16.msra.mxu3 %v6389_v36 }
 0x58d   : > { %1535 = vmatpush.bf16.msra.mxu3 %v6388_v39 }
 0x58e   : > { %5500 = vmatmul.msk.bf16.vlgmr.msra.gmra.mxu2 %vm809_vm0, %v7063_v54 }
 0x598   : > { %5514 = vmatmul.msk.bf16.vlgmr.msra.gmra.mxu3 %vm809_vm0, %v7057_v49 }
 0x5f1   : > { %v7169_v42 = vpop.f32.mrf.mxu2 }
 0x5f9   : > { %v1256_v43 = vpop.f32.mrf.mxu2 }
 0x601   : > { %v1378_v47 = vpop.f32.mrf.mxu2 }
 0x602   : > { %v1379_v48 = vadd.f32 %v6561_v44, %v1378_v47  ;;  %v1274_v44 = vadd.f32 %v7120_v1, %v7169_v42  ;;  %v5531_v47 = vld [vmem:[%s8273_s10 + $0xc] sm:$0xf]  ;;  %v6566_v1 = vld [vmem:[%s8276_s15] ss:$0 sm:$0xff] }
 0x604   : > { %v1428_v50 = vpack.c.bf16 %v1379_v48, %v1379_v48  ;;  %v1649_v48 = vsel %vm1046_vm9, %v5531_v47, 0 }
 0x605   : > { %1658 = vmatpush.bf16.msrb.mxu3 %v1649_v48 }
 0x606   : > { %v1433_v51 = vsel %vm1046_vm9, %v1428_v50, 0 }
 0x607   : > { %1442 = vmatpush.bf16.msra.mxu0 %v1433_v51 }
 0x609   : > { %v1380_v52 = vpop.f32.mrf.mxu2 }
 0x60b   : > { %v1399_v53 = vpop.f32.mrf.mxu3  ;;  %1569 = vmatpush.bf16.msrb.mxu0 %v6391_v7 }
 0x60c   : > { %v1403_v55 = vsel %vm997_vm8, %v1399_v53, -inf }
 0x60d   : > { %1404 = vmax.xlane.f32.xlu2 %v1403_v55 }
 0x60f   : > { %1570 = vmatpush.bf16.msrb.mxu0 %v6390_v8 }
 0x611   : > { %v1502_v56 = vpop.f32.mrf.mxu2 }
 0x612   : > { %v1503_v31 = vadd.f32 %v6562_v30, %v1502_v56 }
 0x613   : > { %v1401_v57 = vpop.f32.mrf.mxu3 }
 0x614   : > { %v1576_v35 = vpack.c.bf16 %v1503_v31, %v1503_v31 }
 0x619   : > { %v1504_v59 = vpop.f32.mrf.mxu2 }
 0x61b   : > { %v1537_v60 = vpop.f32.mrf.mxu3 }
 0x61c   : > { %v1538_v61 = vadd.f32 %v6563_v58, %v1537_v60 }
 0x61e   : > { %v1577_v62 = vpack.c.bf16 %v1538_v61, %v1538_v61 }
 0x620   : > { %v1582_v63 = vsel %vm997_vm8, %v1577_v62, 0 }
 0x621   : > { %1591 = vmatpush.bf16.xpose.msrb.mxu1 %v1582_v63 }
 0x623   : > { %v1539_v0 = vpop.f32.mrf.mxu3 }
 0x680   : > { %v1405_v2 = vpop.xlane.xlu2 %1404 }
 0x681   : > { %v1406_v3 = vsub.f32 %v1399_v53, %v1405_v2 }
 0x683   : > { %v1407_v4 = vmul.f32 1.442695, %v1406_v3  ;;  %v6397_v3 = vld [vmem:[%s8277_s16 + $0x8] sm:$0xff] }
 0x685   : > { %6636 = vpow2.f32 %v1407_v4  ;;  %v6396_v4 = vld [vmem:[%s8277_s16] sm:$0xff] }
 0x68b   : > { %v6637_v5 = vpop.eup %6636 }
 0x68c   : > { %v1409_v6 = vsel %vm997_vm8, %v6637_v5, 0.0 }
 0x68d   : > { %1410 = vadd.xlane.f32.xlu0 %v1409_v6 }
 0x700   : > { %v1411_v9 = vpop.xlane.xlu0 %1410 }
 0x701   : > { %6638 = vrcp.f32 %v1411_v9  ;;  %v1423_v14 = vand.u32 2147483648, %v1411_v9  ;;  %v1421_v16 = vand.u32 2147483647, %v1411_v9  ;;  %vm1417_vm4 = vweird.f32 %v1411_v9 }
 0x703   : > { %v1424_v18 = vor.u32 1.1754944e-38, %v1423_v14  ;;  %vm1422_vm6 = vcmp.eq.f32.partialorder %v1421_v16, 8.507059e+37 }
 0x707   : > { %v6639_v11 = vpop.eup %6638 }
 0x708   : > { %v1413_v12 = vmul.f32 %v6639_v11, %v1411_v9  ;;  %vm1418_vm3 = vweird.f32 %v6639_v11 }
 0x709   : > { %vm1419_vm5 = vmor %vm1417_vm4, %vm1418_vm3 }
 0x70a   : > { %v1414_v13 = vsub.f32 1.0, %v1413_v12 }
 0x70c   : > { %v1415_v15 = vmul.f32 %v6639_v11, %v1414_v13 }
 0x70e   : > { %v1416_v17 = vadd.f32 %v6639_v11, %v1415_v15 }
 0x710   : > { %v1420_v19 = vsel %vm1419_vm5, %v6639_v11, %v1416_v17 }
 0x711   : > { %v1425_v20 = vsel %vm1422_vm6, %v1424_v18, %v1420_v19  ;;  %v6401_v18 = vld [vmem:[%s8275_s14 + $0x18] sm:$0xff] }
 0x712   : > { %v1426_v21 = vmul.f32 %v6637_v5, %v1425_v20  ;;  %v6400_v20 = vld [vmem:[%s8275_s14 + $0x10] sm:$0xff] }
 0x714   : > { %v1427_v23 = vpack.c.bf16 %v1426_v21, %v1426_v21 }
 0x716   : > { %5484 = vmatmul.msk.bf16.vlgmr.msra.gmra.mxu0 %vm997_vm8, %v1427_v23 }
 0x717   : > { %1697 = vmatpush.bf16.msra.mxu0 %v6393_v22  ;;  %v6403_v22 = vld [vmem:[%s8277_s16 + $0x18] sm:$0xff] }
 0x71b   : > { %1698 = vmatpush.bf16.msra.mxu0 %v6392_v24  ;;  %v6402_v24 = vld [vmem:[%s8277_s16 + $0x10] sm:$0xff] }
 0x726   : > { %5528 = vmatmul.msk.bf16.vlgmr.msrb.gmra.mxu0 %vm809_vm0, %v7057_v49 }
 0x736   : > { %5541 = vmatmul.msk.bf16.vlgmr.msra.gmra.mxu0 %vm809_vm0, %v7063_v54 }
 0x793   : > { %v1444_v25 = vpop.f32.mrf.mxu0 }
 0x794   : > { %v1448_v27 = vpack.c.bf16 %v1444_v25, %v1444_v25 }
 0x796   : > { %5486 = vmatmul.msk.bf16.vlgmr.msra.gmra.mxu1 %vm997_vm8, %v1448_v27 }
 0x797   : > { %1730 = vmatpush.bf16.msra.mxu1 %v6395_v26  ;;  %v6565_v26 = vld [vmem:[%s8278_s13] ss:$0 sm:$0xff] }
 0x79b   : > { %v1446_v29 = vpop.f32.mrf.mxu0  ;;  %1731 = vmatpush.bf16.msra.mxu1 %v6394_v28  ;;  %v6568_v28 = vld [vmem:[%s8279_s17] ss:$0 sm:$0xff] }
 0x7a3   : > { %v1572_v33 = vpop.f32.mrf.mxu0 }
 0x7a4   : > { %v1573_v36 = vadd.f32 %v6564_v32, %v1572_v33 }
 0x7a6   : > { %v1622_v37 = vpack.c.bf16 %v1573_v36, %v1573_v36  ;;  %5529 = vmatmul.msk.bf16.vlgmr.msrb.gmra.mxu1 %vm997_vm8, %v1576_v35  ;;  %v6569_v35 = vld [vmem:[%s8276_s15 + $0x1] ss:$0 sm:$0xff] }
 0x7a7   : > { %1866 = vmatpush.bf16.msrb.mxu1 %v6399_v34 }
 0x7a8   : > { %v1627_v39 = vsel %vm1046_vm9, %v1622_v37, 0 }
 0x7a9   : > { %1636 = vmatpush.bf16.msrb.mxu2 %v1627_v39 }
 0x7ab   : > { %v1574_v40 = vpop.f32.mrf.mxu0  ;;  %1867 = vmatpush.bf16.msrb.mxu1 %v6398_v38 }
 0x7ad   : > { %1763 = vmatpush.bf16.msra.mxu2 %v6397_v3 }
 0x7b1   : > { %1764 = vmatpush.bf16.msra.mxu2 %v6396_v4 }
 0x7b3   : > { %v7223_v41 = vpop.f32.mrf.mxu0 }
 0x7b4   : > { %v1701_v27 = vadd.f32 %v6565_v26, %v7223_v41 }
 0x7b6   : > { %5550 = vmatmul.msk.bf16.vlgmr.msra.gmra.mxu1 %vm809_vm0, %v7063_v54  ;;  %v1770_v30 = vpack.c.bf16 %v1701_v27, %v1701_v27 }
 0x7bb   : > { %v1702_v43 = vpop.f32.mrf.mxu0 }
 0x7c6   : > { %5575 = vmatmul.msk.bf16.vlgmr.msrb.gmra.mxu1 %vm809_vm0, %v7063_v54 }
 0x813   : > { %v1466_v45 = vpop.f32.mrf.mxu1 }
 0x814   : > { %v7231_v46 = vadd.f32 %v1466_v45, %v1274_v44 }
 0x81b   : > { %v1468_v50 = vpop.f32.mrf.mxu1 }
 0x81c   : > { %v6571_v50 = vld [vmem:[%s8279_s17 + $0x1] ss:$0 sm:$0xff] }
 0x823   : > { %v1593_v51 = vpop.f32.mrf.mxu1 }
 0x824   : > { %v1597_v52 = vsel %vm997_vm8, %v1593_v51, -inf }
 0x825   : > { %1598 = vmax.xlane.f32.xlu1 %v1597_v52 }
 0x82b   : > { %v1595_v53 = vpop.f32.mrf.mxu1 }
 0x833   : > { %v1733_v42 = vpop.f32.mrf.mxu1 }
 0x834   : > { %v1734_v55 = vadd.f32 %v6566_v1, %v1733_v42 }
 0x836   : > { %v1771_v56 = vpack.c.bf16 %v1734_v55, %v1734_v55 }
 0x838   : > { %v1776_v57 = vsel %vm997_vm8, %v1771_v56, 0 }
 0x839   : > { %1785 = vmatpush.bf16.xpose.msra.mxu3 %v1776_v57 }
 0x83b   : > { %v1735_v58 = vpop.f32.mrf.mxu1 }
 0x843   : > { %v7242_v59 = vpop.f32.mrf.mxu1 }
 0x84b   : > { %v1871_v60 = vpop.f32.mrf.mxu1 }
 0x898   : > { %v1599_v61 = vpop.xlane.xlu1 %1598 }
 0x899   : > { %v1600_v62 = vsub.f32 %v1593_v51, %v1599_v61 }
 0x89b   : > { %v1601_v63 = vmul.f32 1.442695, %v1600_v62 }
 0x89d   : > { %6640 = vpow2.f32 %v1601_v63 }
 0x8a3   : > { %v6641_v0 = vpop.eup %6640 }
 0x8a4   : > { %v1603_v2 = vsel %vm997_vm8, %v6641_v0, 0.0 }
 0x8a5   : > { %1604 = vadd.xlane.f32.xlu2 %v1603_v2 }
 0x918   : > { %v1605_v5 = vpop.xlane.xlu2 %1604 }
 0x919   : > { %6642 = vrcp.f32 %v1605_v5  ;;  %v1617_v9 = vand.u32 2147483648, %v1605_v5  ;;  %v1615_v12 = vand.u32 2147483647, %v1605_v5  ;;  %vm1611_vm10 = vweird.f32 %v1605_v5 }
 0x91b   : > { %v1618_v14 = vor.u32 1.1754944e-38, %v1617_v9  ;;  %vm1616_vm12 = vcmp.eq.f32.partialorder %v1615_v12, 8.507059e+37  ;;  %v6405_v9 = vld [vmem:[%s8274_s12 + $0x28] sm:$0xff]  ;;  %v6404_v12 = vld [vmem:[%s8274_s12 + $0x20] sm:$0xff] }
 0x91f   : > { %v6643_v6 = vpop.eup %6642 }
 0x920   : > { %v1607_v7 = vmul.f32 %v6643_v6, %v1605_v5  ;;  %vm1612_vm7 = vweird.f32 %v6643_v6 }
 0x921   : > { %vm1613_vm11 = vmor %vm1611_vm10, %vm1612_vm7 }
 0x922   : > { %v1608_v8 = vsub.f32 1.0, %v1607_v7 }
 0x924   : > { %v1609_v11 = vmul.f32 %v6643_v6, %v1608_v8 }
 0x926   : > { %v1610_v13 = vadd.f32 %v6643_v6, %v1609_v11 }
 0x928   : > { %v1614_v15 = vsel %vm1613_vm11, %v6643_v6, %v1610_v13  ;;  %v6567_v13 = vld [vmem:[%s8278_s13 + $0x1] ss:$0 sm:$0xff] }
 0x929   : > { %v1619_v16 = vsel %vm1616_vm12, %v1618_v14, %v1614_v15  ;;  %v1870_v14 = vadd.f32 %v6567_v13, %v7242_v59 }
 0x92a   : > { %v1620_v17 = vmul.f32 %v6641_v0, %v1619_v16  ;;  %v1837_v16 = vld [vmem:[%s8280_s18] sm:$0xf] }
 0x92b   : > { %v1943_v15 = vpack.c.bf16 %v1870_v14, %v1870_v14 }
 0x92c   : > { %v1621_v19 = vpack.c.bf16 %v1620_v17, %v1620_v17  ;;  %v2035_v17 = vsel %vm1046_vm9, %v1837_v16, 0 }
 0x92e   : > { %5530 = vmatmul.msk.bf16.vlgmr.msrb.gmra.mxu2 %vm997_vm8, %v1621_v19 }
 0x92f   : > { %1901 = vmatpush.bf16.msrb.mxu2 %v6401_v18 }
 0x933   : > { %1902 = vmatpush.bf16.msrb.mxu2 %v6400_v20 }
 0x93e   : > { %5559 = vmatmul.msk.bf16.vlgmr.msra.gmra.mxu2 %vm809_vm0, %v7063_v54 }
 0x94e   : > { %5589 = vmatmul.msk.bf16.vlgmr.msrb.gmra.mxu2 %vm809_vm0, %v7063_v54 }
 0x9b1   : > { %v1638_v21 = vpop.f32.mrf.mxu2 }
 0x9b2   : > { %v1642_v23 = vpack.c.bf16 %v1638_v21, %v1638_v21 }
 0x9b4   : > { %5532 = vmatmul.msk.bf16.vlgmr.msrb.gmra.mxu3 %vm997_vm8, %v1642_v23 }
 0x9b5   : > { %1936 = vmatpush.bf16.msrb.mxu3 %v6403_v22 }
 0x9b9   : > { %v1640_v25 = vpop.f32.mrf.mxu2  ;;  %1937 = vmatpush.bf16.msrb.mxu3 %v6402_v24 }
 0x9c1   : > { %v1766_v29 = vpop.f32.mrf.mxu2 }
 0x9c2   : > { %v1767_v31 = vadd.f32 %v6568_v28, %v1766_v29 }
 0x9c4   : > { %v1816_v32 = vpack.c.bf16 %v1767_v31, %v1767_v31  ;;  %5560 = vmatmul.msk.bf16.vlgmr.msra.gmra.mxu3 %vm997_vm8, %v1770_v30 }
 0x9c5   : > { %2044 = vmatpush.bf16.msra.mxu3 %v2035_v17 }
 0x9c6   : > { %v1821_v33 = vsel %vm1046_vm9, %v1816_v32, 0  ;;  %v6407_v32 = vld [vmem:[%s8275_s14 + $0x28] sm:$0xff] }
 0x9c7   : > { %1830 = vmatpush.bf16.msrb.mxu0 %v1821_v33  ;;  %v6406_v33 = vld [vmem:[%s8275_s14 + $0x20] sm:$0xff] }
 0x9c9   : > { %v1768_v34 = vpop.f32.mrf.mxu2 }
 0x9d1   : > { %v1904_v36 = vpop.f32.mrf.mxu2 }
 0x9d2   : > { %v1905_v37 = vadd.f32 %v6569_v35, %v1904_v36 }
 0x9d4   : > { %v1944_v38 = vpack.c.bf16 %v1905_v37, %v1905_v37  ;;  %5603 = vmatmul.msk.bf16.vlgmr.msrb.gmra.mxu3 %vm809_vm0, %v7063_v54 }
 0x9d6   : > { %v1949_v39 = vsel %vm997_vm8, %v1944_v38, 0 }
 0x9d7   : > { %1958 = vmatpush.bf16.xpose.msra.mxu0 %v1949_v39 }
 0x9d9   : > { %v1906_v40 = vpop.f32.mrf.mxu2 }
 0xa37   : > { %v1660_v41 = vpop.f32.mrf.mxu3 }
 0xa38   : > { %v7285_v43 = vadd.f32 %v1660_v41, %v7231_v46 }
 0xa3f   : > { %v1662_v44 = vpop.f32.mrf.mxu3 }
 0xa47   : > { %v1787_v45 = vpop.f32.mrf.mxu3 }
 0xa48   : > { %v1791_v47 = vsel %vm997_vm8, %v1787_v45, -inf }
 0xa49   : > { %1792 = vmax.xlane.f32.xlu0 %v1791_v47 }
 0xa4f   : > { %v1789_v48 = vpop.f32.mrf.mxu3 }
 0xa57   : > { %v1939_v51 = vpop.f32.mrf.mxu3 }
 0xa58   : > { %v1940_v52 = vadd.f32 %v6571_v50, %v1939_v51  ;;  %v5606_v51 = vld [vmem:[%s8280_s18 + $0x4] sm:$0xf] }
 0xa5a   : > { %v1989_v53 = vpack.c.bf16 %v1940_v52, %v1940_v52  ;;  %v2016_v52 = vsel %vm1046_vm9, %v5606_v51, 0 }
 0xa5b   : > { %2025 = vmatpush.bf16.msra.mxu2 %v2016_v52 }
 0xa5c   : > { %v1994_v1 = vsel %vm1046_vm9, %v1989_v53, 0  ;;  %v6409_v53 = vld [vmem:[%s8277_s16 + $0x28] sm:$0xff] }
 0xa5d   : > { %2003 = vmatpush.bf16.msra.mxu1 %v1994_v1  ;;  %v6408_v1 = vld [vmem:[%s8277_s16 + $0x20] sm:$0xff] }
 0xa5f   : > { %v1941_v42 = vpop.f32.mrf.mxu3  ;;  %2148 = vmatpush.bf16.msrb.mxu2 %v6409_v53 }
 0xa61   : > { %2113 = vmatpush.bf16.msrb.mxu1 %v6407_v32 }
 0xa63   : > { %2149 = vmatpush.bf16.msrb.mxu2 %v6408_v1 }
 0xa65   : > { %2114 = vmatpush.bf16.msrb.mxu1 %v6406_v33 }
 0xabc   : > { %v1793_v55 = vpop.xlane.xlu0 %1792 }
 0xabd   : > { %v1794_v46 = vsub.f32 %v1787_v45, %v1793_v55  ;;  %v6411_v55 = vld [vmem:[%s8274_s12 + $0x38] sm:$0xff] }
 0xabf   : > { %v1795_v56 = vmul.f32 1.442695, %v1794_v46 }
 0xac1   : > { %6644 = vpow2.f32 %v1795_v56  ;;  %v6410_v56 = vld [vmem:[%s8274_s12 + $0x30] sm:$0xff] }
 0xac7   : > { %v6645_v57 = vpop.eup %6644 }
 0xac8   : > { %v1797_v58 = vsel %vm997_vm8, %v6645_v57, 0.0 }
 0xac9   : > { %1798 = vadd.xlane.f32.xlu1 %v1797_v58  ;;  %v6573_v58 = vld [vmem:[%s8276_s15 + $0x2] ss:$0 sm:$0xff] }
 0xb3c   : > { %v1799_v60 = vpop.xlane.xlu1 %1798 }
 0xb3d   : > { %6646 = vrcp.f32 %v1799_v60  ;;  %v1811_v0 = vand.u32 2147483648, %v1799_v60  ;;  %v1809_v3 = vand.u32 2147483647, %v1799_v60  ;;  %vm1805_vm14 = vweird.f32 %v1799_v60 }
 0xb3f   : > { %v1812_v5 = vor.u32 1.1754944e-38, %v1811_v0  ;;  %vm1810_vm1 = vcmp.eq.f32.partialorder %v1809_v3, 8.507059e+37  ;;  %v6413_v0 = vld [vmem:[%s8275_s14 + $0x38] sm:$0xff] }
 0xb43   : > { %v6647_v61 = vpop.eup %6646 }
 0xb44   : > { %v1801_v62 = vmul.f32 %v6647_v61, %v1799_v60  ;;  %vm1806_vm13 = vweird.f32 %v6647_v61 }
 0xb45   : > { %vm1807_vm15 = vmor %vm1805_vm14, %vm1806_vm13 }
 0xb46   : > { %v1802_v63 = vsub.f32 1.0, %v1801_v62  ;;  %v6572_v62 = vld [vmem:[%s8278_s13 + $0x2] ss:$0 sm:$0xff] }
 0xb48   : > { %v1803_v2 = vmul.f32 %v6647_v61, %v1802_v63 }
 0xb4a   : > { %v1804_v4 = vadd.f32 %v6647_v61, %v1803_v2 }
 0xb4c   : > { %v1808_v6 = vsel %vm1807_vm15, %v6647_v61, %v1804_v4  ;;  %v6412_v4 = vld [vmem:[%s8275_s14 + $0x30] sm:$0xff] }
 0xb4d   : > { %v1813_v7 = vsel %vm1810_vm1, %v1812_v5, %v1808_v6 }
 0xb4e   : > { %v1814_v8 = vmul.f32 %v6645_v57, %v1813_v7 }
 0xb50   : > { %v1815_v11 = vpack.c.bf16 %v1814_v8, %v1814_v8 }
 0xb52   : > { %5561 = vmatmul.msk.bf16.vlgmr.msrb.gmra.mxu0 %vm997_vm8, %v1815_v11  ;;  %v5653_v11 = vld [vmem:[%s8280_s18 + $0x8] sm:$0xf] }
 0xb53   : > { %2078 = vmatpush.bf16.msrb.mxu0 %v6405_v9  ;;  %v6574_v9 = vld [vmem:[%s8279_s17 + $0x2] ss:$0 sm:$0xff] }
 0xb57   : > { %2079 = vmatpush.bf16.msrb.mxu0 %v6404_v12  ;;  %v2228_v12 = vsel %vm1046_vm9, %v5653_v11, 0 }
 0xb62   : > { %5604 = vmatmul.msk.bf16.vlgmr.msra.gmra.mxu0 %vm997_vm8, %v1943_v15 }
 0xb72   : > { %5622 = vmatmul.msk.bf16.vlgmr.msrb.gmra.mxu0 %vm809_vm0, %v7063_v54 }
 0xbcf   : > { %v1832_v18 = vpop.f32.mrf.mxu0 }
 0xbd0   : > { %v1836_v19 = vpack.c.bf16 %v1832_v18, %v1832_v18 }
 0xbd2   : > { %5608 = vmatmul.msk.bf16.vlgmr.msra.gmra.mxu3 %vm997_vm8, %v1836_v19 }
 0xbd7   : > { %v1834_v20 = vpop.f32.mrf.mxu0 }
 0xbdf   : > { %v1960_v21 = vpop.f32.mrf.mxu0 }
 0xbe0   : > { %v1964_v59 = vsel %vm997_vm8, %v1960_v21, -inf }
 0xbe1   : > { %1965 = vmax.xlane.f32.xlu2 %v1964_v59  ;;  %v6576_v59 = vld [vmem:[%s8276_s15 + $0x3] ss:$0 sm:$0xff] }
 0xbe7   : > { %v1962_v22 = vpop.f32.mrf.mxu0 }
 0xbef   : > { %v2081_v23 = vpop.f32.mrf.mxu0 }
 0xbf0   : > { %v2082_v3 = vadd.f32 %v6572_v62, %v2081_v23 }
 0xbf2   : > { %v2155_v6 = vpack.c.bf16 %v2082_v3, %v2082_v3 }
 0xbf7   : > { %v2083_v24 = vpop.f32.mrf.mxu0 }
 0xc54   : > { %v1966_v25 = vpop.xlane.xlu2 %1965 }
 0xc55   : > { %v1967_v26 = vsub.f32 %v1960_v21, %v1966_v25  ;;  %v7313_v27 = vpop.f32.mrf.mxu3 }
 0xc57   : > { %v1968_v28 = vmul.f32 1.442695, %v1967_v26 }
 0xc59   : > { %6648 = vpow2.f32 %v1968_v28 }
 0xc5d   : > { %v2048_v29 = vpop.f32.mrf.mxu3 }
 0xc5f   : > { %v6649_v30 = vpop.eup %6648 }
 0xc60   : > { %v1970_v31 = vsel %vm997_vm8, %v6649_v30, 0.0 }
 0xc61   : > { %1971 = vadd.xlane.f32.xlu0 %v1970_v31 }
 0xcd4   : > { %v1972_v34 = vpop.xlane.xlu0 %1971 }
 0xcd5   : > { %6650 = vrcp.f32 %v1972_v34  ;;  %v1984_v38 = vand.u32 2147483648, %v1972_v34  ;;  %v1982_v40 = vand.u32 2147483647, %v1972_v34  ;;  %vm1978_vm3 = vweird.f32 %v1972_v34 }
 0xcd7   : > { %v1985_v44 = vor.u32 1.1754944e-38, %v1984_v38  ;;  %vm1983_vm5 = vcmp.eq.f32.partialorder %v1982_v40, 8.507059e+37 }
 0xcdb   : > { %v6651_v35 = vpop.eup %6650 }
 0xcdc   : > { %v1974_v36 = vmul.f32 %v6651_v35, %v1972_v34  ;;  %vm1979_vm2 = vweird.f32 %v6651_v35  ;;  %v6415_v34 = vld [vmem:[%s8277_s16 + $0x38] sm:$0xff] }
 0xcdd   : > { %vm1980_vm4 = vmor %vm1978_vm3, %vm1979_vm2 }
 0xcde   : > { %v1975_v37 = vsub.f32 1.0, %v1974_v36 }
 0xce0   : > { %v1976_v39 = vmul.f32 %v6651_v35, %v1975_v37 }
 0xce2   : > { %v1977_v41 = vadd.f32 %v6651_v35, %v1976_v39 }
 0xce4   : > { %v1981_v45 = vsel %vm1980_vm4, %v6651_v35, %v1977_v41  ;;  %v6414_v35 = vld [vmem:[%s8277_s16 + $0x30] sm:$0xff] }
 0xce5   : > { %v1986_v47 = vsel %vm1983_vm5, %v1985_v44, %v1981_v45 }
 0xce6   : > { %v1987_v48 = vmul.f32 %v6649_v30, %v1986_v47 }
 0xce8   : > { %v1988_v50 = vpack.c.bf16 %v1987_v48, %v1987_v48 }
 0xcea   : > { %5605 = vmatmul.msk.bf16.vlgmr.msra.gmra.mxu1 %vm997_vm8, %v1988_v50 }
 0xceb   : > { %2237 = vmatpush.bf16.msra.mxu1 %v2228_v12 }
 0xcfa   : > { %5636 = vmatmul.msk.bf16.vlgmr.msrb.gmra.mxu1 %vm809_vm0, %v7063_v54 }
 0xd67   : > { %v2005_v42 = vpop.f32.mrf.mxu1 }
 0xd68   : > { %v2009_v46 = vpack.c.bf16 %v2005_v42, %v2005_v42 }
 0xd6a   : > { %5607 = vmatmul.msk.bf16.vlgmr.msra.gmra.mxu2 %vm997_vm8, %v2009_v46 }
 0xd6b   : > { %2272 = vmatpush.bf16.msra.mxu2 %v6411_v55  ;;  %v6575_v55 = vld [vmem:[%s8278_s13 + $0x3] ss:$0 sm:$0xff] }
 0xd6f   : > { %v2007_v57 = vpop.f32.mrf.mxu1  ;;  %2273 = vmatpush.bf16.msra.mxu2 %v6410_v56  ;;  %v6577_v56 = vld [vmem:[%s8279_s17 + $0x3] ss:$0 sm:$0xff] }
 0xd77   : > { %v2116_v60 = vpop.f32.mrf.mxu1 }
 0xd78   : > { %v2117_v61 = vadd.f32 %v6573_v58, %v2116_v60 }
 0xd7a   : > { %v2156_v63 = vpack.c.bf16 %v2117_v61, %v2117_v61  ;;  %5650 = vmatmul.msk.bf16.vlgmr.msrb.gmra.mxu2 %vm809_vm0, %v7063_v54 }
 0xd7c   : > { %v2161_v2 = vsel %vm997_vm8, %v2156_v63, 0 }
 0xd7d   : > { %2170 = vmatpush.bf16.xpose.msrb.mxu3 %v2161_v2 }
 0xd7f   : > { %v2118_v5 = vpop.f32.mrf.mxu1 }
 0xd84   : > { %5651 = vmatmul.msk.bf16.vlgmr.msrb.gmra.mxu3 %vm997_vm8, %v2155_v6 }
 0xd85   : > { %2307 = vmatpush.bf16.msra.mxu3 %v6413_v0 }
 0xd89   : > { %2308 = vmatpush.bf16.msra.mxu3 %v6412_v4 }
 0xd8a   : > { %5668 = vmatmul.msk.bf16.vlgmr.msra.gmra.mxu2 %vm809_vm0, %v7063_v54 }
 0xd94   : > { %5682 = vmatmul.msk.bf16.vlgmr.msra.gmra.mxu3 %vm809_vm0, %v7063_v54 }
 0xded   : > { %v7362_v7 = vpop.f32.mrf.mxu2 }
 0xdee   : > { %v2047_v63 = vadd.f32 %v7313_v27, %v7362_v7  ;;  %v5699_v27 = vld [vmem:[%s8280_s18 + $0xc] sm:$0xf] }
 0xdef   : > { %v2422_v7 = vsel %vm1046_vm9, %v5699_v27, 0  ;;  %v6421_v27 = vld [vmem:[%s8204_s22 + $0x18] sm:$0xff] }
 0xdf0   : > { %2431 = vmatpush.bf16.msrb.mxu3 %v2422_v7  ;;  %v6420_v7 = vld [vmem:[%s8204_s22 + $0x10] sm:$0xff] }
 0xdf5   : > { %v2029_v8 = vpop.f32.mrf.mxu2 }
 0xdfd   : > { %v2151_v13 = vpop.f32.mrf.mxu2 }
 0xdfe   : > { %v2152_v14 = vadd.f32 %v6574_v9, %v2151_v13 }
 0xe00   : > { %v2201_v15 = vpack.c.bf16 %v2152_v14, %v2152_v14 }
 0xe02   : > { %v2206_v16 = vsel %vm1046_vm9, %v2201_v15, 0 }
 0xe03   : > { %2215 = vmatpush.bf16.msra.mxu0 %v2206_v16 }
 0xe05   : > { %v2153_v17 = vpop.f32.mrf.mxu2 }
 0xe07   : > { %v2172_v18 = vpop.f32.mrf.mxu3  ;;  %2342 = vmatpush.bf16.msrb.mxu0 %v6415_v34  ;;  %v6578_v34 = vld [vmem:[%s8201_s19] ss:$0 sm:$0xff] }
 0xe08   : > { %v2176_v19 = vsel %vm997_vm8, %v2172_v18, -inf }
 0xe09   : > { %2177 = vmax.xlane.f32.xlu1 %v2176_v19 }
 0xe0b   : > { %2343 = vmatpush.bf16.msrb.mxu0 %v6414_v35 }
 0xe0d   : > { %v2275_v20 = vpop.f32.mrf.mxu2 }
 0xe0e   : > { %v2276_v46 = vadd.f32 %v6575_v55, %v2275_v20 }
 0xe0f   : > { %v2174_v21 = vpop.f32.mrf.mxu3 }
 0xe10   : > { %v2349_v58 = vpack.c.bf16 %v2276_v46, %v2276_v46  ;;  %v6417_v46 = vld [vmem:[%s8202_s20 + $0x8] sm:$0xff] }
 0xe15   : > { %v2277_v22 = vpop.f32.mrf.mxu2 }
 0xe17   : > { %v2310_v23 = vpop.f32.mrf.mxu3 }
 0xe18   : > { %v2311_v24 = vadd.f32 %v6576_v59, %v2310_v23 }
 0xe1a   : > { %v2350_v25 = vpack.c.bf16 %v2311_v24, %v2311_v24 }
 0xe1c   : > { %v2355_v26 = vsel %vm997_vm8, %v2350_v25, 0 }
 0xe1d   : > { %2364 = vmatpush.bf16.xpose.msrb.mxu1 %v2355_v26  ;;  %v6429_v26 = vld [vmem:[%s8265_s27 + $0x48] sm:$0xff] }
 0xe1e   : > { %2713 = vmatpush.bf16.msra.mxu3 %v6429_v26  ;;  %v6581_v26 = vld [vmem:[%s8271_s24 + $0x4] ss:$0 sm:$0xff] }
 0xe1f   : > { %v2312_v28 = vpop.f32.mrf.mxu3 }
 0xe20   : > { %v6428_v28 = vld [vmem:[%s8265_s27 + $0x40] sm:$0xff] }
 0xe22   : > { %2714 = vmatpush.bf16.msra.mxu3 %v6428_v28 }
 0xe7c   : > { %v2178_v29 = vpop.xlane.xlu1 %2177 }
 0xe7d   : > { %v2179_v30 = vsub.f32 %v2172_v18, %v2178_v29 }
 0xe7f   : > { %v2180_v31 = vmul.f32 1.442695, %v2179_v30 }
 0xe81   : > { %6652 = vpow2.f32 %v2180_v31 }
 0xe87   : > { %v6653_v32 = vpop.eup %6652 }
 0xe88   : > { %v2182_v33 = vsel %vm997_vm8, %v6653_v32, 0.0 }
 0xe89   : > { %2183 = vadd.xlane.f32.xlu2 %v2182_v33  ;;  %v6426_v33 = vld [vmem:[%s8268_s26 + $0x40] sm:$0xff] }
 0xefc   : > { %v2184_v36 = vpop.xlane.xlu2 %2183 }
 0xefd   : > { %6654 = vrcp.f32 %v2184_v36  ;;  %v2196_v40 = vand.u32 2147483648, %v2184_v36  ;;  %v2194_v44 = vand.u32 2147483647, %v2184_v36  ;;  %vm2190_vm7 = vweird.f32 %v2184_v36 }
 0xeff   : > { %v2197_v47 = vor.u32 1.1754944e-38, %v2196_v40  ;;  %vm2195_vm11 = vcmp.eq.f32.partialorder %v2194_v44, 8.507059e+37  ;;  %v6579_v44 = vld [vmem:[%s8269_s0 + $0x4] ss:$0 sm:$0xff] }
 0xf03   : > { %v6655_v37 = vpop.eup %6654 }
 0xf04   : > { %v2186_v38 = vmul.f32 %v6655_v37, %v2184_v36  ;;  %vm2191_vm6 = vweird.f32 %v6655_v37 }
 0xf05   : > { %vm2192_vm10 = vmor %vm2190_vm7, %vm2191_vm6 }
 0xf06   : > { %v2187_v39 = vsub.f32 1.0, %v2186_v38  ;;  %v6726_v38 = vld [vmem:[%s7014_s28] sm:$0xff]  ;;  %s8284_s28 = sld [smem:[#allocation27_spill]] }
 0xf08   : > { %v2188_v41 = vmul.f32 %v6655_v37, %v2187_v39 }
 0xf0a   : > { %v2189_v45 = vadd.f32 %v6655_v37, %v2188_v41 }
 0xf0c   : > { %v2193_v48 = vsel %vm2192_vm10, %v6655_v37, %v2189_v45 }
 0xf0d   : > { %v2198_v50 = vsel %vm2195_vm11, %v2197_v47, %v2193_v48 }
 0xf0e   : > { %v2199_v51 = vmul.f32 %v6653_v32, %v2198_v50  ;;  %v6427_v32 = vld [vmem:[%s8268_s26 + $0x48] sm:$0xff] }
 0xf10   : > { %v2200_v52 = vpack.c.bf16 %v2199_v51, %v2199_v51 }
 0xf12   : > { %5652 = vmatmul.msk.bf16.vlgmr.msra.gmra.mxu0 %vm997_vm8, %v2200_v52 }
 0xf13   : > { %2496 = vmatpush.bf16.msra.mxu0 %v6417_v46 }
 0xf22   : > { %5696 = vmatmul.msk.bf16.vlgmr.msrb.gmra.mxu0 %vm809_vm0, %v7063_v54 }
 0xf8f   : > { %v2217_v53 = vpop.f32.mrf.mxu0 }
 0xf90   : > { %v2221_v1 = vpack.c.bf16 %v2217_v53, %v2217_v53 }
 0xf92   : > { %5654 = vmatmul.msk.bf16.vlgmr.msra.gmra.mxu1 %vm997_vm8, %v2221_v1 }
 0xf97   : > { %v2219_v42 = vpop.f32.mrf.mxu0 }
 0xf9f   : > { %v2345_v57 = vpop.f32.mrf.mxu0 }
 0xfa0   : > { %v2346_v60 = vadd.f32 %v6577_v56, %v2345_v57  ;;  %v6416_v56 = vld [vmem:[%s8202_s20] sm:$0xff]  ;;  %v6431_v57 = vld [vmem:[%s8266_s3 + $0x48] sm:$0xff] }
 0xfa1   : > { %2497 = vmatpush.bf16.msra.mxu0 %v6416_v56 }
 0xfa2   : > { %v2395_v61 = vpack.c.bf16 %v2346_v60, %v2346_v60  ;;  %5697 = vmatmul.msk.bf16.vlgmr.msrb.gmra.mxu1 %vm997_vm8, %v2349_v58  ;;  %v6430_v58 = vld [vmem:[%s8266_s3 + $0x40] sm:$0xff] }
 0xfa4   : > { %v2400_v54 = vsel %vm1046_vm9, %v2395_v61, 0 }
 0xfa5   : > { %2409 = vmatpush.bf16.msrb.mxu2 %v2400_v54  ;;  %2748 = vmatpush.bf16.msrb.mxu0 %v6431_v57  ;;  %v6433_v57 = vld [vmem:[%s8268_s26 + $0x58] sm:$0xff] }
 0xfa7   : > { %v2347_v62 = vpop.f32.mrf.mxu0 }
 0xfa9   : > { %2678 = vmatpush.bf16.msra.mxu2 %v6427_v32  ;;  %2749 = vmatpush.bf16.msrb.mxu0 %v6430_v58  ;;  %v6432_v58 = vld [vmem:[%s8268_s26 + $0x50] sm:$0xff] }
 0xfad   : > { %2679 = vmatpush.bf16.msra.mxu2 %v6426_v33 }
0x100f   : > { %v2239_v0 = vpop.f32.mrf.mxu1 }
0x1010   : > { %v2243_v2 = vadd.f32 %v2239_v0, %v2047_v63  ;;  %v6425_v63 = vld [vmem:[%s8204_s22 + $0x38] sm:$0xff] }
0x1011   : > { %2577 = vmatpush.bf16.msra.mxu1 %v6425_v63 }
0x1017   : > { %v2241_v3 = vpop.f32.mrf.mxu1 }
0x101f   : > { %v2366_v4 = vpop.f32.mrf.mxu1 }
0x1020   : > { %v2370_v5 = vsel %vm997_vm8, %v2366_v4, -inf }
0x1021   : > { %2371 = vmax.xlane.f32.xlu0 %v2370_v5 }
0x1027   : > { %v2368_v6 = vpop.f32.mrf.mxu1 }
0x1094   : > { %v2372_v8 = vpop.xlane.xlu0 %2371 }
0x1095   : > { %v2373_v9 = vsub.f32 %v2366_v4, %v2372_v8 }
0x1097   : > { %v2374_v11 = vmul.f32 1.442695, %v2373_v9 }
0x1099   : > { %6656 = vpow2.f32 %v2374_v11  ;;  %v6424_v11 = vld [vmem:[%s8204_s22 + $0x30] sm:$0xff] }
0x109a   : > { %2578 = vmatpush.bf16.msra.mxu1 %v6424_v11  ;;  %v6436_v11 = vld [vmem:[%s8266_s3 + $0x50] sm:$0xff] }
0x109f   : > { %v6657_v12 = vpop.eup %6656 }
0x10a0   : > { %v2376_v13 = vsel %vm997_vm8, %v6657_v12, 0.0 }
0x10a1   : > { %2377 = vadd.xlane.f32.xlu1 %v2376_v13  ;;  %v6422_v13 = vld [vmem:[%s8204_s22 + $0x20] sm:$0xff] }
0x1114   : > { %v2378_v14 = vpop.xlane.xlu1 %2377 }
0x1115   : > { %6658 = vrcp.f32 %v2378_v14  ;;  %v2390_v18 = vand.u32 2147483648, %v2378_v14  ;;  %v2388_v20 = vand.u32 2147483647, %v2378_v14  ;;  %vm2384_vm13 = vweird.f32 %v2378_v14 }
0x1117   : > { %v2391_v59 = vor.u32 1.1754944e-38, %v2390_v18  ;;  %vm2389_vm15 = vcmp.eq.f32.partialorder %v2388_v20, 8.507059e+37  ;;  %v6434_v18 = vld [vmem:[%s8265_s27 + $0x50] sm:$0xff] }
0x111b   : > { %v6659_v15 = vpop.eup %6658 }
0x111c   : > { %v2380_v16 = vmul.f32 %v6659_v15, %v2378_v14  ;;  %vm2385_vm12 = vweird.f32 %v6659_v15  ;;  %v6419_v14 = vld [vmem:[%s8204_s22 + $0x8] sm:$0xff] }
0x111d   : > { %vm2386_vm14 = vmor %vm2384_vm13, %vm2385_vm12 }
0x111e   : > { %v2381_v17 = vsub.f32 1.0, %v2380_v16  ;;  %v6435_v16 = vld [vmem:[%s8265_s27 + $0x58] sm:$0xff] }
0x1120   : > { %v2382_v19 = vmul.f32 %v6659_v15, %v2381_v17  ;;  %v6580_v17 = vld [vmem:[%s8203_s21] ss:$0 sm:$0xff] }
0x1122   : > { %v2383_v21 = vadd.f32 %v6659_v15, %v2382_v19 }
0x1124   : > { %v2387_v22 = vsel %vm2386_vm14, %v6659_v15, %v2383_v21  ;;  %v6418_v15 = vld [vmem:[%s8204_s22] sm:$0xff] }
0x1125   : > { %v2392_v23 = vsel %vm2389_vm15, %v2391_v59, %v2387_v22 }
0x1126   : > { %v2393_v24 = vmul.f32 %v6657_v12, %v2392_v23  ;;  %v6423_v12 = vld [vmem:[%s8204_s22 + $0x28] sm:$0xff] }
0x1127   : > { %2579 = vmatpush.bf16.msra.mxu1 %v6423_v12 }
0x1128   : > { %v2394_v25 = vpack.c.bf16 %v2393_v24, %v2393_v24 }
0x112a   : > { %5698 = vmatmul.msk.bf16.vlgmr.msrb.gmra.mxu2 %vm997_vm8, %v2394_v25 }
0x112b   : > { %2580 = vmatpush.bf16.msra.mxu1 %v6422_v13  ;;  %v6585_v13 = vld [vmem:[%s8272_s11 + $0x4] ss:$0 sm:$0xff] }
0x112f   : > { %2581 = vmatpush.bf16.msra.mxu1 %v6421_v27 }
0x1133   : > { %2582 = vmatpush.bf16.msra.mxu1 %v6420_v7 }
0x1137   : > { %2583 = vmatpush.bf16.msra.mxu1 %v6419_v14 }
0x113b   : > { %2584 = vmatpush.bf16.msra.mxu1 %v6418_v15 }
0x113f   : > { %2887 = vmatpush.bf16.msrb.mxu1 %v6435_v16 }
0x1143   : > { %2888 = vmatpush.bf16.msrb.mxu1 %v6434_v18 }
0x11ad   : > { %v2411_v29 = vpop.f32.mrf.mxu2 }
0x11ae   : > { %v2415_v30 = vpack.c.bf16 %v2411_v29, %v2411_v29 }
0x11b0   : > { %5700 = vmatmul.msk.bf16.vlgmr.msrb.gmra.mxu3 %vm997_vm8, %v2415_v30 }
0x11b5   : > { %v2413_v31 = vpop.f32.mrf.mxu2 }
0x11c0   : > { %5770 = vmatmul.msk.bf16.vlgmr.msra.gmra.mxu3 %vm809_vm0, %v7057_v49 }
0x1233   : > { %v2433_v35 = vpop.f32.mrf.mxu3 }
0x1234   : > { %v2437_v36 = vadd.f32 %v2433_v35, %v2243_v2 }
0x1236   : > { %v2442_v37 = vadd.f32 %v6578_v34, %v2437_v36 }
0x1238   : > { %v7424_v39 = vadd.f32 %v6726_v38, %v2442_v37  ;;  %v6582_v38 = vld [vmem:[%s8205_s23] ss:$0 sm:$0xff] }
0x123a   : > { %v2444_v40 = vsel %vm809_vm0, %v7424_v39, 0.0 }
0x123b   : > { %2445 = vadd.xlane.f32.xlu2 %v2444_v40  ;;  %v2435_v41 = vpop.f32.mrf.mxu3 }
0x1243   : > { %v2716_v45 = vpop.f32.mrf.mxu3 }
0x1244   : > { %v2717_v47 = vadd.f32 %v6579_v44, %v2716_v45 }
0x1246   : > { %v2756_v48 = vpack.c.bf16 %v2717_v47, %v2717_v47 }
0x1248   : > { %v2761_v50 = vsel %vm997_vm8, %v2756_v48, 0  ;;  %v6583_v48 = vld [vmem:[%s8269_s0 + $0x5] ss:$0 sm:$0xff] }
0x1249   : > { %2770 = vmatpush.bf16.xpose.msrb.mxu2 %v2761_v50 }
0x124b   : > { %v2718_v51 = vpop.f32.mrf.mxu3 }
0x12ae   : > { %v2446_v52 = vpop.xlane.xlu2 %2445 }
0x12af   : > { %v2447_v53 = vmul.f32 %v2446_v52, %v7019_v10 }
0x12b1   : > { %v2448_v1 = vsub.f32 %v7424_v39, %v2447_v53 }
0x12b3   : > { %v2449_v42 = vmul.f32 %v2448_v1, %v2448_v1 }
0x12b5   : > { %v2450_v55 = vsel %vm809_vm0, %v2449_v42, 0.0 }
0x12b6   : > { %2451 = vadd.xlane.f32.xlu0 %v2450_v55 }
0x1329   : > { %v2452_v60 = vpop.xlane.xlu0 %2451 }
0x132a   : > { %v2453_v61 = vmul.f32 %v2452_v60, %v7019_v10 }
0x132c   : > { %v2454_v54 = vadd.f32 1e-05, %v2453_v61 }
0x132e   : > { %6660 = vrsqrt.f32 %v2454_v54  ;;  %vm2461_vm2 = vweird.f32 %v2454_v54 }
0x1334   : > { %v6661_v62 = vpop.eup %6660 }
0x1335   : > { %v2456_v0 = vmul.f32 %v6661_v62, %v2454_v54  ;;  %vm2462_vm1 = vweird.f32 %v6661_v62 }
0x1336   : > { %vm2463_vm3 = vmor %vm2461_vm2, %vm2462_vm1 }
0x1337   : > { %v2457_v2 = vmul.f32 %v6661_v62, %v2456_v0 }
0x1339   : > { %v2458_v3 = vmul.f32 0.5, %v2457_v2 }
0x133b   : > { %v2459_v4 = vsub.f32 1.5, %v2458_v3 }
0x133d   : > { %v2460_v5 = vmul.f32 %v6661_v62, %v2459_v4 }
0x133f   : > { %v2464_v6 = vsel %vm2463_vm3, %v6661_v62, %v2460_v5 }
0x1340   : > { %v2465_v8 = vmul.f32 %v2464_v6, %v2448_v1 }
0x1342   : > { %v2466_v9 = vpack.c.bf16 %v2465_v8, %v2465_v8 }
0x1344   : > { %5709 = vmatmul.msk.bf16.vlgmr.msra.gmra.mxu0 %vm809_vm0, %v2466_v9  ;;  %v6437_v9 = vld [vmem:[%s8266_s3 + $0x58] sm:$0xff] }
0x1345   : > { %2852 = vmatpush.bf16.msra.mxu0 %v6433_v57 }
0x1349   : > { %2853 = vmatpush.bf16.msra.mxu0 %v6432_v58 }
0x1354   : > { %5784 = vmatmul.msk.bf16.vlgmr.msrb.gmra.mxu0 %vm809_vm0, %v7057_v49 }
0x13c1   : > { %v2499_v19 = vpop.f32.mrf.mxu0 }
0x13c2   : > { %v2500_v20 = vadd.f32 %v6580_v17, %v2499_v19 }
0x13c4   : > { %v2503_v21 = vmul.f32 %v2500_v20, %v2500_v20 }
0x13c6   : > { %v2504_v59 = vmul.f32 %v2503_v21, %v2500_v20 }
0x13c8   : > { %v2505_v22 = vmul.f32 0.044715, %v2504_v59 }
0x13c9   : > { %v2501_v23 = vpop.f32.mrf.mxu0 }
0x13ca   : > { %v2506_v24 = vadd.f32 %v2505_v22, %v2500_v20 }
0x13cc   : > { %v2507_v25 = vmul.f32 0.7978846, %v2506_v24 }
0x13ce   : > { %6662 = vtanh.f32 %v2507_v25 }
0x13d1   : > { %v2751_v28 = vpop.f32.mrf.mxu0 }
0x13d2   : > { %v2752_v29 = vadd.f32 %v6581_v26, %v2751_v28 }
0x13d4   : > { %v6663_v30 = vpop.eup %6662  ;;  %v2801_v31 = vpack.c.bf16 %v2752_v29, %v2752_v29 }
0x13d5   : > { %v2509_v32 = vadd.f32 1.0, %v6663_v30 }
0x13d6   : > { %v2806_v33 = vsel %vm1046_vm9, %v2801_v31, 0 }
0x13d7   : > { %v2510_v34 = vmul.f32 0.5, %v2509_v32  ;;  %2815 = vmatpush.bf16.msrb.mxu3 %v2806_v33 }
0x13d9   : > { %v2511_v35 = vmul.f32 %v2510_v34, %v2500_v20  ;;  %v2753_v36 = vpop.f32.mrf.mxu0  ;;  %v6586_v20 = vld [vmem:[%s8271_s24 + $0x5] ss:$0 sm:$0xff] }
0x13db   : > { %v2512_v37 = vpack.c.bf16 %v2511_v35, %v2511_v35 }
0x13dd   : > { %2585 = vmatmul.bf16.vlgmr.msra.gmra.mxu1 %v2512_v37 }
0x13ed   : > { %5815 = vmatmul.msk.bf16.vlgmr.msrb.gmra.mxu1 %vm809_vm0, %v7057_v49 }
0x145a   : > { %v2586_v40 = vpop.f32.mrf.mxu1 }
0x145b   : > { %v2590_v41 = vadd.f32 %v2586_v40, %v7424_v39 }
0x145d   : > { %v7494_v44 = vadd.f32 %v6582_v38, %v2590_v41 }
0x145f   : > { %v2596_v45 = vsel %vm809_vm0, %v7494_v44, 0.0 }
0x1460   : > { %2597 = vadd.xlane.f32.xlu1 %v2596_v45 }
0x1462   : > { %v2588_v47 = vpop.f32.mrf.mxu1 }
0x146a   : > { %v2890_v50 = vpop.f32.mrf.mxu1 }
0x146b   : > { %v2891_v51 = vadd.f32 %v6583_v48, %v2890_v50  ;;  %v6439_v48 = vld [vmem:[%s8268_s26 + $0x68] sm:$0xff] }
0x146d   : > { %v2930_v52 = vpack.c.bf16 %v2891_v51, %v2891_v51  ;;  %v6438_v51 = vld [vmem:[%s8268_s26 + $0x60] sm:$0xff] }
0x146f   : > { %v2935_v53 = vsel %vm997_vm8, %v2930_v52, 0  ;;  %v6584_v52 = vld [vmem:[%s8272_s11 + $0x5] ss:$0 sm:$0xff] }
0x1470   : > { %2944 = vmatpush.bf16.xpose.msra.mxu3 %v2935_v53 }
0x1472   : > { %v2892_v1 = vpop.f32.mrf.mxu1 }
0x14d3   : > { %v2598_v42 = vpop.xlane.xlu1 %2597 }
0x14d4   : > { %v2599_v39 = vmul.f32 %v2598_v42, %v7019_v10  ;;  %v5787_v42 = vld [vmem:[%s8273_s10 + $0x10] sm:$0xf] }
0x14d6   : > { %v2600_v55 = vsub.f32 %v7494_v44, %v2599_v39  ;;  %v3021_v39 = vsel %vm1046_vm9, %v5787_v42, 0 }
0x14d8   : > { %v2601_v46 = vmul.f32 %v2600_v55, %v2600_v55 }
0x14da   : > { %v2602_v56 = vsel %vm809_vm0, %v2601_v46, 0.0 }
0x14db   : > { %2603 = vadd.xlane.f32.xlu2 %v2602_v56 }
0x154e   : > { %v2604_v60 = vpop.xlane.xlu2 %2603 }
0x154f   : > { %v2605_v61 = vmul.f32 %v2604_v60, %v7019_v10 }
0x1551   : > { %v2606_v54 = vadd.f32 1e-05, %v2605_v61 }
0x1553   : > { %6664 = vrsqrt.f32 %v2606_v54  ;;  %vm2613_vm5 = vweird.f32 %v2606_v54 }
0x1559   : > { %v6665_v62 = vpop.eup %6664 }
0x155a   : > { %v2608_v63 = vmul.f32 %v6665_v62, %v2606_v54  ;;  %vm2614_vm4 = vweird.f32 %v6665_v62 }
0x155b   : > { %vm2615_vm6 = vmor %vm2613_vm5, %vm2614_vm4 }
0x155c   : > { %v2609_v0 = vmul.f32 %v6665_v62, %v2608_v63 }
0x155e   : > { %v2610_v2 = vmul.f32 0.5, %v2609_v0 }
0x1560   : > { %v2611_v3 = vsub.f32 1.5, %v2610_v2 }
0x1562   : > { %v2612_v4 = vmul.f32 %v6665_v62, %v2611_v3 }
0x1564   : > { %v2616_v5 = vsel %vm2615_vm6, %v6665_v62, %v2612_v4 }
0x1565   : > { %v2617_v6 = vmul.f32 %v2616_v5, %v2600_v55 }
0x1567   : > { %v7512_v8 = vpack.c.bf16 %v2617_v6, %v2617_v6  ;;  %v6441_v6 = vld [vmem:[%s8265_s27 + $0x68] sm:$0xff] }
0x1569   : > { %5756 = vmatmul.msk.bf16.vlgmr.msra.gmra.mxu2 %vm809_vm0, %v7512_v8  ;;  %5801 = vmatmul.msk.bf16.vlgmr.msra.gmra.mxu0 %vm809_vm0, %v7512_v8 }
0x156a   : > { %2922 = vmatpush.bf16.msra.mxu2 %v6437_v9  ;;  %v6440_v9 = vld [vmem:[%s8265_s27 + $0x60] sm:$0xff] }
0x156e   : > { %2923 = vmatpush.bf16.msra.mxu2 %v6436_v11 }
0x15e6   : > { %v2855_v12 = vpop.f32.mrf.mxu0 }
0x15e7   : > { %v2856_v53 = vadd.f32 %v6584_v52, %v2855_v12 }
0x15e9   : > { %v2929_v1 = vpack.c.bf16 %v2856_v53, %v2856_v53 }
0x15ec   : > { %v2681_v27 = vpop.f32.mrf.mxu2 }
0x15ed   : > { %v2682_v7 = vadd.f32 %v6585_v13, %v2681_v27 }
0x15ee   : > { %v2857_v14 = vpop.f32.mrf.mxu0 }
0x15ef   : > { %v2755_v15 = vpack.c.bf16 %v2682_v7, %v2682_v7 }
0x15f1   : > { %5785 = vmatmul.msk.bf16.vlgmr.msrb.gmra.mxu2 %vm997_vm8, %v2755_v15 }
0x15f2   : > { %3030 = vmatpush.bf16.msrb.mxu2 %v3021_v39 }
0x15f4   : > { %v2683_v16 = vpop.f32.mrf.mxu2 }
0x1601   : > { %5829 = vmatmul.msk.bf16.vlgmr.msra.gmra.mxu2 %vm809_vm0, %v7057_v49 }
0x1674   : > { %v2772_v17 = vpop.f32.mrf.mxu2 }
0x1675   : > { %v2776_v18 = vsel %vm997_vm8, %v2772_v17, -inf }
0x1676   : > { %2777 = vmax.xlane.f32.xlu0 %v2776_v18 }
0x167c   : > { %v2774_v19 = vpop.f32.mrf.mxu2 }
0x1684   : > { %v2925_v21 = vpop.f32.mrf.mxu2 }
0x1685   : > { %v2926_v59 = vadd.f32 %v6586_v20, %v2925_v21 }
0x1687   : > { %v2975_v22 = vpack.c.bf16 %v2926_v59, %v2926_v59  ;;  %v5832_v59 = vld [vmem:[%s8273_s10 + $0x14] sm:$0xf] }
0x1689   : > { %v2980_v23 = vsel %vm1046_vm9, %v2975_v22, 0  ;;  %v3002_v22 = vsel %vm1046_vm9, %v5832_v59, 0 }
0x168a   : > { %2989 = vmatpush.bf16.msrb.mxu0 %v2980_v23  ;;  %3011 = vmatpush.bf16.msra.mxu1 %v3002_v22  ;;  %v6443_v23 = vld [vmem:[%s8266_s3 + $0x68] sm:$0xff] }
0x168c   : > { %v2927_v24 = vpop.f32.mrf.mxu2 }
0x168d   : > { %v6442_v24 = vld [vmem:[%s8266_s3 + $0x60] sm:$0xff] }
0x168e   : > { %3099 = vmatpush.bf16.msra.mxu0 %v6441_v6  ;;  %3134 = vmatpush.bf16.msrb.mxu1 %v6443_v23  ;;  %v6451_v23 = vld [vmem:[%s8274_s12 + $0x48] sm:$0xff] }
0x1692   : > { %3100 = vmatpush.bf16.msra.mxu0 %v6440_v9  ;;  %3135 = vmatpush.bf16.msrb.mxu1 %v6442_v24 }
0x16e9   : > { %v2778_v25 = vpop.xlane.xlu0 %2777 }
0x16ea   : > { %v2779_v26 = vsub.f32 %v2772_v17, %v2778_v25 }
0x16ec   : > { %v2780_v28 = vmul.f32 1.442695, %v2779_v26  ;;  %v6445_v26 = vld [vmem:[%s8268_s26 + $0x78] sm:$0xff] }
0x16ee   : > { %6666 = vpow2.f32 %v2780_v28 }
0x16f4   : > { %v6667_v29 = vpop.eup %6666 }
0x16f5   : > { %v2782_v30 = vsel %vm997_vm8, %v6667_v29, 0.0 }
0x16f6   : > { %2783 = vadd.xlane.f32.xlu1 %v2782_v30 }
0x1769   : > { %v2784_v31 = vpop.xlane.xlu1 %2783 }
0x176a   : > { %6668 = vrcp.f32 %v2784_v31  ;;  %v2796_v35 = vand.u32 2147483648, %v2784_v31  ;;  %v2794_v37 = vand.u32 2147483647, %v2784_v31  ;;  %vm2790_vm10 = vweird.f32 %v2784_v31 }
0x176c   : > { %v2797_v40 = vor.u32 1.1754944e-38, %v2796_v35  ;;  %vm2795_vm12 = vcmp.eq.f32.partialorder %v2794_v37, 8.507059e+37 }
0x1770   : > { %v6669_v32 = vpop.eup %6668 }
0x1771   : > { %v2786_v33 = vmul.f32 %v6669_v32, %v2784_v31  ;;  %vm2791_vm7 = vweird.f32 %v6669_v32  ;;  %v6588_v31 = vld [vmem:[%s8269_s0 + $0x6] ss:$0 sm:$0xff] }
0x1772   : > { %vm2792_vm11 = vmor %vm2790_vm10, %vm2791_vm7 }
0x1773   : > { %v2787_v34 = vsub.f32 1.0, %v2786_v33 }
0x1775   : > { %v2788_v36 = vmul.f32 %v6669_v32, %v2787_v34  ;;  %v6587_v34 = vld [vmem:[%s8272_s11 + $0x6] ss:$0 sm:$0xff] }
0x1777   : > { %v2789_v38 = vadd.f32 %v6669_v32, %v2788_v36  ;;  %v6447_v36 = vld [vmem:[%s8265_s27 + $0x78] sm:$0xff] }
0x1779   : > { %v2793_v41 = vsel %vm2792_vm11, %v6669_v32, %v2789_v38 }
0x177a   : > { %v2798_v45 = vsel %vm2795_vm12, %v2797_v40, %v2793_v41  ;;  %v6446_v40 = vld [vmem:[%s8265_s27 + $0x70] sm:$0xff] }
0x177b   : > { %v2799_v47 = vmul.f32 %v6667_v29, %v2798_v45  ;;  %v6444_v29 = vld [vmem:[%s8268_s26 + $0x70] sm:$0xff] }
0x177d   : > { %v2800_v50 = vpack.c.bf16 %v2799_v47, %v2799_v47 }
0x177f   : > { %5786 = vmatmul.msk.bf16.vlgmr.msrb.gmra.mxu3 %vm997_vm8, %v2800_v50  ;;  %v6589_v50 = vld [vmem:[%s8271_s24 + $0x6] ss:$0 sm:$0xff] }
0x1780   : > { %3064 = vmatpush.bf16.msrb.mxu3 %v6439_v48 }
0x1784   : > { %3065 = vmatpush.bf16.msrb.mxu3 %v6438_v51 }
0x178f   : > { %5830 = vmatmul.msk.bf16.vlgmr.msra.gmra.mxu3 %vm997_vm8, %v2929_v1  ;;  %v5879_v1 = vld [vmem:[%s8273_s10 + $0x18] sm:$0xf] }
0x1790   : > { %v3214_v42 = vsel %vm1046_vm9, %v5879_v1, 0 }
0x179f   : > { %5848 = vmatmul.msk.bf16.vlgmr.msrb.gmra.mxu3 %vm809_vm0, %v7512_v8 }
0x1802   : > { %v2817_v55 = vpop.f32.mrf.mxu3 }
0x1803   : > { %v2821_v46 = vpack.c.bf16 %v2817_v55, %v2817_v55 }
0x1805   : > { %5834 = vmatmul.msk.bf16.vlgmr.msrb.gmra.mxu2 %vm997_vm8, %v2821_v46 }
0x180a   : > { %v2819_v56 = vpop.f32.mrf.mxu3 }
0x1812   : > { %v2946_v57 = vpop.f32.mrf.mxu3 }
0x1813   : > { %v2950_v58 = vsel %vm997_vm8, %v2946_v57, -inf }
0x1814   : > { %2951 = vmax.xlane.f32.xlu2 %v2950_v58 }
0x181a   : > { %v2948_v60 = vpop.f32.mrf.mxu3 }
0x1822   : > { %v3067_v61 = vpop.f32.mrf.mxu3 }
0x1823   : > { %v3068_v38 = vadd.f32 %v6587_v34, %v3067_v61  ;;  %v6591_v61 = vld [vmem:[%s8269_s0 + $0x7] ss:$0 sm:$0xff] }
0x1824   : > { %v6592_v34 = vld [vmem:[%s8271_s24 + $0x7] ss:$0 sm:$0xff] }
0x1825   : > { %v3141_v45 = vpack.c.bf16 %v3068_v38, %v3068_v38 }
0x182a   : > { %v3069_v54 = vpop.f32.mrf.mxu3 }
0x1887   : > { %v2952_v62 = vpop.xlane.xlu2 %2951 }
0x1888   : > { %v2953_v63 = vsub.f32 %v2946_v57, %v2952_v62  ;;  %v7555_v0 = vpop.f32.mrf.mxu2 }
0x188a   : > { %v2954_v2 = vmul.f32 1.442695, %v2953_v63 }
0x188c   : > { %6670 = vpow2.f32 %v2954_v2 }
0x1890   : > { %v3034_v3 = vpop.f32.mrf.mxu2 }
0x1892   : > { %v6671_v4 = vpop.eup %6670 }
0x1893   : > { %v2956_v5 = vsel %vm997_vm8, %v6671_v4, 0.0 }
0x1894   : > { %2957 = vadd.xlane.f32.xlu0 %v2956_v5 }
0x1907   : > { %v2958_v11 = vpop.xlane.xlu0 %2957 }
0x1908   : > { %6672 = vrcp.f32 %v2958_v11  ;;  %v2970_v7 = vand.u32 2147483648, %v2958_v11  ;;  %v2968_v15 = vand.u32 2147483647, %v2958_v11  ;;  %vm2964_vm14 = vweird.f32 %v2958_v11 }
0x190a   : > { %v2971_v17 = vor.u32 1.1754944e-38, %v2970_v7  ;;  %vm2969_vm1 = vcmp.eq.f32.partialorder %v2968_v15, 8.507059e+37 }
0x190e   : > { %v6673_v12 = vpop.eup %6672 }
0x190f   : > { %v2960_v13 = vmul.f32 %v6673_v12, %v2958_v11  ;;  %vm2965_vm13 = vweird.f32 %v6673_v12 }
0x1910   : > { %vm2966_vm15 = vmor %vm2964_vm14, %vm2965_vm13 }
0x1911   : > { %v2961_v27 = vsub.f32 1.0, %v2960_v13  ;;  %v6448_v13 = vld [vmem:[%s8266_s3 + $0x70] sm:$0xff] }
0x1913   : > { %v2962_v14 = vmul.f32 %v6673_v12, %v2961_v27 }
0x1915   : > { %v2963_v16 = vadd.f32 %v6673_v12, %v2962_v14 }
0x1917   : > { %v2967_v18 = vsel %vm2966_vm15, %v6673_v12, %v2963_v16  ;;  %v6449_v12 = vld [vmem:[%s8266_s3 + $0x78] sm:$0xff] }
0x1918   : > { %v2972_v19 = vsel %vm2969_vm1, %v2971_v17, %v2967_v18 }
0x1919   : > { %v2973_v20 = vmul.f32 %v6671_v4, %v2972_v19 }
0x191b   : > { %v2974_v21 = vpack.c.bf16 %v2973_v20, %v2973_v20 }
0x191d   : > { %5831 = vmatmul.msk.bf16.vlgmr.msrb.gmra.mxu0 %vm997_vm8, %v2974_v21 }
0x191e   : > { %3223 = vmatpush.bf16.msrb.mxu0 %v3214_v42  ;;  %v5925_v42 = vld [vmem:[%s8273_s10 + $0x1c] sm:$0xf] }
0x192d   : > { %5862 = vmatmul.msk.bf16.vlgmr.msra.gmra.mxu0 %vm809_vm0, %v7057_v49 }
0x199a   : > { %v2991_v25 = vpop.f32.mrf.mxu0 }
0x199b   : > { %v2995_v28 = vpack.c.bf16 %v2991_v25, %v2991_v25  ;;  %v6450_v25 = vld [vmem:[%s8274_s12 + $0x40] sm:$0xff] }
0x199d   : > { %5833 = vmatmul.msk.bf16.vlgmr.msra.gmra.mxu1 %vm997_vm8, %v2995_v28  ;;  %v6453_v28 = vld [vmem:[%s8275_s14 + $0x48] sm:$0xff] }
0x199e   : > { %3258 = vmatpush.bf16.msra.mxu1 %v6445_v26 }
0x19a2   : > { %v2993_v30 = vpop.f32.mrf.mxu0  ;;  %3259 = vmatpush.bf16.msra.mxu1 %v6444_v29 }
0x19a3   : > { %v6452_v30 = vld [vmem:[%s8275_s14 + $0x40] sm:$0xff] }
0x19aa   : > { %v3102_v32 = vpop.f32.mrf.mxu0 }
0x19ab   : > { %v3103_v33 = vadd.f32 %v6588_v31, %v3102_v32  ;;  %v6590_v32 = vld [vmem:[%s8272_s11 + $0x7] ss:$0 sm:$0xff] }
0x19ad   : > { %v3142_v35 = vpack.c.bf16 %v3103_v33, %v3103_v33  ;;  %5876 = vmatmul.msk.bf16.vlgmr.msrb.gmra.mxu1 %vm809_vm0, %v7057_v49 }
0x19af   : > { %v3147_v37 = vsel %vm997_vm8, %v3142_v35, 0 }
0x19b0   : > { %3156 = vmatpush.bf16.xpose.msra.mxu2 %v3147_v37 }
0x19b2   : > { %v3104_v41 = vpop.f32.mrf.mxu0 }
0x19b3   : > { %v6456_v41 = vld [vmem:[%s8274_s12 + $0x50] sm:$0xff] }
0x19b7   : > { %5877 = vmatmul.msk.bf16.vlgmr.msra.gmra.mxu2 %vm997_vm8, %v3141_v45 }
0x19b8   : > { %3293 = vmatpush.bf16.msrb.mxu2 %v6447_v36  ;;  %v6457_v36 = vld [vmem:[%s8274_s12 + $0x58] sm:$0xff] }
0x19bc   : > { %3294 = vmatpush.bf16.msrb.mxu2 %v6446_v40 }
0x19bd   : > { %5894 = vmatmul.msk.bf16.vlgmr.msra.gmra.mxu1 %vm809_vm0, %v7512_v8 }
0x19c7   : > { %5908 = vmatmul.msk.bf16.vlgmr.msrb.gmra.mxu2 %vm809_vm0, %v7057_v49 }
0x1a1a   : > { %v7604_v47 = vpop.f32.mrf.mxu1 }
0x1a22   : > { %v3015_v48 = vpop.f32.mrf.mxu1 }
0x1a2a   : > { %v3137_v51 = vpop.f32.mrf.mxu1 }
0x1a2b   : > { %v3138_v52 = vadd.f32 %v6589_v50, %v3137_v51 }
0x1a2d   : > { %v3187_v53 = vpack.c.bf16 %v3138_v52, %v3138_v52  ;;  %v3033_v52 = vadd.f32 %v7555_v0, %v7604_v47  ;;  %v6594_v0 = vld [vmem:[%s8276_s15 + $0x4] ss:$0 sm:$0xff] }
0x1a2f   : > { %v3192_v39 = vsel %vm1046_vm9, %v3187_v53, 0 }
0x1a30   : > { %3201 = vmatpush.bf16.msra.mxu3 %v3192_v39  ;;  %v3408_v39 = vsel %vm1046_vm9, %v5925_v42, 0 }
0x1a31   : > { %3417 = vmatpush.bf16.msra.mxu2 %v3408_v39 }
0x1a32   : > { %v3139_v55 = vpop.f32.mrf.mxu1 }
0x1a34   : > { %3328 = vmatpush.bf16.msrb.mxu3 %v6449_v12 }
0x1a38   : > { %3329 = vmatpush.bf16.msrb.mxu3 %v6448_v13 }
0x1a3a   : > { %v3158_v46 = vpop.f32.mrf.mxu2  ;;  %v3261_v56 = vpop.f32.mrf.mxu1 }
0x1a3b   : > { %v3162_v57 = vsel %vm997_vm8, %v3158_v46, -inf  ;;  %v3262_v33 = vadd.f32 %v6590_v32, %v3261_v56  ;;  %v6596_v32 = vld [vmem:[%s8279_s17 + $0x4] ss:$0 sm:$0xff] }
0x1a3c   : > { %3163 = vmax.xlane.f32.xlu1 %v3162_v57 }
0x1a3d   : > { %v3335_v37 = vpack.c.bf16 %v3262_v33, %v3262_v33 }
0x1a42   : > { %v3160_v58 = vpop.f32.mrf.mxu2  ;;  %v3263_v60 = vpop.f32.mrf.mxu1 }
0x1a4a   : > { %v3296_v54 = vpop.f32.mrf.mxu2 }
0x1a4b   : > { %v3297_v62 = vadd.f32 %v6591_v61, %v3296_v54 }
0x1a4d   : > { %v3336_v63 = vpack.c.bf16 %v3297_v62, %v3297_v62 }
0x1a4f   : > { %v3341_v2 = vsel %vm997_vm8, %v3336_v63, 0 }
0x1a50   : > { %3350 = vmatpush.bf16.xpose.msra.mxu0 %v3341_v2 }
0x1a52   : > { %v3298_v3 = vpop.f32.mrf.mxu2 }
0x1aaf   : > { %v3164_v4 = vpop.xlane.xlu1 %3163 }
0x1ab0   : > { %v3165_v5 = vsub.f32 %v3158_v46, %v3164_v4 }
0x1ab2   : > { %v3166_v6 = vmul.f32 1.442695, %v3165_v5 }
0x1ab4   : > { %6674 = vpow2.f32 %v3166_v6 }
0x1aba   : > { %v6675_v9 = vpop.eup %6674 }
0x1abb   : > { %v3168_v11 = vsel %vm997_vm8, %v6675_v9, 0.0 }
0x1abc   : > { %3169 = vadd.xlane.f32.xlu2 %v3168_v11  ;;  %v6454_v11 = vld [vmem:[%s8277_s16 + $0x40] sm:$0xff] }
0x1b2f   : > { %v3170_v27 = vpop.xlane.xlu2 %3169 }
0x1b30   : > { %6676 = vrcp.f32 %v3170_v27  ;;  %v3182_v16 = vand.u32 2147483648, %v3170_v27  ;;  %v3180_v18 = vand.u32 2147483647, %v3170_v27  ;;  %vm3176_vm3 = vweird.f32 %v3170_v27 }
0x1b32   : > { %v3183_v20 = vor.u32 1.1754944e-38, %v3182_v16  ;;  %vm3181_vm5 = vcmp.eq.f32.partialorder %v3180_v18, 8.507059e+37 }
0x1b36   : > { %v6677_v7 = vpop.eup %6676 }
0x1b37   : > { %v3172_v14 = vmul.f32 %v6677_v7, %v3170_v27  ;;  %vm3177_vm2 = vweird.f32 %v6677_v7 }
0x1b38   : > { %vm3178_vm4 = vmor %vm3176_vm3, %vm3177_vm2 }
0x1b39   : > { %v3173_v15 = vsub.f32 1.0, %v3172_v14 }
0x1b3b   : > { %v3174_v17 = vmul.f32 %v6677_v7, %v3173_v15 }
0x1b3d   : > { %v3175_v19 = vadd.f32 %v6677_v7, %v3174_v17 }
0x1b3f   : > { %v3179_v21 = vsel %vm3178_vm4, %v6677_v7, %v3175_v19 }
0x1b40   : > { %v3184_v59 = vsel %vm3181_vm5, %v3183_v20, %v3179_v21 }
0x1b41   : > { %v3185_v22 = vmul.f32 %v6675_v9, %v3184_v59  ;;  %v6455_v9 = vld [vmem:[%s8277_s16 + $0x48] sm:$0xff]  ;;  %v6459_v59 = vld [vmem:[%s8275_s14 + $0x58] sm:$0xff] }
0x1b43   : > { %v3186_v24 = vpack.c.bf16 %v3185_v22, %v3185_v22 }
0x1b45   : > { %5878 = vmatmul.msk.bf16.vlgmr.msra.gmra.mxu3 %vm997_vm8, %v3186_v24 }
0x1b46   : > { %3459 = vmatpush.bf16.msra.mxu3 %v6451_v23  ;;  %v6458_v23 = vld [vmem:[%s8275_s14 + $0x50] sm:$0xff] }
0x1b4a   : > { %3460 = vmatpush.bf16.msra.mxu3 %v6450_v25  ;;  %v6461_v25 = vld [vmem:[%s8277_s16 + $0x58] sm:$0xff] }
0x1b55   : > { %5922 = vmatmul.msk.bf16.vlgmr.msrb.gmra.mxu3 %vm809_vm0, %v7057_v49 }
0x1b65   : > { %5941 = vmatmul.msk.bf16.vlgmr.msra.gmra.mxu3 %vm809_vm0, %v7512_v8 }
0x1bc8   : > { %v3203_v26 = vpop.f32.mrf.mxu3 }
0x1bc9   : > { %v3207_v29 = vpack.c.bf16 %v3203_v26, %v3203_v26 }
0x1bcb   : > { %5880 = vmatmul.msk.bf16.vlgmr.msrb.gmra.mxu0 %vm997_vm8, %v3207_v29 }
0x1bcc   : > { %3494 = vmatpush.bf16.msrb.mxu0 %v6453_v28  ;;  %v6460_v28 = vld [vmem:[%s8277_s16 + $0x50] sm:$0xff] }
0x1bd0   : > { %v3205_v31 = vpop.f32.mrf.mxu3  ;;  %3495 = vmatpush.bf16.msrb.mxu0 %v6452_v30  ;;  %v6593_v30 = vld [vmem:[%s8278_s13 + $0x4] ss:$0 sm:$0xff] }
0x1bd8   : > { %v3331_v35 = vpop.f32.mrf.mxu3 }
0x1bd9   : > { %v3332_v38 = vadd.f32 %v6592_v34, %v3331_v35 }
0x1bdb   : > { %v3381_v40 = vpack.c.bf16 %v3332_v38, %v3332_v38  ;;  %5923 = vmatmul.msk.bf16.vlgmr.msra.gmra.mxu0 %vm997_vm8, %v3335_v37 }
0x1bdc   : > { %3633 = vmatpush.bf16.msra.mxu0 %v6457_v36 }
0x1bdd   : > { %v3386_v45 = vsel %vm1046_vm9, %v3381_v40, 0  ;;  %v6597_v40 = vld [vmem:[%s8276_s15 + $0x5] ss:$0 sm:$0xff] }
0x1bde   : > { %3395 = vmatpush.bf16.msrb.mxu1 %v3386_v45 }
0x1be0   : > { %v3333_v48 = vpop.f32.mrf.mxu3  ;;  %3634 = vmatpush.bf16.msra.mxu0 %v6456_v41 }
0x1be2   : > { %3529 = vmatpush.bf16.msra.mxu1 %v6455_v9 }
0x1be6   : > { %3530 = vmatpush.bf16.msra.mxu1 %v6454_v11 }
0x1be8   : > { %v7658_v50 = vpop.f32.mrf.mxu3 }
0x1be9   : > { %v3463_v31 = vadd.f32 %v6593_v30, %v7658_v50 }
0x1beb   : > { %5955 = vmatmul.msk.bf16.vlgmr.msrb.gmra.mxu0 %vm809_vm0, %v7512_v8  ;;  %v3536_v34 = vpack.c.bf16 %v3463_v31, %v3463_v31 }
0x1bf0   : > { %v3464_v51 = vpop.f32.mrf.mxu3 }
0x1bfb   : > { %5986 = vmatmul.msk.bf16.vlgmr.msra.gmra.mxu0 %vm809_vm0, %v7512_v8 }
0x1c48   : > { %v3225_v53 = vpop.f32.mrf.mxu0 }
0x1c49   : > { %v7666_v1 = vadd.f32 %v3225_v53, %v3033_v52 }
0x1c50   : > { %v3227_v55 = vpop.f32.mrf.mxu0 }
0x1c58   : > { %v3352_v46 = vpop.f32.mrf.mxu0 }
0x1c59   : > { %v3356_v56 = vsel %vm997_vm8, %v3352_v46, -inf }
0x1c5a   : > { %3357 = vmax.xlane.f32.xlu0 %v3356_v56  ;;  %v6599_v56 = vld [vmem:[%s8279_s17 + $0x5] ss:$0 sm:$0xff] }
0x1c60   : > { %v3354_v57 = vpop.f32.mrf.mxu0 }
0x1c68   : > { %v3497_v47 = vpop.f32.mrf.mxu0 }
0x1c69   : > { %v3498_v58 = vadd.f32 %v6594_v0, %v3497_v47 }
0x1c6b   : > { %v3537_v60 = vpack.c.bf16 %v3498_v58, %v3498_v58 }
0x1c6d   : > { %v3542_v61 = vsel %vm997_vm8, %v3537_v60, 0 }
0x1c6e   : > { %3551 = vmatpush.bf16.xpose.msrb.mxu2 %v3542_v61 }
0x1c70   : > { %v3499_v54 = vpop.f32.mrf.mxu0 }
0x1c78   : > { %v7677_v62 = vpop.f32.mrf.mxu0 }
0x1c80   : > { %v3638_v63 = vpop.f32.mrf.mxu0 }
0x1ccd   : > { %v3358_v2 = vpop.xlane.xlu0 %3357 }
0x1cce   : > { %v3359_v3 = vsub.f32 %v3352_v46, %v3358_v2 }
0x1cd0   : > { %v3360_v4 = vmul.f32 1.442695, %v3359_v3 }
0x1cd2   : > { %6678 = vpow2.f32 %v3360_v4 }
0x1cd8   : > { %v6679_v5 = vpop.eup %6678 }
0x1cd9   : > { %v3362_v6 = vsel %vm997_vm8, %v6679_v5, 0.0 }
0x1cda   : > { %3363 = vadd.xlane.f32.xlu1 %v3362_v6 }
0x1d4d   : > { %v3364_v12 = vpop.xlane.xlu1 %3363 }
0x1d4e   : > { %6680 = vrcp.f32 %v3364_v12  ;;  %v3376_v14 = vand.u32 2147483648, %v3364_v12  ;;  %v3374_v16 = vand.u32 2147483647, %v3364_v12  ;;  %vm3370_vm7 = vweird.f32 %v3364_v12 }
0x1d50   : > { %v3377_v18 = vor.u32 1.1754944e-38, %v3376_v14  ;;  %vm3375_vm11 = vcmp.eq.f32.partialorder %v3374_v16, 8.507059e+37  ;;  %v6463_v16 = vld [vmem:[%s8274_s12 + $0x68] sm:$0xff] }
0x1d54   : > { %v6681_v13 = vpop.eup %6680 }
0x1d55   : > { %v3366_v27 = vmul.f32 %v6681_v13, %v3364_v12  ;;  %vm3371_vm6 = vweird.f32 %v6681_v13 }
0x1d56   : > { %vm3372_vm10 = vmor %vm3370_vm7, %vm3371_vm6 }
0x1d57   : > { %v3367_v7 = vsub.f32 1.0, %v3366_v27 }
0x1d59   : > { %v3368_v15 = vmul.f32 %v6681_v13, %v3367_v7 }
0x1d5b   : > { %v3369_v17 = vadd.f32 %v6681_v13, %v3368_v15 }
0x1d5d   : > { %v3373_v19 = vsel %vm3372_vm10, %v6681_v13, %v3369_v17 }
0x1d5e   : > { %v3378_v20 = vsel %vm3375_vm11, %v3377_v18, %v3373_v19  ;;  %v6462_v18 = vld [vmem:[%s8274_s12 + $0x60] sm:$0xff] }
0x1d5f   : > { %v3379_v21 = vmul.f32 %v6679_v5, %v3378_v20  ;;  %v6595_v19 = vld [vmem:[%s8278_s13 + $0x5] ss:$0 sm:$0xff] }
0x1d60   : > { %v3637_v20 = vadd.f32 %v6595_v19, %v7677_v62 }
0x1d61   : > { %v3380_v22 = vpack.c.bf16 %v3379_v21, %v3379_v21 }
0x1d62   : > { %v3710_v21 = vpack.c.bf16 %v3637_v20, %v3637_v20 }
0x1d63   : > { %5924 = vmatmul.msk.bf16.vlgmr.msrb.gmra.mxu1 %vm997_vm8, %v3380_v22 }
0x1d64   : > { %3668 = vmatpush.bf16.msrb.mxu1 %v6459_v59  ;;  %v5972_v59 = vld [vmem:[%s8280_s18 + $0x10] sm:$0xf] }
0x1d65   : > { %v3802_v22 = vsel %vm1046_vm9, %v5972_v59, 0  ;;  %v6064_v59 = vld [vmem:[%s8280_s18 + $0x18] sm:$0xf] }
0x1d68   : > { %3669 = vmatpush.bf16.msrb.mxu1 %v6458_v23 }
0x1d73   : > { %5969 = vmatmul.msk.bf16.vlgmr.msra.gmra.mxu1 %vm809_vm0, %v7512_v8 }
0x1d83   : > { %6000 = vmatmul.msk.bf16.vlgmr.msrb.gmra.mxu1 %vm809_vm0, %v7512_v8 }
0x1de0   : > { %v3397_v24 = vpop.f32.mrf.mxu1 }
0x1de1   : > { %v3401_v26 = vpack.c.bf16 %v3397_v24, %v3397_v24 }
0x1de3   : > { %5926 = vmatmul.msk.bf16.vlgmr.msra.gmra.mxu2 %vm997_vm8, %v3401_v26 }
0x1de4   : > { %3703 = vmatpush.bf16.msra.mxu2 %v6461_v25 }
0x1de8   : > { %v3399_v29 = vpop.f32.mrf.mxu1  ;;  %3704 = vmatpush.bf16.msra.mxu2 %v6460_v28 }
0x1df0   : > { %v3532_v33 = vpop.f32.mrf.mxu1 }
0x1df1   : > { %v3533_v35 = vadd.f32 %v6596_v32, %v3532_v33 }
0x1df3   : > { %v3582_v36 = vpack.c.bf16 %v3533_v35, %v3533_v35  ;;  %5970 = vmatmul.msk.bf16.vlgmr.msrb.gmra.mxu2 %vm997_vm8, %v3536_v34 }
0x1df4   : > { %3811 = vmatpush.bf16.msrb.mxu2 %v3802_v22  ;;  %v3995_v22 = vsel %vm1046_vm9, %v6064_v59, 0 }
0x1df5   : > { %v3587_v37 = vsel %vm1046_vm9, %v3582_v36, 0 }
0x1df6   : > { %3596 = vmatpush.bf16.msrb.mxu3 %v3587_v37 }
0x1df8   : > { %v3534_v38 = vpop.f32.mrf.mxu1 }
0x1df9   : > { %v6465_v38 = vld [vmem:[%s8275_s14 + $0x68] sm:$0xff] }
0x1e00   : > { %v3671_v41 = vpop.f32.mrf.mxu1 }
0x1e01   : > { %v3672_v45 = vadd.f32 %v6597_v40, %v3671_v41  ;;  %v6464_v40 = vld [vmem:[%s8275_s14 + $0x60] sm:$0xff] }
0x1e03   : > { %v3711_v48 = vpack.c.bf16 %v3672_v45, %v3672_v45  ;;  %6014 = vmatmul.msk.bf16.vlgmr.msra.gmra.mxu2 %vm809_vm0, %v7512_v8 }
0x1e05   : > { %v3716_v50 = vsel %vm997_vm8, %v3711_v48, 0 }
0x1e06   : > { %3725 = vmatpush.bf16.xpose.msra.mxu3 %v3716_v50 }
0x1e08   : > { %v3673_v51 = vpop.f32.mrf.mxu1 }
0x1e66   : > { %v3419_v52 = vpop.f32.mrf.mxu2 }
0x1e67   : > { %v7720_v53 = vadd.f32 %v3419_v52, %v7666_v1 }
0x1e6e   : > { %v3421_v42 = vpop.f32.mrf.mxu2 }
0x1e76   : > { %v3553_v39 = vpop.f32.mrf.mxu2 }
0x1e77   : > { %v3557_v55 = vsel %vm997_vm8, %v3553_v39, -inf }
0x1e78   : > { %3558 = vmax.xlane.f32.xlu2 %v3557_v55 }
0x1e7e   : > { %v3555_v46 = vpop.f32.mrf.mxu2 }
0x1e86   : > { %v3706_v57 = vpop.f32.mrf.mxu2 }
0x1e87   : > { %v3707_v0 = vadd.f32 %v6599_v56, %v3706_v57 }
0x1e89   : > { %v3756_v47 = vpack.c.bf16 %v3707_v0, %v3707_v0 }
0x1e8b   : > { %v3761_v58 = vsel %vm1046_vm9, %v3756_v47, 0  ;;  %v6017_v47 = vld [vmem:[%s8280_s18 + $0x14] sm:$0xf] }
0x1e8c   : > { %3770 = vmatpush.bf16.msrb.mxu0 %v3761_v58  ;;  %v3783_v58 = vsel %vm1046_vm9, %v6017_v47, 0 }
0x1e8d   : > { %3792 = vmatpush.bf16.msra.mxu1 %v3783_v58 }
0x1e8e   : > { %v3708_v60 = vpop.f32.mrf.mxu2 }
0x1e8f   : > { %v6467_v60 = vld [vmem:[%s8277_s16 + $0x68] sm:$0xff] }
0x1e90   : > { %3880 = vmatpush.bf16.msra.mxu0 %v6465_v38 }
0x1e91   : > { %3915 = vmatpush.bf16.msrb.mxu1 %v6467_v60 }
0x1e94   : > { %3881 = vmatpush.bf16.msra.mxu0 %v6464_v40 }
0x1eeb   : > { %v3559_v61 = vpop.xlane.xlu2 %3558 }
0x1eec   : > { %v3560_v1 = vsub.f32 %v3553_v39, %v3559_v61  ;;  %v6466_v61 = vld [vmem:[%s8277_s16 + $0x60] sm:$0xff] }
0x1eed   : > { %3916 = vmatpush.bf16.msrb.mxu1 %v6466_v61 }
0x1eee   : > { %v3561_v54 = vmul.f32 1.442695, %v3560_v1 }
0x1ef0   : > { %6682 = vpow2.f32 %v3561_v54  ;;  %v6469_v54 = vld [vmem:[%s8274_s12 + $0x78] sm:$0xff] }
0x1ef6   : > { %v6683_v63 = vpop.eup %6682 }
0x1ef7   : > { %v3563_v2 = vsel %vm997_vm8, %v6683_v63, 0.0 }
0x1ef8   : > { %3564 = vadd.xlane.f32.xlu0 %v3563_v2  ;;  %v6468_v2 = vld [vmem:[%s8274_s12 + $0x70] sm:$0xff] }
0x1f6b   : > { %v3565_v3 = vpop.xlane.xlu0 %3564 }
0x1f6c   : > { %6684 = vrcp.f32 %v3565_v3  ;;  %v3577_v9 = vand.u32 2147483648, %v3565_v3  ;;  %v3575_v12 = vand.u32 2147483647, %v3565_v3  ;;  %vm3571_vm13 = vweird.f32 %v3565_v3 }
0x1f6e   : > { %v3578_v27 = vor.u32 1.1754944e-38, %v3577_v9  ;;  %vm3576_vm15 = vcmp.eq.f32.partialorder %v3575_v12, 8.507059e+37  ;;  %v6600_v9 = vld [vmem:[%s8278_s13 + $0x6] ss:$0 sm:$0xff]  ;;  %v6471_v12 = vld [vmem:[%s8275_s14 + $0x78] sm:$0xff] }
0x1f72   : > { %v6685_v4 = vpop.eup %6684 }
0x1f73   : > { %v3567_v5 = vmul.f32 %v6685_v4, %v3565_v3  ;;  %vm3572_vm12 = vweird.f32 %v6685_v4 }
0x1f74   : > { %vm3573_vm14 = vmor %vm3571_vm13, %vm3572_vm12 }
0x1f75   : > { %v3568_v6 = vsub.f32 1.0, %v3567_v5 }
0x1f77   : > { %v3569_v11 = vmul.f32 %v6685_v4, %v3568_v6 }
0x1f79   : > { %v3570_v13 = vadd.f32 %v6685_v4, %v3569_v11 }
0x1f7b   : > { %v3574_v7 = vsel %vm3573_vm14, %v6685_v4, %v3570_v13  ;;  %v6601_v4 = vld [vmem:[%s8276_s15 + $0x6] ss:$0 sm:$0xff] }
0x1f7c   : > { %v3579_v14 = vsel %vm3576_vm15, %v3578_v27, %v3574_v7  ;;  %v6470_v7 = vld [vmem:[%s8275_s14 + $0x70] sm:$0xff] }
0x1f7d   : > { %v3580_v15 = vmul.f32 %v6683_v63, %v3579_v14 }
0x1f7f   : > { %v3581_v17 = vpack.c.bf16 %v3580_v15, %v3580_v15 }
0x1f81   : > { %5971 = vmatmul.msk.bf16.vlgmr.msrb.gmra.mxu3 %vm997_vm8, %v3581_v17 }
0x1f82   : > { %3845 = vmatpush.bf16.msrb.mxu3 %v6463_v16 }
0x1f86   : > { %3846 = vmatpush.bf16.msrb.mxu3 %v6462_v18  ;;  %v6602_v18 = vld [vmem:[%s8279_s17 + $0x6] ss:$0 sm:$0xff] }
0x1f91   : > { %6015 = vmatmul.msk.bf16.vlgmr.msra.gmra.mxu3 %vm997_vm8, %v3710_v21 }
0x1fa1   : > { %6033 = vmatmul.msk.bf16.vlgmr.msrb.gmra.mxu3 %vm809_vm0, %v7512_v8 }
0x2004   : > { %v3598_v23 = vpop.f32.mrf.mxu3 }
0x2005   : > { %v3602_v24 = vpack.c.bf16 %v3598_v23, %v3598_v23 }
0x2007   : > { %6019 = vmatmul.msk.bf16.vlgmr.msrb.gmra.mxu2 %vm997_vm8, %v3602_v24 }
0x200c   : > { %v3600_v25 = vpop.f32.mrf.mxu3 }
0x2014   : > { %v3727_v26 = vpop.f32.mrf.mxu3 }
0x2015   : > { %v3731_v62 = vsel %vm997_vm8, %v3727_v26, -inf }
0x2016   : > { %3732 = vmax.xlane.f32.xlu1 %v3731_v62 }
0x201c   : > { %v3729_v28 = vpop.f32.mrf.mxu3 }
0x2024   : > { %v3848_v29 = vpop.f32.mrf.mxu3 }
0x2025   : > { %v3849_v27 = vadd.f32 %v6600_v9, %v3848_v29 }
0x2027   : > { %v3922_v15 = vpack.c.bf16 %v3849_v27, %v3849_v27 }
0x202c   : > { %v3850_v30 = vpop.f32.mrf.mxu3 }
0x202d   : > { %v6604_v30 = vld [vmem:[%s8276_s15 + $0x7] ss:$0 sm:$0xff] }
0x2089   : > { %v3733_v31 = vpop.xlane.xlu1 %3732 }
0x208a   : > { %v3734_v32 = vsub.f32 %v3727_v26, %v3733_v31  ;;  %v7748_v33 = vpop.f32.mrf.mxu2 }
0x208c   : > { %v3735_v34 = vmul.f32 1.442695, %v3734_v32 }
0x208e   : > { %6686 = vpow2.f32 %v3735_v34 }
0x2092   : > { %v3815_v35 = vpop.f32.mrf.mxu2 }
0x2094   : > { %v6687_v36 = vpop.eup %6686 }
0x2095   : > { %v3737_v37 = vsel %vm997_vm8, %v6687_v36, 0.0 }
0x2096   : > { %3738 = vadd.xlane.f32.xlu2 %v3737_v37 }
0x2109   : > { %v3739_v41 = vpop.xlane.xlu2 %3738 }
0x210a   : > { %6688 = vrcp.f32 %v3739_v41  ;;  %v3751_v51 = vand.u32 2147483648, %v3739_v41  ;;  %v3749_v42 = vand.u32 2147483647, %v3739_v41  ;;  %vm3745_vm2 = vweird.f32 %v3739_v41 }
0x210c   : > { %v3752_v55 = vor.u32 1.1754944e-38, %v3751_v51  ;;  %vm3750_vm4 = vcmp.eq.f32.partialorder %v3749_v42, 8.507059e+37 }
0x2110   : > { %v6689_v45 = vpop.eup %6688 }
0x2111   : > { %v3741_v48 = vmul.f32 %v6689_v45, %v3739_v41  ;;  %vm3746_vm1 = vweird.f32 %v6689_v45 }
0x2112   : > { %vm3747_vm3 = vmor %vm3745_vm2, %vm3746_vm1 }
0x2113   : > { %v3742_v50 = vsub.f32 1.0, %v3741_v48  ;;  %v6473_v48 = vld [vmem:[%s8277_s16 + $0x78] sm:$0xff] }
0x2115   : > { %v3743_v52 = vmul.f32 %v6689_v45, %v3742_v50  ;;  %v6472_v50 = vld [vmem:[%s8277_s16 + $0x70] sm:$0xff] }
0x2117   : > { %v3744_v39 = vadd.f32 %v6689_v45, %v3743_v52 }
0x2119   : > { %v3748_v46 = vsel %vm3747_vm3, %v6689_v45, %v3744_v39 }
0x211a   : > { %v3753_v56 = vsel %vm3750_vm4, %v3752_v55, %v3748_v46 }
0x211b   : > { %v3754_v57 = vmul.f32 %v6687_v36, %v3753_v56 }
0x211d   : > { %v3755_v0 = vpack.c.bf16 %v3754_v57, %v3754_v57 }
0x211f   : > { %6016 = vmatmul.msk.bf16.vlgmr.msrb.gmra.mxu0 %vm997_vm8, %v3755_v0 }
0x2120   : > { %4004 = vmatpush.bf16.msrb.mxu0 %v3995_v22 }
0x212f   : > { %6047 = vmatmul.msk.bf16.vlgmr.msra.gmra.mxu0 %vm809_vm0, %v7512_v8 }
0x219c   : > { %v3772_v1 = vpop.f32.mrf.mxu0 }
0x219d   : > { %v3776_v63 = vpack.c.bf16 %v3772_v1, %v3772_v1 }
0x219f   : > { %6018 = vmatmul.msk.bf16.vlgmr.msra.gmra.mxu1 %vm997_vm8, %v3776_v63 }
0x21a0   : > { %4039 = vmatpush.bf16.msra.mxu1 %v6469_v54 }
0x21a4   : > { %v3774_v3 = vpop.f32.mrf.mxu0  ;;  %4040 = vmatpush.bf16.msra.mxu1 %v6468_v2  ;;  %v6603_v2 = vld [vmem:[%s8278_s13 + $0x7] ss:$0 sm:$0xff] }
0x21ac   : > { %v3883_v5 = vpop.f32.mrf.mxu0 }
0x21ad   : > { %v3884_v6 = vadd.f32 %v6601_v4, %v3883_v5  ;;  %v6605_v4 = vld [vmem:[%s8279_s17 + $0x7] ss:$0 sm:$0xff] }
0x21af   : > { %v3923_v11 = vpack.c.bf16 %v3884_v6, %v3884_v6  ;;  %6061 = vmatmul.msk.bf16.vlgmr.msrb.gmra.mxu1 %vm809_vm0, %v7512_v8 }
0x21b1   : > { %v3928_v13 = vsel %vm997_vm8, %v3923_v11, 0 }
0x21b2   : > { %3937 = vmatpush.bf16.xpose.msra.mxu2 %v3928_v13 }
0x21b4   : > { %v3885_v14 = vpop.f32.mrf.mxu0 }
0x21b9   : > { %6062 = vmatmul.msk.bf16.vlgmr.msra.gmra.mxu2 %vm997_vm8, %v3922_v15 }
0x21ba   : > { %4074 = vmatpush.bf16.msrb.mxu2 %v6471_v12 }
0x21be   : > { %4075 = vmatpush.bf16.msrb.mxu2 %v6470_v7 }
0x21bf   : > { %6079 = vmatmul.msk.bf16.vlgmr.msra.gmra.mxu1 %vm809_vm0, %v7512_v8 }
0x21c9   : > { %6093 = vmatmul.msk.bf16.vlgmr.msrb.gmra.mxu2 %vm809_vm0, %v7512_v8 }
0x221c   : > { %v7797_v16 = vpop.f32.mrf.mxu1 }
0x221d   : > { %v3814_v13 = vadd.f32 %v7748_v33, %v7797_v16  ;;  %v6110_v33 = vld [vmem:[%s8280_s18 + $0x1c] sm:$0xf] }
0x221e   : > { %v4189_v16 = vsel %vm1046_vm9, %v6110_v33, 0  ;;  %v6479_v33 = vld [vmem:[%s8204_s22 + $0x58] sm:$0xff] }
0x221f   : > { %4198 = vmatpush.bf16.msra.mxu2 %v4189_v16  ;;  %v6478_v16 = vld [vmem:[%s8204_s22 + $0x50] sm:$0xff] }
0x2224   : > { %v3796_v17 = vpop.f32.mrf.mxu1 }
0x222c   : > { %v3918_v19 = vpop.f32.mrf.mxu1 }
0x222d   : > { %v3919_v20 = vadd.f32 %v6602_v18, %v3918_v19 }
0x222f   : > { %v3968_v21 = vpack.c.bf16 %v3919_v20, %v3919_v20 }
0x2231   : > { %v3973_v23 = vsel %vm1046_vm9, %v3968_v21, 0 }
0x2232   : > { %3982 = vmatpush.bf16.msra.mxu3 %v3973_v23 }
0x2234   : > { %v3920_v24 = vpop.f32.mrf.mxu1 }
0x2236   : > { %4109 = vmatpush.bf16.msrb.mxu3 %v6473_v48  ;;  %v6485_v48 = vld [vmem:[%s8268_s26 + $0x88] sm:$0xff] }
0x223a   : > { %4110 = vmatpush.bf16.msrb.mxu3 %v6472_v50  ;;  %v6484_v50 = vld [vmem:[%s8268_s26 + $0x80] sm:$0xff] }
0x223c   : > { %v3939_v25 = vpop.f32.mrf.mxu2  ;;  %v4042_v26 = vpop.f32.mrf.mxu1 }
0x223d   : > { %v3943_v62 = vsel %vm997_vm8, %v3939_v25, -inf  ;;  %v4043_v3 = vadd.f32 %v6603_v2, %v4042_v26 }
0x223e   : > { %3944 = vmax.xlane.f32.xlu0 %v3943_v62 }
0x223f   : > { %v4116_v6 = vpack.c.bf16 %v4043_v3, %v4043_v3  ;;  %v6475_v3 = vld [vmem:[%s8202_s20 + $0x18] sm:$0xff] }
0x2244   : > { %v3941_v28 = vpop.f32.mrf.mxu2  ;;  %v4044_v29 = vpop.f32.mrf.mxu1 }
0x224c   : > { %v4077_v31 = vpop.f32.mrf.mxu2 }
0x224d   : > { %v4078_v32 = vadd.f32 %v6604_v30, %v4077_v31 }
0x224f   : > { %v4117_v34 = vpack.c.bf16 %v4078_v32, %v4078_v32 }
0x2251   : > { %v4122_v35 = vsel %vm997_vm8, %v4117_v34, 0 }
0x2252   : > { %4131 = vmatpush.bf16.xpose.msra.mxu0 %v4122_v35 }
0x2254   : > { %v4079_v36 = vpop.f32.mrf.mxu2 }
0x22b1   : > { %v3945_v37 = vpop.xlane.xlu0 %3944 }
0x22b2   : > { %v3946_v38 = vsub.f32 %v3939_v25, %v3945_v37  ;;  %v6487_v37 = vld [vmem:[%s8265_s27 + $0x88] sm:$0xff] }
0x22b3   : > { %4485 = vmatpush.bf16.msrb.mxu2 %v6487_v37  ;;  %v6609_v37 = vld [vmem:[%s8271_s24 + $0x8] ss:$0 sm:$0xff] }
0x22b4   : > { %v3947_v40 = vmul.f32 1.442695, %v3946_v38  ;;  %v6486_v38 = vld [vmem:[%s8265_s27 + $0x80] sm:$0xff] }
0x22b6   : > { %6690 = vpow2.f32 %v3947_v40 }
0x22b7   : > { %4486 = vmatpush.bf16.msrb.mxu2 %v6486_v38 }
0x22bc   : > { %v6691_v41 = vpop.eup %6690 }
0x22bd   : > { %v3949_v45 = vsel %vm997_vm8, %v6691_v41, 0.0 }
0x22be   : > { %3950 = vadd.xlane.f32.xlu1 %v3949_v45 }
0x2331   : > { %v3951_v51 = vpop.xlane.xlu1 %3950 }
0x2332   : > { %6692 = vrcp.f32 %v3951_v51  ;;  %v3963_v55 = vand.u32 2147483648, %v3951_v51  ;;  %v3961_v56 = vand.u32 2147483647, %v3951_v51  ;;  %vm3957_vm6 = vweird.f32 %v3951_v51 }
0x2334   : > { %v3964_v0 = vor.u32 1.1754944e-38, %v3963_v55  ;;  %vm3962_vm10 = vcmp.eq.f32.partialorder %v3961_v56, 8.507059e+37 }
0x2338   : > { %v6693_v52 = vpop.eup %6692 }
0x2339   : > { %v3953_v42 = vmul.f32 %v6693_v52, %v3951_v51  ;;  %vm3958_vm5 = vweird.f32 %v6693_v52  ;;  %v6606_v51 = vld [vmem:[%s8201_s19 + $0x1] ss:$0 sm:$0xff] }
0x233a   : > { %vm3959_vm7 = vmor %vm3957_vm6, %vm3958_vm5 }
0x233b   : > { %v3954_v39 = vsub.f32 1.0, %v3953_v42 }
0x233d   : > { %v3955_v46 = vmul.f32 %v6693_v52, %v3954_v39 }
0x233f   : > { %v3956_v57 = vadd.f32 %v6693_v52, %v3955_v46 }
0x2341   : > { %v3960_v47 = vsel %vm3959_vm7, %v6693_v52, %v3956_v57  ;;  %v6607_v57 = vld [vmem:[%s8269_s0 + $0x8] ss:$0 sm:$0xff] }
0x2342   : > { %v3965_v58 = vsel %vm3962_vm10, %v3964_v0, %v3960_v47 }
0x2343   : > { %v3966_v60 = vmul.f32 %v6691_v41, %v3965_v58 }
0x2345   : > { %v3967_v61 = vpack.c.bf16 %v3966_v60, %v3966_v60 }
0x2347   : > { %6063 = vmatmul.msk.bf16.vlgmr.msra.gmra.mxu3 %vm997_vm8, %v3967_v61 }
0x2348   : > { %4266 = vmatpush.bf16.msra.mxu3 %v6475_v3 }
0x2357   : > { %6107 = vmatmul.msk.bf16.vlgmr.msrb.gmra.mxu3 %vm809_vm0, %v7512_v8 }
0x23ca   : > { %v3984_v1 = vpop.f32.mrf.mxu3 }
0x23cb   : > { %v3988_v54 = vpack.c.bf16 %v3984_v1, %v3984_v1 }
0x23cd   : > { %6065 = vmatmul.msk.bf16.vlgmr.msrb.gmra.mxu0 %vm997_vm8, %v3988_v54 }
0x23d2   : > { %v3986_v63 = vpop.f32.mrf.mxu3 }
0x23da   : > { %v4112_v5 = vpop.f32.mrf.mxu3 }
0x23db   : > { %v4113_v9 = vadd.f32 %v6605_v4, %v4112_v5  ;;  %v6474_v4 = vld [vmem:[%s8202_s20 + $0x10] sm:$0xff]  ;;  %v6489_v5 = vld [vmem:[%s8266_s3 + $0x88] sm:$0xff] }
0x23dc   : > { %4267 = vmatpush.bf16.msra.mxu3 %v6474_v4 }
0x23dd   : > { %v4162_v11 = vpack.c.bf16 %v4113_v9, %v4113_v9  ;;  %6108 = vmatmul.msk.bf16.vlgmr.msra.gmra.mxu0 %vm997_vm8, %v4116_v6  ;;  %v6488_v6 = vld [vmem:[%s8266_s3 + $0x80] sm:$0xff] }
0x23df   : > { %v4167_v8 = vsel %vm1046_vm9, %v4162_v11, 0 }
0x23e0   : > { %4176 = vmatpush.bf16.msrb.mxu1 %v4167_v8  ;;  %4520 = vmatpush.bf16.msrb.mxu3 %v6489_v5 }
0x23e2   : > { %v4114_v12 = vpop.f32.mrf.mxu3 }
0x23e4   : > { %4450 = vmatpush.bf16.msra.mxu1 %v6485_v48  ;;  %4521 = vmatpush.bf16.msrb.mxu3 %v6488_v6  ;;  %v6491_v6 = vld [vmem:[%s8268_s26 + $0x98] sm:$0xff] }
0x23e8   : > { %4451 = vmatpush.bf16.msra.mxu1 %v6484_v50 }
0x244a   : > { %v4006_v27 = vpop.f32.mrf.mxu0 }
0x244b   : > { %v4010_v7 = vadd.f32 %v4006_v27, %v3814_v13  ;;  %v6483_v13 = vld [vmem:[%s8204_s22 + $0x78] sm:$0xff] }
0x244c   : > { %4348 = vmatpush.bf16.msrb.mxu0 %v6483_v13 }
0x2452   : > { %v4008_v14 = vpop.f32.mrf.mxu0 }
0x245a   : > { %v4133_v15 = vpop.f32.mrf.mxu0 }
0x245b   : > { %v4137_v17 = vsel %vm997_vm8, %v4133_v15, -inf }
0x245c   : > { %4138 = vmax.xlane.f32.xlu2 %v4137_v17 }
0x2462   : > { %v4135_v18 = vpop.f32.mrf.mxu0 }
0x24cf   : > { %v4139_v19 = vpop.xlane.xlu2 %4138 }
0x24d0   : > { %v4140_v20 = vsub.f32 %v4133_v15, %v4139_v19 }
0x24d2   : > { %v4141_v21 = vmul.f32 1.442695, %v4140_v20 }
0x24d4   : > { %6694 = vpow2.f32 %v4141_v21  ;;  %v6482_v21 = vld [vmem:[%s8204_s22 + $0x70] sm:$0xff] }
0x24d5   : > { %4349 = vmatpush.bf16.msrb.mxu0 %v6482_v21  ;;  %v6495_v21 = vld [vmem:[%s8266_s3 + $0x98] sm:$0xff] }
0x24da   : > { %v6695_v59 = vpop.eup %6694 }
0x24db   : > { %v4143_v22 = vsel %vm997_vm8, %v6695_v59, 0.0 }
0x24dc   : > { %4144 = vadd.xlane.f32.xlu0 %v4143_v22  ;;  %v6480_v22 = vld [vmem:[%s8204_s22 + $0x60] sm:$0xff] }
0x254f   : > { %v4145_v23 = vpop.xlane.xlu0 %4144 }
0x2550   : > { %6696 = vrcp.f32 %v4145_v23  ;;  %v4157_v62 = vand.u32 2147483648, %v4145_v23  ;;  %v4155_v29 = vand.u32 2147483647, %v4145_v23  ;;  %vm4151_vm12 = vweird.f32 %v4145_v23 }
0x2552   : > { %v4158_v31 = vor.u32 1.1754944e-38, %v4157_v62  ;;  %vm4156_vm14 = vcmp.eq.f32.partialorder %v4155_v29, 8.507059e+37  ;;  %v6492_v62 = vld [vmem:[%s8265_s27 + $0x90] sm:$0xff] }
0x2556   : > { %v6697_v24 = vpop.eup %6696 }
0x2557   : > { %v4147_v25 = vmul.f32 %v6697_v24, %v4145_v23  ;;  %vm4152_vm11 = vweird.f32 %v6697_v24  ;;  %v6477_v23 = vld [vmem:[%s8204_s22 + $0x48] sm:$0xff] }
0x2558   : > { %vm4153_vm13 = vmor %vm4151_vm12, %vm4152_vm11 }
0x2559   : > { %v4148_v26 = vsub.f32 1.0, %v4147_v25  ;;  %v6493_v25 = vld [vmem:[%s8265_s27 + $0x98] sm:$0xff] }
0x255b   : > { %v4149_v28 = vmul.f32 %v6697_v24, %v4148_v26  ;;  %v6608_v26 = vld [vmem:[%s8203_s21 + $0x1] ss:$0 sm:$0xff] }
0x255d   : > { %v4150_v30 = vadd.f32 %v6697_v24, %v4149_v28 }
0x255f   : > { %v4154_v32 = vsel %vm4153_vm13, %v6697_v24, %v4150_v30  ;;  %v6476_v24 = vld [vmem:[%s8204_s22 + $0x40] sm:$0xff] }
0x2560   : > { %v4159_v34 = vsel %vm4156_vm14, %v4158_v31, %v4154_v32 }
0x2561   : > { %v4160_v35 = vmul.f32 %v6695_v59, %v4159_v34  ;;  %v6481_v59 = vld [vmem:[%s8204_s22 + $0x68] sm:$0xff] }
0x2562   : > { %4350 = vmatpush.bf16.msrb.mxu0 %v6481_v59  ;;  %v6494_v59 = vld [vmem:[%s8266_s3 + $0x90] sm:$0xff] }
0x2563   : > { %v4161_v36 = vpack.c.bf16 %v4160_v35, %v4160_v35 }
0x2565   : > { %6109 = vmatmul.msk.bf16.vlgmr.msrb.gmra.mxu1 %vm997_vm8, %v4161_v36 }
0x2566   : > { %4351 = vmatpush.bf16.msrb.mxu0 %v6480_v22  ;;  %v6612_v22 = vld [vmem:[%s8272_s11 + $0x8] ss:$0 sm:$0xff] }
0x256a   : > { %4352 = vmatpush.bf16.msrb.mxu0 %v6479_v33 }
0x256e   : > { %4353 = vmatpush.bf16.msrb.mxu0 %v6478_v16 }
0x2572   : > { %4354 = vmatpush.bf16.msrb.mxu0 %v6477_v23 }
0x2576   : > { %4355 = vmatpush.bf16.msrb.mxu0 %v6476_v24 }
0x257a   : > { %4659 = vmatpush.bf16.msra.mxu0 %v6493_v25 }
0x257e   : > { %4660 = vmatpush.bf16.msra.mxu0 %v6492_v62 }
0x25e2   : > { %v4178_v40 = vpop.f32.mrf.mxu1 }
0x25e3   : > { %v4182_v41 = vpack.c.bf16 %v4178_v40, %v4178_v40 }
0x25e5   : > { %6111 = vmatmul.msk.bf16.vlgmr.msra.gmra.mxu2 %vm997_vm8, %v4182_v41 }
0x25ea   : > { %v4180_v45 = vpop.f32.mrf.mxu1 }
0x25f5   : > { %6204 = vmatmul.msk.bf16.vlgmr.msrb.gmra.mxu2 %vm809_vm0, %v7057_v49 }
0x2668   : > { %v4200_v52 = vpop.f32.mrf.mxu2 }
0x2669   : > { %v4204_v42 = vadd.f32 %v4200_v52, %v4010_v7 }
0x266b   : > { %v4210_v39 = vadd.f32 %v6606_v51, %v4204_v42 }
0x266d   : > { %v7859_v55 = vadd.f32 %v4210_v39, %v7494_v44 }
0x266f   : > { %v4212_v46 = vsel %vm809_vm0, %v7859_v55, 0.0 }
0x2670   : > { %4213 = vadd.xlane.f32.xlu1 %v4212_v46  ;;  %v4202_v56 = vpop.f32.mrf.mxu2  ;;  %v6610_v46 = vld [vmem:[%s8205_s23 + $0x1] ss:$0 sm:$0xff] }
0x2678   : > { %v4488_v0 = vpop.f32.mrf.mxu2 }
0x2679   : > { %v4489_v47 = vadd.f32 %v6607_v57, %v4488_v0 }
0x267b   : > { %v4528_v58 = vpack.c.bf16 %v4489_v47, %v4489_v47 }
0x267d   : > { %v4533_v60 = vsel %vm997_vm8, %v4528_v58, 0 }
0x267e   : > { %4542 = vmatpush.bf16.xpose.msrb.mxu1 %v4533_v60  ;;  %v6611_v60 = vld [vmem:[%s8269_s0 + $0x9] ss:$0 sm:$0xff] }
0x2680   : > { %v4490_v61 = vpop.f32.mrf.mxu2 }
0x26e3   : > { %v4214_v1 = vpop.xlane.xlu1 %4213 }
0x26e4   : > { %v4215_v44 = vmul.f32 %v4214_v1, %v7019_v10 }
0x26e6   : > { %v4216_v54 = vsub.f32 %v7859_v55, %v4215_v44 }
0x26e8   : > { %v4217_v63 = vmul.f32 %v4216_v54, %v4216_v54 }
0x26ea   : > { %v4218_v2 = vsel %vm809_vm0, %v4217_v63, 0.0 }
0x26eb   : > { %4219 = vadd.xlane.f32.xlu2 %v4218_v2 }
0x275e   : > { %v4220_v9 = vpop.xlane.xlu2 %4219 }
0x275f   : > { %v4221_v11 = vmul.f32 %v4220_v9, %v7019_v10  ;;  %v6490_v9 = vld [vmem:[%s8268_s26 + $0x90] sm:$0xff] }
0x2761   : > { %v4222_v8 = vadd.f32 1e-05, %v4221_v11 }
0x2763   : > { %6698 = vrsqrt.f32 %v4222_v8  ;;  %vm4229_vm1 = vweird.f32 %v4222_v8 }
0x2769   : > { %v6699_v12 = vpop.eup %6698 }
0x276a   : > { %v4224_v27 = vmul.f32 %v6699_v12, %v4222_v8  ;;  %vm4230_vm15 = vweird.f32 %v6699_v12 }
0x276b   : > { %vm4231_vm2 = vmor %vm4229_vm1, %vm4230_vm15 }
0x276c   : > { %v4225_v7 = vmul.f32 %v6699_v12, %v4224_v27 }
0x276e   : > { %v4226_v14 = vmul.f32 0.5, %v4225_v7 }
0x2770   : > { %v4227_v15 = vsub.f32 1.5, %v4226_v14 }
0x2772   : > { %v4228_v17 = vmul.f32 %v6699_v12, %v4227_v15 }
0x2774   : > { %v4232_v18 = vsel %vm4231_vm2, %v6699_v12, %v4228_v17 }
0x2775   : > { %v4233_v19 = vmul.f32 %v4232_v18, %v4216_v54 }
0x2777   : > { %v4234_v20 = vpack.c.bf16 %v4233_v19, %v4233_v19 }
0x2779   : > { %6126 = vmatmul.msk.bf16.vlgmr.msra.gmra.mxu3 %vm809_vm0, %v4234_v20 }
0x277a   : > { %4624 = vmatpush.bf16.msra.mxu3 %v6491_v6 }
0x277e   : > { %4625 = vmatpush.bf16.msra.mxu3 %v6490_v9 }
0x2789   : > { %6218 = vmatmul.msk.bf16.vlgmr.msrb.gmra.mxu3 %vm809_vm0, %v7057_v49 }
0x27fc   : > { %v4269_v28 = vpop.f32.mrf.mxu3 }
0x27fd   : > { %v4270_v29 = vadd.f32 %v6608_v26, %v4269_v28 }
0x27ff   : > { %v4273_v30 = vmul.f32 %v4270_v29, %v4270_v29 }
0x2801   : > { %v4274_v31 = vmul.f32 %v4273_v30, %v4270_v29  ;;  %v6614_v30 = vld [vmem:[%s8271_s24 + $0x9] ss:$0 sm:$0xff] }
0x2803   : > { %v4275_v32 = vmul.f32 0.044715, %v4274_v31 }
0x2804   : > { %v4271_v34 = vpop.f32.mrf.mxu3 }
0x2805   : > { %v4276_v35 = vadd.f32 %v4275_v32, %v4270_v29 }
0x2807   : > { %v4277_v36 = vmul.f32 0.7978846, %v4276_v35 }
0x2809   : > { %6700 = vtanh.f32 %v4277_v36 }
0x280c   : > { %v4523_v38 = vpop.f32.mrf.mxu3 }
0x280d   : > { %v4524_v40 = vadd.f32 %v6609_v37, %v4523_v38 }
0x280f   : > { %v6701_v41 = vpop.eup %6700  ;;  %v4573_v45 = vpack.c.bf16 %v4524_v40, %v4524_v40 }
0x2810   : > { %v4279_v48 = vadd.f32 1.0, %v6701_v41 }
0x2811   : > { %v4578_v50 = vsel %vm1046_vm9, %v4573_v45, 0 }
0x2812   : > { %v4280_v51 = vmul.f32 0.5, %v4279_v48  ;;  %4587 = vmatpush.bf16.msra.mxu2 %v4578_v50 }
0x2814   : > { %v4281_v52 = vmul.f32 %v4280_v51, %v4270_v29  ;;  %v4525_v42 = vpop.f32.mrf.mxu3 }
0x2816   : > { %v4282_v39 = vpack.c.bf16 %v4281_v52, %v4281_v52 }
0x2818   : > { %4356 = vmatmul.bf16.vlgmr.msrb.gmra.mxu0 %v4282_v39 }
0x2828   : > { %6249 = vmatmul.msk.bf16.vlgmr.msra.gmra.mxu0 %vm809_vm0, %v7057_v49 }
0x2895   : > { %v4357_v56 = vpop.f32.mrf.mxu0 }
0x2896   : > { %v4361_v57 = vadd.f32 %v4357_v56, %v7859_v55 }
0x2898   : > { %v4367_v0 = vadd.f32 %v6610_v46, %v4361_v57 }
0x289a   : > { %v4368_v47 = vsel %vm809_vm0, %v4367_v0, 0.0  ;;  %5204 = vst.msk [vmem:[%s7936_s9] sm:$0xff] %vm809_vm0, %v4367_v0 }
0x289b   : > { %4369 = vadd.xlane.f32.xlu0 %v4368_v47 }
0x289d   : > { %v4359_v58 = vpop.f32.mrf.mxu0 }
0x28a5   : > { %v4662_v61 = vpop.f32.mrf.mxu0 }
0x28a6   : > { %v4663_v1 = vadd.f32 %v6611_v60, %v4662_v61  ;;  %v6497_v60 = vld [vmem:[%s8268_s26 + $0xa8] sm:$0xff] }
0x28a8   : > { %v4702_v44 = vpack.c.bf16 %v4663_v1, %v4663_v1  ;;  %v6496_v1 = vld [vmem:[%s8268_s26 + $0xa0] sm:$0xff] }
0x28aa   : > { %v4707_v55 = vsel %vm997_vm8, %v4702_v44, 0  ;;  %v6613_v44 = vld [vmem:[%s8272_s11 + $0x9] ss:$0 sm:$0xff] }
0x28ab   : > { %4716 = vmatpush.bf16.xpose.msrb.mxu2 %v4707_v55 }
0x28ad   : > { %v4664_v54 = vpop.f32.mrf.mxu0 }
0x290e   : > { %v4370_v63 = vpop.xlane.xlu0 %4369 }
0x290f   : > { %v4371_v2 = vmul.f32 %v4370_v63, %v7019_v10  ;;  %v6221_v63 = vld [vmem:[%s8273_s10 + $0x20] sm:$0xf] }
0x2911   : > { %v4372_v3 = vsub.f32 %v4367_v0, %v4371_v2  ;;  %v4793_v2 = vsel %vm1046_vm9, %v6221_v63, 0 }
0x2913   : > { %v4373_v4 = vmul.f32 %v4372_v3, %v4372_v3 }
0x2915   : > { %v4374_v5 = vsel %vm809_vm0, %v4373_v4, 0.0 }
0x2916   : > { %4375 = vadd.xlane.f32.xlu1 %v4374_v5 }
0x2989   : > { %v4376_v11 = vpop.xlane.xlu1 %4375 }
0x298a   : > { %v4377_v8 = vmul.f32 %v4376_v11, %v7019_v10 }
0x298c   : > { %v4378_v12 = vadd.f32 1e-05, %v4377_v8 }
0x298e   : > { %6702 = vrsqrt.f32 %v4378_v12  ;;  %vm4385_vm4 = vweird.f32 %v4378_v12 }
0x2994   : > { %v6703_v13 = vpop.eup %6702 }
0x2995   : > { %v4380_v27 = vmul.f32 %v6703_v13, %v4378_v12  ;;  %vm4386_vm3 = vweird.f32 %v6703_v13 }
0x2996   : > { %vm4387_vm5 = vmor %vm4385_vm4, %vm4386_vm3 }
0x2997   : > { %v4381_v7 = vmul.f32 %v6703_v13, %v4380_v27 }
0x2999   : > { %v4382_v14 = vmul.f32 0.5, %v4381_v7 }
0x299b   : > { %v4383_v15 = vsub.f32 1.5, %v4382_v14 }
0x299d   : > { %v4384_v17 = vmul.f32 %v6703_v13, %v4383_v15 }
0x299f   : > { %v4388_v18 = vsel %vm4387_vm5, %v6703_v13, %v4384_v17 }
0x29a0   : > { %v4389_v19 = vmul.f32 %v4388_v18, %v4372_v3 }
0x29a2   : > { %v7953_v20 = vpack.c.bf16 %v4389_v19, %v4389_v19  ;;  %v6499_v19 = vld [vmem:[%s8265_s27 + $0xa8] sm:$0xff] }
0x29a4   : > { %6190 = vmatmul.msk.bf16.vlgmr.msra.gmra.mxu1 %vm809_vm0, %v7953_v20  ;;  %6235 = vmatmul.msk.bf16.vlgmr.msra.gmra.mxu3 %vm809_vm0, %v7953_v20 }
0x29a5   : > { %4694 = vmatpush.bf16.msra.mxu1 %v6495_v21  ;;  %v6498_v21 = vld [vmem:[%s8265_s27 + $0xa0] sm:$0xff] }
0x29a9   : > { %4695 = vmatpush.bf16.msra.mxu1 %v6494_v59 }
0x2a21   : > { %v4453_v33 = vpop.f32.mrf.mxu1 }
0x2a22   : > { %v4454_v16 = vadd.f32 %v6612_v22, %v4453_v33 }
0x2a24   : > { %v4527_v23 = vpack.c.bf16 %v4454_v16, %v4454_v16 }
0x2a26   : > { %6219 = vmatmul.msk.bf16.vlgmr.msrb.gmra.mxu1 %vm997_vm8, %v4527_v23 }
0x2a27   : > { %v4627_v24 = vpop.f32.mrf.mxu3  ;;  %4802 = vmatpush.bf16.msrb.mxu1 %v4793_v2 }
0x2a28   : > { %v4628_v55 = vadd.f32 %v6613_v44, %v4627_v24 }
0x2a29   : > { %v4455_v25 = vpop.f32.mrf.mxu1 }
0x2a2a   : > { %v4701_v54 = vpack.c.bf16 %v4628_v55, %v4628_v55 }
0x2a2f   : > { %v4629_v26 = vpop.f32.mrf.mxu3 }
0x2a36   : > { %6263 = vmatmul.msk.bf16.vlgmr.msra.gmra.mxu1 %vm809_vm0, %v7057_v49 }
0x2aa3   : > { %v4544_v62 = vpop.f32.mrf.mxu1 }
0x2aa4   : > { %v4548_v28 = vsel %vm997_vm8, %v4544_v62, -inf }
0x2aa5   : > { %4549 = vmax.xlane.f32.xlu2 %v4548_v28 }
0x2aab   : > { %v4546_v29 = vpop.f32.mrf.mxu1 }
0x2ab3   : > { %v4697_v31 = vpop.f32.mrf.mxu1 }
0x2ab4   : > { %v4698_v32 = vadd.f32 %v6614_v30, %v4697_v31 }
0x2ab6   : > { %v4747_v34 = vpack.c.bf16 %v4698_v32, %v4698_v32  ;;  %v6266_v32 = vld [vmem:[%s8273_s10 + $0x24] sm:$0xf] }
0x2ab8   : > { %v4752_v35 = vsel %vm1046_vm9, %v4747_v34, 0  ;;  %v4774_v34 = vsel %vm1046_vm9, %v6266_v32, 0 }
0x2ab9   : > { %4761 = vmatpush.bf16.msrb.mxu3 %v4752_v35  ;;  %4783 = vmatpush.bf16.msrb.mxu0 %v4774_v34  ;;  %v6501_v35 = vld [vmem:[%s8266_s3 + $0xa8] sm:$0xff] }
0x2abb   : > { %v4699_v36 = vpop.f32.mrf.mxu1 }
0x2abc   : > { %v6500_v36 = vld [vmem:[%s8266_s3 + $0xa0] sm:$0xff] }
0x2abd   : > { %4871 = vmatpush.bf16.msra.mxu3 %v6499_v19  ;;  %4906 = vmatpush.bf16.msra.mxu0 %v6501_v35  ;;  %v808_v35 = vld [vmem:[%s804_s25] sm:$0xff]  ;;  %s8283_s25 = smov %s8282_s30 }
0x2ac1   : > { %4872 = vmatpush.bf16.msra.mxu3 %v6498_v21  ;;  %4907 = vmatpush.bf16.msra.mxu0 %v6500_v36  ;;  %v864_v36 = vsel %vm809_vm0, %v808_v35, 0.0 }
0x2b18   : > { %v4550_v37 = vpop.xlane.xlu2 %4549 }
0x2b19   : > { %v4551_v38 = vsub.f32 %v4544_v62, %v4550_v37 }
0x2b1b   : > { %v4552_v40 = vmul.f32 1.442695, %v4551_v38  ;;  %v6503_v38 = vld [vmem:[%s8268_s26 + $0xb8] sm:$0xff] }
0x2b1d   : > { %6704 = vpow2.f32 %v4552_v40 }
0x2b23   : > { %v6705_v41 = vpop.eup %6704 }
0x2b24   : > { %v4554_v45 = vsel %vm997_vm8, %v6705_v41, 0.0 }
0x2b25   : > { %4555 = vadd.xlane.f32.xlu0 %v4554_v45 }
0x2b98   : > { %v4556_v48 = vpop.xlane.xlu0 %4555 }
0x2b99   : > { %6706 = vrcp.f32 %v4556_v48  ;;  %v4568_v42 = vand.u32 2147483648, %v4556_v48  ;;  %v4566_v46 = vand.u32 2147483647, %v4556_v48  ;;  %vm4562_vm7 = vweird.f32 %v4556_v48 }
0x2b9b   : > { %v4569_v57 = vor.u32 1.1754944e-38, %v4568_v42  ;;  %vm4567_vm11 = vcmp.eq.f32.partialorder %v4566_v46, 8.507059e+37 }
0x2b9f   : > { %v6707_v50 = vpop.eup %6706 }
0x2ba0   : > { %v4558_v51 = vmul.f32 %v6707_v50, %v4556_v48  ;;  %vm4563_vm6 = vweird.f32 %v6707_v50  ;;  %v6616_v48 = vld [vmem:[%s8269_s0 + $0xa] ss:$0 sm:$0xff] }
0x2ba1   : > { %vm4564_vm10 = vmor %vm4562_vm7, %vm4563_vm6 }
0x2ba2   : > { %v4559_v52 = vsub.f32 1.0, %v4558_v51 }
0x2ba4   : > { %v4560_v39 = vmul.f32 %v6707_v50, %v4559_v52  ;;  %v6615_v52 = vld [vmem:[%s8272_s11 + $0xa] ss:$0 sm:$0xff] }
0x2ba6   : > { %v4561_v56 = vadd.f32 %v6707_v50, %v4560_v39  ;;  %v6505_v39 = vld [vmem:[%s8265_s27 + $0xb8] sm:$0xff] }
0x2ba8   : > { %v4565_v0 = vsel %vm4564_vm10, %v6707_v50, %v4561_v56 }
0x2ba9   : > { %v4570_v47 = vsel %vm4567_vm11, %v4569_v57, %v4565_v0  ;;  %v6504_v57 = vld [vmem:[%s8265_s27 + $0xb0] sm:$0xff] }
0x2baa   : > { %v4571_v58 = vmul.f32 %v6705_v41, %v4570_v47  ;;  %v6502_v41 = vld [vmem:[%s8268_s26 + $0xb0] sm:$0xff] }
0x2bac   : > { %v4572_v61 = vpack.c.bf16 %v4571_v58, %v4571_v58 }
0x2bae   : > { %6220 = vmatmul.msk.bf16.vlgmr.msra.gmra.mxu2 %vm997_vm8, %v4572_v61  ;;  %v6617_v61 = vld [vmem:[%s8271_s24 + $0xa] ss:$0 sm:$0xff] }
0x2baf   : > { %4836 = vmatpush.bf16.msra.mxu2 %v6497_v60 }
0x2bb3   : > { %4837 = vmatpush.bf16.msra.mxu2 %v6496_v1  ;;  %v6313_v1 = vld [vmem:[%s8273_s10 + $0x28] sm:$0xf] }
0x2bb4   : > { %v4986_v44 = vsel %vm1046_vm9, %v6313_v1, 0 }
0x2bbe   : > { %6264 = vmatmul.msk.bf16.vlgmr.msrb.gmra.mxu2 %vm997_vm8, %v4701_v54 }
0x2bce   : > { %6282 = vmatmul.msk.bf16.vlgmr.msra.gmra.mxu2 %vm809_vm0, %v7953_v20 }
0x2c31   : > { %v4589_v3 = vpop.f32.mrf.mxu2 }
0x2c32   : > { %v4593_v4 = vpack.c.bf16 %v4589_v3, %v4589_v3 }
0x2c34   : > { %6268 = vmatmul.msk.bf16.vlgmr.msrb.gmra.mxu1 %vm997_vm8, %v4593_v4 }
0x2c39   : > { %v4591_v5 = vpop.f32.mrf.mxu2 }
0x2c41   : > { %v4718_v6 = vpop.f32.mrf.mxu2 }
0x2c42   : > { %v4722_v9 = vsel %vm997_vm8, %v4718_v6, -inf }
0x2c43   : > { %4723 = vmax.xlane.f32.xlu1 %v4722_v9  ;;  %v6619_v9 = vld [vmem:[%s8269_s0 + $0xb] ss:$0 sm:$0xff] }
0x2c49   : > { %v4720_v11 = vpop.f32.mrf.mxu2 }
0x2c51   : > { %v4839_v8 = vpop.f32.mrf.mxu2 }
0x2c52   : > { %v4840_v56 = vadd.f32 %v6615_v52, %v4839_v8 }
0x2c54   : > { %v4913_v47 = vpack.c.bf16 %v4840_v56, %v4840_v56 }
0x2c59   : > { %v4841_v12 = vpop.f32.mrf.mxu2 }
0x2cb1   : > { %v7996_v13 = vpop.f32.mrf.mxu1 }
0x2cb6   : > { %v4724_v27 = vpop.xlane.xlu1 %4723 }
0x2cb7   : > { %v4725_v7 = vsub.f32 %v4718_v6, %v4724_v27 }
0x2cb9   : > { %v4726_v14 = vmul.f32 1.442695, %v4725_v7  ;;  %v4806_v15 = vpop.f32.mrf.mxu1 }
0x2cbb   : > { %6708 = vpow2.f32 %v4726_v14 }
0x2cc1   : > { %v6709_v17 = vpop.eup %6708 }
0x2cc2   : > { %v4728_v18 = vsel %vm997_vm8, %v6709_v17, 0.0 }
0x2cc3   : > { %4729 = vadd.xlane.f32.xlu2 %v4728_v18 }
0x2d36   : > { %v4730_v59 = vpop.xlane.xlu2 %4729 }
0x2d37   : > { %6710 = vrcp.f32 %v4730_v59  ;;  %v4742_v23 = vand.u32 2147483648, %v4730_v59  ;;  %v4740_v25 = vand.u32 2147483647, %v4730_v59  ;;  %vm4736_vm13 = vweird.f32 %v4730_v59 }
0x2d39   : > { %v4743_v62 = vor.u32 1.1754944e-38, %v4742_v23  ;;  %vm4741_vm15 = vcmp.eq.f32.partialorder %v4740_v25, 8.507059e+37 }
0x2d3d   : > { %v6711_v22 = vpop.eup %6710 }
0x2d3e   : > { %v4732_v33 = vmul.f32 %v6711_v22, %v4730_v59  ;;  %vm4737_vm12 = vweird.f32 %v6711_v22  ;;  %v6507_v59 = vld [vmem:[%s8266_s3 + $0xb8] sm:$0xff] }
0x2d3f   : > { %vm4738_vm14 = vmor %vm4736_vm13, %vm4737_vm12 }
0x2d40   : > { %v4733_v16 = vsub.f32 1.0, %v4732_v33 }
0x2d42   : > { %v4734_v24 = vmul.f32 %v6711_v22, %v4733_v16 }
0x2d44   : > { %v4735_v26 = vadd.f32 %v6711_v22, %v4734_v24 }
0x2d46   : > { %v4739_v28 = vsel %vm4738_vm14, %v6711_v22, %v4735_v26  ;;  %v6506_v22 = vld [vmem:[%s8266_s3 + $0xb0] sm:$0xff]  ;;  %s5237_s3 = sshll.u32 %s7936_s9, 4  ;;  %s5238_s3 = int_to_ptr.vmem [resolvable:$true] %s5237_s3 }
0x2d47   : > { %v4744_v29 = vsel %vm4741_vm15, %v4743_v62, %v4739_v28 }
0x2d48   : > { %v4745_v30 = vmul.f32 %v6709_v17, %v4744_v29 }
0x2d4a   : > { %v4746_v31 = vpack.c.bf16 %v4745_v30, %v4745_v30 }
0x2d4c   : > { %6265 = vmatmul.msk.bf16.vlgmr.msrb.gmra.mxu3 %vm997_vm8, %v4746_v31 }
0x2d4d   : > { %4995 = vmatpush.bf16.msrb.mxu3 %v4986_v44 }
0x2d5c   : > { %6296 = vmatmul.msk.bf16.vlgmr.msra.gmra.mxu3 %vm809_vm0, %v7057_v49 }
0x2dcf   : > { %v4763_v37 = vpop.f32.mrf.mxu3 }
0x2dd0   : > { %v4767_v40 = vpack.c.bf16 %v4763_v37, %v4763_v37 }
0x2dd2   : > { %6267 = vmatmul.msk.bf16.vlgmr.msrb.gmra.mxu0 %vm997_vm8, %v4767_v40 }
0x2dd3   : > { %5030 = vmatpush.bf16.msrb.mxu0 %v6503_v38 }
0x2dd7   : > { %v4765_v45 = vpop.f32.mrf.mxu3  ;;  %5031 = vmatpush.bf16.msrb.mxu0 %v6502_v41  ;;  %v6618_v41 = vld [vmem:[%s8272_s11 + $0xb] ss:$0 sm:$0xff]  ;;  %s5211_s11 = scalar_lea.sflag [#allocation5], %s7926_s4 }
0x2ddf   : > { %v4874_v50 = vpop.f32.mrf.mxu3 }
0x2de0   : > { %v4875_v51 = vadd.f32 %v6616_v48, %v4874_v50 }
0x2de2   : > { %v4914_v42 = vpack.c.bf16 %v4875_v51, %v4875_v51  ;;  %6310 = vmatmul.msk.bf16.vlgmr.msra.gmra.mxu0 %vm809_vm0, %v7057_v49 }
0x2de4   : > { %v4919_v46 = vsel %vm997_vm8, %v4914_v42, 0 }
0x2de5   : > { %4928 = vmatpush.bf16.xpose.msra.mxu1 %v4919_v46 }
0x2de7   : > { %v4876_v0 = vpop.f32.mrf.mxu3 }
0x2dec   : > { %6311 = vmatmul.msk.bf16.vlgmr.msra.gmra.mxu1 %vm997_vm8, %v4913_v47 }
0x2ded   : > { %5065 = vmatpush.bf16.msrb.mxu1 %v6505_v39 }
0x2df1   : > { %5066 = vmatpush.bf16.msrb.mxu1 %v6504_v57 }
0x2df2   : > { %6328 = vmatmul.msk.bf16.vlgmr.msrb.gmra.mxu0 %vm809_vm0, %v7953_v20 }
0x2dfc   : > { %6342 = vmatmul.msk.bf16.vlgmr.msrb.gmra.mxu1 %vm809_vm0, %v7057_v49 }
0x2e4f   : > { %v8045_v58 = vpop.f32.mrf.mxu0 }
0x2e50   : > { %v4805_v46 = vadd.f32 %v7996_v13, %v8045_v58 }
0x2e57   : > { %v4787_v60 = vpop.f32.mrf.mxu0 }
0x2e5f   : > { %v4909_v55 = vpop.f32.mrf.mxu0 }
0x2e60   : > { %v4910_v54 = vadd.f32 %v6617_v61, %v4909_v55 }
0x2e62   : > { %v4959_v20 = vpack.c.bf16 %v4910_v54, %v4910_v54 }
0x2e64   : > { %v4964_v63 = vsel %vm1046_vm9, %v4959_v20, 0 }
0x2e65   : > { %4973 = vmatpush.bf16.msrb.mxu2 %v4964_v63 }
0x2e67   : > { %v4911_v2 = vpop.f32.mrf.mxu0 }
0x2e69   : > { %v4930_v3 = vpop.f32.mrf.mxu1  ;;  %5100 = vmatpush.bf16.msra.mxu2 %v6507_v59 }
0x2e6a   : > { %v4934_v4 = vsel %vm997_vm8, %v4930_v3, -inf }
0x2e6b   : > { %4935 = vmax.xlane.f32.xlu0 %v4934_v4 }
0x2e6d   : > { %5101 = vmatpush.bf16.msra.mxu2 %v6506_v22 }
0x2e6f   : > { %v5033_v5 = vpop.f32.mrf.mxu0 }
0x2e70   : > { %v5034_v45 = vadd.f32 %v6618_v41, %v5033_v5 }
0x2e71   : > { %v4932_v6 = vpop.f32.mrf.mxu1 }
0x2e72   : > { %v5107_v50 = vpack.c.bf16 %v5034_v45, %v5034_v45 }
0x2e73   : > { %865 = vadd.xlane.f32.xlu0 %v864_v36 }
0x2e77   : > { %v5035_v11 = vpop.f32.mrf.mxu0 }
0x2e79   : > { %v5068_v8 = vpop.f32.mrf.mxu1 }
0x2e7a   : > { %v5069_v12 = vadd.f32 %v6619_v9, %v5068_v8 }
0x2e7c   : > { %v5108_v27 = vpack.c.bf16 %v5069_v12, %v5069_v12 }
0x2e7e   : > { %v5113_v7 = vsel %vm997_vm8, %v5108_v27, 0 }
0x2e7f   : > { %5122 = vmatpush.bf16.xpose.msra.mxu3 %v5113_v7  ;;  %v863_v7 = vld [vmem:[%s8282_s30] sm:$0x3]  ;;  %s8287_s30 = sld [smem:[#allocation36_spill]] }
0x2e81   : > { %v5070_v14 = vpop.f32.mrf.mxu1 }
0x2e85   : > { %s8288_s0 = smov %s8287_s30  ;;  %s5235_s6 = scalar_lea.hbm %s8287_s30, %s6364_s1 }
0x2e86   : > { %s6747_s16 = scalar_lea.hbm %s8288_s0, 16 }
0x2ede   : > { %v4936_v15 = vpop.xlane.xlu0 %4935 }
0x2edf   : > { %v4937_v17 = vsub.f32 %v4930_v3, %v4936_v15  ;;  %v886_v15 = vperm.slane %v863_v7, 0 }
0x2ee1   : > { %v4938_v18 = vmul.f32 1.442695, %v4937_v17 }
0x2ee3   : > { %6712 = vpow2.f32 %v4938_v18  ;;  %v6570_v18 = vld [vmem:[%s8284_s28] ss:$0 sm:$0xff] }
0x2ee4   : > { %v1669_v22 = vadd.f32 %v6570_v18, %v7285_v43 }
0x2ee6   : > { %v866_v47 = vpop.xlane.xlu0 %865 }
0x2ee7   : > { %v867_v60 = vmul.f32 %v866_v47, %v7019_v10 }
0x2ee9   : > { %v6713_v19 = vpop.eup %6712  ;;  %v868_v61 = vsub.f32 %v808_v35, %v867_v60 }
0x2eea   : > { %v4940_v21 = vsel %vm997_vm8, %v6713_v19, 0.0 }
0x2eeb   : > { %4941 = vadd.xlane.f32.xlu1 %v4940_v21  ;;  %v869_v55 = vmul.f32 %v868_v61, %v868_v61  ;;  %v888_v21 = vperm.slane %v863_v7, 1 }
0x2eed   : > { %v870_v54 = vsel %vm809_vm0, %v869_v55, 0.0 }
0x2f5e   : > { %v4942_v33 = vpop.xlane.xlu1 %4941 }
0x2f5f   : > { %6714 = vrcp.f32 %v4942_v33  ;;  %v4954_v25 = vand.u32 2147483648, %v4942_v33  ;;  %v4952_v62 = vand.u32 2147483647, %v4942_v33  ;;  %vm4948_vm2 = vweird.f32 %v4942_v33 }
0x2f61   : > { %v4955_v29 = vor.u32 1.1754944e-38, %v4954_v25  ;;  %vm4953_vm4 = vcmp.eq.f32.partialorder %v4952_v62, 8.507059e+37 }
0x2f65   : > { %v6715_v16 = vpop.eup %6714 }
0x2f66   : > { %v4944_v23 = vmul.f32 %v6715_v16, %v4942_v33  ;;  %vm4949_vm1 = vweird.f32 %v6715_v16 }
0x2f67   : > { %vm4950_vm3 = vmor %vm4948_vm2, %vm4949_vm1 }
0x2f68   : > { %v4945_v24 = vsub.f32 1.0, %v4944_v23 }
0x2f6a   : > { %v4946_v26 = vmul.f32 %v6715_v16, %v4945_v24 }
0x2f6c   : > { %v4947_v28 = vadd.f32 %v6715_v16, %v4946_v26 }
0x2f6e   : > { %v4951_v30 = vsel %vm4950_vm3, %v6715_v16, %v4947_v28 }
0x2f6f   : > { %v4956_v31 = vsel %vm4953_vm4, %v4955_v29, %v4951_v30 }
0x2f70   : > { %v4957_v32 = vmul.f32 %v6713_v19, %v4956_v31 }
0x2f72   : > { %v4958_v34 = vpack.c.bf16 %v4957_v32, %v4957_v32 }
0x2f74   : > { %6312 = vmatmul.msk.bf16.vlgmr.msrb.gmra.mxu2 %vm997_vm8, %v4958_v34 }
0x2f84   : > { %6356 = vmatmul.msk.bf16.vlgmr.msra.gmra.mxu2 %vm809_vm0, %v7057_v49  ;;  %v6620_v49 = vld [vmem:[%s8271_s24 + $0xb] ss:$0 sm:$0xff] }
0x2ff7   : > { %v4975_v37 = vpop.f32.mrf.mxu2 }
0x2ff8   : > { %v4979_v38 = vpack.c.bf16 %v4975_v37, %v4975_v37 }
0x2ffa   : > { %6314 = vmatmul.msk.bf16.vlgmr.msrb.gmra.mxu3 %vm997_vm8, %v4979_v38 }
0x2fff   : > { %v4977_v40 = vpop.f32.mrf.mxu2 }
0x3007   : > { %v5103_v48 = vpop.f32.mrf.mxu2 }
0x3008   : > { %v5104_v51 = vadd.f32 %v6620_v49, %v5103_v48  ;;  %v6359_v49 = vld [vmem:[%s8273_s10 + $0x2c] sm:$0xf]  ;;  %s5239_s10 = sshll.u32 %s5235_s6, 4  ;;  %s5240_s10 = int_to_ptr.hbm [resolvable:$true] %s5239_s10 }
0x3009   : > { %v5180_v48 = vsel %vm1046_vm9, %v6359_v49, 0  ;;  %s6741_s12 = sshra.s32 %s5240_s10, 4  ;;  %s6742_s12 = int_to_ptr.hbm [resolvable:$true] %s6741_s12 }
0x300a   : > { %v5153_v52 = vpack.c.bf16 %v5104_v51, %v5104_v51  ;;  %6357 = vmatmul.msk.bf16.vlgmr.msra.gmra.mxu3 %vm997_vm8, %v5107_v50  ;;  %5189 = vmatpush.bf16.msra.mxu1 %v5180_v48  ;;  %s6743_s13 = scalar_lea.hbm %s6742_s12, 8  ;;  %p6748_p0 = scmp.lt.s32.totalorder %s6742_s12, %s8288_s0 }
0x300b   : > { %p6744_p11 = scmp.ne.s32.totalorder %s6742_s12, %s6743_s13  ;;  %p6749_p1 = scmp.lt.s32.totalorder %s6747_s16, %s6743_s13 }
0x300c   : > { %v5158_v42 = vsel %vm1046_vm9, %v5153_v52, 0 }
0x300d   : > { %5167 = vmatpush.bf16.msra.mxu0 %v5158_v42  ;;  %p6745_p12 = pnand %p6744_p11, %p6992_p5  ;;  %p6750_p2 = por %p6749_p1, %p6748_p0 }
0x300f   : > { %v5105_v39 = vpop.f32.mrf.mxu2  ;;  %p6746_p13 = pneg %p6745_p12 }
0x3011   : > { %p6751_p3 = pnand %p6750_p2, %p6746_p13 }
0x307d   : > { %v4997_v56 = vpop.f32.mrf.mxu3 }
0x307e   : > { %v8086_v57 = vadd.f32 %v4997_v56, %v4805_v46 }
0x3085   : > { %v4999_v0 = vpop.f32.mrf.mxu3 }
0x308d   : > { %v5124_v1 = vpop.f32.mrf.mxu3 }
0x308e   : > { %v5128_v44 = vsel %vm997_vm8, %v5124_v1, -inf }
0x308f   : > { %5129 = vmax.xlane.f32.xlu2 %v5128_v44 }
0x3095   : > { %v5126_v20 = vpop.f32.mrf.mxu3 }
0x3096   : > { %v6598_v20 = vld [vmem:[%s8284_s28 + $0x1] ss:$0 sm:$0xff] }
0x3097   : > { %871 = vadd.xlane.f32.xlu2 %v870_v54 }
0x3102   : > { %v5130_v63 = vpop.xlane.xlu2 %5129 }
0x3103   : > { %v5131_v2 = vsub.f32 %v5124_v1, %v5130_v63  ;;  %v5742_v1 = vld [vmem:[%s8283_s25 + $0x2] sm:$0x3] }
0x3104   : > { %v2643_v55 = vperm.slane %v5742_v1, 0 }
0x3105   : > { %v5132_v13 = vmul.f32 1.442695, %v5131_v2  ;;  %v2645_v2 = vperm.slane %v5742_v1, 1 }
0x3107   : > { %6716 = vpow2.f32 %v5132_v13 }
0x310a   : > { %v872_v58 = vpop.xlane.xlu2 %871 }
0x310b   : > { %v873_v3 = vmul.f32 %v872_v58, %v7019_v10  ;;  %v3429_v58 = vadd.f32 %v6598_v20, %v7720_v53 }
0x310d   : > { %v6717_v4 = vpop.eup %6716  ;;  %v874_v5 = vadd.f32 1e-05, %v873_v3 }
0x310e   : > { %v5134_v6 = vsel %vm997_vm8, %v6717_v4, 0.0 }
0x310f   : > { %6718 = vrsqrt.f32 %v874_v5  ;;  %5135 = vadd.xlane.f32.xlu1 %v5134_v6  ;;  %vm881_vm6 = vweird.f32 %v874_v5 }
0x3115   : > { %v6719_v9 = vpop.eup %6718 }
0x3116   : > { %v876_v11 = vmul.f32 %v6719_v9, %v874_v5  ;;  %vm882_vm5 = vweird.f32 %v6719_v9 }
0x3117   : > { %vm883_vm7 = vmor %vm881_vm6, %vm882_vm5 }
0x3118   : > { %v877_v8 = vmul.f32 %v6719_v9, %v876_v11 }
0x311a   : > { %v878_v12 = vmul.f32 0.5, %v877_v8 }
0x311c   : > { %v879_v27 = vsub.f32 1.5, %v878_v12 }
0x311e   : > { %v880_v14 = vmul.f32 %v6719_v9, %v879_v27 }
0x3120   : > { %v884_v17 = vsel %vm883_vm7, %v6719_v9, %v880_v14 }
0x3121   : > { %v885_v19 = vmul.f32 %v884_v17, %v868_v61 }
0x3123   : > { %v887_v59 = vmul.f32 %v886_v15, %v885_v19 }
0x3125   : > { %v889_v33 = vadd.f32 %v888_v21, %v887_v59 }
0x3127   : > { %v1670_v16 = vadd.f32 %v1669_v22, %v889_v33 }
0x3129   : > { %v2621_v23 = vsel %vm809_vm0, %v1670_v16, 0.0 }
0x312a   : > { %2622 = vadd.xlane.f32.xlu0 %v2621_v23 }
0x3182   : > { %v5136_v24 = vpop.xlane.xlu1 %5135 }
0x3183   : > { %6720 = vrcp.f32 %v5136_v24  ;;  %v5148_v28 = vand.u32 2147483648, %v5136_v24  ;;  %v5146_v30 = vand.u32 2147483647, %v5136_v24  ;;  %vm5142_vm11 = vweird.f32 %v5136_v24 }
0x3185   : > { %v5149_v32 = vor.u32 1.1754944e-38, %v5148_v28  ;;  %vm5147_vm13 = vcmp.eq.f32.partialorder %v5146_v30, 8.507059e+37 }
0x3189   : > { %v6721_v25 = vpop.eup %6720 }
0x318a   : > { %v5138_v26 = vmul.f32 %v6721_v25, %v5136_v24  ;;  %vm5143_vm10 = vweird.f32 %v6721_v25 }
0x318b   : > { %vm5144_vm12 = vmor %vm5142_vm11, %vm5143_vm10 }
0x318c   : > { %v5139_v62 = vsub.f32 1.0, %v5138_v26 }
0x318e   : > { %v5140_v29 = vmul.f32 %v6721_v25, %v5139_v62 }
0x3190   : > { %v5141_v31 = vadd.f32 %v6721_v25, %v5140_v29 }
0x3192   : > { %v5145_v34 = vsel %vm5144_vm12, %v6721_v25, %v5141_v31 }
0x3193   : > { %v5150_v43 = vsel %vm5147_vm13, %v5149_v32, %v5145_v34 }
0x3194   : > { %v5151_v35 = vmul.f32 %v6717_v4, %v5150_v43 }
0x3196   : > { %v5152_v36 = vpack.c.bf16 %v5151_v35, %v5151_v35 }
0x3198   : > { %6358 = vmatmul.msk.bf16.vlgmr.msra.gmra.mxu0 %vm997_vm8, %v5152_v36 }
0x319d   : > { %v2623_v37 = vpop.xlane.xlu0 %2622 }
0x319e   : > { %v2624_v38 = vmul.f32 %v2623_v37, %v7019_v10 }
0x31a0   : > { %v2625_v40 = vsub.f32 %v1670_v16, %v2624_v38 }
0x31a2   : > { %v2626_v41 = vmul.f32 %v2625_v40, %v2625_v40 }
0x31a4   : > { %v2627_v45 = vsel %vm809_vm0, %v2626_v41, 0.0 }
0x31a5   : > { %2628 = vadd.xlane.f32.xlu1 %v2627_v45 }
0x3215   : > { %v5169_v50 = vpop.f32.mrf.mxu0 }
0x3216   : > { %v5173_v51 = vpack.c.bf16 %v5169_v50, %v5169_v50 }
0x3218   : > { %6360 = vmatmul.msk.bf16.vlgmr.msra.gmra.mxu1 %vm997_vm8, %v5173_v51  ;;  %v2629_v52 = vpop.xlane.xlu1 %2628 }
0x3219   : > { %v2630_v42 = vmul.f32 %v2629_v52, %v7019_v10 }
0x321b   : > { %v2631_v39 = vadd.f32 1e-05, %v2630_v42 }
0x321d   : > { %6722 = vrsqrt.f32 %v2631_v39  ;;  %v5171_v46 = vpop.f32.mrf.mxu0  ;;  %vm2638_vm9 = vweird.f32 %v2631_v39 }
0x3223   : > { %v6723_v56 = vpop.eup %6722 }
0x3224   : > { %v2633_v0 = vmul.f32 %v6723_v56, %v2631_v39  ;;  %vm2639_vm14 = vweird.f32 %v6723_v56 }
0x3225   : > { %vm2640_vm15 = vmor %vm2638_vm9, %vm2639_vm14 }
0x3226   : > { %v2634_v47 = vmul.f32 %v6723_v56, %v2633_v0 }
0x3228   : > { %v2635_v60 = vmul.f32 0.5, %v2634_v47 }
0x322a   : > { %v2636_v61 = vsub.f32 1.5, %v2635_v60 }
0x322c   : > { %v2637_v44 = vmul.f32 %v6723_v56, %v2636_v61 }
0x322e   : > { %v2641_v54 = vsel %vm2640_vm15, %v6723_v56, %v2637_v44 }
0x322f   : > { %v2642_v63 = vmul.f32 %v2641_v54, %v2625_v40 }
0x3231   : > { %v2644_v13 = vmul.f32 %v2643_v55, %v2642_v63 }
0x3233   : > { %v2646_v3 = vadd.f32 %v2645_v2, %v2644_v13 }
0x3235   : > { %v3430_v4 = vadd.f32 %v3429_v58, %v2646_v3 }
0x3237   : > { %v4393_v5 = vsel %vm809_vm0, %v3430_v4, 0.0 }
0x3238   : > { %4394 = vadd.xlane.f32.xlu2 %v4393_v5 }
0x3295   : > { %v5191_v6 = vpop.f32.mrf.mxu1 }
0x3296   : > { %v5195_v9 = vadd.f32 %v5191_v6, %v8086_v57 }
0x329d   : > { %v5193_v11 = vpop.f32.mrf.mxu1 }
0x32ab   : > { %v4395_v8 = vpop.xlane.xlu2 %4394 }
0x32ac   : > { %v4396_v12 = vmul.f32 %v4395_v8, %v7019_v10 }
0x32ae   : > { %v4397_v27 = vsub.f32 %v3430_v4, %v4396_v12 }
0x32b0   : > { %v4398_v7 = vmul.f32 %v4397_v27, %v4397_v27 }
0x32b2   : > { %v4399_v14 = vsel %vm809_vm0, %v4398_v7, 0.0 }
0x32b3   : > { %4400 = vadd.xlane.f32.xlu0 %v4399_v14 }
0x32b4   : > { %6754 = shalt.err (!%p6751_p3)
}
0x32b5   : > { %6509 = dma.vmem_to_hbm [thread:$0]  (%p6992_p5), %s5238_s3, 128, %s5240_s10, %s5211_s11   ;;  %v6176_v59 = vld [vmem:[%s8283_s25 + $0x4] sm:$0x3]  ;;  %v6621_v23 = vld [vmem:[%s8284_s28 + $0x2] ss:$0 sm:$0xff] }
0x32b6   : > { %v4415_v16 = vperm.slane %v6176_v59, 0  ;;  %v4417_v25 = vperm.slane %v6176_v59, 1  ;;  %s8289_s16 = sld [smem:[#allocation35_spill]]  ;;  %s8290_s18 = sshll.u32 %s7926_s4, 3  ;;  %v5201_v62 = vadd.f32 %v6621_v23, %v5195_v9 }
0x32b7   : > { %s785_s3 = scalar_lea.vmem [#allocation2], %s8290_s18  ;;  %s5206_s29 = scalar_lea.sflag [#allocation3], %s7926_s4 }
0x32b8   : > { %s5223_s9 = sshll.u32 %s785_s3, 4  ;;  %s5224_s9 = int_to_ptr.vmem [resolvable:$true] %s5223_s9 }
0x32bc   : > { %s5221_s17 = scalar_lea.hbm %s8289_s16, %s6364_s1  ;;  %s6775_s14 = scalar_lea.hbm %s8289_s16, 16 }
0x32bd   : > { %s5225_s5 = sshll.u32 %s5221_s17, 4  ;;  %s5226_s5 = int_to_ptr.hbm [resolvable:$true] %s5225_s5 }
0x32be   : > { %s6769_s30 = sshra.s32 %s5226_s5, 4  ;;  %s6770_s30 = int_to_ptr.hbm [resolvable:$true] %s6769_s30 }
0x32bf   : > { %s6771_s8 = scalar_lea.hbm %s6770_s30, 8  ;;  %p6776_p9 = scmp.lt.s32.totalorder %s6770_s30, %s8289_s16 }
0x32c0   : > { %p6772_p4 = scmp.ne.s32.totalorder %s6770_s30, %s6771_s8  ;;  %p6777_p10 = scmp.lt.s32.totalorder %s6775_s14, %s6771_s8 }
0x32c2   : > { %p6773_p7 = pnand %p6772_p4, %p6992_p5  ;;  %p6778_p11 = por %p6777_p10, %p6776_p9 }
0x32c4   : > { %p6774_p8 = pneg %p6773_p7 }
0x32c6   : > { %p6779_p12 = pnand %p6778_p11, %p6774_p8 }
0x3326   : > { %v4401_v53 = vpop.xlane.xlu0 %4400 }
0x3327   : > { %v4402_v57 = vmul.f32 %v4401_v53, %v7019_v10 }
0x3329   : > { %v4403_v15 = vadd.f32 1e-05, %v4402_v57 }
0x332b   : > { %6724 = vrsqrt.f32 %v4403_v15  ;;  %vm4410_vm1 = vweird.f32 %v4403_v15 }
0x3331   : > { %v6725_v17 = vpop.eup %6724 }
0x3332   : > { %v4405_v18 = vmul.f32 %v6725_v17, %v4403_v15  ;;  %vm4411_vm8 = vweird.f32 %v6725_v17 }
0x3333   : > { %vm4412_vm2 = vmor %vm4410_vm1, %vm4411_vm8 }
0x3334   : > { %v4406_v19 = vmul.f32 %v6725_v17, %v4405_v18 }
0x3336   : > { %v4407_v21 = vmul.f32 0.5, %v4406_v19 }
0x3338   : > { %v4408_v22 = vsub.f32 1.5, %v4407_v21 }
0x333a   : > { %v4409_v33 = vmul.f32 %v6725_v17, %v4408_v22 }
0x333c   : > { %v4413_v10 = vsel %vm4412_vm2, %v6725_v17, %v4409_v33 }
0x333d   : > { %v4414_v24 = vmul.f32 %v4413_v10, %v4397_v27 }
0x333f   : > { %v4416_v26 = vmul.f32 %v4415_v16, %v4414_v24 }
0x3341   : > { %v4418_v28 = vadd.f32 %v4417_v25, %v4416_v26 }
0x3343   : > { %v5202_v29 = vadd.f32 %v5201_v62, %v4418_v28 }
0x3345   : > { %5203 = vst.msk [vmem:[%s785_s3] sm:$0xff] %vm809_vm0, %v5202_v29 }
0x3346   : > { %6782 = shalt.err (!%p6779_p12)
}
0x3347   : > { %6508 = dma.vmem_to_hbm [thread:$0]  (%p6992_p5), %s5224_s9, 128, %s5226_s5, %s5206_s29  }
0x3348 PF: > { %s8291_s4 = sld [smem:[#allocation10_spill]] }
0x3349   : > { %s8292_s11 = sld [smem:[#allocation8_spill]] }
0x334e   : > { %p6519_p13 = scmp.ge.s32.totalorder %s8291_s4, 2 }
0x334f   : > { %s5251_s15 = sand.u32 1, %s8292_s11  }
0x3350   : > { %p6513_p0 = pnand %p6519_p13, %p6996_p6  ;;  %s5252_s17 = scalar_lea.sflag [#allocation3], %s5251_s15 }
0x3352   : > { %p6514_p1 = pneg %p6513_p0 }
0x3354   : > { %6800 = dma.done.wait (%p6514_p1), %s5252_s17, 128  }
0x3355   : > { %6802 = vsyncadd (%p6514_p1), %s5252_s17, 4294967168  ;;  %s5262_s18 = scalar_lea.sflag [#allocation5], %s5251_s15 }
0x3356   : > { %6804 = dma.done.wait (%p6514_p1), %s5262_s18, 128  }
0x3357   : > { %6806 = vsyncadd (%p6514_p1), %s5262_s18, 4294967168  ;;  %s8294_s30 = sld [smem:[#allocation12_spill]]  ;;  %s8297_s29 = smov %s6813_s2 }
0x3358   : > { %s8295_s3 = sld [smem:[#allocation9_spill]] }
0x3359   : > { %s8296_s6 = sld [smem:[#allocation13_spill]] }
0x335d   : > { %p39_p5 = scmp.ge.s32.totalorder %s8294_s30, 4  }
0x335e   : > { %s8298_s2 = smov %s8295_s3 }
0x335f   :  { %41 = sbr.rel (!%p39_p5) target bundleno = 27 (0x1b), region = 309 }
0x3364   :  { %5268 = vsyncpa [#allocation3], 1 }
0x3365   :  { %5270 = vsyncpa [#allocation3 + $0x1], 1 }
0x3366   :  { %5271 = vsyncpa [#allocation5], 1 }
0x3367   :  { %5273 = vsyncpa [#allocation5 + $0x1], 1 }

</bundles_post_ra>
